<compile_context>
chip_gen: v5e
topology: v5e:2x2
jax: 0.10.0
libtpu: 0.0.40
codegen_flags: <defaults>
</compile_context>

<pallas_src>
import functools

import jax
import jax.numpy as jnp
from jax.experimental import pallas as pl
from jax.experimental.pallas import tpu as pltpu


# -----------------------------------------------------------------------------
# In-kernel helpers (traced inside the Pallas kernel body)
# -----------------------------------------------------------------------------
def _zero_border(ref):
    """Zero the 1-pixel border of a (H+2, W+2, C) padded scratch ref."""
    Hp, Wp, C = ref.shape
    row = jnp.zeros((1, Wp, C), ref.dtype)
    col = jnp.zeros((Hp, 1, C), ref.dtype)
    ref[0:1, :, :] = row
    ref[Hp - 1:Hp, :, :] = row
    ref[:, 0:1, :] = col
    ref[:, Wp - 1:Wp, :] = col


def _conv3x3(pad_ref, w_ref, b_ref, H, W, cdt):
    """3x3 'same' conv + bias + ReLU, taps read directly from the padded ref.

    pad_ref: (H+2, W+2, Cin) f32 scratch (zero border, data at offset 1,1)
    w_ref:   (3, 3, Cin, Cout) in compute dtype   b_ref: (1, Cout) f32
    """
    acc = None
    for dy in range(3):
        for dx in range(3):
            patch = pad_ref[dy:dy + H, dx:dx + W, :].astype(cdt)   # (H, W, Cin)
            part = jax.lax.dot_general(
                patch, w_ref[dy, dx],
                dimension_numbers=(((2,), (0,)), ((), ())),
                preferred_element_type=jnp.float32)                # (H, W, Cout)
            acc = part if acc is None else acc + part              # init from 1st tap
    return jnp.maximum(acc + b_ref[0], 0.0)


def _conv1x1(x, w_ref, b_ref, cdt):
    """1x1 conv + bias + ReLU on an in-register activation (H, W, Cin)."""
    y = jax.lax.dot_general(
        x.astype(cdt), w_ref[...],
        dimension_numbers=(((2,), (0,)), ((), ())),
        preferred_element_type=jnp.float32)
    return jnp.maximum(y + b_ref[0], 0.0)


def _upsample2x(z, rep_w_ref, cdt):
    """Nearest-neighbour 2x upsample of z (H, W, C) -> (2H, 2W, C) f32, in regs.

    Width doubling: one batched matmul against the hoisted (2W, W) 0/1
    interleave matrix (batch dim = H).  Height doubling: leading-dim
    broadcast + reshape (the trailing (2W, C) tile is unchanged).
    """
    H, W, C = z.shape
    rep = jnp.broadcast_to(rep_w_ref[...], (H, 2 * W, W))
    zw = jax.lax.dot_general(                                      # (H, 2W, C)
        rep, z.astype(cdt),
        dimension_numbers=(((2,), (1,)), ((0,), (0,))),
        preferred_element_type=jnp.float32)
    zw = jnp.broadcast_to(zw[:, None, :, :], (H, 2, 2 * W, C))
    return zw.reshape(2 * H, 2 * W, C)


# -----------------------------------------------------------------------------
# Fused FPN kernel (one grid step == one batch element)
# -----------------------------------------------------------------------------
def _fpn_kernel(need_id3, need_id2, cdt,
                x1_ref, x2_ref, x3_ref, rw3_ref, rw2_ref,
                w31_ref, b31_ref, w32_ref, b32_ref, w33_ref, b33_ref,
                wi3_ref, bi3_ref, w2_ref, b2_ref,
                wi2_ref, bi2_ref, w1_ref, b1_ref,
                o1_ref, o2_ref, o3_ref,
                *scratch):
    f32 = jnp.float32
    H3, W3, _ = x3_ref.shape
    H2, W2, _ = x2_ref.shape
    H1, W1, _ = x1_ref.shape

    p3_ref, pt2_ref, pt1_ref = scratch[0], scratch[1], scratch[2]
    idx = 3
    pu3_ref = pu2_ref = None
    if need_id3:
        pu3_ref = scratch[idx]; idx += 1
    if need_id2:
        pu2_ref = scratch[idx]; idx += 1

    # Zero only the 1-px borders; interiors are fully overwritten below.
    for ref in scratch:
        _zero_border(ref)

    # ---- branch 3 block: 3x3 -> 1x1 (C/2) -> 1x1 (C) ------------------------
    p3_ref[1:H3 + 1, 1:W3 + 1, :] = x3_ref[...].astype(p3_ref.dtype)
    t = _conv3x3(p3_ref, w31_ref, b31_ref, H3, W3, cdt)
    t = _conv1x1(t, w32_ref, b32_ref, cdt)
    b3_out = _conv1x1(t, w33_ref, b33_ref, cdt)
    o3_ref[...] = b3_out.astype(o3_ref.dtype)

    # ---- branch 2: up(b3) [-> identity 3x3] ; + x2 (in regs) ; 3x3 ----------
    u3 = _upsample2x(b3_out, rw3_ref, cdt)                         # (H2, W2, C3)
    if need_id3:
        pu3_ref[1:H2 + 1, 1:W2 + 1, :] = u3.astype(pu3_ref.dtype)
        u3 = _conv3x3(pu3_ref, wi3_ref, bi3_ref, H2, W2, cdt)
    s2 = x2_ref[...].astype(f32) + u3
    pt2_ref[1:H2 + 1, 1:W2 + 1, :] = s2.astype(pt2_ref.dtype)      # one store
    b2_out = _conv3x3(pt2_ref, w2_ref, b2_ref, H2, W2, cdt)
    o2_ref[...] = b2_out.astype(o2_ref.dtype)

    # ---- branch 1: up(b2) [-> identity 3x3] ; + x1 (in regs) ; 3x3 ----------
    u2 = _upsample2x(b2_out, rw2_ref, cdt)                         # (H1, W1, C2)
    if need_id2:
        pu2_ref[1:H1 + 1, 1:W1 + 1, :] = u2.astype(pu2_ref.dtype)
        u2 = _conv3x3(pu2_ref, wi2_ref, bi2_ref, H1, W1, cdt)
    s1 = x1_ref[...].astype(f32) + u2
    pt1_ref[1:H1 + 1, 1:W1 + 1, :] = s1.astype(pt1_ref.dtype)      # one store
    b1_out = _conv3x3(pt1_ref, w1_ref, b1_ref, H1, W1, cdt)
    o1_ref[...] = b1_out.astype(o1_ref.dtype)


# -----------------------------------------------------------------------------
# Host wrapper (NCHW in / NCHW out, matching the PyTorch module)
# -----------------------------------------------------------------------------
def _interleave_matrix(w, dtype):
    """(2w, w) 0/1 matrix: rep[q, j] = 1 iff j == q // 2 (nearest 2x)."""
    q = jnp.arange(2 * w, dtype=jnp.int32)[:, None] // 2
    j = jnp.arange(w, dtype=jnp.int32)[None, :]
    return (q == j).astype(dtype)


def fpn_3branch_forward(params, x1_nchw, x2_nchw, x3_nchw, *,
                        compute_dtype=jnp.float32):
    to_nhwc = lambda t: jnp.transpose(t, (0, 2, 3, 1))
    to_nchw = lambda t: jnp.transpose(t, (0, 3, 1, 2))
    x1, x2, x3 = to_nhwc(x1_nchw), to_nhwc(x2_nchw), to_nhwc(x3_nchw)

    N, H1, W1, C1in = x1.shape
    _, H2, W2, C2in = x2.shape
    _, H3, W3, C3in = x3.shape
    assert (H2, W2) == (2 * H3, 2 * W3) and (H1, W1) == (2 * H2, 2 * W2)

    w31, b31 = params["b3_c1"]
    w32, b32 = params["b3_c2"]
    w33, b33 = params["b3_c3"]
    wi3, bi3 = params["id3"]
    w2_, b2_ = params["b2_c"]
    wi2, bi2 = params["id2"]
    w1_, b1_ = params["b1_c"]

    C3 = w31.shape[-1]             # out_branch_channels[2]
    C3h = w32.shape[-1]            # out_branch_channels[2] // 2
    C2 = w2_.shape[-1]             # out_branch_channels[1]
    C1 = w1_.shape[-1]             # out_branch_channels[0]

    # PyTorch applies the identity convs iff channel counts differ (static).
    need_id3 = (C2in != C3)
    need_id2 = (C1in != C2)
    # Explicit channel-consistency checks for the skip adds (review note).
    if need_id3:
        assert wi3.shape[2] == C3 and wi3.shape[3] == C2in
    else:
        assert C3 == C2in
    if need_id2:
        assert wi2.shape[2] == C2 and wi2.shape[3] == C1in
    else:
        assert C2 == C1in

    cdt = compute_dtype
    wc = lambda w: w.astype(cdt)                    # MXU operands in compute dtype
    rb = lambda b: b.reshape(1, -1).astype(jnp.float32)

    # Hoisted 0/1 interleave matrices for the 2x width upsample (constants).
    rep_w3 = _interleave_matrix(W3, cdt)
    rep_w2 = _interleave_matrix(W2, cdt)

    def act_spec(H, W, C):
        return pl.BlockSpec((None, H, W, C), lambda n: (n, 0, 0, 0))

    def const_spec(a):
        nd = a.ndim
        return pl.BlockSpec(a.shape, lambda n: (0,) * nd)

    inputs = [x1, x2, x3, rep_w3, rep_w2,
              wc(w31), rb(b31),
              wc(w32.reshape(C3, C3h)), rb(b32),
              wc(w33.reshape(C3h, C3)), rb(b33),
              wc(wi3), rb(bi3), wc(w2_), rb(b2_),
              wc(wi2), rb(bi2), wc(w1_), rb(b1_)]
    in_specs = ([act_spec(H1, W1, C1in),
                 act_spec(H2, W2, C2in),
                 act_spec(H3, W3, C3in)]
                + [const_spec(a) for a in inputs[3:]])

    # TODO(synk): lane-dense output layout (last dim multiple of 128, e.g.
    #             (N, H, W*C)) is the next store-side win; it needs a
    #             sublane->lane relayout in-kernel and is deferred to the
    #             production-size pass.
    out_shape = (jax.ShapeDtypeStruct((N, H1, W1, C1), x1.dtype),
                 jax.ShapeDtypeStruct((N, H2, W2, C2), x2.dtype),
                 jax.ShapeDtypeStruct((N, H3, W3, C3), x3.dtype))
    out_specs = (act_spec(H1, W1, C1),
                 act_spec(H2, W2, C2),
                 act_spec(H3, W3, C3))

    scratch_shapes = [
        pltpu.VMEM((H3 + 2, W3 + 2, C3in), jnp.float32),   # padded x3
        pltpu.VMEM((H2 + 2, W2 + 2, C2in), jnp.float32),   # padded (x2 + skip)
        pltpu.VMEM((H1 + 2, W1 + 2, C1in), jnp.float32),   # padded (x1 + skip)
    ]
    if need_id3:
        scratch_shapes.append(pltpu.VMEM((H2 + 2, W2 + 2, C3), jnp.float32))
    if need_id2:
        scratch_shapes.append(pltpu.VMEM((H1 + 2, W1 + 2, C2), jnp.float32))

    # Advisory cost estimate so XLA schedules the NCHW<->NHWC transposes sanely.
    conv_flops = lambda H, W, ci, co, k: 2 * H * W * k * k * ci * co
    flops = N * (conv_flops(H3, W3, C3in, C3, 3)
                 + conv_flops(H3, W3, C3, C3h, 1)
                 + conv_flops(H3, W3, C3h, C3, 1)
                 + (conv_flops(H2, W2, C3, C2, 3) if need_id3 else 0)
                 + conv_flops(H2, W2, C2in, C2, 3)
                 + (conv_flops(H1, W1, C2, C1, 3) if need_id2 else 0)
                 + conv_flops(H1, W1, C1in, C1, 3)
                 + 2 * H3 * (2 * W3) * W3 * C3          # upsample interleave dots
                 + 2 * H2 * (2 * W2) * W2 * C2)
    out_bytes = x1.dtype.itemsize * N * (H1 * W1 * C1 + H2 * W2 * C2 + H3 * W3 * C3)
    bytes_accessed = int(sum(a.size * a.dtype.itemsize for a in inputs) + out_bytes)

    kernel = functools.partial(_fpn_kernel, need_id3, need_id2, cdt)
    o1, o2, o3 = pl.pallas_call(
        kernel,
        out_shape=out_shape,
        grid=(N,),
        in_specs=in_specs,
        out_specs=out_specs,
        scratch_shapes=scratch_shapes,
        cost_estimate=pl.CostEstimate(flops=flops, transcendentals=0,
                                      bytes_accessed=bytes_accessed),
        compiler_params=pltpu.CompilerParams(
            dimension_semantics=("parallel",),
            vmem_limit_bytes=32 * 1024 * 1024),
    )(*inputs)
    return [to_nchw(o1), to_nchw(o2), to_nchw(o3)]


# -----------------------------------------------------------------------------
# Parameter construction (deterministic; BN folded into conv)
# -----------------------------------------------------------------------------
def make_conv_bn_params(key, cin, cout, k):
    kw, kb, kg, kbt, km, kv = jax.random.split(key, 6)
    w = jax.random.normal(kw, (k, k, cin, cout), jnp.float32) / jnp.sqrt(k * k * cin)
    b = 0.1 * jax.random.normal(kb, (cout,), jnp.float32)
    gamma = 1.0 + 0.1 * jax.random.normal(kg, (cout,), jnp.float32)
    beta = 0.1 * jax.random.normal(kbt, (cout,), jnp.float32)
    mean = 0.1 * jax.random.normal(km, (cout,), jnp.float32)
    var = jax.random.uniform(kv, (cout,), jnp.float32, minval=0.5, maxval=1.5)
    scale = gamma / jnp.sqrt(var + 1e-5)
    return w * scale[None, None, None, :], (b - mean) * scale + beta


def make_fpn_params(key, in_ch, out_ch):
    ks = jax.random.split(key, 7)
    return {
        "b3_c1": make_conv_bn_params(ks[0], in_ch[2], out_ch[2], 3),
        "b3_c2": make_conv_bn_params(ks[1], out_ch[2], out_ch[2] // 2, 1),
        "b3_c3": make_conv_bn_params(ks[2], out_ch[2] // 2, out_ch[2], 1),
        "id3":   make_conv_bn_params(ks[3], out_ch[2], out_ch[1], 3),
        "b2_c":  make_conv_bn_params(ks[4], in_ch[1], out_ch[1], 3),
        "id2":   make_conv_bn_params(ks[5], out_ch[1], out_ch[0], 3),
        "b1_c":  make_conv_bn_params(ks[6], in_ch[0], out_ch[0], 3),
    }


# -----------------------------------------------------------------------------
# Plain-JAX reference (sanity check only)
# -----------------------------------------------------------------------------
def upsample2x_nearest(x_nhwc):
    return jnp.repeat(jnp.repeat(x_nhwc, 2, axis=1), 2, axis=2)


def _ref_conv(x, w, b, add=None):
    if add is not None:
        x = x + add
    y = jax.lax.conv_general_dilated(
        x, w, (1, 1), "SAME",
        dimension_numbers=("NHWC", "HWIO", "NHWC"),
        precision=jax.lax.Precision.HIGHEST)
    return jnp.maximum(y + b[None, None, None, :], 0.0)


def fpn_3branch_ref(params, x1_nchw, x2_nchw, x3_nchw):
    to_nhwc = lambda t: jnp.transpose(t, (0, 2, 3, 1))
    to_nchw = lambda t: jnp.transpose(t, (0, 3, 1, 2))
    x1, x2, x3 = to_nhwc(x1_nchw), to_nhwc(x2_nchw), to_nhwc(x3_nchw)
    b3 = _ref_conv(x3, *params["b3_c1"])
    b3 = _ref_conv(b3, *params["b3_c2"])
    branch3_out = _ref_conv(b3, *params["b3_c3"])
    branch3_up = upsample2x_nearest(branch3_out)
    if x2.shape[-1] != branch3_up.shape[-1]:
        branch3_up = _ref_conv(branch3_up, *params["id3"])
    branch2_out = _ref_conv(x2, *params["b2_c"], add=branch3_up)
    branch2_up = upsample2x_nearest(branch2_out)
    if x1.shape[-1] != branch2_up.shape[-1]:
        branch2_up = _ref_conv(branch2_up, *params["id2"])
    branch1_out = _ref_conv(x1, *params["b1_c"], add=branch2_up)
    return [to_nchw(branch1_out), to_nchw(branch2_out), to_nchw(branch3_out)]


if __name__ == "__main__":
    key = jax.random.PRNGKey(0)
    k_p, k1, k2, k3, k_p2 = jax.random.split(key, 5)

    # ---- Config A: channel counts differ across levels -> identity convs ----
    in_ch = [8, 16, 32]
    out_ch = [8, 16, 32]
    params = make_fpn_params(k_p, in_ch, out_ch)

    x1 = jax.random.normal(k1, (2, in_ch[0], 16, 16), jnp.float32)
    x2 = jax.random.normal(k2, (2, in_ch[1], 8, 8), jnp.float32)
    x3 = jax.random.normal(k3, (2, in_ch[2], 4, 4), jnp.float32)

    refs = jax.block_until_ready(fpn_3branch_ref(params, x1, x2, x3))

    # f32 MXU operands (exact path).
    fwd = jax.jit(functools.partial(fpn_3branch_forward, params))
    outs = jax.block_until_ready(fwd(x1, x2, x3))
    assert outs[0].shape == (2, out_ch[0], 16, 16)
    assert outs[1].shape == (2, out_ch[1], 8, 8)
    assert outs[2].shape == (2, out_ch[2], 4, 4)
    for o, r in zip(outs, refs):
        assert jnp.allclose(o, r, rtol=5e-2, atol=5e-2), float(jnp.max(jnp.abs(o - r)))

    # bf16 MXU operands / f32 accumulation (production MXU path), loose check.
    fwd_bf16 = jax.jit(functools.partial(fpn_3branch_forward, params,
                                         compute_dtype=jnp.bfloat16))
    outs_bf = jax.block_until_ready(fwd_bf16(x1, x2, x3))
    for o, r in zip(outs_bf, refs):
        rel = float(jnp.sqrt(jnp.sum((o - r) ** 2)) /
                    (jnp.sqrt(jnp.sum(r ** 2)) + 1e-6))
        assert rel < 5e-2, rel

    # ---- Config B: matching channels -> identity convs are skipped ----------
    in_ch_b = [32, 32, 32]
    out_ch_b = [32, 32, 32]
    params_b = make_fpn_params(k_p2, in_ch_b, out_ch_b)
    y1 = jax.random.normal(k1, (1, 32, 16, 16), jnp.float32)
    y2 = jax.random.normal(k2, (1, 32, 8, 8), jnp.float32)
    y3 = jax.random.normal(k3, (1, 32, 4, 4), jnp.float32)
    fwd_b = jax.jit(functools.partial(fpn_3branch_forward, params_b))
    outs_b = jax.block_until_ready(fwd_b(y1, y2, y3))
    refs_b = jax.block_until_ready(fpn_3branch_ref(params_b, y1, y2, y3))
    for o, r in zip(outs_b, refs_b):
        assert jnp.allclose(o, r, rtol=5e-2, atol=5e-2), float(jnp.max(jnp.abs(o - r)))

    print("KERNEL_OK")
</pallas_src>

<mosaic_0001>
module attributes {stable_mosaic.version = 11 : i64} {
  func.func @_fpn_kernel(%arg0: i32, %arg1: memref<1x16x16x8xf32, #tpu.memory_space<vmem>>, %arg2: memref<1x8x8x16xf32, #tpu.memory_space<vmem>>, %arg3: memref<1x4x4x32xf32, #tpu.memory_space<vmem>>, %arg4: memref<8x4xf32, #tpu.memory_space<vmem>>, %arg5: memref<16x8xf32, #tpu.memory_space<vmem>>, %arg6: memref<3x3x32x32xf32, #tpu.memory_space<vmem>>, %arg7: memref<1x32xf32, #tpu.memory_space<vmem>>, %arg8: memref<32x16xf32, #tpu.memory_space<vmem>>, %arg9: memref<1x16xf32, #tpu.memory_space<vmem>>, %arg10: memref<16x32xf32, #tpu.memory_space<vmem>>, %arg11: memref<1x32xf32, #tpu.memory_space<vmem>>, %arg12: memref<3x3x32x16xf32, #tpu.memory_space<vmem>>, %arg13: memref<1x16xf32, #tpu.memory_space<vmem>>, %arg14: memref<3x3x16x16xf32, #tpu.memory_space<vmem>>, %arg15: memref<1x16xf32, #tpu.memory_space<vmem>>, %arg16: memref<3x3x16x8xf32, #tpu.memory_space<vmem>>, %arg17: memref<1x8xf32, #tpu.memory_space<vmem>>, %arg18: memref<3x3x8x8xf32, #tpu.memory_space<vmem>>, %arg19: memref<1x8xf32, #tpu.memory_space<vmem>>, %arg20: memref<1x16x16x8xf32, #tpu.memory_space<vmem>>, %arg21: memref<1x8x8x16xf32, #tpu.memory_space<vmem>>, %arg22: memref<1x4x4x32xf32, #tpu.memory_space<vmem>>, %arg23: memref<6x6x32xf32, #tpu.memory_space<vmem>>, %arg24: memref<10x10x16xf32, #tpu.memory_space<vmem>>, %arg25: memref<18x18x8xf32, #tpu.memory_space<vmem>>, %arg26: memref<10x10x32xf32, #tpu.memory_space<vmem>>, %arg27: memref<18x18x16xf32, #tpu.memory_space<vmem>>) attributes {dimension_semantics = [#tpu.dimension_semantics<parallel>], iteration_bounds = array<i64: 2>, scalar_prefetch = 0 : i64, scratch_operands = 5 : i64, tpu.core_type = #tpu.core_type<tc>, window_params = [{transform_indices = @transform_0, window_bounds = array<i64: 1, 16, 16, 8>}, {transform_indices = @transform_1, window_bounds = array<i64: 1, 8, 8, 16>}, {transform_indices = @transform_2, window_bounds = array<i64: 1, 4, 4, 32>}, {pipeline_mode = #tpu.pipeline_mode<synchronous>, transform_indices = @transform_3, window_bounds = array<i64: 8, 4>}, {pipeline_mode = #tpu.pipeline_mode<synchronous>, transform_indices = @transform_4, window_bounds = array<i64: 16, 8>}, {pipeline_mode = #tpu.pipeline_mode<synchronous>, transform_indices = @transform_5, window_bounds = array<i64: 3, 3, 32, 32>}, {pipeline_mode = #tpu.pipeline_mode<synchronous>, transform_indices = @transform_6, window_bounds = array<i64: 1, 32>}, {pipeline_mode = #tpu.pipeline_mode<synchronous>, transform_indices = @transform_7, window_bounds = array<i64: 32, 16>}, {pipeline_mode = #tpu.pipeline_mode<synchronous>, transform_indices = @transform_8, window_bounds = array<i64: 1, 16>}, {pipeline_mode = #tpu.pipeline_mode<synchronous>, transform_indices = @transform_9, window_bounds = array<i64: 16, 32>}, {pipeline_mode = #tpu.pipeline_mode<synchronous>, transform_indices = @transform_10, window_bounds = array<i64: 1, 32>}, {pipeline_mode = #tpu.pipeline_mode<synchronous>, transform_indices = @transform_11, window_bounds = array<i64: 3, 3, 32, 16>}, {pipeline_mode = #tpu.pipeline_mode<synchronous>, transform_indices = @transform_12, window_bounds = array<i64: 1, 16>}, {pipeline_mode = #tpu.pipeline_mode<synchronous>, transform_indices = @transform_13, window_bounds = array<i64: 3, 3, 16, 16>}, {pipeline_mode = #tpu.pipeline_mode<synchronous>, transform_indices = @transform_14, window_bounds = array<i64: 1, 16>}, {pipeline_mode = #tpu.pipeline_mode<synchronous>, transform_indices = @transform_15, window_bounds = array<i64: 3, 3, 16, 8>}, {pipeline_mode = #tpu.pipeline_mode<synchronous>, transform_indices = @transform_16, window_bounds = array<i64: 1, 8>}, {pipeline_mode = #tpu.pipeline_mode<synchronous>, transform_indices = @transform_17, window_bounds = array<i64: 3, 3, 8, 8>}, {pipeline_mode = #tpu.pipeline_mode<synchronous>, transform_indices = @transform_18, window_bounds = array<i64: 1, 8>}, {transform_indices = @transform_19, window_bounds = array<i64: 1, 16, 16, 8>}, {transform_indices = @transform_20, window_bounds = array<i64: 1, 8, 8, 16>}, {transform_indices = @transform_21, window_bounds = array<i64: 1, 4, 4, 32>}]} {
    %cst = arith.constant 0.000000e+00 : f32
    %0 = vector.broadcast %cst : f32 to vector<1x6x32xf32>
    %cst_0 = arith.constant 0.000000e+00 : f32
    %1 = vector.broadcast %cst_0 : f32 to vector<6x1x32xf32>
    %c0 = arith.constant 0 : index
    %c0_1 = arith.constant 0 : index
    %c0_2 = arith.constant 0 : index
    %2 = vector.load %arg23[%c0, %c0_1, %c0_2] : memref<6x6x32xf32, #tpu.memory_space<vmem>>, vector<1x6x32xf32>
    tpu.vector_store %arg23[%c0, %c0_1, %c0_2], %0 {strides = array<i32>} : memref<6x6x32xf32, #tpu.memory_space<vmem>>, vector<1x6x32xf32>,
    %c5 = arith.constant 5 : index
    %c0_3 = arith.constant 0 : index
    %c0_4 = arith.constant 0 : index
    %3 = vector.load %arg23[%c5, %c0_3, %c0_4] : memref<6x6x32xf32, #tpu.memory_space<vmem>>, vector<1x6x32xf32>
    tpu.vector_store %arg23[%c5, %c0_3, %c0_4], %0 {strides = array<i32>} : memref<6x6x32xf32, #tpu.memory_space<vmem>>, vector<1x6x32xf32>,
    %c0_5 = arith.constant 0 : index
    %c0_6 = arith.constant 0 : index
    %c0_7 = arith.constant 0 : index
    %4 = vector.load %arg23[%c0_5, %c0_6, %c0_7] : memref<6x6x32xf32, #tpu.memory_space<vmem>>, vector<6x1x32xf32>
    tpu.vector_store %arg23[%c0_5, %c0_6, %c0_7], %1 {strides = array<i32>} : memref<6x6x32xf32, #tpu.memory_space<vmem>>, vector<6x1x32xf32>,
    %c0_8 = arith.constant 0 : index
    %c5_9 = arith.constant 5 : index
    %c0_10 = arith.constant 0 : index
    %5 = vector.load %arg23[%c0_8, %c5_9, %c0_10] : memref<6x6x32xf32, #tpu.memory_space<vmem>>, vector<6x1x32xf32>
    tpu.vector_store %arg23[%c0_8, %c5_9, %c0_10], %1 {strides = array<i32>} : memref<6x6x32xf32, #tpu.memory_space<vmem>>, vector<6x1x32xf32>,
    %cst_11 = arith.constant 0.000000e+00 : f32
    %6 = vector.broadcast %cst_11 : f32 to vector<1x10x16xf32>
    %cst_12 = arith.constant 0.000000e+00 : f32
    %7 = vector.broadcast %cst_12 : f32 to vector<10x1x16xf32>
    %c0_13 = arith.constant 0 : index
    %c0_14 = arith.constant 0 : index
    %c0_15 = arith.constant 0 : index
    %8 = vector.load %arg24[%c0_13, %c0_14, %c0_15] : memref<10x10x16xf32, #tpu.memory_space<vmem>>, vector<1x10x16xf32>
    tpu.vector_store %arg24[%c0_13, %c0_14, %c0_15], %6 {strides = array<i32>} : memref<10x10x16xf32, #tpu.memory_space<vmem>>, vector<1x10x16xf32>,
    %c9 = arith.constant 9 : index
    %c0_16 = arith.constant 0 : index
    %c0_17 = arith.constant 0 : index
    %9 = vector.load %arg24[%c9, %c0_16, %c0_17] : memref<10x10x16xf32, #tpu.memory_space<vmem>>, vector<1x10x16xf32>
    tpu.vector_store %arg24[%c9, %c0_16, %c0_17], %6 {strides = array<i32>} : memref<10x10x16xf32, #tpu.memory_space<vmem>>, vector<1x10x16xf32>,
    %c0_18 = arith.constant 0 : index
    %c0_19 = arith.constant 0 : index
    %c0_20 = arith.constant 0 : index
    %10 = vector.load %arg24[%c0_18, %c0_19, %c0_20] : memref<10x10x16xf32, #tpu.memory_space<vmem>>, vector<10x1x16xf32>
    tpu.vector_store %arg24[%c0_18, %c0_19, %c0_20], %7 {strides = array<i32>} : memref<10x10x16xf32, #tpu.memory_space<vmem>>, vector<10x1x16xf32>,
    %c0_21 = arith.constant 0 : index
    %c9_22 = arith.constant 9 : index
    %c0_23 = arith.constant 0 : index
    %11 = vector.load %arg24[%c0_21, %c9_22, %c0_23] : memref<10x10x16xf32, #tpu.memory_space<vmem>>, vector<10x1x16xf32>
    tpu.vector_store %arg24[%c0_21, %c9_22, %c0_23], %7 {strides = array<i32>} : memref<10x10x16xf32, #tpu.memory_space<vmem>>, vector<10x1x16xf32>,
    %cst_24 = arith.constant 0.000000e+00 : f32
    %12 = vector.broadcast %cst_24 : f32 to vector<1x18x8xf32>
    %cst_25 = arith.constant 0.000000e+00 : f32
    %13 = vector.broadcast %cst_25 : f32 to vector<18x1x8xf32>
    %c0_26 = arith.constant 0 : index
    %c0_27 = arith.constant 0 : index
    %c0_28 = arith.constant 0 : index
    %14 = vector.load %arg25[%c0_26, %c0_27, %c0_28] : memref<18x18x8xf32, #tpu.memory_space<vmem>>, vector<1x18x8xf32>
    tpu.vector_store %arg25[%c0_26, %c0_27, %c0_28], %12 {strides = array<i32>} : memref<18x18x8xf32, #tpu.memory_space<vmem>>, vector<1x18x8xf32>,
    %c17 = arith.constant 17 : index
    %c0_29 = arith.constant 0 : index
    %c0_30 = arith.constant 0 : index
    %15 = vector.load %arg25[%c17, %c0_29, %c0_30] : memref<18x18x8xf32, #tpu.memory_space<vmem>>, vector<1x18x8xf32>
    tpu.vector_store %arg25[%c17, %c0_29, %c0_30], %12 {strides = array<i32>} : memref<18x18x8xf32, #tpu.memory_space<vmem>>, vector<1x18x8xf32>,
    %c0_31 = arith.constant 0 : index
    %c0_32 = arith.constant 0 : index
    %c0_33 = arith.constant 0 : index
    %16 = vector.load %arg25[%c0_31, %c0_32, %c0_33] : memref<18x18x8xf32, #tpu.memory_space<vmem>>, vector<18x1x8xf32>
    tpu.vector_store %arg25[%c0_31, %c0_32, %c0_33], %13 {strides = array<i32>} : memref<18x18x8xf32, #tpu.memory_space<vmem>>, vector<18x1x8xf32>,
    %c0_34 = arith.constant 0 : index
    %c17_35 = arith.constant 17 : index
    %c0_36 = arith.constant 0 : index
    %17 = vector.load %arg25[%c0_34, %c17_35, %c0_36] : memref<18x18x8xf32, #tpu.memory_space<vmem>>, vector<18x1x8xf32>
    tpu.vector_store %arg25[%c0_34, %c17_35, %c0_36], %13 {strides = array<i32>} : memref<18x18x8xf32, #tpu.memory_space<vmem>>, vector<18x1x8xf32>,
    %cst_37 = arith.constant 0.000000e+00 : f32
    %18 = vector.broadcast %cst_37 : f32 to vector<1x10x32xf32>
    %cst_38 = arith.constant 0.000000e+00 : f32
    %19 = vector.broadcast %cst_38 : f32 to vector<10x1x32xf32>
    %c0_39 = arith.constant 0 : index
    %c0_40 = arith.constant 0 : index
    %c0_41 = arith.constant 0 : index
    %20 = vector.load %arg26[%c0_39, %c0_40, %c0_41] : memref<10x10x32xf32, #tpu.memory_space<vmem>>, vector<1x10x32xf32>
    tpu.vector_store %arg26[%c0_39, %c0_40, %c0_41], %18 {strides = array<i32>} : memref<10x10x32xf32, #tpu.memory_space<vmem>>, vector<1x10x32xf32>,
    %c9_42 = arith.constant 9 : index
    %c0_43 = arith.constant 0 : index
    %c0_44 = arith.constant 0 : index
    %21 = vector.load %arg26[%c9_42, %c0_43, %c0_44] : memref<10x10x32xf32, #tpu.memory_space<vmem>>, vector<1x10x32xf32>
    tpu.vector_store %arg26[%c9_42, %c0_43, %c0_44], %18 {strides = array<i32>} : memref<10x10x32xf32, #tpu.memory_space<vmem>>, vector<1x10x32xf32>,
    %c0_45 = arith.constant 0 : index
    %c0_46 = arith.constant 0 : index
    %c0_47 = arith.constant 0 : index
    %22 = vector.load %arg26[%c0_45, %c0_46, %c0_47] : memref<10x10x32xf32, #tpu.memory_space<vmem>>, vector<10x1x32xf32>
    tpu.vector_store %arg26[%c0_45, %c0_46, %c0_47], %19 {strides = array<i32>} : memref<10x10x32xf32, #tpu.memory_space<vmem>>, vector<10x1x32xf32>,
    %c0_48 = arith.constant 0 : index
    %c9_49 = arith.constant 9 : index
    %c0_50 = arith.constant 0 : index
    %23 = vector.load %arg26[%c0_48, %c9_49, %c0_50] : memref<10x10x32xf32, #tpu.memory_space<vmem>>, vector<10x1x32xf32>
    tpu.vector_store %arg26[%c0_48, %c9_49, %c0_50], %19 {strides = array<i32>} : memref<10x10x32xf32, #tpu.memory_space<vmem>>, vector<10x1x32xf32>,
    %cst_51 = arith.constant 0.000000e+00 : f32
    %24 = vector.broadcast %cst_51 : f32 to vector<1x18x16xf32>
    %cst_52 = arith.constant 0.000000e+00 : f32
    %25 = vector.broadcast %cst_52 : f32 to vector<18x1x16xf32>
    %c0_53 = arith.constant 0 : index
    %c0_54 = arith.constant 0 : index
    %c0_55 = arith.constant 0 : index
    %26 = vector.load %arg27[%c0_53, %c0_54, %c0_55] : memref<18x18x16xf32, #tpu.memory_space<vmem>>, vector<1x18x16xf32>
    tpu.vector_store %arg27[%c0_53, %c0_54, %c0_55], %24 {strides = array<i32>} : memref<18x18x16xf32, #tpu.memory_space<vmem>>, vector<1x18x16xf32>,
    %c17_56 = arith.constant 17 : index
    %c0_57 = arith.constant 0 : index
    %c0_58 = arith.constant 0 : index
    %27 = vector.load %arg27[%c17_56, %c0_57, %c0_58] : memref<18x18x16xf32, #tpu.memory_space<vmem>>, vector<1x18x16xf32>
    tpu.vector_store %arg27[%c17_56, %c0_57, %c0_58], %24 {strides = array<i32>} : memref<18x18x16xf32, #tpu.memory_space<vmem>>, vector<1x18x16xf32>,
    %c0_59 = arith.constant 0 : index
    %c0_60 = arith.constant 0 : index
    %c0_61 = arith.constant 0 : index
    %28 = vector.load %arg27[%c0_59, %c0_60, %c0_61] : memref<18x18x16xf32, #tpu.memory_space<vmem>>, vector<18x1x16xf32>
    tpu.vector_store %arg27[%c0_59, %c0_60, %c0_61], %25 {strides = array<i32>} : memref<18x18x16xf32, #tpu.memory_space<vmem>>, vector<18x1x16xf32>,
    %c0_62 = arith.constant 0 : index
    %c17_63 = arith.constant 17 : index
    %c0_64 = arith.constant 0 : index
    %29 = vector.load %arg27[%c0_62, %c17_63, %c0_64] : memref<18x18x16xf32, #tpu.memory_space<vmem>>, vector<18x1x16xf32>
    tpu.vector_store %arg27[%c0_62, %c17_63, %c0_64], %25 {strides = array<i32>} : memref<18x18x16xf32, #tpu.memory_space<vmem>>, vector<18x1x16xf32>,
    %c0_65 = arith.constant 0 : index
    %c0_66 = arith.constant 0 : index
    %c0_67 = arith.constant 0 : index
    %c0_68 = arith.constant 0 : index
    %30 = vector.load %arg3[%c0_65, %c0_66, %c0_67, %c0_68] : memref<1x4x4x32xf32, #tpu.memory_space<vmem>>, vector<1x4x4x32xf32>
    %31 = vector.shape_cast %30 : vector<1x4x4x32xf32> to vector<4x4x32xf32>
    %c1 = arith.constant 1 : index
    %c1_69 = arith.constant 1 : index
    %c0_70 = arith.constant 0 : index
    %32 = vector.load %arg23[%c1, %c1_69, %c0_70] : memref<6x6x32xf32, #tpu.memory_space<vmem>>, vector<4x4x32xf32>
    tpu.vector_store %arg23[%c1, %c1_69, %c0_70], %31 {strides = array<i32>} : memref<6x6x32xf32, #tpu.memory_space<vmem>>, vector<4x4x32xf32>,
    %c0_71 = arith.constant 0 : index
    %c0_72 = arith.constant 0 : index
    %c0_73 = arith.constant 0 : index
    %33 = vector.load %arg23[%c0_71, %c0_72, %c0_73] : memref<6x6x32xf32, #tpu.memory_space<vmem>>, vector<4x4x32xf32>
    %c0_74 = arith.constant 0 : index
    %c0_75 = arith.constant 0 : index
    %c0_76 = arith.constant 0 : index
    %c0_77 = arith.constant 0 : index
    %34 = vector.load %arg6[%c0_74, %c0_75, %c0_76, %c0_77] : memref<3x3x32x32xf32, #tpu.memory_space<vmem>>, vector<1x1x32x32xf32>
    %35 = vector.shape_cast %34 : vector<1x1x32x32xf32> to vector<32x32xf32>
    %cst_78 = arith.constant dense<0.000000e+00> : vector<4x4x32xf32>
    %36 = tpu.matmul %33, %35, %cst_78 {dimension_numbers = #tpu.dot_dimension_numbers<[2], [0], [0, 1], [1], [0, 0, 0, 1, 1, 1], [], []>} : vector<4x4x32xf32>, vector<32x32xf32>, vector<4x4x32xf32> -> vector<4x4x32xf32>
    %c0_79 = arith.constant 0 : index
    %c1_80 = arith.constant 1 : index
    %c0_81 = arith.constant 0 : index
    %37 = vector.load %arg23[%c0_79, %c1_80, %c0_81] : memref<6x6x32xf32, #tpu.memory_space<vmem>>, vector<4x4x32xf32>
    %c0_82 = arith.constant 0 : index
    %c1_83 = arith.constant 1 : index
    %c0_84 = arith.constant 0 : index
    %c0_85 = arith.constant 0 : index
    %38 = vector.load %arg6[%c0_82, %c1_83, %c0_84, %c0_85] : memref<3x3x32x32xf32, #tpu.memory_space<vmem>>, vector<1x1x32x32xf32>
    %39 = vector.shape_cast %38 : vector<1x1x32x32xf32> to vector<32x32xf32>
    %cst_86 = arith.constant dense<0.000000e+00> : vector<4x4x32xf32>
    %40 = tpu.matmul %37, %39, %cst_86 {dimension_numbers = #tpu.dot_dimension_numbers<[2], [0], [0, 1], [1], [0, 0, 0, 1, 1, 1], [], []>} : vector<4x4x32xf32>, vector<32x32xf32>, vector<4x4x32xf32> -> vector<4x4x32xf32>
    %41 = arith.addf %36, %40 : vector<4x4x32xf32>
    %c0_87 = arith.constant 0 : index
    %c2 = arith.constant 2 : index
    %c0_88 = arith.constant 0 : index
    %42 = vector.load %arg23[%c0_87, %c2, %c0_88] : memref<6x6x32xf32, #tpu.memory_space<vmem>>, vector<4x4x32xf32>
    %c0_89 = arith.constant 0 : index
    %c2_90 = arith.constant 2 : index
    %c0_91 = arith.constant 0 : index
    %c0_92 = arith.constant 0 : index
    %43 = vector.load %arg6[%c0_89, %c2_90, %c0_91, %c0_92] : memref<3x3x32x32xf32, #tpu.memory_space<vmem>>, vector<1x1x32x32xf32>
    %44 = vector.shape_cast %43 : vector<1x1x32x32xf32> to vector<32x32xf32>
    %cst_93 = arith.constant dense<0.000000e+00> : vector<4x4x32xf32>
    %45 = tpu.matmul %42, %44, %cst_93 {dimension_numbers = #tpu.dot_dimension_numbers<[2], [0], [0, 1], [1], [0, 0, 0, 1, 1, 1], [], []>} : vector<4x4x32xf32>, vector<32x32xf32>, vector<4x4x32xf32> -> vector<4x4x32xf32>
    %46 = arith.addf %41, %45 : vector<4x4x32xf32>
    %c1_94 = arith.constant 1 : index
    %c0_95 = arith.constant 0 : index
    %c0_96 = arith.constant 0 : index
    %47 = vector.load %arg23[%c1_94, %c0_95, %c0_96] : memref<6x6x32xf32, #tpu.memory_space<vmem>>, vector<4x4x32xf32>
    %c1_97 = arith.constant 1 : index
    %c0_98 = arith.constant 0 : index
    %c0_99 = arith.constant 0 : index
    %c0_100 = arith.constant 0 : index
    %48 = vector.load %arg6[%c1_97, %c0_98, %c0_99, %c0_100] : memref<3x3x32x32xf32, #tpu.memory_space<vmem>>, vector<1x1x32x32xf32>
    %49 = vector.shape_cast %48 : vector<1x1x32x32xf32> to vector<32x32xf32>
    %cst_101 = arith.constant dense<0.000000e+00> : vector<4x4x32xf32>
    %50 = tpu.matmul %47, %49, %cst_101 {dimension_numbers = #tpu.dot_dimension_numbers<[2], [0], [0, 1], [1], [0, 0, 0, 1, 1, 1], [], []>} : vector<4x4x32xf32>, vector<32x32xf32>, vector<4x4x32xf32> -> vector<4x4x32xf32>
    %51 = arith.addf %46, %50 : vector<4x4x32xf32>
    %c1_102 = arith.constant 1 : index
    %c1_103 = arith.constant 1 : index
    %c0_104 = arith.constant 0 : index
    %52 = vector.load %arg23[%c1_102, %c1_103, %c0_104] : memref<6x6x32xf32, #tpu.memory_space<vmem>>, vector<4x4x32xf32>
    %c1_105 = arith.constant 1 : index
    %c1_106 = arith.constant 1 : index
    %c0_107 = arith.constant 0 : index
    %c0_108 = arith.constant 0 : index
    %53 = vector.load %arg6[%c1_105, %c1_106, %c0_107, %c0_108] : memref<3x3x32x32xf32, #tpu.memory_space<vmem>>, vector<1x1x32x32xf32>
    %54 = vector.shape_cast %53 : vector<1x1x32x32xf32> to vector<32x32xf32>
    %cst_109 = arith.constant dense<0.000000e+00> : vector<4x4x32xf32>
    %55 = tpu.matmul %52, %54, %cst_109 {dimension_numbers = #tpu.dot_dimension_numbers<[2], [0], [0, 1], [1], [0, 0, 0, 1, 1, 1], [], []>} : vector<4x4x32xf32>, vector<32x32xf32>, vector<4x4x32xf32> -> vector<4x4x32xf32>
    %56 = arith.addf %51, %55 : vector<4x4x32xf32>
    %c1_110 = arith.constant 1 : index
    %c2_111 = arith.constant 2 : index
    %c0_112 = arith.constant 0 : index
    %57 = vector.load %arg23[%c1_110, %c2_111, %c0_112] : memref<6x6x32xf32, #tpu.memory_space<vmem>>, vector<4x4x32xf32>
    %c1_113 = arith.constant 1 : index
    %c2_114 = arith.constant 2 : index
    %c0_115 = arith.constant 0 : index
    %c0_116 = arith.constant 0 : index
    %58 = vector.load %arg6[%c1_113, %c2_114, %c0_115, %c0_116] : memref<3x3x32x32xf32, #tpu.memory_space<vmem>>, vector<1x1x32x32xf32>
    %59 = vector.shape_cast %58 : vector<1x1x32x32xf32> to vector<32x32xf32>
    %cst_117 = arith.constant dense<0.000000e+00> : vector<4x4x32xf32>
    %60 = tpu.matmul %57, %59, %cst_117 {dimension_numbers = #tpu.dot_dimension_numbers<[2], [0], [0, 1], [1], [0, 0, 0, 1, 1, 1], [], []>} : vector<4x4x32xf32>, vector<32x32xf32>, vector<4x4x32xf32> -> vector<4x4x32xf32>
    %61 = arith.addf %56, %60 : vector<4x4x32xf32>
    %c2_118 = arith.constant 2 : index
    %c0_119 = arith.constant 0 : index
    %c0_120 = arith.constant 0 : index
    %62 = vector.load %arg23[%c2_118, %c0_119, %c0_120] : memref<6x6x32xf32, #tpu.memory_space<vmem>>, vector<4x4x32xf32>
    %c2_121 = arith.constant 2 : index
    %c0_122 = arith.constant 0 : index
    %c0_123 = arith.constant 0 : index
    %c0_124 = arith.constant 0 : index
    %63 = vector.load %arg6[%c2_121, %c0_122, %c0_123, %c0_124] : memref<3x3x32x32xf32, #tpu.memory_space<vmem>>, vector<1x1x32x32xf32>
    %64 = vector.shape_cast %63 : vector<1x1x32x32xf32> to vector<32x32xf32>
    %cst_125 = arith.constant dense<0.000000e+00> : vector<4x4x32xf32>
    %65 = tpu.matmul %62, %64, %cst_125 {dimension_numbers = #tpu.dot_dimension_numbers<[2], [0], [0, 1], [1], [0, 0, 0, 1, 1, 1], [], []>} : vector<4x4x32xf32>, vector<32x32xf32>, vector<4x4x32xf32> -> vector<4x4x32xf32>
    %66 = arith.addf %61, %65 : vector<4x4x32xf32>
    %c2_126 = arith.constant 2 : index
    %c1_127 = arith.constant 1 : index
    %c0_128 = arith.constant 0 : index
    %67 = vector.load %arg23[%c2_126, %c1_127, %c0_128] : memref<6x6x32xf32, #tpu.memory_space<vmem>>, vector<4x4x32xf32>
    %c2_129 = arith.constant 2 : index
    %c1_130 = arith.constant 1 : index
    %c0_131 = arith.constant 0 : index
    %c0_132 = arith.constant 0 : index
    %68 = vector.load %arg6[%c2_129, %c1_130, %c0_131, %c0_132] : memref<3x3x32x32xf32, #tpu.memory_space<vmem>>, vector<1x1x32x32xf32>
    %69 = vector.shape_cast %68 : vector<1x1x32x32xf32> to vector<32x32xf32>
    %cst_133 = arith.constant dense<0.000000e+00> : vector<4x4x32xf32>
    %70 = tpu.matmul %67, %69, %cst_133 {dimension_numbers = #tpu.dot_dimension_numbers<[2], [0], [0, 1], [1], [0, 0, 0, 1, 1, 1], [], []>} : vector<4x4x32xf32>, vector<32x32xf32>, vector<4x4x32xf32> -> vector<4x4x32xf32>
    %71 = arith.addf %66, %70 : vector<4x4x32xf32>
    %c2_134 = arith.constant 2 : index
    %c2_135 = arith.constant 2 : index
    %c0_136 = arith.constant 0 : index
    %72 = vector.load %arg23[%c2_134, %c2_135, %c0_136] : memref<6x6x32xf32, #tpu.memory_space<vmem>>, vector<4x4x32xf32>
    %c2_137 = arith.constant 2 : index
    %c2_138 = arith.constant 2 : index
    %c0_139 = arith.constant 0 : index
    %c0_140 = arith.constant 0 : index
    %73 = vector.load %arg6[%c2_137, %c2_138, %c0_139, %c0_140] : memref<3x3x32x32xf32, #tpu.memory_space<vmem>>, vector<1x1x32x32xf32>
    %74 = vector.shape_cast %73 : vector<1x1x32x32xf32> to vector<32x32xf32>
    %cst_141 = arith.constant dense<0.000000e+00> : vector<4x4x32xf32>
    %75 = tpu.matmul %72, %74, %cst_141 {dimension_numbers = #tpu.dot_dimension_numbers<[2], [0], [0, 1], [1], [0, 0, 0, 1, 1, 1], [], []>} : vector<4x4x32xf32>, vector<32x32xf32>, vector<4x4x32xf32> -> vector<4x4x32xf32>
    %76 = arith.addf %71, %75 : vector<4x4x32xf32>
    %c0_142 = arith.constant 0 : index
    %c0_143 = arith.constant 0 : index
    %77 = vector.load %arg7[%c0_142, %c0_143] : memref<1x32xf32, #tpu.memory_space<vmem>>, vector<1x32xf32>
    %78 = vector.shape_cast %77 : vector<1x32xf32> to vector<32xf32>
    %79 = vector.shape_cast %78 : vector<32xf32> to vector<1x1x32xf32>
    %80 = vector.broadcast %79 : vector<1x1x32xf32> to vector<4x4x32xf32>
    %81 = arith.addf %76, %80 : vector<4x4x32xf32>
    %cst_144 = arith.constant 0.000000e+00 : f32
    %82 = vector.broadcast %cst_144 : f32 to vector<4x4x32xf32>
    %83 = arith.maximumf %81, %82 : vector<4x4x32xf32>
    %c0_145 = arith.constant 0 : index
    %c0_146 = arith.constant 0 : index
    %84 = vector.load %arg8[%c0_145, %c0_146] : memref<32x16xf32, #tpu.memory_space<vmem>>, vector<32x16xf32>
    %cst_147 = arith.constant dense<0.000000e+00> : vector<4x4x16xf32>
    %85 = tpu.matmul %83, %84, %cst_147 {dimension_numbers = #tpu.dot_dimension_numbers<[2], [0], [0, 1], [1], [0, 0, 0, 1, 1, 1], [], []>} : vector<4x4x32xf32>, vector<32x16xf32>, vector<4x4x16xf32> -> vector<4x4x16xf32>
    %c0_148 = arith.constant 0 : index
    %c0_149 = arith.constant 0 : index
    %86 = vector.load %arg9[%c0_148, %c0_149] : memref<1x16xf32, #tpu.memory_space<vmem>>, vector<1x16xf32>
    %87 = vector.shape_cast %86 : vector<1x16xf32> to vector<16xf32>
    %88 = vector.shape_cast %87 : vector<16xf32> to vector<1x1x16xf32>
    %89 = vector.broadcast %88 : vector<1x1x16xf32> to vector<4x4x16xf32>
    %90 = arith.addf %85, %89 : vector<4x4x16xf32>
    %cst_150 = arith.constant 0.000000e+00 : f32
    %91 = vector.broadcast %cst_150 : f32 to vector<4x4x16xf32>
    %92 = arith.maximumf %90, %91 : vector<4x4x16xf32>
    %c0_151 = arith.constant 0 : index
    %c0_152 = arith.constant 0 : index
    %93 = vector.load %arg10[%c0_151, %c0_152] : memref<16x32xf32, #tpu.memory_space<vmem>>, vector<16x32xf32>
    %cst_153 = arith.constant dense<0.000000e+00> : vector<4x4x32xf32>
    %94 = tpu.matmul %92, %93, %cst_153 {dimension_numbers = #tpu.dot_dimension_numbers<[2], [0], [0, 1], [1], [0, 0, 0, 1, 1, 1], [], []>} : vector<4x4x16xf32>, vector<16x32xf32>, vector<4x4x32xf32> -> vector<4x4x32xf32>
    %c0_154 = arith.constant 0 : index
    %c0_155 = arith.constant 0 : index
    %95 = vector.load %arg11[%c0_154, %c0_155] : memref<1x32xf32, #tpu.memory_space<vmem>>, vector<1x32xf32>
    %96 = vector.shape_cast %95 : vector<1x32xf32> to vector<32xf32>
    %97 = vector.shape_cast %96 : vector<32xf32> to vector<1x1x32xf32>
    %98 = vector.broadcast %97 : vector<1x1x32xf32> to vector<4x4x32xf32>
    %99 = arith.addf %94, %98 : vector<4x4x32xf32>
    %cst_156 = arith.constant 0.000000e+00 : f32
    %100 = vector.broadcast %cst_156 : f32 to vector<4x4x32xf32>
    %101 = arith.maximumf %99, %100 : vector<4x4x32xf32>
    %c0_157 = arith.constant 0 : index
    %c0_158 = arith.constant 0 : index
    %c0_159 = arith.constant 0 : index
    %c0_160 = arith.constant 0 : index
    %102 = vector.load %arg22[%c0_157, %c0_158, %c0_159, %c0_160] : memref<1x4x4x32xf32, #tpu.memory_space<vmem>>, vector<1x4x4x32xf32>
    %103 = vector.shape_cast %102 : vector<1x4x4x32xf32> to vector<4x4x32xf32>
    %104 = vector.shape_cast %101 : vector<4x4x32xf32> to vector<1x4x4x32xf32>
    tpu.vector_store %arg22[%c0_157, %c0_158, %c0_159, %c0_160], %104 {strides = array<i32>} : memref<1x4x4x32xf32, #tpu.memory_space<vmem>>, vector<1x4x4x32xf32>,
    %c0_161 = arith.constant 0 : index
    %c0_162 = arith.constant 0 : index
    %105 = vector.load %arg4[%c0_161, %c0_162] : memref<8x4xf32, #tpu.memory_space<vmem>>, vector<8x4xf32>
    %106 = vector.shape_cast %105 : vector<8x4xf32> to vector<1x8x4xf32>
    %107 = vector.broadcast %106 : vector<1x8x4xf32> to vector<4x8x4xf32>
    %cst_163 = arith.constant dense<0.000000e+00> : vector<4x8x32xf32>
    %108 = tpu.matmul %107, %101, %cst_163 {dimension_numbers = #tpu.dot_dimension_numbers<[2], [1], [1], [2], [0, 0, 0, 1, 1, 2], [0], [0]>} : vector<4x8x4xf32>, vector<4x4x32xf32>, vector<4x8x32xf32> -> vector<4x8x32xf32>
    %109 = vector.shape_cast %108 : vector<4x8x32xf32> to vector<4x1x8x32xf32>
    %110 = vector.shape_cast %109 : vector<4x1x8x32xf32> to vector<4x1x8x32xf32>
    %111 = vector.broadcast %110 : vector<4x1x8x32xf32> to vector<4x2x8x32xf32>
    %112 = vector.shape_cast %111 : vector<4x2x8x32xf32> to vector<8x8x32xf32>
    %c1_164 = arith.constant 1 : index
    %c1_165 = arith.constant 1 : index
    %c0_166 = arith.constant 0 : index
    %113 = vector.load %arg26[%c1_164, %c1_165, %c0_166] : memref<10x10x32xf32, #tpu.memory_space<vmem>>, vector<8x8x32xf32>
    tpu.vector_store %arg26[%c1_164, %c1_165, %c0_166], %112 {strides = array<i32>} : memref<10x10x32xf32, #tpu.memory_space<vmem>>, vector<8x8x32xf32>,
    %c0_167 = arith.constant 0 : index
    %c0_168 = arith.constant 0 : index
    %c0_169 = arith.constant 0 : index
    %114 = vector.load %arg26[%c0_167, %c0_168, %c0_169] : memref<10x10x32xf32, #tpu.memory_space<vmem>>, vector<8x8x32xf32>
    %c0_170 = arith.constant 0 : index
    %c0_171 = arith.constant 0 : index
    %c0_172 = arith.constant 0 : index
    %c0_173 = arith.constant 0 : index
    %115 = vector.load %arg12[%c0_170, %c0_171, %c0_172, %c0_173] : memref<3x3x32x16xf32, #tpu.memory_space<vmem>>, vector<1x1x32x16xf32>
    %116 = vector.shape_cast %115 : vector<1x1x32x16xf32> to vector<32x16xf32>
    %cst_174 = arith.constant dense<0.000000e+00> : vector<8x8x16xf32>
    %117 = tpu.matmul %114, %116, %cst_174 {dimension_numbers = #tpu.dot_dimension_numbers<[2], [0], [0, 1], [1], [0, 0, 0, 1, 1, 1], [], []>} : vector<8x8x32xf32>, vector<32x16xf32>, vector<8x8x16xf32> -> vector<8x8x16xf32>
    %c0_175 = arith.constant 0 : index
    %c1_176 = arith.constant 1 : index
    %c0_177 = arith.constant 0 : index
    %118 = vector.load %arg26[%c0_175, %c1_176, %c0_177] : memref<10x10x32xf32, #tpu.memory_space<vmem>>, vector<8x8x32xf32>
    %c0_178 = arith.constant 0 : index
    %c1_179 = arith.constant 1 : index
    %c0_180 = arith.constant 0 : index
    %c0_181 = arith.constant 0 : index
    %119 = vector.load %arg12[%c0_178, %c1_179, %c0_180, %c0_181] : memref<3x3x32x16xf32, #tpu.memory_space<vmem>>, vector<1x1x32x16xf32>
    %120 = vector.shape_cast %119 : vector<1x1x32x16xf32> to vector<32x16xf32>
    %cst_182 = arith.constant dense<0.000000e+00> : vector<8x8x16xf32>
    %121 = tpu.matmul %118, %120, %cst_182 {dimension_numbers = #tpu.dot_dimension_numbers<[2], [0], [0, 1], [1], [0, 0, 0, 1, 1, 1], [], []>} : vector<8x8x32xf32>, vector<32x16xf32>, vector<8x8x16xf32> -> vector<8x8x16xf32>
    %122 = arith.addf %117, %121 : vector<8x8x16xf32>
    %c0_183 = arith.constant 0 : index
    %c2_184 = arith.constant 2 : index
    %c0_185 = arith.constant 0 : index
    %123 = vector.load %arg26[%c0_183, %c2_184, %c0_185] : memref<10x10x32xf32, #tpu.memory_space<vmem>>, vector<8x8x32xf32>
    %c0_186 = arith.constant 0 : index
    %c2_187 = arith.constant 2 : index
    %c0_188 = arith.constant 0 : index
    %c0_189 = arith.constant 0 : index
    %124 = vector.load %arg12[%c0_186, %c2_187, %c0_188, %c0_189] : memref<3x3x32x16xf32, #tpu.memory_space<vmem>>, vector<1x1x32x16xf32>
    %125 = vector.shape_cast %124 : vector<1x1x32x16xf32> to vector<32x16xf32>
    %cst_190 = arith.constant dense<0.000000e+00> : vector<8x8x16xf32>
    %126 = tpu.matmul %123, %125, %cst_190 {dimension_numbers = #tpu.dot_dimension_numbers<[2], [0], [0, 1], [1], [0, 0, 0, 1, 1, 1], [], []>} : vector<8x8x32xf32>, vector<32x16xf32>, vector<8x8x16xf32> -> vector<8x8x16xf32>
    %127 = arith.addf %122, %126 : vector<8x8x16xf32>
    %c1_191 = arith.constant 1 : index
    %c0_192 = arith.constant 0 : index
    %c0_193 = arith.constant 0 : index
    %128 = vector.load %arg26[%c1_191, %c0_192, %c0_193] : memref<10x10x32xf32, #tpu.memory_space<vmem>>, vector<8x8x32xf32>
    %c1_194 = arith.constant 1 : index
    %c0_195 = arith.constant 0 : index
    %c0_196 = arith.constant 0 : index
    %c0_197 = arith.constant 0 : index
    %129 = vector.load %arg12[%c1_194, %c0_195, %c0_196, %c0_197] : memref<3x3x32x16xf32, #tpu.memory_space<vmem>>, vector<1x1x32x16xf32>
    %130 = vector.shape_cast %129 : vector<1x1x32x16xf32> to vector<32x16xf32>
    %cst_198 = arith.constant dense<0.000000e+00> : vector<8x8x16xf32>
    %131 = tpu.matmul %128, %130, %cst_198 {dimension_numbers = #tpu.dot_dimension_numbers<[2], [0], [0, 1], [1], [0, 0, 0, 1, 1, 1], [], []>} : vector<8x8x32xf32>, vector<32x16xf32>, vector<8x8x16xf32> -> vector<8x8x16xf32>
    %132 = arith.addf %127, %131 : vector<8x8x16xf32>
    %c1_199 = arith.constant 1 : index
    %c1_200 = arith.constant 1 : index
    %c0_201 = arith.constant 0 : index
    %133 = vector.load %arg26[%c1_199, %c1_200, %c0_201] : memref<10x10x32xf32, #tpu.memory_space<vmem>>, vector<8x8x32xf32>
    %c1_202 = arith.constant 1 : index
    %c1_203 = arith.constant 1 : index
    %c0_204 = arith.constant 0 : index
    %c0_205 = arith.constant 0 : index
    %134 = vector.load %arg12[%c1_202, %c1_203, %c0_204, %c0_205] : memref<3x3x32x16xf32, #tpu.memory_space<vmem>>, vector<1x1x32x16xf32>
    %135 = vector.shape_cast %134 : vector<1x1x32x16xf32> to vector<32x16xf32>
    %cst_206 = arith.constant dense<0.000000e+00> : vector<8x8x16xf32>
    %136 = tpu.matmul %133, %135, %cst_206 {dimension_numbers = #tpu.dot_dimension_numbers<[2], [0], [0, 1], [1], [0, 0, 0, 1, 1, 1], [], []>} : vector<8x8x32xf32>, vector<32x16xf32>, vector<8x8x16xf32> -> vector<8x8x16xf32>
    %137 = arith.addf %132, %136 : vector<8x8x16xf32>
    %c1_207 = arith.constant 1 : index
    %c2_208 = arith.constant 2 : index
    %c0_209 = arith.constant 0 : index
    %138 = vector.load %arg26[%c1_207, %c2_208, %c0_209] : memref<10x10x32xf32, #tpu.memory_space<vmem>>, vector<8x8x32xf32>
    %c1_210 = arith.constant 1 : index
    %c2_211 = arith.constant 2 : index
    %c0_212 = arith.constant 0 : index
    %c0_213 = arith.constant 0 : index
    %139 = vector.load %arg12[%c1_210, %c2_211, %c0_212, %c0_213] : memref<3x3x32x16xf32, #tpu.memory_space<vmem>>, vector<1x1x32x16xf32>
    %140 = vector.shape_cast %139 : vector<1x1x32x16xf32> to vector<32x16xf32>
    %cst_214 = arith.constant dense<0.000000e+00> : vector<8x8x16xf32>
    %141 = tpu.matmul %138, %140, %cst_214 {dimension_numbers = #tpu.dot_dimension_numbers<[2], [0], [0, 1], [1], [0, 0, 0, 1, 1, 1], [], []>} : vector<8x8x32xf32>, vector<32x16xf32>, vector<8x8x16xf32> -> vector<8x8x16xf32>
    %142 = arith.addf %137, %141 : vector<8x8x16xf32>
    %c2_215 = arith.constant 2 : index
    %c0_216 = arith.constant 0 : index
    %c0_217 = arith.constant 0 : index
    %143 = vector.load %arg26[%c2_215, %c0_216, %c0_217] : memref<10x10x32xf32, #tpu.memory_space<vmem>>, vector<8x8x32xf32>
    %c2_218 = arith.constant 2 : index
    %c0_219 = arith.constant 0 : index
    %c0_220 = arith.constant 0 : index
    %c0_221 = arith.constant 0 : index
    %144 = vector.load %arg12[%c2_218, %c0_219, %c0_220, %c0_221] : memref<3x3x32x16xf32, #tpu.memory_space<vmem>>, vector<1x1x32x16xf32>
    %145 = vector.shape_cast %144 : vector<1x1x32x16xf32> to vector<32x16xf32>
    %cst_222 = arith.constant dense<0.000000e+00> : vector<8x8x16xf32>
    %146 = tpu.matmul %143, %145, %cst_222 {dimension_numbers = #tpu.dot_dimension_numbers<[2], [0], [0, 1], [1], [0, 0, 0, 1, 1, 1], [], []>} : vector<8x8x32xf32>, vector<32x16xf32>, vector<8x8x16xf32> -> vector<8x8x16xf32>
    %147 = arith.addf %142, %146 : vector<8x8x16xf32>
    %c2_223 = arith.constant 2 : index
    %c1_224 = arith.constant 1 : index
    %c0_225 = arith.constant 0 : index
    %148 = vector.load %arg26[%c2_223, %c1_224, %c0_225] : memref<10x10x32xf32, #tpu.memory_space<vmem>>, vector<8x8x32xf32>
    %c2_226 = arith.constant 2 : index
    %c1_227 = arith.constant 1 : index
    %c0_228 = arith.constant 0 : index
    %c0_229 = arith.constant 0 : index
    %149 = vector.load %arg12[%c2_226, %c1_227, %c0_228, %c0_229] : memref<3x3x32x16xf32, #tpu.memory_space<vmem>>, vector<1x1x32x16xf32>
    %150 = vector.shape_cast %149 : vector<1x1x32x16xf32> to vector<32x16xf32>
    %cst_230 = arith.constant dense<0.000000e+00> : vector<8x8x16xf32>
    %151 = tpu.matmul %148, %150, %cst_230 {dimension_numbers = #tpu.dot_dimension_numbers<[2], [0], [0, 1], [1], [0, 0, 0, 1, 1, 1], [], []>} : vector<8x8x32xf32>, vector<32x16xf32>, vector<8x8x16xf32> -> vector<8x8x16xf32>
    %152 = arith.addf %147, %151 : vector<8x8x16xf32>
    %c2_231 = arith.constant 2 : index
    %c2_232 = arith.constant 2 : index
    %c0_233 = arith.constant 0 : index
    %153 = vector.load %arg26[%c2_231, %c2_232, %c0_233] : memref<10x10x32xf32, #tpu.memory_space<vmem>>, vector<8x8x32xf32>
    %c2_234 = arith.constant 2 : index
    %c2_235 = arith.constant 2 : index
    %c0_236 = arith.constant 0 : index
    %c0_237 = arith.constant 0 : index
    %154 = vector.load %arg12[%c2_234, %c2_235, %c0_236, %c0_237] : memref<3x3x32x16xf32, #tpu.memory_space<vmem>>, vector<1x1x32x16xf32>
    %155 = vector.shape_cast %154 : vector<1x1x32x16xf32> to vector<32x16xf32>
    %cst_238 = arith.constant dense<0.000000e+00> : vector<8x8x16xf32>
    %156 = tpu.matmul %153, %155, %cst_238 {dimension_numbers = #tpu.dot_dimension_numbers<[2], [0], [0, 1], [1], [0, 0, 0, 1, 1, 1], [], []>} : vector<8x8x32xf32>, vector<32x16xf32>, vector<8x8x16xf32> -> vector<8x8x16xf32>
    %157 = arith.addf %152, %156 : vector<8x8x16xf32>
    %c0_239 = arith.constant 0 : index
    %c0_240 = arith.constant 0 : index
    %158 = vector.load %arg13[%c0_239, %c0_240] : memref<1x16xf32, #tpu.memory_space<vmem>>, vector<1x16xf32>
    %159 = vector.shape_cast %158 : vector<1x16xf32> to vector<16xf32>
    %160 = vector.shape_cast %159 : vector<16xf32> to vector<1x1x16xf32>
    %161 = vector.broadcast %160 : vector<1x1x16xf32> to vector<8x8x16xf32>
    %162 = arith.addf %157, %161 : vector<8x8x16xf32>
    %cst_241 = arith.constant 0.000000e+00 : f32
    %163 = vector.broadcast %cst_241 : f32 to vector<8x8x16xf32>
    %164 = arith.maximumf %162, %163 : vector<8x8x16xf32>
    %c0_242 = arith.constant 0 : index
    %c0_243 = arith.constant 0 : index
    %c0_244 = arith.constant 0 : index
    %c0_245 = arith.constant 0 : index
    %165 = vector.load %arg2[%c0_242, %c0_243, %c0_244, %c0_245] : memref<1x8x8x16xf32, #tpu.memory_space<vmem>>, vector<1x8x8x16xf32>
    %166 = vector.shape_cast %165 : vector<1x8x8x16xf32> to vector<8x8x16xf32>
    %167 = arith.addf %166, %164 : vector<8x8x16xf32>
    %c1_246 = arith.constant 1 : index
    %c1_247 = arith.constant 1 : index
    %c0_248 = arith.constant 0 : index
    %168 = vector.load %arg24[%c1_246, %c1_247, %c0_248] : memref<10x10x16xf32, #tpu.memory_space<vmem>>, vector<8x8x16xf32>
    tpu.vector_store %arg24[%c1_246, %c1_247, %c0_248], %167 {strides = array<i32>} : memref<10x10x16xf32, #tpu.memory_space<vmem>>, vector<8x8x16xf32>,
    %c0_249 = arith.constant 0 : index
    %c0_250 = arith.constant 0 : index
    %c0_251 = arith.constant 0 : index
    %169 = vector.load %arg24[%c0_249, %c0_250, %c0_251] : memref<10x10x16xf32, #tpu.memory_space<vmem>>, vector<8x8x16xf32>
    %c0_252 = arith.constant 0 : index
    %c0_253 = arith.constant 0 : index
    %c0_254 = arith.constant 0 : index
    %c0_255 = arith.constant 0 : index
    %170 = vector.load %arg14[%c0_252, %c0_253, %c0_254, %c0_255] : memref<3x3x16x16xf32, #tpu.memory_space<vmem>>, vector<1x1x16x16xf32>
    %171 = vector.shape_cast %170 : vector<1x1x16x16xf32> to vector<16x16xf32>
    %cst_256 = arith.constant dense<0.000000e+00> : vector<8x8x16xf32>
    %172 = tpu.matmul %169, %171, %cst_256 {dimension_numbers = #tpu.dot_dimension_numbers<[2], [0], [0, 1], [1], [0, 0, 0, 1, 1, 1], [], []>} : vector<8x8x16xf32>, vector<16x16xf32>, vector<8x8x16xf32> -> vector<8x8x16xf32>
    %c0_257 = arith.constant 0 : index
    %c1_258 = arith.constant 1 : index
    %c0_259 = arith.constant 0 : index
    %173 = vector.load %arg24[%c0_257, %c1_258, %c0_259] : memref<10x10x16xf32, #tpu.memory_space<vmem>>, vector<8x8x16xf32>
    %c0_260 = arith.constant 0 : index
    %c1_261 = arith.constant 1 : index
    %c0_262 = arith.constant 0 : index
    %c0_263 = arith.constant 0 : index
    %174 = vector.load %arg14[%c0_260, %c1_261, %c0_262, %c0_263] : memref<3x3x16x16xf32, #tpu.memory_space<vmem>>, vector<1x1x16x16xf32>
    %175 = vector.shape_cast %174 : vector<1x1x16x16xf32> to vector<16x16xf32>
    %cst_264 = arith.constant dense<0.000000e+00> : vector<8x8x16xf32>
    %176 = tpu.matmul %173, %175, %cst_264 {dimension_numbers = #tpu.dot_dimension_numbers<[2], [0], [0, 1], [1], [0, 0, 0, 1, 1, 1], [], []>} : vector<8x8x16xf32>, vector<16x16xf32>, vector<8x8x16xf32> -> vector<8x8x16xf32>
    %177 = arith.addf %172, %176 : vector<8x8x16xf32>
    %c0_265 = arith.constant 0 : index
    %c2_266 = arith.constant 2 : index
    %c0_267 = arith.constant 0 : index
    %178 = vector.load %arg24[%c0_265, %c2_266, %c0_267] : memref<10x10x16xf32, #tpu.memory_space<vmem>>, vector<8x8x16xf32>
    %c0_268 = arith.constant 0 : index
    %c2_269 = arith.constant 2 : index
    %c0_270 = arith.constant 0 : index
    %c0_271 = arith.constant 0 : index
    %179 = vector.load %arg14[%c0_268, %c2_269, %c0_270, %c0_271] : memref<3x3x16x16xf32, #tpu.memory_space<vmem>>, vector<1x1x16x16xf32>
    %180 = vector.shape_cast %179 : vector<1x1x16x16xf32> to vector<16x16xf32>
    %cst_272 = arith.constant dense<0.000000e+00> : vector<8x8x16xf32>
    %181 = tpu.matmul %178, %180, %cst_272 {dimension_numbers = #tpu.dot_dimension_numbers<[2], [0], [0, 1], [1], [0, 0, 0, 1, 1, 1], [], []>} : vector<8x8x16xf32>, vector<16x16xf32>, vector<8x8x16xf32> -> vector<8x8x16xf32>
    %182 = arith.addf %177, %181 : vector<8x8x16xf32>
    %c1_273 = arith.constant 1 : index
    %c0_274 = arith.constant 0 : index
    %c0_275 = arith.constant 0 : index
    %183 = vector.load %arg24[%c1_273, %c0_274, %c0_275] : memref<10x10x16xf32, #tpu.memory_space<vmem>>, vector<8x8x16xf32>
    %c1_276 = arith.constant 1 : index
    %c0_277 = arith.constant 0 : index
    %c0_278 = arith.constant 0 : index
    %c0_279 = arith.constant 0 : index
    %184 = vector.load %arg14[%c1_276, %c0_277, %c0_278, %c0_279] : memref<3x3x16x16xf32, #tpu.memory_space<vmem>>, vector<1x1x16x16xf32>
    %185 = vector.shape_cast %184 : vector<1x1x16x16xf32> to vector<16x16xf32>
    %cst_280 = arith.constant dense<0.000000e+00> : vector<8x8x16xf32>
    %186 = tpu.matmul %183, %185, %cst_280 {dimension_numbers = #tpu.dot_dimension_numbers<[2], [0], [0, 1], [1], [0, 0, 0, 1, 1, 1], [], []>} : vector<8x8x16xf32>, vector<16x16xf32>, vector<8x8x16xf32> -> vector<8x8x16xf32>
    %187 = arith.addf %182, %186 : vector<8x8x16xf32>
    %c1_281 = arith.constant 1 : index
    %c1_282 = arith.constant 1 : index
    %c0_283 = arith.constant 0 : index
    %188 = vector.load %arg24[%c1_281, %c1_282, %c0_283] : memref<10x10x16xf32, #tpu.memory_space<vmem>>, vector<8x8x16xf32>
    %c1_284 = arith.constant 1 : index
    %c1_285 = arith.constant 1 : index
    %c0_286 = arith.constant 0 : index
    %c0_287 = arith.constant 0 : index
    %189 = vector.load %arg14[%c1_284, %c1_285, %c0_286, %c0_287] : memref<3x3x16x16xf32, #tpu.memory_space<vmem>>, vector<1x1x16x16xf32>
    %190 = vector.shape_cast %189 : vector<1x1x16x16xf32> to vector<16x16xf32>
    %cst_288 = arith.constant dense<0.000000e+00> : vector<8x8x16xf32>
    %191 = tpu.matmul %188, %190, %cst_288 {dimension_numbers = #tpu.dot_dimension_numbers<[2], [0], [0, 1], [1], [0, 0, 0, 1, 1, 1], [], []>} : vector<8x8x16xf32>, vector<16x16xf32>, vector<8x8x16xf32> -> vector<8x8x16xf32>
    %192 = arith.addf %187, %191 : vector<8x8x16xf32>
    %c1_289 = arith.constant 1 : index
    %c2_290 = arith.constant 2 : index
    %c0_291 = arith.constant 0 : index
    %193 = vector.load %arg24[%c1_289, %c2_290, %c0_291] : memref<10x10x16xf32, #tpu.memory_space<vmem>>, vector<8x8x16xf32>
    %c1_292 = arith.constant 1 : index
    %c2_293 = arith.constant 2 : index
    %c0_294 = arith.constant 0 : index
    %c0_295 = arith.constant 0 : index
    %194 = vector.load %arg14[%c1_292, %c2_293, %c0_294, %c0_295] : memref<3x3x16x16xf32, #tpu.memory_space<vmem>>, vector<1x1x16x16xf32>
    %195 = vector.shape_cast %194 : vector<1x1x16x16xf32> to vector<16x16xf32>
    %cst_296 = arith.constant dense<0.000000e+00> : vector<8x8x16xf32>
    %196 = tpu.matmul %193, %195, %cst_296 {dimension_numbers = #tpu.dot_dimension_numbers<[2], [0], [0, 1], [1], [0, 0, 0, 1, 1, 1], [], []>} : vector<8x8x16xf32>, vector<16x16xf32>, vector<8x8x16xf32> -> vector<8x8x16xf32>
    %197 = arith.addf %192, %196 : vector<8x8x16xf32>
    %c2_297 = arith.constant 2 : index
    %c0_298 = arith.constant 0 : index
    %c0_299 = arith.constant 0 : index
    %198 = vector.load %arg24[%c2_297, %c0_298, %c0_299] : memref<10x10x16xf32, #tpu.memory_space<vmem>>, vector<8x8x16xf32>
    %c2_300 = arith.constant 2 : index
    %c0_301 = arith.constant 0 : index
    %c0_302 = arith.constant 0 : index
    %c0_303 = arith.constant 0 : index
    %199 = vector.load %arg14[%c2_300, %c0_301, %c0_302, %c0_303] : memref<3x3x16x16xf32, #tpu.memory_space<vmem>>, vector<1x1x16x16xf32>
    %200 = vector.shape_cast %199 : vector<1x1x16x16xf32> to vector<16x16xf32>
    %cst_304 = arith.constant dense<0.000000e+00> : vector<8x8x16xf32>
    %201 = tpu.matmul %198, %200, %cst_304 {dimension_numbers = #tpu.dot_dimension_numbers<[2], [0], [0, 1], [1], [0, 0, 0, 1, 1, 1], [], []>} : vector<8x8x16xf32>, vector<16x16xf32>, vector<8x8x16xf32> -> vector<8x8x16xf32>
    %202 = arith.addf %197, %201 : vector<8x8x16xf32>
    %c2_305 = arith.constant 2 : index
    %c1_306 = arith.constant 1 : index
    %c0_307 = arith.constant 0 : index
    %203 = vector.load %arg24[%c2_305, %c1_306, %c0_307] : memref<10x10x16xf32, #tpu.memory_space<vmem>>, vector<8x8x16xf32>
    %c2_308 = arith.constant 2 : index
    %c1_309 = arith.constant 1 : index
    %c0_310 = arith.constant 0 : index
    %c0_311 = arith.constant 0 : index
    %204 = vector.load %arg14[%c2_308, %c1_309, %c0_310, %c0_311] : memref<3x3x16x16xf32, #tpu.memory_space<vmem>>, vector<1x1x16x16xf32>
    %205 = vector.shape_cast %204 : vector<1x1x16x16xf32> to vector<16x16xf32>
    %cst_312 = arith.constant dense<0.000000e+00> : vector<8x8x16xf32>
    %206 = tpu.matmul %203, %205, %cst_312 {dimension_numbers = #tpu.dot_dimension_numbers<[2], [0], [0, 1], [1], [0, 0, 0, 1, 1, 1], [], []>} : vector<8x8x16xf32>, vector<16x16xf32>, vector<8x8x16xf32> -> vector<8x8x16xf32>
    %207 = arith.addf %202, %206 : vector<8x8x16xf32>
    %c2_313 = arith.constant 2 : index
    %c2_314 = arith.constant 2 : index
    %c0_315 = arith.constant 0 : index
    %208 = vector.load %arg24[%c2_313, %c2_314, %c0_315] : memref<10x10x16xf32, #tpu.memory_space<vmem>>, vector<8x8x16xf32>
    %c2_316 = arith.constant 2 : index
    %c2_317 = arith.constant 2 : index
    %c0_318 = arith.constant 0 : index
    %c0_319 = arith.constant 0 : index
    %209 = vector.load %arg14[%c2_316, %c2_317, %c0_318, %c0_319] : memref<3x3x16x16xf32, #tpu.memory_space<vmem>>, vector<1x1x16x16xf32>
    %210 = vector.shape_cast %209 : vector<1x1x16x16xf32> to vector<16x16xf32>
    %cst_320 = arith.constant dense<0.000000e+00> : vector<8x8x16xf32>
    %211 = tpu.matmul %208, %210, %cst_320 {dimension_numbers = #tpu.dot_dimension_numbers<[2], [0], [0, 1], [1], [0, 0, 0, 1, 1, 1], [], []>} : vector<8x8x16xf32>, vector<16x16xf32>, vector<8x8x16xf32> -> vector<8x8x16xf32>
    %212 = arith.addf %207, %211 : vector<8x8x16xf32>
    %c0_321 = arith.constant 0 : index
    %c0_322 = arith.constant 0 : index
    %213 = vector.load %arg15[%c0_321, %c0_322] : memref<1x16xf32, #tpu.memory_space<vmem>>, vector<1x16xf32>
    %214 = vector.shape_cast %213 : vector<1x16xf32> to vector<16xf32>
    %215 = vector.shape_cast %214 : vector<16xf32> to vector<1x1x16xf32>
    %216 = vector.broadcast %215 : vector<1x1x16xf32> to vector<8x8x16xf32>
    %217 = arith.addf %212, %216 : vector<8x8x16xf32>
    %cst_323 = arith.constant 0.000000e+00 : f32
    %218 = vector.broadcast %cst_323 : f32 to vector<8x8x16xf32>
    %219 = arith.maximumf %217, %218 : vector<8x8x16xf32>
    %c0_324 = arith.constant 0 : index
    %c0_325 = arith.constant 0 : index
    %c0_326 = arith.constant 0 : index
    %c0_327 = arith.constant 0 : index
    %220 = vector.load %arg21[%c0_324, %c0_325, %c0_326, %c0_327] : memref<1x8x8x16xf32, #tpu.memory_space<vmem>>, vector<1x8x8x16xf32>
    %221 = vector.shape_cast %220 : vector<1x8x8x16xf32> to vector<8x8x16xf32>
    %222 = vector.shape_cast %219 : vector<8x8x16xf32> to vector<1x8x8x16xf32>
    tpu.vector_store %arg21[%c0_324, %c0_325, %c0_326, %c0_327], %222 {strides = array<i32>} : memref<1x8x8x16xf32, #tpu.memory_space<vmem>>, vector<1x8x8x16xf32>,
    %c0_328 = arith.constant 0 : index
    %c0_329 = arith.constant 0 : index
    %223 = vector.load %arg5[%c0_328, %c0_329] : memref<16x8xf32, #tpu.memory_space<vmem>>, vector<16x8xf32>
    %224 = vector.shape_cast %223 : vector<16x8xf32> to vector<1x16x8xf32>
    %225 = vector.broadcast %224 : vector<1x16x8xf32> to vector<8x16x8xf32>
    %cst_330 = arith.constant dense<0.000000e+00> : vector<8x16x16xf32>
    %226 = tpu.matmul %225, %219, %cst_330 {dimension_numbers = #tpu.dot_dimension_numbers<[2], [1], [1], [2], [0, 0, 0, 1, 1, 2], [0], [0]>} : vector<8x16x8xf32>, vector<8x8x16xf32>, vector<8x16x16xf32> -> vector<8x16x16xf32>
    %227 = vector.shape_cast %226 : vector<8x16x16xf32> to vector<8x1x16x16xf32>
    %228 = vector.shape_cast %227 : vector<8x1x16x16xf32> to vector<8x1x16x16xf32>
    %229 = vector.broadcast %228 : vector<8x1x16x16xf32> to vector<8x2x16x16xf32>
    %230 = vector.shape_cast %229 : vector<8x2x16x16xf32> to vector<16x16x16xf32>
    %c1_331 = arith.constant 1 : index
    %c1_332 = arith.constant 1 : index
    %c0_333 = arith.constant 0 : index
    %231 = vector.load %arg27[%c1_331, %c1_332, %c0_333] : memref<18x18x16xf32, #tpu.memory_space<vmem>>, vector<16x16x16xf32>
    tpu.vector_store %arg27[%c1_331, %c1_332, %c0_333], %230 {strides = array<i32>} : memref<18x18x16xf32, #tpu.memory_space<vmem>>, vector<16x16x16xf32>,
    %c0_334 = arith.constant 0 : index
    %c0_335 = arith.constant 0 : index
    %c0_336 = arith.constant 0 : index
    %232 = vector.load %arg27[%c0_334, %c0_335, %c0_336] : memref<18x18x16xf32, #tpu.memory_space<vmem>>, vector<16x16x16xf32>
    %c0_337 = arith.constant 0 : index
    %c0_338 = arith.constant 0 : index
    %c0_339 = arith.constant 0 : index
    %c0_340 = arith.constant 0 : index
    %233 = vector.load %arg16[%c0_337, %c0_338, %c0_339, %c0_340] : memref<3x3x16x8xf32, #tpu.memory_space<vmem>>, vector<1x1x16x8xf32>
    %234 = vector.shape_cast %233 : vector<1x1x16x8xf32> to vector<16x8xf32>
    %cst_341 = arith.constant dense<0.000000e+00> : vector<16x16x8xf32>
    %235 = tpu.matmul %232, %234, %cst_341 {dimension_numbers = #tpu.dot_dimension_numbers<[2], [0], [0, 1], [1], [0, 0, 0, 1, 1, 1], [], []>} : vector<16x16x16xf32>, vector<16x8xf32>, vector<16x16x8xf32> -> vector<16x16x8xf32>
    %c0_342 = arith.constant 0 : index
    %c1_343 = arith.constant 1 : index
    %c0_344 = arith.constant 0 : index
    %236 = vector.load %arg27[%c0_342, %c1_343, %c0_344] : memref<18x18x16xf32, #tpu.memory_space<vmem>>, vector<16x16x16xf32>
    %c0_345 = arith.constant 0 : index
    %c1_346 = arith.constant 1 : index
    %c0_347 = arith.constant 0 : index
    %c0_348 = arith.constant 0 : index
    %237 = vector.load %arg16[%c0_345, %c1_346, %c0_347, %c0_348] : memref<3x3x16x8xf32, #tpu.memory_space<vmem>>, vector<1x1x16x8xf32>
    %238 = vector.shape_cast %237 : vector<1x1x16x8xf32> to vector<16x8xf32>
    %cst_349 = arith.constant dense<0.000000e+00> : vector<16x16x8xf32>
    %239 = tpu.matmul %236, %238, %cst_349 {dimension_numbers = #tpu.dot_dimension_numbers<[2], [0], [0, 1], [1], [0, 0, 0, 1, 1, 1], [], []>} : vector<16x16x16xf32>, vector<16x8xf32>, vector<16x16x8xf32> -> vector<16x16x8xf32>
    %240 = arith.addf %235, %239 : vector<16x16x8xf32>
    %c0_350 = arith.constant 0 : index
    %c2_351 = arith.constant 2 : index
    %c0_352 = arith.constant 0 : index
    %241 = vector.load %arg27[%c0_350, %c2_351, %c0_352] : memref<18x18x16xf32, #tpu.memory_space<vmem>>, vector<16x16x16xf32>
    %c0_353 = arith.constant 0 : index
    %c2_354 = arith.constant 2 : index
    %c0_355 = arith.constant 0 : index
    %c0_356 = arith.constant 0 : index
    %242 = vector.load %arg16[%c0_353, %c2_354, %c0_355, %c0_356] : memref<3x3x16x8xf32, #tpu.memory_space<vmem>>, vector<1x1x16x8xf32>
    %243 = vector.shape_cast %242 : vector<1x1x16x8xf32> to vector<16x8xf32>
    %cst_357 = arith.constant dense<0.000000e+00> : vector<16x16x8xf32>
    %244 = tpu.matmul %241, %243, %cst_357 {dimension_numbers = #tpu.dot_dimension_numbers<[2], [0], [0, 1], [1], [0, 0, 0, 1, 1, 1], [], []>} : vector<16x16x16xf32>, vector<16x8xf32>, vector<16x16x8xf32> -> vector<16x16x8xf32>
    %245 = arith.addf %240, %244 : vector<16x16x8xf32>
    %c1_358 = arith.constant 1 : index
    %c0_359 = arith.constant 0 : index
    %c0_360 = arith.constant 0 : index
    %246 = vector.load %arg27[%c1_358, %c0_359, %c0_360] : memref<18x18x16xf32, #tpu.memory_space<vmem>>, vector<16x16x16xf32>
    %c1_361 = arith.constant 1 : index
    %c0_362 = arith.constant 0 : index
    %c0_363 = arith.constant 0 : index
    %c0_364 = arith.constant 0 : index
    %247 = vector.load %arg16[%c1_361, %c0_362, %c0_363, %c0_364] : memref<3x3x16x8xf32, #tpu.memory_space<vmem>>, vector<1x1x16x8xf32>
    %248 = vector.shape_cast %247 : vector<1x1x16x8xf32> to vector<16x8xf32>
    %cst_365 = arith.constant dense<0.000000e+00> : vector<16x16x8xf32>
    %249 = tpu.matmul %246, %248, %cst_365 {dimension_numbers = #tpu.dot_dimension_numbers<[2], [0], [0, 1], [1], [0, 0, 0, 1, 1, 1], [], []>} : vector<16x16x16xf32>, vector<16x8xf32>, vector<16x16x8xf32> -> vector<16x16x8xf32>
    %250 = arith.addf %245, %249 : vector<16x16x8xf32>
    %c1_366 = arith.constant 1 : index
    %c1_367 = arith.constant 1 : index
    %c0_368 = arith.constant 0 : index
    %251 = vector.load %arg27[%c1_366, %c1_367, %c0_368] : memref<18x18x16xf32, #tpu.memory_space<vmem>>, vector<16x16x16xf32>
    %c1_369 = arith.constant 1 : index
    %c1_370 = arith.constant 1 : index
    %c0_371 = arith.constant 0 : index
    %c0_372 = arith.constant 0 : index
    %252 = vector.load %arg16[%c1_369, %c1_370, %c0_371, %c0_372] : memref<3x3x16x8xf32, #tpu.memory_space<vmem>>, vector<1x1x16x8xf32>
    %253 = vector.shape_cast %252 : vector<1x1x16x8xf32> to vector<16x8xf32>
    %cst_373 = arith.constant dense<0.000000e+00> : vector<16x16x8xf32>
    %254 = tpu.matmul %251, %253, %cst_373 {dimension_numbers = #tpu.dot_dimension_numbers<[2], [0], [0, 1], [1], [0, 0, 0, 1, 1, 1], [], []>} : vector<16x16x16xf32>, vector<16x8xf32>, vector<16x16x8xf32> -> vector<16x16x8xf32>
    %255 = arith.addf %250, %254 : vector<16x16x8xf32>
    %c1_374 = arith.constant 1 : index
    %c2_375 = arith.constant 2 : index
    %c0_376 = arith.constant 0 : index
    %256 = vector.load %arg27[%c1_374, %c2_375, %c0_376] : memref<18x18x16xf32, #tpu.memory_space<vmem>>, vector<16x16x16xf32>
    %c1_377 = arith.constant 1 : index
    %c2_378 = arith.constant 2 : index
    %c0_379 = arith.constant 0 : index
    %c0_380 = arith.constant 0 : index
    %257 = vector.load %arg16[%c1_377, %c2_378, %c0_379, %c0_380] : memref<3x3x16x8xf32, #tpu.memory_space<vmem>>, vector<1x1x16x8xf32>
    %258 = vector.shape_cast %257 : vector<1x1x16x8xf32> to vector<16x8xf32>
    %cst_381 = arith.constant dense<0.000000e+00> : vector<16x16x8xf32>
    %259 = tpu.matmul %256, %258, %cst_381 {dimension_numbers = #tpu.dot_dimension_numbers<[2], [0], [0, 1], [1], [0, 0, 0, 1, 1, 1], [], []>} : vector<16x16x16xf32>, vector<16x8xf32>, vector<16x16x8xf32> -> vector<16x16x8xf32>
    %260 = arith.addf %255, %259 : vector<16x16x8xf32>
    %c2_382 = arith.constant 2 : index
    %c0_383 = arith.constant 0 : index
    %c0_384 = arith.constant 0 : index
    %261 = vector.load %arg27[%c2_382, %c0_383, %c0_384] : memref<18x18x16xf32, #tpu.memory_space<vmem>>, vector<16x16x16xf32>
    %c2_385 = arith.constant 2 : index
    %c0_386 = arith.constant 0 : index
    %c0_387 = arith.constant 0 : index
    %c0_388 = arith.constant 0 : index
    %262 = vector.load %arg16[%c2_385, %c0_386, %c0_387, %c0_388] : memref<3x3x16x8xf32, #tpu.memory_space<vmem>>, vector<1x1x16x8xf32>
    %263 = vector.shape_cast %262 : vector<1x1x16x8xf32> to vector<16x8xf32>
    %cst_389 = arith.constant dense<0.000000e+00> : vector<16x16x8xf32>
    %264 = tpu.matmul %261, %263, %cst_389 {dimension_numbers = #tpu.dot_dimension_numbers<[2], [0], [0, 1], [1], [0, 0, 0, 1, 1, 1], [], []>} : vector<16x16x16xf32>, vector<16x8xf32>, vector<16x16x8xf32> -> vector<16x16x8xf32>
    %265 = arith.addf %260, %264 : vector<16x16x8xf32>
    %c2_390 = arith.constant 2 : index
    %c1_391 = arith.constant 1 : index
    %c0_392 = arith.constant 0 : index
    %266 = vector.load %arg27[%c2_390, %c1_391, %c0_392] : memref<18x18x16xf32, #tpu.memory_space<vmem>>, vector<16x16x16xf32>
    %c2_393 = arith.constant 2 : index
    %c1_394 = arith.constant 1 : index
    %c0_395 = arith.constant 0 : index
    %c0_396 = arith.constant 0 : index
    %267 = vector.load %arg16[%c2_393, %c1_394, %c0_395, %c0_396] : memref<3x3x16x8xf32, #tpu.memory_space<vmem>>, vector<1x1x16x8xf32>
    %268 = vector.shape_cast %267 : vector<1x1x16x8xf32> to vector<16x8xf32>
    %cst_397 = arith.constant dense<0.000000e+00> : vector<16x16x8xf32>
    %269 = tpu.matmul %266, %268, %cst_397 {dimension_numbers = #tpu.dot_dimension_numbers<[2], [0], [0, 1], [1], [0, 0, 0, 1, 1, 1], [], []>} : vector<16x16x16xf32>, vector<16x8xf32>, vector<16x16x8xf32> -> vector<16x16x8xf32>
    %270 = arith.addf %265, %269 : vector<16x16x8xf32>
    %c2_398 = arith.constant 2 : index
    %c2_399 = arith.constant 2 : index
    %c0_400 = arith.constant 0 : index
    %271 = vector.load %arg27[%c2_398, %c2_399, %c0_400] : memref<18x18x16xf32, #tpu.memory_space<vmem>>, vector<16x16x16xf32>
    %c2_401 = arith.constant 2 : index
    %c2_402 = arith.constant 2 : index
    %c0_403 = arith.constant 0 : index
    %c0_404 = arith.constant 0 : index
    %272 = vector.load %arg16[%c2_401, %c2_402, %c0_403, %c0_404] : memref<3x3x16x8xf32, #tpu.memory_space<vmem>>, vector<1x1x16x8xf32>
    %273 = vector.shape_cast %272 : vector<1x1x16x8xf32> to vector<16x8xf32>
    %cst_405 = arith.constant dense<0.000000e+00> : vector<16x16x8xf32>
    %274 = tpu.matmul %271, %273, %cst_405 {dimension_numbers = #tpu.dot_dimension_numbers<[2], [0], [0, 1], [1], [0, 0, 0, 1, 1, 1], [], []>} : vector<16x16x16xf32>, vector<16x8xf32>, vector<16x16x8xf32> -> vector<16x16x8xf32>
    %275 = arith.addf %270, %274 : vector<16x16x8xf32>
    %c0_406 = arith.constant 0 : index
    %c0_407 = arith.constant 0 : index
    %276 = vector.load %arg17[%c0_406, %c0_407] : memref<1x8xf32, #tpu.memory_space<vmem>>, vector<1x8xf32>
    %277 = vector.shape_cast %276 : vector<1x8xf32> to vector<8xf32>
    %278 = vector.shape_cast %277 : vector<8xf32> to vector<1x1x8xf32>
    %279 = vector.broadcast %278 : vector<1x1x8xf32> to vector<16x16x8xf32>
    %280 = arith.addf %275, %279 : vector<16x16x8xf32>
    %cst_408 = arith.constant 0.000000e+00 : f32
    %281 = vector.broadcast %cst_408 : f32 to vector<16x16x8xf32>
    %282 = arith.maximumf %280, %281 : vector<16x16x8xf32>
    %c0_409 = arith.constant 0 : index
    %c0_410 = arith.constant 0 : index
    %c0_411 = arith.constant 0 : index
    %c0_412 = arith.constant 0 : index
    %283 = vector.load %arg1[%c0_409, %c0_410, %c0_411, %c0_412] : memref<1x16x16x8xf32, #tpu.memory_space<vmem>>, vector<1x16x16x8xf32>
    %284 = vector.shape_cast %283 : vector<1x16x16x8xf32> to vector<16x16x8xf32>
    %285 = arith.addf %284, %282 : vector<16x16x8xf32>
    %c1_413 = arith.constant 1 : index
    %c1_414 = arith.constant 1 : index
    %c0_415 = arith.constant 0 : index
    %286 = vector.load %arg25[%c1_413, %c1_414, %c0_415] : memref<18x18x8xf32, #tpu.memory_space<vmem>>, vector<16x16x8xf32>
    tpu.vector_store %arg25[%c1_413, %c1_414, %c0_415], %285 {strides = array<i32>} : memref<18x18x8xf32, #tpu.memory_space<vmem>>, vector<16x16x8xf32>,
    %c0_416 = arith.constant 0 : index
    %c0_417 = arith.constant 0 : index
    %c0_418 = arith.constant 0 : index
    %287 = vector.load %arg25[%c0_416, %c0_417, %c0_418] : memref<18x18x8xf32, #tpu.memory_space<vmem>>, vector<16x16x8xf32>
    %c0_419 = arith.constant 0 : index
    %c0_420 = arith.constant 0 : index
    %c0_421 = arith.constant 0 : index
    %c0_422 = arith.constant 0 : index
    %288 = vector.load %arg18[%c0_419, %c0_420, %c0_421, %c0_422] : memref<3x3x8x8xf32, #tpu.memory_space<vmem>>, vector<1x1x8x8xf32>
    %289 = vector.shape_cast %288 : vector<1x1x8x8xf32> to vector<8x8xf32>
    %cst_423 = arith.constant dense<0.000000e+00> : vector<16x16x8xf32>
    %290 = tpu.matmul %287, %289, %cst_423 {dimension_numbers = #tpu.dot_dimension_numbers<[2], [0], [0, 1], [1], [0, 0, 0, 1, 1, 1], [], []>} : vector<16x16x8xf32>, vector<8x8xf32>, vector<16x16x8xf32> -> vector<16x16x8xf32>
    %c0_424 = arith.constant 0 : index
    %c1_425 = arith.constant 1 : index
    %c0_426 = arith.constant 0 : index
    %291 = vector.load %arg25[%c0_424, %c1_425, %c0_426] : memref<18x18x8xf32, #tpu.memory_space<vmem>>, vector<16x16x8xf32>
    %c0_427 = arith.constant 0 : index
    %c1_428 = arith.constant 1 : index
    %c0_429 = arith.constant 0 : index
    %c0_430 = arith.constant 0 : index
    %292 = vector.load %arg18[%c0_427, %c1_428, %c0_429, %c0_430] : memref<3x3x8x8xf32, #tpu.memory_space<vmem>>, vector<1x1x8x8xf32>
    %293 = vector.shape_cast %292 : vector<1x1x8x8xf32> to vector<8x8xf32>
    %cst_431 = arith.constant dense<0.000000e+00> : vector<16x16x8xf32>
    %294 = tpu.matmul %291, %293, %cst_431 {dimension_numbers = #tpu.dot_dimension_numbers<[2], [0], [0, 1], [1], [0, 0, 0, 1, 1, 1], [], []>} : vector<16x16x8xf32>, vector<8x8xf32>, vector<16x16x8xf32> -> vector<16x16x8xf32>
    %295 = arith.addf %290, %294 : vector<16x16x8xf32>
    %c0_432 = arith.constant 0 : index
    %c2_433 = arith.constant 2 : index
    %c0_434 = arith.constant 0 : index
    %296 = vector.load %arg25[%c0_432, %c2_433, %c0_434] : memref<18x18x8xf32, #tpu.memory_space<vmem>>, vector<16x16x8xf32>
    %c0_435 = arith.constant 0 : index
    %c2_436 = arith.constant 2 : index
    %c0_437 = arith.constant 0 : index
    %c0_438 = arith.constant 0 : index
    %297 = vector.load %arg18[%c0_435, %c2_436, %c0_437, %c0_438] : memref<3x3x8x8xf32, #tpu.memory_space<vmem>>, vector<1x1x8x8xf32>
    %298 = vector.shape_cast %297 : vector<1x1x8x8xf32> to vector<8x8xf32>
    %cst_439 = arith.constant dense<0.000000e+00> : vector<16x16x8xf32>
    %299 = tpu.matmul %296, %298, %cst_439 {dimension_numbers = #tpu.dot_dimension_numbers<[2], [0], [0, 1], [1], [0, 0, 0, 1, 1, 1], [], []>} : vector<16x16x8xf32>, vector<8x8xf32>, vector<16x16x8xf32> -> vector<16x16x8xf32>
    %300 = arith.addf %295, %299 : vector<16x16x8xf32>
    %c1_440 = arith.constant 1 : index
    %c0_441 = arith.constant 0 : index
    %c0_442 = arith.constant 0 : index
    %301 = vector.load %arg25[%c1_440, %c0_441, %c0_442] : memref<18x18x8xf32, #tpu.memory_space<vmem>>, vector<16x16x8xf32>
    %c1_443 = arith.constant 1 : index
    %c0_444 = arith.constant 0 : index
    %c0_445 = arith.constant 0 : index
    %c0_446 = arith.constant 0 : index
    %302 = vector.load %arg18[%c1_443, %c0_444, %c0_445, %c0_446] : memref<3x3x8x8xf32, #tpu.memory_space<vmem>>, vector<1x1x8x8xf32>
    %303 = vector.shape_cast %302 : vector<1x1x8x8xf32> to vector<8x8xf32>
    %cst_447 = arith.constant dense<0.000000e+00> : vector<16x16x8xf32>
    %304 = tpu.matmul %301, %303, %cst_447 {dimension_numbers = #tpu.dot_dimension_numbers<[2], [0], [0, 1], [1], [0, 0, 0, 1, 1, 1], [], []>} : vector<16x16x8xf32>, vector<8x8xf32>, vector<16x16x8xf32> -> vector<16x16x8xf32>
    %305 = arith.addf %300, %304 : vector<16x16x8xf32>
    %c1_448 = arith.constant 1 : index
    %c1_449 = arith.constant 1 : index
    %c0_450 = arith.constant 0 : index
    %306 = vector.load %arg25[%c1_448, %c1_449, %c0_450] : memref<18x18x8xf32, #tpu.memory_space<vmem>>, vector<16x16x8xf32>
    %c1_451 = arith.constant 1 : index
    %c1_452 = arith.constant 1 : index
    %c0_453 = arith.constant 0 : index
    %c0_454 = arith.constant 0 : index
    %307 = vector.load %arg18[%c1_451, %c1_452, %c0_453, %c0_454] : memref<3x3x8x8xf32, #tpu.memory_space<vmem>>, vector<1x1x8x8xf32>
    %308 = vector.shape_cast %307 : vector<1x1x8x8xf32> to vector<8x8xf32>
    %cst_455 = arith.constant dense<0.000000e+00> : vector<16x16x8xf32>
    %309 = tpu.matmul %306, %308, %cst_455 {dimension_numbers = #tpu.dot_dimension_numbers<[2], [0], [0, 1], [1], [0, 0, 0, 1, 1, 1], [], []>} : vector<16x16x8xf32>, vector<8x8xf32>, vector<16x16x8xf32> -> vector<16x16x8xf32>
    %310 = arith.addf %305, %309 : vector<16x16x8xf32>
    %c1_456 = arith.constant 1 : index
    %c2_457 = arith.constant 2 : index
    %c0_458 = arith.constant 0 : index
    %311 = vector.load %arg25[%c1_456, %c2_457, %c0_458] : memref<18x18x8xf32, #tpu.memory_space<vmem>>, vector<16x16x8xf32>
    %c1_459 = arith.constant 1 : index
    %c2_460 = arith.constant 2 : index
    %c0_461 = arith.constant 0 : index
    %c0_462 = arith.constant 0 : index
    %312 = vector.load %arg18[%c1_459, %c2_460, %c0_461, %c0_462] : memref<3x3x8x8xf32, #tpu.memory_space<vmem>>, vector<1x1x8x8xf32>
    %313 = vector.shape_cast %312 : vector<1x1x8x8xf32> to vector<8x8xf32>
    %cst_463 = arith.constant dense<0.000000e+00> : vector<16x16x8xf32>
    %314 = tpu.matmul %311, %313, %cst_463 {dimension_numbers = #tpu.dot_dimension_numbers<[2], [0], [0, 1], [1], [0, 0, 0, 1, 1, 1], [], []>} : vector<16x16x8xf32>, vector<8x8xf32>, vector<16x16x8xf32> -> vector<16x16x8xf32>
    %315 = arith.addf %310, %314 : vector<16x16x8xf32>
    %c2_464 = arith.constant 2 : index
    %c0_465 = arith.constant 0 : index
    %c0_466 = arith.constant 0 : index
    %316 = vector.load %arg25[%c2_464, %c0_465, %c0_466] : memref<18x18x8xf32, #tpu.memory_space<vmem>>, vector<16x16x8xf32>
    %c2_467 = arith.constant 2 : index
    %c0_468 = arith.constant 0 : index
    %c0_469 = arith.constant 0 : index
    %c0_470 = arith.constant 0 : index
    %317 = vector.load %arg18[%c2_467, %c0_468, %c0_469, %c0_470] : memref<3x3x8x8xf32, #tpu.memory_space<vmem>>, vector<1x1x8x8xf32>
    %318 = vector.shape_cast %317 : vector<1x1x8x8xf32> to vector<8x8xf32>
    %cst_471 = arith.constant dense<0.000000e+00> : vector<16x16x8xf32>
    %319 = tpu.matmul %316, %318, %cst_471 {dimension_numbers = #tpu.dot_dimension_numbers<[2], [0], [0, 1], [1], [0, 0, 0, 1, 1, 1], [], []>} : vector<16x16x8xf32>, vector<8x8xf32>, vector<16x16x8xf32> -> vector<16x16x8xf32>
    %320 = arith.addf %315, %319 : vector<16x16x8xf32>
    %c2_472 = arith.constant 2 : index
    %c1_473 = arith.constant 1 : index
    %c0_474 = arith.constant 0 : index
    %321 = vector.load %arg25[%c2_472, %c1_473, %c0_474] : memref<18x18x8xf32, #tpu.memory_space<vmem>>, vector<16x16x8xf32>
    %c2_475 = arith.constant 2 : index
    %c1_476 = arith.constant 1 : index
    %c0_477 = arith.constant 0 : index
    %c0_478 = arith.constant 0 : index
    %322 = vector.load %arg18[%c2_475, %c1_476, %c0_477, %c0_478] : memref<3x3x8x8xf32, #tpu.memory_space<vmem>>, vector<1x1x8x8xf32>
    %323 = vector.shape_cast %322 : vector<1x1x8x8xf32> to vector<8x8xf32>
    %cst_479 = arith.constant dense<0.000000e+00> : vector<16x16x8xf32>
    %324 = tpu.matmul %321, %323, %cst_479 {dimension_numbers = #tpu.dot_dimension_numbers<[2], [0], [0, 1], [1], [0, 0, 0, 1, 1, 1], [], []>} : vector<16x16x8xf32>, vector<8x8xf32>, vector<16x16x8xf32> -> vector<16x16x8xf32>
    %325 = arith.addf %320, %324 : vector<16x16x8xf32>
    %c2_480 = arith.constant 2 : index
    %c2_481 = arith.constant 2 : index
    %c0_482 = arith.constant 0 : index
    %326 = vector.load %arg25[%c2_480, %c2_481, %c0_482] : memref<18x18x8xf32, #tpu.memory_space<vmem>>, vector<16x16x8xf32>
    %c2_483 = arith.constant 2 : index
    %c2_484 = arith.constant 2 : index
    %c0_485 = arith.constant 0 : index
    %c0_486 = arith.constant 0 : index
    %327 = vector.load %arg18[%c2_483, %c2_484, %c0_485, %c0_486] : memref<3x3x8x8xf32, #tpu.memory_space<vmem>>, vector<1x1x8x8xf32>
    %328 = vector.shape_cast %327 : vector<1x1x8x8xf32> to vector<8x8xf32>
    %cst_487 = arith.constant dense<0.000000e+00> : vector<16x16x8xf32>
    %329 = tpu.matmul %326, %328, %cst_487 {dimension_numbers = #tpu.dot_dimension_numbers<[2], [0], [0, 1], [1], [0, 0, 0, 1, 1, 1], [], []>} : vector<16x16x8xf32>, vector<8x8xf32>, vector<16x16x8xf32> -> vector<16x16x8xf32>
    %330 = arith.addf %325, %329 : vector<16x16x8xf32>
    %c0_488 = arith.constant 0 : index
    %c0_489 = arith.constant 0 : index
    %331 = vector.load %arg19[%c0_488, %c0_489] : memref<1x8xf32, #tpu.memory_space<vmem>>, vector<1x8xf32>
    %332 = vector.shape_cast %331 : vector<1x8xf32> to vector<8xf32>
    %333 = vector.shape_cast %332 : vector<8xf32> to vector<1x1x8xf32>
    %334 = vector.broadcast %333 : vector<1x1x8xf32> to vector<16x16x8xf32>
    %335 = arith.addf %330, %334 : vector<16x16x8xf32>
    %cst_490 = arith.constant 0.000000e+00 : f32
    %336 = vector.broadcast %cst_490 : f32 to vector<16x16x8xf32>
    %337 = arith.maximumf %335, %336 : vector<16x16x8xf32>
    %c0_491 = arith.constant 0 : index
    %c0_492 = arith.constant 0 : index
    %c0_493 = arith.constant 0 : index
    %c0_494 = arith.constant 0 : index
    %338 = vector.load %arg20[%c0_491, %c0_492, %c0_493, %c0_494] : memref<1x16x16x8xf32, #tpu.memory_space<vmem>>, vector<1x16x16x8xf32>
    %339 = vector.shape_cast %338 : vector<1x16x16x8xf32> to vector<16x16x8xf32>
    %340 = vector.shape_cast %337 : vector<16x16x8xf32> to vector<1x16x16x8xf32>
    tpu.vector_store %arg20[%c0_491, %c0_492, %c0_493, %c0_494], %340 {strides = array<i32>} : memref<1x16x16x8xf32, #tpu.memory_space<vmem>>, vector<1x16x16x8xf32>,
    return
  }
  func.func @transform_0(%arg0: i32) -> (i32, i32, i32, i32) {
    %c0_i32 = arith.constant 0 : i32
    %c0_i32_0 = arith.constant 0 : i32
    %c0_i32_1 = arith.constant 0 : i32
    %c0_i32_2 = arith.constant 0 : i32
    return %arg0, %c0_i32, %c0_i32_0, %c0_i32_1 : i32, i32, i32, i32
  }
  func.func @transform_1(%arg0: i32) -> (i32, i32, i32, i32) {
    %c0_i32 = arith.constant 0 : i32
    %c0_i32_0 = arith.constant 0 : i32
    %c0_i32_1 = arith.constant 0 : i32
    %c0_i32_2 = arith.constant 0 : i32
    return %arg0, %c0_i32, %c0_i32_0, %c0_i32_1 : i32, i32, i32, i32
  }
  func.func @transform_2(%arg0: i32) -> (i32, i32, i32, i32) {
    %c0_i32 = arith.constant 0 : i32
    %c0_i32_0 = arith.constant 0 : i32
    %c0_i32_1 = arith.constant 0 : i32
    %c0_i32_2 = arith.constant 0 : i32
    return %arg0, %c0_i32, %c0_i32_0, %c0_i32_1 : i32, i32, i32, i32
  }
  func.func @transform_3(%arg0: i32) -> (i32, i32) {
    %c0_i32 = arith.constant 0 : i32
    %c0_i32_0 = arith.constant 0 : i32
    %c0_i32_1 = arith.constant 0 : i32
    return %c0_i32, %c0_i32_0 : i32, i32
  }
  func.func @transform_4(%arg0: i32) -> (i32, i32) {
    %c0_i32 = arith.constant 0 : i32
    %c0_i32_0 = arith.constant 0 : i32
    %c0_i32_1 = arith.constant 0 : i32
    return %c0_i32, %c0_i32_0 : i32, i32
  }
  func.func @transform_5(%arg0: i32) -> (i32, i32, i32, i32) {
    %c0_i32 = arith.constant 0 : i32
    %c0_i32_0 = arith.constant 0 : i32
    %c0_i32_1 = arith.constant 0 : i32
    %c0_i32_2 = arith.constant 0 : i32
    %c0_i32_3 = arith.constant 0 : i32
    return %c0_i32, %c0_i32_0, %c0_i32_1, %c0_i32_2 : i32, i32, i32, i32
  }
  func.func @transform_6(%arg0: i32) -> (i32, i32) {
    %c0_i32 = arith.constant 0 : i32
    %c0_i32_0 = arith.constant 0 : i32
    %c0_i32_1 = arith.constant 0 : i32
    return %c0_i32, %c0_i32_0 : i32, i32
  }
  func.func @transform_7(%arg0: i32) -> (i32, i32) {
    %c0_i32 = arith.constant 0 : i32
    %c0_i32_0 = arith.constant 0 : i32
    %c0_i32_1 = arith.constant 0 : i32
    return %c0_i32, %c0_i32_0 : i32, i32
  }
  func.func @transform_8(%arg0: i32) -> (i32, i32) {
    %c0_i32 = arith.constant 0 : i32
    %c0_i32_0 = arith.constant 0 : i32
    %c0_i32_1 = arith.constant 0 : i32
    return %c0_i32, %c0_i32_0 : i32, i32
  }
  func.func @transform_9(%arg0: i32) -> (i32, i32) {
    %c0_i32 = arith.constant 0 : i32
    %c0_i32_0 = arith.constant 0 : i32
    %c0_i32_1 = arith.constant 0 : i32
    return %c0_i32, %c0_i32_0 : i32, i32
  }
  func.func @transform_10(%arg0: i32) -> (i32, i32) {
    %c0_i32 = arith.constant 0 : i32
    %c0_i32_0 = arith.constant 0 : i32
    %c0_i32_1 = arith.constant 0 : i32
    return %c0_i32, %c0_i32_0 : i32, i32
  }
  func.func @transform_11(%arg0: i32) -> (i32, i32, i32, i32) {
    %c0_i32 = arith.constant 0 : i32
    %c0_i32_0 = arith.constant 0 : i32
    %c0_i32_1 = arith.constant 0 : i32
    %c0_i32_2 = arith.constant 0 : i32
    %c0_i32_3 = arith.constant 0 : i32
    return %c0_i32, %c0_i32_0, %c0_i32_1, %c0_i32_2 : i32, i32, i32, i32
  }
  func.func @transform_12(%arg0: i32) -> (i32, i32) {
    %c0_i32 = arith.constant 0 : i32
    %c0_i32_0 = arith.constant 0 : i32
    %c0_i32_1 = arith.constant 0 : i32
    return %c0_i32, %c0_i32_0 : i32, i32
  }
  func.func @transform_13(%arg0: i32) -> (i32, i32, i32, i32) {
    %c0_i32 = arith.constant 0 : i32
    %c0_i32_0 = arith.constant 0 : i32
    %c0_i32_1 = arith.constant 0 : i32
    %c0_i32_2 = arith.constant 0 : i32
    %c0_i32_3 = arith.constant 0 : i32
    return %c0_i32, %c0_i32_0, %c0_i32_1, %c0_i32_2 : i32, i32, i32, i32
  }
  func.func @transform_14(%arg0: i32) -> (i32, i32) {
    %c0_i32 = arith.constant 0 : i32
    %c0_i32_0 = arith.constant 0 : i32
    %c0_i32_1 = arith.constant 0 : i32
    return %c0_i32, %c0_i32_0 : i32, i32
  }
  func.func @transform_15(%arg0: i32) -> (i32, i32, i32, i32) {
    %c0_i32 = arith.constant 0 : i32
    %c0_i32_0 = arith.constant 0 : i32
    %c0_i32_1 = arith.constant 0 : i32
    %c0_i32_2 = arith.constant 0 : i32
    %c0_i32_3 = arith.constant 0 : i32
    return %c0_i32, %c0_i32_0, %c0_i32_1, %c0_i32_2 : i32, i32, i32, i32
  }
  func.func @transform_16(%arg0: i32) -> (i32, i32) {
    %c0_i32 = arith.constant 0 : i32
    %c0_i32_0 = arith.constant 0 : i32
    %c0_i32_1 = arith.constant 0 : i32
    return %c0_i32, %c0_i32_0 : i32, i32
  }
  func.func @transform_17(%arg0: i32) -> (i32, i32, i32, i32) {
    %c0_i32 = arith.constant 0 : i32
    %c0_i32_0 = arith.constant 0 : i32
    %c0_i32_1 = arith.constant 0 : i32
    %c0_i32_2 = arith.constant 0 : i32
    %c0_i32_3 = arith.constant 0 : i32
    return %c0_i32, %c0_i32_0, %c0_i32_1, %c0_i32_2 : i32, i32, i32, i32
  }
  func.func @transform_18(%arg0: i32) -> (i32, i32) {
    %c0_i32 = arith.constant 0 : i32
    %c0_i32_0 = arith.constant 0 : i32
    %c0_i32_1 = arith.constant 0 : i32
    return %c0_i32, %c0_i32_0 : i32, i32
  }
  func.func @transform_19(%arg0: i32) -> (i32, i32, i32, i32) {
    %c0_i32 = arith.constant 0 : i32
    %c0_i32_0 = arith.constant 0 : i32
    %c0_i32_1 = arith.constant 0 : i32
    %c0_i32_2 = arith.constant 0 : i32
    return %arg0, %c0_i32, %c0_i32_0, %c0_i32_1 : i32, i32, i32, i32
  }
  func.func @transform_20(%arg0: i32) -> (i32, i32, i32, i32) {
    %c0_i32 = arith.constant 0 : i32
    %c0_i32_0 = arith.constant 0 : i32
    %c0_i32_1 = arith.constant 0 : i32
    %c0_i32_2 = arith.constant 0 : i32
    return %arg0, %c0_i32, %c0_i32_0, %c0_i32_1 : i32, i32, i32, i32
  }
  func.func @transform_21(%arg0: i32) -> (i32, i32, i32, i32) {
    %c0_i32 = arith.constant 0 : i32
    %c0_i32_0 = arith.constant 0 : i32
    %c0_i32_1 = arith.constant 0 : i32
    %c0_i32_2 = arith.constant 0 : i32
    return %arg0, %c0_i32, %c0_i32_0, %c0_i32_1 : i32, i32, i32, i32
  }
}

</mosaic_0001>

<bundles_post_ra>
// kernel: fpn_3branch_forward.1
= control target key start
LH: loop header
LB: loop body
LE: loop exit
PB: predicated region body
PF: predicated region fallthrough
CT: control target
= control target key end

     0   :  { %s14598_s0 = inlined_call_operand.vmem [shape: f32[2,16,16,8], index: 0, kind: input, shape index: {}]   ;;  %s14599_s1 = inlined_call_operand.hbm [shape: f32[2,8,8,16], index: 1, kind: input, shape index: {}]   ;;  %s14600_s2 = inlined_call_operand.hbm [shape: f32[2,4,4,32], index: 2, kind: input, shape index: {}]   ;;  %s14601_s3 = inlined_call_operand.vmem [shape: f32[8,4], index: 3, kind: input, shape index: {}]   ;;  %s14602_s4 = inlined_call_operand.vmem [shape: f32[16,8], index: 4, kind: input, shape index: {}]   ;;  %s14603_s5 = inlined_call_operand.vmem [shape: f32[3,3,32,32], index: 5, kind: input, shape index: {}]   ;;  %s14604_s6 = inlined_call_operand.vmem [shape: f32[1,32], index: 6, kind: input, shape index: {}]   ;;  %s14605_s7 = inlined_call_operand.hbm [shape: f32[32,16], index: 7, kind: input, shape index: {}]   ;;  %s14606_s8 = inlined_call_operand.vmem [shape: f32[1,16], index: 8, kind: input, shape index: {}]   ;;  %s14607_s9 = inlined_call_operand.hbm [shape: f32[16,32], index: 9, kind: input, shape index: {}]   ;;  %s14608_s10 = inlined_call_operand.vmem [shape: f32[1,32], index: 10, kind: input, shape index: {}]   ;;  %s14609_s11 = inlined_call_operand.vmem [shape: f32[3,3,32,16], index: 11, kind: input, shape index: {}]   ;;  %s14610_s12 = inlined_call_operand.vmem [shape: f32[1,16], index: 12, kind: input, shape index: {}]   ;;  %s14611_s13 = inlined_call_operand.hbm [shape: f32[3,3,16,16], index: 13, kind: input, shape index: {}]   ;;  %s14612_s14 = inlined_call_operand.vmem [shape: f32[1,16], index: 14, kind: input, shape index: {}]   ;;  %s14613_s15 = inlined_call_operand.vmem [shape: f32[3,3,16,8], index: 15, kind: input, shape index: {}]   ;;  %s14614_s16 = inlined_call_operand.hbm [shape: f32[1,8], index: 16, kind: input, shape index: {}]   ;;  %s14615_s17 = inlined_call_operand.vmem [shape: f32[3,3,8,8], index: 17, kind: input, shape index: {}]   ;;  %s14616_s18 = inlined_call_operand.hbm [shape: f32[1,8], index: 18, kind: input, shape index: {}]   ;;  %s14617_s19 = inlined_call_operand.vmem [shape: f32[2,16,16,8], index: 19, kind: output, shape index: {0}]   ;;  %s14618_s20 = inlined_call_operand.hbm [shape: f32[2,8,8,16], index: 20, kind: output, shape index: {1}]   ;;  %s14619_s21 = inlined_call_operand.hbm [shape: f32[2,4,4,32], index: 21, kind: output, shape index: {2}]  }
   0x1   :  { %14704 = sst [smem:[#allocation95_spill]] %s14598_s0 }
   0x2   :  { %14705 = sst [smem:[#allocation96_spill]] %s14599_s1 }
   0x3   :  { %14706 = sst [smem:[#allocation97_spill]] %s14600_s2 }
   0x4   :  { %14707 = sst [smem:[#allocation98_spill]] %s14601_s3 }
   0x5   :  { %14708 = sst [smem:[#allocation99_spill]] %s14602_s4 }
   0x6   :  { %14709 = sst [smem:[#allocation100_spill]] %s14603_s5 }
   0x7   :  { %14710 = sst [smem:[#allocation101_spill]] %s14605_s7 }
   0x8   :  { %14711 = sst [smem:[#allocation102_spill]] %s14607_s9 }
   0x9   :  { %14712 = sst [smem:[#allocation103_spill]] %s14611_s13 }
   0xa   :  { %14713 = sst [smem:[#allocation104_spill]] %s14613_s15 }
   0xb   :  { %14714 = sst [smem:[#allocation105_spill]] %s14614_s16 }
   0xc   :  { %14715 = sst [smem:[#allocation106_spill]] %s14615_s17 }
   0xd   :  { %14716 = sst [smem:[#allocation107_spill]] %s14616_s18 }
   0xe   :  { %14717 = sst [smem:[#allocation108_spill]] %s14617_s19 }
   0xf   :  { %14718 = sst [smem:[#allocation109_spill]] %s14618_s20 }
  0x10   :  { %14719 = sst [smem:[#allocation110_spill]] %s14619_s21 }
  0x11   :  { %27 = vsyncpa [#allocation8], 0 }
  0x12   :  { %29 = vsyncpa [#allocation8 + $0x1], 0 }
  0x13   :  { %30 = vsyncpa [#allocation11], 0 }
  0x14   :  { %32 = vsyncpa [#allocation11 + $0x1], 0 }
  0x15   :  { %33 = vsyncpa [#allocation14], 0 }
  0x16   :  { %34 = vsyncpa [#allocation17], 0 }
  0x17   :  { %35 = vsyncpa [#allocation9], 0 }
  0x18   :  { %37 = vsyncpa [#allocation9 + $0x1], 0 }
  0x19   :  { %38 = vsyncpa [#allocation21], 0 }
  0x1a   :  { %40 = vsyncpa [#allocation21 + $0x1], 0  ;;  %s10410_s2 = smov 0   ;;  %s10412_s25 = smov 0  }
  0x1b   :  { %s10414_s26 = smov 0   ;;  %s10416_s27 = smov 0  }
  0x1c LB: > { %14720 = sst [smem:[#allocation29_spill]] %s10272_s2  ;;  %s10434_s0 = sadd.s32 4294967295, %s10284_s27   ;;  %s10284_s27 = sphi %s10416_s27, %s15001_s27   ;;  %s10280_s26 = sphi %s10414_s26, %s15003_s26   ;;  %s10276_s25 = sphi %s10412_s25, %s15005_s25   ;;  %s10272_s2 = sphi %s10410_s2, %s15004_s2  }
  0x1d   : > { %14721 = sst [smem:[#allocation30_spill]] %s10280_s26  ;;  %p8937_p0 = scmp.ge.s32.totalorder %s10284_s27, 1 }
  0x1e   : > { %s14722_s7 = sld [smem:[#allocation101_spill]]  ;;  %p93_p1 = scmp.eq.s32.totalorder %s10434_s0, 0 }
  0x1f   : > { %p543_p2 = scmp.lt.s32.totalorder %s10284_s27, 3  ;;  %s10286_s30 = smov [#allocation12]  }
  0x20   : > { %s568_s5 = sshll.u32 %s10286_s30, 4  ;;  %s14724_s9 = sld [smem:[#allocation102_spill]]  ;;  %s569_s5 = int_to_ptr.vmem [resolvable:$true] %s568_s5 }
  0x21   : > { %p10439_p3 = pnand %p8937_p0, %p543_p2  ;;  %s14726_s16 = sld [smem:[#allocation105_spill]] }
  0x22   : > { %s14626_s20 = smov 128   ;;  %s14627_s19 = smov 8  }
  0x23   : > { %p9864_p4 = pneg %p10439_p3  ;;  %s14727_s13 = sld [smem:[#allocation103_spill]] }
  0x24   : > { %s566_s29 = sshll.u32 %s14722_s7, 4  ;;  %s10287_s7 = smov [#allocation13]   ;;  %s567_s29 = int_to_ptr.hbm [resolvable:$true] %s566_s29 }
  0x25   : > { %p10451_p6 = pnand %p9864_p4, %p93_p1  ;;  %s585_s21 = sshll.u32 %s10287_s7, 4  ;;  %s586_s21 = int_to_ptr.vmem [resolvable:$true] %s585_s21 }
  0x26   : > { %s583_s1 = sshll.u32 %s14724_s9, 4  ;;  %s10290_s3 = smov [#allocation16]   ;;  %s584_s1 = int_to_ptr.hbm [resolvable:$true] %s583_s1 }
  0x27   : > { %s627_s30 = sshll.u32 %s14726_s16, 4  ;;  %s629_s28 = sshll.u32 %s10290_s3, 4  ;;  %s628_s30 = int_to_ptr.hbm [resolvable:$true] %s627_s30  ;;  %s630_s28 = int_to_ptr.vmem [resolvable:$true] %s629_s28 }
  0x28   : > { %9867 = dma.hbm_to_vmem [thread:$0]  (!%p10451_p6), %s567_s29, 512, %s569_s5, [#allocation11], %s14626_s20, %s14626_s20, %s14627_s19  }
  0x29   : > { %9870 = dma.hbm_to_vmem [thread:$0]  (!%p10451_p6), %s584_s1, 256, %s586_s21, [#allocation14], %s14626_s20, %s14626_s20, %s14627_s19  }
  0x2a   : > { %s606_s7 = sshll.u32 %s14727_s13, 4  ;;  %s10291_s29 = smov [#allocation15]   ;;  %s607_s7 = int_to_ptr.hbm [resolvable:$true] %s606_s7 }
  0x2b   : > { %9876 = dma.hbm_to_vmem [thread:$0]  (!%p10451_p6), %s628_s30, 16, %s630_s28, [#allocation17]  }
  0x2c   : > { %s608_s21 = sshll.u32 %s10291_s29, 4  ;;  %s14728_s18 = sld [smem:[#allocation107_spill]]  ;;  %s609_s21 = int_to_ptr.vmem [resolvable:$true] %s608_s21 }
  0x2d   : > { %9873 = dma.hbm_to_vmem [thread:$0]  (!%p10451_p6), %s607_s7, 2304, %s609_s21, [#allocation14], %s14626_s20, %s14626_s20, %s14627_s19  }
  0x2e   : > { %s10292_s30 = smov [#allocation18]   ;;  %s8936_s3 = sadd.s32 4294967294, %s10284_s27  }
  0x2f   : > { %s644_s23 = sshll.u32 %s10292_s30, 4  ;;  %s10485_s28 = sadd.s32 1, %s10284_s27   ;;  %s645_s23 = int_to_ptr.vmem [resolvable:$true] %s644_s23 }
  0x30   : > { %14729 = sst [smem:[#allocation31_spill]] %s10485_s28  ;;  %s79_s29 = sadd.s32 1, %s10280_s26 }
  0x31   : > { %s76_s5 = ssub.s32 %s10284_s27, %s10485_s28  ;;  %p86_p7 = scmp.ne.s32.totalorder %s10280_s26, %s10276_s25 }
  0x32   : > { %s642_s22 = sshll.u32 %s14728_s18, 4  ;;  %p77_p8 = scmp.eq.s32.totalorder %s76_s5, 0  ;;  %s643_s22 = int_to_ptr.hbm [resolvable:$true] %s642_s22 }
  0x33   : > { %9879 = dma.hbm_to_vmem [thread:$0]  (!%p10451_p6), %s643_s22, 16, %s645_s23, [#allocation17]  }
  0x34   : > { %p87_p9 = scmp.eq.s32.totalorder %s10284_s27, 0  ;;  %p92_p10 = scmp.ne.s32.totalorder %s10276_s25, %s10272_s2 }
  0x35   : > { %p504_p11 = scmp.eq.s32.totalorder %s10434_s0, 1  ;;  %p510_p2 = scmp.eq.s32.totalorder %s8936_s3, 1 }
  0x36   : > { %s10497_s7 = scalar_select %p77_p8, %s10280_s26, %s79_s29  }
  0x37   : > { %p10499_p12 = por %p87_p9, %p86_p7  ;;  %p10505_p13 = por %p93_p1, %p92_p10 }
  0x38   : > { %14730 = sst [smem:[#allocation32_spill]] %s10497_s7  ;;  %p10509_p0 = por %p504_p11, %p86_p7 }
  0x39   : > { %p9899_p4 = scmp.lt.s32.totalorder %s10284_s27, 2  ;;  %s10515_s22 = sand.u32 1, %s10280_s26  }
  0x3a   : > { %s14733_s1 = scalar_select %p10509_p0, 1, 0 }
  0x3b   : > { %p10517_p6 = por %p510_p2, %p92_p10  ;;  %s8944_s23 = sshll.u32 %s10515_s22, 6 }
  0x3c   : > { %14734 = sst [smem:[#allocation33_spill]] %s14733_s1  ;;  %s9826_s29 = sshll.u32 %s10284_s27, 6 }
  0x3d   : > { %s14735_s30 = scalar_select %p10517_p6, 1, 0 }
  0x3e   : > { %s14737_s19 = sld [smem:[#allocation96_spill]]  ;;  %s667_s16 = scalar_lea.vmem [#allocation7], %s8944_s23 }
  0x3f   : > { %14736 = sst [smem:[#allocation34_spill]] %s14735_s30  ;;  %s675_s18 = sshll.u32 %s667_s16, 4  ;;  %s676_s18 = int_to_ptr.vmem [resolvable:$true] %s675_s18 }
  0x40   : > { %p10528_p7 = pnand %p9899_p4, %p10499_p12  ;;  %s685_s7 = sand.u32 1, %s10284_s27  }
  0x41   : > { %s8947_s26 = sshll.u32 %s10515_s22, 4  ;;  %s664_s28 = scalar_lea.sflag [#allocation8], %s10515_s22 }
  0x42   : > { %p10114_p9 = pneg %p10528_p7 }
  0x44   : > { %s672_s9 = scalar_lea.hbm %s14737_s19, %s9826_s29  ;;  %s10117_s20 = scalar_lea.hbm %s14737_s19, 128 }
  0x45   : > { %s673_s13 = sshll.u32 %s672_s9, 4  ;;  %s674_s13 = int_to_ptr.hbm [resolvable:$true] %s673_s13 }
  0x46   : > { %s10110_s30 = sshra.s32 %s674_s13, 4  ;;  %s10111_s30 = int_to_ptr.hbm [resolvable:$true] %s10110_s30 }
  0x47   : > { %s10112_s2 = scalar_lea.hbm %s10111_s30, 64  ;;  %p10118_p12 = scmp.lt.s32.totalorder %s10111_s30, %s14737_s19 }
  0x48   : > { %p10113_p8 = scmp.ne.s32.totalorder %s10111_s30, %s10112_s2  ;;  %p10119_p2 = scmp.lt.s32.totalorder %s10117_s20, %s10112_s2 }
  0x4a   : > { %p10115_p10 = pnand %p10114_p9, %p10113_p8  ;;  %p10120_p4 = por %p10119_p2, %p10118_p12 }
  0x4c   : > { %p10116_p11 = pneg %p10115_p10 }
  0x4e   : > { %p10121_p5 = pnand %p10120_p4, %p10116_p11 }
  0x50   : > { %10124 = shalt.err (!%p10121_p5)
}
  0x51   : > { %s14739_s22 = smov 8   ;;  %s14740_s29 = smov 128  }
  0x52   : > { %9883 = dma.hbm_to_vmem [thread:$0]  (!%p10528_p7), %s674_s13, 1024, %s676_s18, %s664_s28, %s14740_s29, %s14740_s29, %s14739_s22  }
  0x53   : > { %s9827_s5 = sshll.u32 %s10284_s27, 4  ;;  %s689_s1 = scalar_lea.vmem [#allocation10], %s8947_s26 }
  0x54   : > { %s697_s9 = sshll.u32 %s689_s1, 4  ;;  %s14741_s15 = sld [smem:[#allocation97_spill]]  ;;  %s698_s9 = int_to_ptr.vmem [resolvable:$true] %s697_s9 }
  0x55   : > { %s686_s30 = scalar_lea.sflag [#allocation11], %s685_s7 }
  0x5a   : > { %s694_s21 = scalar_lea.hbm %s14741_s15, %s9827_s5  ;;  %s10147_s26 = scalar_lea.hbm %s14741_s15, 32 }
  0x5b   : > { %s695_s2 = sshll.u32 %s694_s21, 4  ;;  %s696_s2 = int_to_ptr.hbm [resolvable:$true] %s695_s2 }
  0x5c   : > { %s10140_s20 = sshra.s32 %s696_s2, 4  ;;  %s10141_s20 = int_to_ptr.hbm [resolvable:$true] %s10140_s20 }
  0x5d   : > { %s10142_s23 = scalar_lea.hbm %s10141_s20, 16  ;;  %p10148_p11 = scmp.lt.s32.totalorder %s10141_s20, %s14741_s15 }
  0x5e   : > { %p10143_p5 = scmp.ne.s32.totalorder %s10141_s20, %s10142_s23  ;;  %p10149_p12 = scmp.lt.s32.totalorder %s10147_s26, %s10142_s23 }
  0x60   : > { %p10145_p8 = pnand %p10143_p5, %p10114_p9  ;;  %p10150_p2 = por %p10149_p12, %p10148_p11 }
  0x62   : > { %p10146_p10 = pneg %p10145_p8 }
  0x64   : > { %p10151_p4 = pnand %p10150_p2, %p10146_p10 }
  0x66   : > { %10154 = shalt.err (!%p10151_p4)
}
  0x67   : > { %s10293_s17 = smov 64   ;;  %s10294_s7 = smov 4  }
  0x68   : > { %9886 = dma.hbm_to_vmem [thread:$0]  (!%p10528_p7), %s696_s2, 256, %s698_s9, %s686_s30, %s10293_s17, %s10293_s17, %s10294_s7  }
  0x69   : > { %709 = sbr.rel (%p10439_p3) target bundleno = 2917 (0xb65), region = 96 }
  0x6e   : > { %s10569_s22 = sand.u32 1, %s10276_s25  }
  0x6f   : > { %s8951_s29 = sshll.u32 %s10569_s22, 6  ;;  %s712_s5 = scalar_lea.sflag [#allocation8], %s10569_s22 }
  0x70   : > { %s10575_s16 = scalar_lea.vmem [#allocation7], %s8951_s29 }
  0x71   : > { %10243 = dma.done.wait (%p10505_p13), %s712_s5, 1024  }
  0x72   : > { %10245 = vsyncadd (%p10505_p13), %s712_s5, 4294966272  ;;  %s721_s4 = sand.u32 1, %s10434_s0   ;;  %s8952_s3 = sshll.u32 %s10569_s22, 4 }
  0x73   : > { %s722_s9 = scalar_lea.sflag [#allocation11], %s721_s4  ;;  %s10585_s21 = scalar_lea.vmem [#allocation10], %s8952_s3 }
  0x74   : > { %10247 = dma.done.wait (%p10505_p13), %s722_s9, 256  }
  0x75   : > { %10249 = vsyncadd (%p10505_p13), %s722_s9, 4294967040 }
  0x76   : > { %10251 = dma.done.wait (%p93_p1), [#allocation11], 512  }
  0x77   : > { %10253 = vsyncadd (%p93_p1), [#allocation11], 4294966784 }
  0x78   : > { %10255 = dma.done.wait (%p93_p1), [#allocation14], 2560  }
  0x79   : > { %10257 = vsyncadd (%p93_p1), [#allocation14], 4294964736 }
  0x7a   : > { %10259 = dma.done.wait (%p93_p1), [#allocation17], 32  }
  0x7b   : > { %10261 = vsyncadd (%p93_p1), [#allocation17], 4294967264  ;;  %vm840_vm0 = vcmask 259072   ;;  %v14637_v0 = vmov 0.0   ;;  %vm931_vm1 = vcmask 261120   ;;  %vm844_vm2 = vcmask 253952  }
  0x7c   : > { %841 = vst.msk [vmem:[#allocation2] sm:$0x3f] %vm840_vm0, %v14637_v0  ;;  %s14742_s30 = sld [smem:[#allocation100_spill]]  ;;  %vm1006_vm3 = vcmask 257024   ;;  %v1001_v8 = vld [vmem:[%s10585_s21] sm:$0xf] }
  0x7d   : > { %843 = vst.msk [vmem:[#allocation2 + $0x28] sm:$0x3f] %vm840_vm0, %v14637_v0  ;;  %v1002_v31 = vld [vmem:[%s10585_s21 + $0x4] sm:$0xf]  ;;  %v1003_v32 = vld [vmem:[%s10585_s21 + $0x8] sm:$0xf] }
  0x7e   : > { %932 = vst.msk [vmem:[#allocation5] sm:$0xff] %vm931_vm1, %v14637_v0  ;;  %v1004_v33 = vld [vmem:[%s10585_s21 + $0xc] sm:$0xf]  ;;  %vm857_vm4 = vcmask 130048   ;;  %vm1683_vm5 = vcmask 1043456   ;;  %s14743_s5 = sld [smem:[#allocation98_spill]] }
  0x7f   : > { %936 = vst.msk [vmem:[#allocation5 + $0x90] sm:$0xff] %vm931_vm1, %v14637_v0  ;;  %vm1679_vm6 = vcmask 31744   ;;  %vm933_vm7 = vcmask 254976   ;;  %s10842_s24 = scalar_lea.vmem [#allocation20], %s8952_s3  ;;  %vm859_vm8 = vcmask 123904   ;;  %vm864_vm9 = vcmask 122880  }
  0x80   : > { %845 = vst.msk [vmem:[#allocation2] sm:$0x1] %vm844_vm2, %v14637_v0  ;;  %vm885_vm10 = vcmask 64512   ;;  %s14744_s7 = sld [smem:[#allocation99_spill]]  ;;  %vm888_vm11 = vcmask 58368   ;;  %vm894_vm12 = vcmask 57344  }
  0x81   : > { %846 = vst.msk [vmem:[#allocation2 + $0x8] sm:$0x1] %vm844_vm2, %v14637_v0  ;;  %s14745_s20 = sld [smem:[#allocation104_spill]]  ;;  %p830_p1 = scmp.lt.s32.totalorder %s10434_s0, 1 }
  0x82   : > { %v8967_v1 = vld [vmem:[%s14742_s30 + $0x38] sm:$0xff]  ;;  %v8966_v2 = vld [vmem:[%s14742_s30 + $0x30] sm:$0xff]  ;;  %847 = vst.msk [vmem:[#allocation2 + $0x10] sm:$0x1] %vm844_vm2, %v14637_v0  ;;  %v8965_v4 = vld [vmem:[%s14742_s30 + $0x28] sm:$0xff]  ;;  %s14790_s1 = sld [smem:[#allocation106_spill]] }
  0x83   : > { %v1018_v3 = vld [vmem:[%s14742_s30 + $0x18] sm:$0xff]  ;;  %1057 = vmatpush.msra.mxu0 %v8967_v1  ;;  %v1017_v5 = vld [vmem:[%s14742_s30 + $0x10] sm:$0xff]  ;;  %848 = vst.msk [vmem:[#allocation2 + $0x18] sm:$0x1] %vm844_vm2, %v14637_v0  ;;  %v1016_v6 = vld [vmem:[%s14742_s30 + $0x8] sm:$0xff]  ;;  %s12802_s17 = scalar_select %p830_p1, %s10434_s0, 1 }
  0x84   : > { %1097 = vmatpush.msra.mxu1 %v1018_v3  ;;  %v8975_v7 = vld [vmem:[%s14742_s30 + $0x58] sm:$0xff]  ;;  %849 = vst.msk [vmem:[#allocation2 + $0x20] sm:$0x1] %vm844_vm2, %v14637_v0  ;;  %v1019_v9 = vld [vmem:[#allocation2 + $0x1] sm:$0xf]  ;;  %v8974_v10 = vld [vmem:[%s14742_s30 + $0x50] sm:$0xff] }
  0x85   : > { %1058 = vmatpush.msra.mxu0 %v8966_v2  ;;  %1007 = vst.msk [vmem:[#allocation2 + $0x9] sm:$0xf] %vm1006_vm3, %v1001_v8  ;;  %v8964_v11 = vld [vmem:[%s14742_s30 + $0x20] sm:$0xff]  ;;  %1152 = vmatpush.msra.mxu2 %v8975_v7  ;;  %v8981_v13 = vld [vmem:[%s14742_s30 + $0x78] sm:$0xff]  ;;  %v8973_v14 = vld [vmem:[%s14742_s30 + $0x48] sm:$0xff]  ;;  %s14828_s2 = sld [smem:[#allocation95_spill]] }
  0x86   : > { %1098 = vmatpush.msra.mxu1 %v1017_v5  ;;  %1032 = vst [vmem:[#allocation1] ss:$2 sm:$0xff] %v1019_v9  ;;  %v1015_v12 = vld [vmem:[%s14742_s30] sm:$0xff]  ;;  %v8980_v15 = vld [vmem:[%s14742_s30 + $0x70] sm:$0xff]  ;;  %1211 = vmatpush.msra.mxu3 %v8981_v13  ;;  %v8979_v17 = vld [vmem:[%s14742_s30 + $0x68] sm:$0xff]  ;;  %s14993_s4 = sld [smem:[#allocation108_spill]] }
  0x87   : > { %1059 = vmatpush.msra.mxu0 %v8965_v4  ;;  %850 = vst.msk [vmem:[#allocation2 + $0x28] sm:$0x1] %vm844_vm2, %v14637_v0  ;;  %1153 = vmatpush.msra.mxu2 %v8974_v10  ;;  %v8972_v16 = vld [vmem:[%s14742_s30 + $0x40] sm:$0xff]  ;;  %v1011_v20 = vld [vmem:[#allocation2] sm:$0xf]  ;;  %v8987_v23 = vld [vmem:[%s14742_s30 + $0x98] sm:$0xff] }
  0x88   : > { %1099 = vmatpush.msra.mxu1 %v1016_v6  ;;  %851 = vst.msk [vmem:[#allocation2 + $0x5] sm:$0x1] %vm844_vm2, %v14637_v0  ;;  %1212 = vmatpush.msra.mxu3 %v8980_v15  ;;  %v8978_v19 = vld [vmem:[%s14742_s30 + $0x60] sm:$0xff]  ;;  %v8986_v25 = vld [vmem:[%s14742_s30 + $0x90] sm:$0xff]  ;;  %v8993_v26 = vld [vmem:[%s14742_s30 + $0xb8] sm:$0xff]  ;;  %s14995_s3 = sld [smem:[#allocation109_spill]] }
  0x89   : > { %1060 = vmatpush.msra.mxu0 %v8964_v11  ;;  %852 = vst.msk [vmem:[#allocation2 + $0xd] sm:$0x1] %vm844_vm2, %v14637_v0  ;;  %1154 = vmatpush.msra.mxu2 %v8973_v14  ;;  %v8985_v27 = vld [vmem:[%s14742_s30 + $0x88] sm:$0xff]  ;;  %v8992_v29 = vld [vmem:[%s14742_s30 + $0xb0] sm:$0xff]  ;;  %v8984_v34 = vld [vmem:[%s14742_s30 + $0x80] sm:$0xff] }
  0x8a   : > { %1100 = vmatpush.msra.mxu1 %v1015_v12  ;;  %853 = vst.msk [vmem:[#allocation2 + $0x15] sm:$0x1] %vm844_vm2, %v14637_v0  ;;  %1213 = vmatpush.msra.mxu3 %v8979_v17  ;;  %v8991_v35 = vld [vmem:[%s14742_s30 + $0xa8] sm:$0xff]  ;;  %v8990_v41 = vld [vmem:[%s14742_s30 + $0xa0] sm:$0xff]  ;;  %v8999_v42 = vld [vmem:[%s14742_s30 + $0xd8] sm:$0xff] }
  0x8b   : > { %854 = vst.msk [vmem:[#allocation2 + $0x1d] sm:$0x1] %vm844_vm2, %v14637_v0  ;;  %1155 = vmatpush.msra.mxu2 %v8972_v16  ;;  %1270 = vmatpush.msrb.mxu0 %v8987_v23  ;;  %v8998_v43 = vld [vmem:[%s14742_s30 + $0xd0] sm:$0xff]  ;;  %v8997_v45 = vld [vmem:[%s14742_s30 + $0xc8] sm:$0xff]  ;;  %v8996_v51 = vld [vmem:[%s14742_s30 + $0xc0] sm:$0xff] }
  0x8c   : > { %v1020_v18 = vld [vmem:[#allocation2 + $0x9] sm:$0xf]  ;;  %855 = vst.msk [vmem:[#allocation2 + $0x25] sm:$0x1] %vm844_vm2, %v14637_v0  ;;  %1214 = vmatpush.msra.mxu3 %v8978_v19  ;;  %1329 = vmatpush.msrb.mxu1 %v8993_v26  ;;  %v9005_v58 = vld [vmem:[%s14742_s30 + $0xf8] sm:$0xff]  ;;  %v9003_v61 = vld [vmem:[%s14742_s30 + $0xe8] sm:$0xff] }
  0x8d   : > { %1034 = vst [vmem:[#allocation1 + $0x1] ss:$2 sm:$0xff] %v1020_v18  ;;  %v1012_v21 = vld [vmem:[#allocation2 + $0x8] sm:$0xf]  ;;  %1271 = vmatpush.msrb.mxu0 %v8986_v25  ;;  %1389 = vmatpush.msrb.mxu2 %v8999_v42  ;;  %v9002_v2 = vld [vmem:[%s14742_s30 + $0xe0] sm:$0xff]  ;;  %v9011_v5 = vld [vmem:[%s14742_s30 + $0x118] sm:$0xff] }
  0x8e   : > { %856 = vst.msk [vmem:[#allocation2 + $0x2d] sm:$0x1] %vm844_vm2, %v14637_v0  ;;  %1330 = vmatpush.msrb.mxu1 %v8992_v29  ;;  %v1173_v36 = vld [vmem:[#allocation2 + $0x8] sm:$0xf]  ;;  %1448 = vmatpush.msrb.mxu3 %v9005_v58  ;;  %v9009_v8 = vld [vmem:[%s14742_s30 + $0x108] sm:$0xff]  ;;  %v9008_v12 = vld [vmem:[%s14742_s30 + $0x100] sm:$0xff] }
  0x8f   : > { %938 = vst.msk [vmem:[#allocation5] sm:$0x1] %vm844_vm2, %v14637_v0  ;;  %v1114_v28 = vld [vmem:[#allocation2 + $0x2] sm:$0xf]  ;;  %1272 = vmatpush.msrb.mxu0 %v8985_v27  ;;  %v1232_v47 = vld [vmem:[#allocation2 + $0x9] sm:$0xf]  ;;  %1390 = vmatpush.msrb.mxu2 %v8998_v43 }
  0x90   : > { %939 = vst.msk [vmem:[#allocation5 + $0x10] sm:$0x1] %vm844_vm2, %v14637_v0  ;;  %v1115_v30 = vld [vmem:[#allocation2 + $0xa] sm:$0xf]  ;;  %1331 = vmatpush.msrb.mxu1 %v8991_v35 }
  0x91   : > { %940 = vst.msk [vmem:[#allocation5 + $0x20] sm:$0x1] %vm844_vm2, %v14637_v0  ;;  %1273 = vmatpush.msrb.mxu0 %v8984_v34  ;;  %1391 = vmatpush.msrb.mxu2 %v8997_v45  ;;  %v1291_v55 = vld [vmem:[#allocation2 + $0xa] sm:$0xf] }
  0x92   : > { %941 = vst.msk [vmem:[#allocation5 + $0x30] sm:$0x1] %vm844_vm2, %v14637_v0  ;;  %1332 = vmatpush.msrb.mxu1 %v8990_v41  ;;  %v9004_v59 = vld [vmem:[%s14742_s30 + $0xf0] sm:$0xff] }
  0x93   : > { %942 = vst.msk [vmem:[#allocation5 + $0x40] sm:$0x1] %vm844_vm2, %v14637_v0  ;;  %1392 = vmatpush.msrb.mxu2 %v8996_v51  ;;  %1449 = vmatpush.msrb.mxu3 %v9004_v59  ;;  %v9010_v6 = vld [vmem:[%s14742_s30 + $0x110] sm:$0xff] }
  0x94   : > { %v1039_v22 = vld.sshfl [vmem:[#allocation1] sm:$0xff pattern:$0x75316420]  ;;  %943 = vst.msk [vmem:[#allocation5 + $0x50] sm:$0x1] %vm844_vm2, %v14637_v0  ;;  %v1543_v58 = vld [vmem:[#allocation12 + $0x18] sm:$0xff] }
  0x95   : > { %8968 = vmatmul.msk.f32.vlgmr.msra.gmra.mxu0 %vm931_vm1, %v1039_v22  ;;  %1072 = vst [vmem:[#allocation1] ss:$2 sm:$0xff] %v1011_v20  ;;  %1450 = vmatpush.msrb.mxu3 %v9003_v61  ;;  %v1354_v22 = vld [vmem:[#allocation2 + $0x28] sm:$0xf]  ;;  %v1542_v61 = vld [vmem:[#allocation12 + $0x10] sm:$0xff] }
  0x96   : > { %1074 = vst [vmem:[#allocation1 + $0x1] ss:$2 sm:$0xff] %v1012_v21  ;;  %1507 = vmatpush.msra.mxu0 %v9011_v5  ;;  %v1413_v26 = vld [vmem:[#allocation2 + $0x29] sm:$0xf] }
  0x97   : > { %944 = vst.msk [vmem:[#allocation5 + $0x60] sm:$0x1] %vm844_vm2, %v14637_v0  ;;  %1451 = vmatpush.msrb.mxu3 %v9002_v2  ;;  %v1472_v29 = vld [vmem:[#allocation2 + $0x2a] sm:$0xf] }
  0x98   : > { %945 = vst.msk [vmem:[#allocation5 + $0x70] sm:$0x1] %vm844_vm2, %v14637_v0  ;;  %1508 = vmatpush.msra.mxu0 %v9010_v6 }
  0x99   : > { %946 = vst.msk [vmem:[#allocation5 + $0x80] sm:$0x1] %vm844_vm2, %v14637_v0 }
  0x9a   : > { %947 = vst.msk [vmem:[#allocation5 + $0x90] sm:$0x1] %vm844_vm2, %v14637_v0  ;;  %1509 = vmatpush.msra.mxu0 %v9009_v8 }
  0x9b   : > { %949 = vst.msk [vmem:[#allocation5 + $0x19] sm:$0x1] %vm844_vm2, %v14637_v0 }
  0x9c   : > { %950 = vst.msk [vmem:[#allocation5 + $0x29] sm:$0x1] %vm844_vm2, %v14637_v0  ;;  %1510 = vmatpush.msra.mxu0 %v9008_v12 }
  0x9d   : > { %v1079_v24 = vld.sshfl [vmem:[#allocation1] sm:$0xff pattern:$0x75316420]  ;;  %951 = vst.msk [vmem:[#allocation5 + $0x39] sm:$0x1] %vm844_vm2, %v14637_v0 }
  0x9e   : > { %8970 = vmatmul.msk.f32.vlgmr.msra.gmra.mxu1 %vm931_vm1, %v1079_v24  ;;  %952 = vst.msk [vmem:[#allocation5 + $0x49] sm:$0x1] %vm844_vm2, %v14637_v0 }
  0x9f   : > { %953 = vst.msk [vmem:[#allocation5 + $0x59] sm:$0x1] %vm844_vm2, %v14637_v0  ;;  %1587 = vmatpush.msra.mxu1 %v1543_v58 }
  0xa0   : > { %954 = vst.msk [vmem:[#allocation5 + $0x69] sm:$0x1] %vm844_vm2, %v14637_v0 }
  0xa1   : > { %955 = vst.msk [vmem:[#allocation5 + $0x79] sm:$0x1] %vm844_vm2, %v14637_v0  ;;  %1588 = vmatpush.msra.mxu1 %v1542_v61 }
  0xa2   : > { %956 = vst.msk [vmem:[#allocation5 + $0x89] sm:$0x1] %vm844_vm2, %v14637_v0 }
  0xa3   : > { %1127 = vst [vmem:[#allocation1] ss:$2 sm:$0xff] %v1114_v28 }
  0xa4   : > { %1129 = vst [vmem:[#allocation1 + $0x1] ss:$2 sm:$0xff] %v1115_v30 }
  0xa5   : > { %1008 = vst.msk [vmem:[#allocation2 + $0x11] sm:$0xf] %vm1006_vm3, %v1002_v31 }
  0xa6   : > { %1009 = vst.msk [vmem:[#allocation2 + $0x19] sm:$0xf] %vm1006_vm3, %v1003_v32 }
  0xa7   : > { %1010 = vst.msk [vmem:[#allocation2 + $0x21] sm:$0xf] %vm1006_vm3, %v1004_v33 }
  0xa8   : > { %858 = vst.msk [vmem:[#allocation3] sm:$0xff] %vm857_vm4, %v14637_v0 }
  0xa9   : > { %862 = vst.msk [vmem:[#allocation3 + $0x90] sm:$0xff] %vm857_vm4, %v14637_v0 }
  0xaa   : > { %958 = vst.msk [vmem:[#allocation6] sm:$0xff] %vm857_vm4, %v14637_v0 }
  0xab   : > { %v1134_v37 = vld.sshfl [vmem:[#allocation1] sm:$0xff pattern:$0x75316420]  ;;  %959 = vst.msk [vmem:[#allocation6 + $0x8] sm:$0xff] %vm857_vm4, %v14637_v0 }
  0xac   : > { %8976 = vmatmul.msk.f32.vlgmr.msra.gmra.mxu2 %vm931_vm1, %v1134_v37  ;;  %v1021_v38 = vld [vmem:[#allocation2 + $0x11] sm:$0xf]  ;;  %1186 = vst [vmem:[#allocation1] ss:$2 sm:$0xff] %v1173_v36 }
  0xad   : > { %v1174_v39 = vld [vmem:[#allocation2 + $0x10] sm:$0xf]  ;;  %v1022_v40 = vld [vmem:[#allocation2 + $0x19] sm:$0xf]  ;;  %1036 = vst [vmem:[#allocation1 + $0x10] ss:$2 sm:$0xff] %v1021_v38 }
  0xae   : > { %1038 = vst [vmem:[#allocation1 + $0x11] ss:$2 sm:$0xff] %v1022_v40  ;;  %v1013_v44 = vld [vmem:[#allocation2 + $0x10] sm:$0xf]  ;;  %v1014_v46 = vld [vmem:[#allocation2 + $0x18] sm:$0xf] }
  0xaf   : > { %1188 = vst [vmem:[#allocation1 + $0x1] ss:$2 sm:$0xff] %v1174_v39  ;;  %v1233_v49 = vld [vmem:[#allocation2 + $0x11] sm:$0xf]  ;;  %v1117_v53 = vld [vmem:[#allocation2 + $0x1a] sm:$0xf] }
  0xb0   : > { %v1116_v52 = vld [vmem:[#allocation2 + $0x12] sm:$0xf]  ;;  %v1175_v60 = vld [vmem:[#allocation2 + $0x18] sm:$0xf]  ;;  %v1176_v62 = vld [vmem:[#allocation2 + $0x20] sm:$0xf] }
  0xb1   : > { %v1292_v56 = vld [vmem:[#allocation2 + $0x12] sm:$0xf]  ;;  %v1352_v3 = vld [vmem:[#allocation2 + $0x18] sm:$0xf]  ;;  %v1235_v9 = vld [vmem:[#allocation2 + $0x21] sm:$0xf] }
  0xb2   : > { %v1351_v1 = vld [vmem:[#allocation2 + $0x10] sm:$0xf]  ;;  %v1234_v7 = vld [vmem:[#allocation2 + $0x19] sm:$0xf]  ;;  %v1294_v16 = vld [vmem:[#allocation2 + $0x22] sm:$0xf] }
  0xb3   : > { %v1410_v11 = vld [vmem:[#allocation2 + $0x11] sm:$0xf]  ;;  %v1411_v13 = vld [vmem:[#allocation2 + $0x19] sm:$0xf]  ;;  %v1353_v21 = vld [vmem:[#allocation2 + $0x20] sm:$0xf] }
  0xb4   : > { %v1293_v15 = vld [vmem:[#allocation2 + $0x1a] sm:$0xf]  ;;  %v1469_v18 = vld [vmem:[#allocation2 + $0x12] sm:$0xf]  ;;  %v1412_v25 = vld [vmem:[#allocation2 + $0x21] sm:$0xf] }
  0xb5   : > { %v1040_v48 = vld.sshfl [vmem:[#allocation1 + $0x10] sm:$0xff pattern:$0x75316420]  ;;  %v1470_v19 = vld [vmem:[#allocation2 + $0x1a] sm:$0xf]  ;;  %962 = vst.msk [vmem:[#allocation6 + $0x198] sm:$0xff] %vm857_vm4, %v14637_v0 }
  0xb6   : > { %8969 = vmatmul.msk.f32.gmra.mxu0 %vm931_vm1, %v1040_v48  ;;  %v1193_v50 = vld.sshfl [vmem:[#allocation1] sm:$0xff pattern:$0x75316420]  ;;  %1076 = vst [vmem:[#allocation1 + $0x10] ss:$2 sm:$0xff] %v1013_v44 }
  0xb7   : > { %8982 = vmatmul.msk.f32.vlgmr.msra.gmra.mxu3 %vm931_vm1, %v1193_v50  ;;  %1078 = vst [vmem:[#allocation1 + $0x11] ss:$2 sm:$0xff] %v1014_v46  ;;  %v1471_v28 = vld [vmem:[#allocation2 + $0x22] sm:$0xf] }
  0xb8   : > { %1245 = vst [vmem:[#allocation1] ss:$2 sm:$0xff] %v1232_v47 }
  0xb9   : > { %1247 = vst [vmem:[#allocation1 + $0x1] ss:$2 sm:$0xff] %v1233_v49 }
  0xba   : > { %963 = vst.msk [vmem:[#allocation6 + $0x1a0] sm:$0xff] %vm857_vm4, %v14637_v0 }
  0xbb   : > { %934 = vst.msk [vmem:[#allocation5 + $0x8] sm:$0x3] %vm933_vm7, %v14637_v0 }
  0xbc   : > { %937 = vst.msk [vmem:[#allocation5 + $0x98] sm:$0x3] %vm933_vm7, %v14637_v0 }
  0xbd   : > { %948 = vst.msk [vmem:[#allocation5 + $0x9] sm:$0x1] %vm844_vm2, %v14637_v0 }
  0xbe   : > { %v1080_v54 = vld.sshfl [vmem:[#allocation1 + $0x10] sm:$0xff pattern:$0x75316420]  ;;  %957 = vst.msk [vmem:[#allocation5 + $0x99] sm:$0x1] %vm844_vm2, %v14637_v0 }
  0xbf   : > { %8971 = vmatmul.msk.f32.gmra.mxu1 %vm931_vm1, %v1080_v54  ;;  %1131 = vst [vmem:[#allocation1 + $0x10] ss:$2 sm:$0xff] %v1116_v52 }
  0xc0   : > { %1133 = vst [vmem:[#allocation1 + $0x11] ss:$2 sm:$0xff] %v1117_v53  ;;  %v1252_v57 = vld.sshfl [vmem:[#allocation1] sm:$0xff pattern:$0x75316420] }
  0xc1   : > { %8988 = vmatmul.msk.f32.vlgmr.msrb.gmra.mxu0 %vm931_vm1, %v1252_v57  ;;  %1304 = vst [vmem:[#allocation1] ss:$2 sm:$0xff] %v1291_v55 }
  0xc2   : > { %1306 = vst [vmem:[#allocation1 + $0x1] ss:$2 sm:$0xff] %v1292_v56 }
  0xc3   : > { %860 = vst.msk [vmem:[#allocation3 + $0x8] sm:$0x3] %vm859_vm8, %v14637_v0 }
  0xc4   : > { %863 = vst.msk [vmem:[#allocation3 + $0x98] sm:$0x3] %vm859_vm8, %v14637_v0 }
  0xc5   : > { %960 = vst.msk [vmem:[#allocation6 + $0x10] sm:$0x3] %vm859_vm8, %v14637_v0 }
  0xc6   : > { %964 = vst.msk [vmem:[#allocation6 + $0x1a8] sm:$0x3] %vm859_vm8, %v14637_v0 }
  0xc7   : > { %v1135_v63 = vld.sshfl [vmem:[#allocation1 + $0x10] sm:$0xff pattern:$0x75316420]  ;;  %865 = vst.msk [vmem:[#allocation3] sm:$0x1] %vm864_vm9, %v14637_v0 }
  0xc8   : > { %8977 = vmatmul.msk.f32.gmra.mxu2 %vm931_vm1, %v1135_v63  ;;  %1190 = vst [vmem:[#allocation1 + $0x10] ss:$2 sm:$0xff] %v1175_v60 }
  0xc9   : > { %1192 = vst [vmem:[#allocation1 + $0x11] ss:$2 sm:$0xff] %v1176_v62  ;;  %v1311_v4 = vld.sshfl [vmem:[#allocation1] sm:$0xff pattern:$0x75316420] }
  0xca   : > { %8994 = vmatmul.msk.f32.vlgmr.msrb.gmra.mxu1 %vm931_vm1, %v1311_v4  ;;  %1364 = vst [vmem:[#allocation1] ss:$2 sm:$0xff] %v1351_v1  ;;  %v9952_v4 = vld [vmem:[%s14604_s6] ss:$0 sm:$0xff] }
  0xcb   : > { %1366 = vst [vmem:[#allocation1 + $0x1] ss:$2 sm:$0xff] %v1352_v3  ;;  %v1541_v3 = vld [vmem:[#allocation12 + $0x8] sm:$0xff] }
  0xcc   : > { %1589 = vmatpush.msra.mxu1 %v1541_v3  ;;  %866 = vst.msk [vmem:[#allocation3 + $0x10] sm:$0x1] %vm864_vm9, %v14637_v0 }
  0xcd   : > { %867 = vst.msk [vmem:[#allocation3 + $0x20] sm:$0x1] %vm864_vm9, %v14637_v0 }
  0xce   : > { %868 = vst.msk [vmem:[#allocation3 + $0x30] sm:$0x1] %vm864_vm9, %v14637_v0 }
  0xcf   : > { %869 = vst.msk [vmem:[#allocation3 + $0x40] sm:$0x1] %vm864_vm9, %v14637_v0 }
  0xd0   : > { %v1194_v10 = vld.sshfl [vmem:[#allocation1 + $0x10] sm:$0xff pattern:$0x75316420]  ;;  %870 = vst.msk [vmem:[#allocation3 + $0x50] sm:$0x1] %vm864_vm9, %v14637_v0 }
  0xd1   : > { %8983 = vmatmul.msk.f32.gmra.mxu3 %vm931_vm1, %v1194_v10  ;;  %1249 = vst [vmem:[#allocation1 + $0x10] ss:$2 sm:$0xff] %v1234_v7  ;;  %v1540_v7 = vld [vmem:[#allocation12] sm:$0xff] }
  0xd2   : > { %1251 = vst [vmem:[#allocation1 + $0x11] ss:$2 sm:$0xff] %v1235_v9  ;;  %v1371_v14 = vld.sshfl [vmem:[#allocation1] sm:$0xff pattern:$0x75316420]  ;;  %1590 = vmatpush.msra.mxu1 %v1540_v7  ;;  %v9028_v7 = vld [vmem:[%s14609_s11 + $0x30] sm:$0xff] }
  0xd3   : > { %9000 = vmatmul.msk.f32.vlgmr.msrb.gmra.mxu2 %vm931_vm1, %v1371_v14  ;;  %1423 = vst [vmem:[#allocation1] ss:$2 sm:$0xff] %v1410_v11 }
  0xd4   : > { %1425 = vst [vmem:[#allocation1 + $0x1] ss:$2 sm:$0xff] %v1411_v13 }
  0xd5   : > { %871 = vst.msk [vmem:[#allocation3 + $0x60] sm:$0x1] %vm864_vm9, %v14637_v0 }
  0xd6   : > { %872 = vst.msk [vmem:[#allocation3 + $0x70] sm:$0x1] %vm864_vm9, %v14637_v0 }
  0xd7   : > { %873 = vst.msk [vmem:[#allocation3 + $0x80] sm:$0x1] %vm864_vm9, %v14637_v0 }
  0xd8   : > { %874 = vst.msk [vmem:[#allocation3 + $0x90] sm:$0x1] %vm864_vm9, %v14637_v0 }
  0xd9   : > { %v1253_v17 = vld.sshfl [vmem:[#allocation1 + $0x10] sm:$0xff pattern:$0x75316420]  ;;  %875 = vst.msk [vmem:[#allocation3 + $0x9] sm:$0x1] %vm864_vm9, %v14637_v0 }
  0xda   : > { %8989 = vmatmul.msk.f32.gmra.mxu0 %vm931_vm1, %v1253_v17  ;;  %1308 = vst [vmem:[#allocation1 + $0x10] ss:$2 sm:$0xff] %v1293_v15 }
  0xdb   : > { %1310 = vst [vmem:[#allocation1 + $0x11] ss:$2 sm:$0xff] %v1294_v16  ;;  %v1430_v20 = vld.sshfl [vmem:[#allocation1] sm:$0xff pattern:$0x75316420] }
  0xdc   : > { %9006 = vmatmul.msk.f32.vlgmr.msrb.gmra.mxu3 %vm931_vm1, %v1430_v20  ;;  %1482 = vst [vmem:[#allocation1] ss:$2 sm:$0xff] %v1469_v18 }
  0xdd   : > { %1484 = vst [vmem:[#allocation1 + $0x1] ss:$2 sm:$0xff] %v1470_v19 }
  0xde   : > { %876 = vst.msk [vmem:[#allocation3 + $0x19] sm:$0x1] %vm864_vm9, %v14637_v0 }
  0xdf   : > { %877 = vst.msk [vmem:[#allocation3 + $0x29] sm:$0x1] %vm864_vm9, %v14637_v0 }
  0xe0   : > { %878 = vst.msk [vmem:[#allocation3 + $0x39] sm:$0x1] %vm864_vm9, %v14637_v0 }
  0xe1   : > { %879 = vst.msk [vmem:[#allocation3 + $0x49] sm:$0x1] %vm864_vm9, %v14637_v0 }
  0xe2   : > { %v1312_v23 = vld.sshfl [vmem:[#allocation1 + $0x10] sm:$0xff pattern:$0x75316420]  ;;  %880 = vst.msk [vmem:[#allocation3 + $0x59] sm:$0x1] %vm864_vm9, %v14637_v0 }
  0xe3   : > { %8995 = vmatmul.msk.f32.gmra.mxu1 %vm931_vm1, %v1312_v23  ;;  %1368 = vst [vmem:[#allocation1 + $0x10] ss:$2 sm:$0xff] %v1353_v21 }
  0xe4   : > { %1370 = vst [vmem:[#allocation1 + $0x11] ss:$2 sm:$0xff] %v1354_v22  ;;  %v1489_v24 = vld.sshfl [vmem:[#allocation1] sm:$0xff pattern:$0x75316420] }
  0xe5   : > { %9012 = vmatmul.msk.f32.vlgmr.msra.gmra.mxu0 %vm931_vm1, %v1489_v24  ;;  %v9953_v24 = vld [vmem:[%s14606_s8] ss:$0 sm:$0xff]  ;;  %881 = vst.msk [vmem:[#allocation3 + $0x69] sm:$0x1] %vm864_vm9, %v14637_v0 }
  0xe6   : > { %882 = vst.msk [vmem:[#allocation3 + $0x79] sm:$0x1] %vm864_vm9, %v14637_v0 }
  0xe7   : > { %883 = vst.msk [vmem:[#allocation3 + $0x89] sm:$0x1] %vm864_vm9, %v14637_v0 }
  0xe8   : > { %884 = vst.msk [vmem:[#allocation3 + $0x99] sm:$0x1] %vm864_vm9, %v14637_v0 }
  0xe9   : > { %965 = vst.msk [vmem:[#allocation6] sm:$0x1] %vm864_vm9, %v14637_v0 }
  0xea   : > { %966 = vst.msk [vmem:[#allocation6 + $0x18] sm:$0x1] %vm864_vm9, %v14637_v0 }
  0xeb   : > { %v1372_v27 = vld.sshfl [vmem:[#allocation1 + $0x10] sm:$0xff pattern:$0x75316420]  ;;  %967 = vst.msk [vmem:[#allocation6 + $0x30] sm:$0x1] %vm864_vm9, %v14637_v0 }
  0xec   : > { %9001 = vmatmul.msk.f32.gmra.mxu2 %vm931_vm1, %v1372_v27  ;;  %1427 = vst [vmem:[#allocation1 + $0x10] ss:$2 sm:$0xff] %v1412_v25 }
  0xed   : > { %1429 = vst [vmem:[#allocation1 + $0x11] ss:$2 sm:$0xff] %v1413_v26 }
  0xee   : > { %968 = vst.msk [vmem:[#allocation6 + $0x48] sm:$0x1] %vm864_vm9, %v14637_v0 }
  0xef   : > { %969 = vst.msk [vmem:[#allocation6 + $0x60] sm:$0x1] %vm864_vm9, %v14637_v0 }
  0xf0   : > { %970 = vst.msk [vmem:[#allocation6 + $0x78] sm:$0x1] %vm864_vm9, %v14637_v0 }
  0xf1   : > { %971 = vst.msk [vmem:[#allocation6 + $0x90] sm:$0x1] %vm864_vm9, %v14637_v0 }
  0xf2   : > { %972 = vst.msk [vmem:[#allocation6 + $0xa8] sm:$0x1] %vm864_vm9, %v14637_v0 }
  0xf3   : > { %973 = vst.msk [vmem:[#allocation6 + $0xc0] sm:$0x1] %vm864_vm9, %v14637_v0 }
  0xf4   : > { %v1431_v30 = vld.sshfl [vmem:[#allocation1 + $0x10] sm:$0xff pattern:$0x75316420]  ;;  %974 = vst.msk [vmem:[#allocation6 + $0xd8] sm:$0x1] %vm864_vm9, %v14637_v0 }
  0xf5   : > { %9007 = vmatmul.msk.f32.gmra.mxu3 %vm931_vm1, %v1431_v30  ;;  %1486 = vst [vmem:[#allocation1 + $0x10] ss:$2 sm:$0xff] %v1471_v28 }
  0xf6   : > { %1488 = vst [vmem:[#allocation1 + $0x11] ss:$2 sm:$0xff] %v1472_v29 }
  0xf7   : > { %975 = vst.msk [vmem:[#allocation6 + $0xf0] sm:$0x1] %vm864_vm9, %v14637_v0 }
  0xf8   : > { %976 = vst.msk [vmem:[#allocation6 + $0x108] sm:$0x1] %vm864_vm9, %v14637_v0 }
  0xf9   : > { %977 = vst.msk [vmem:[#allocation6 + $0x120] sm:$0x1] %vm864_vm9, %v14637_v0 }
  0xfa   : > { %978 = vst.msk [vmem:[#allocation6 + $0x138] sm:$0x1] %vm864_vm9, %v14637_v0 }
  0xfb   : > { %979 = vst.msk [vmem:[#allocation6 + $0x150] sm:$0x1] %vm864_vm9, %v14637_v0 }
  0xfc   : > { %980 = vst.msk [vmem:[#allocation6 + $0x168] sm:$0x1] %vm864_vm9, %v14637_v0 }
  0xfd   : > { %v1490_v31 = vld.sshfl [vmem:[#allocation1 + $0x10] sm:$0xff pattern:$0x75316420]  ;;  %981 = vst.msk [vmem:[#allocation6 + $0x180] sm:$0x1] %vm864_vm9, %v14637_v0 }
  0xfe   : > { %9013 = vmatmul.msk.f32.gmra.mxu0 %vm931_vm1, %v1490_v31  ;;  %982 = vst.msk [vmem:[#allocation6 + $0x198] sm:$0x1] %vm864_vm9, %v14637_v0 }
  0xff   : > { %983 = vst.msk [vmem:[#allocation6 + $0x11] sm:$0x1] %vm864_vm9, %v14637_v0 }
 0x100   : > { %984 = vst.msk [vmem:[#allocation6 + $0x29] sm:$0x1] %vm864_vm9, %v14637_v0 }
 0x101   : > { %985 = vst.msk [vmem:[#allocation6 + $0x41] sm:$0x1] %vm864_vm9, %v14637_v0 }
 0x102   : > { %986 = vst.msk [vmem:[#allocation6 + $0x59] sm:$0x1] %vm864_vm9, %v14637_v0 }
 0x103   : > { %987 = vst.msk [vmem:[#allocation6 + $0x71] sm:$0x1] %vm864_vm9, %v14637_v0 }
 0x104   : > { %988 = vst.msk [vmem:[#allocation6 + $0x89] sm:$0x1] %vm864_vm9, %v14637_v0 }
 0x105   : > { %989 = vst.msk [vmem:[#allocation6 + $0xa1] sm:$0x1] %vm864_vm9, %v14637_v0 }
 0x106   : > { %990 = vst.msk [vmem:[#allocation6 + $0xb9] sm:$0x1] %vm864_vm9, %v14637_v0 }
 0x107   : > { %991 = vst.msk [vmem:[#allocation6 + $0xd1] sm:$0x1] %vm864_vm9, %v14637_v0 }
 0x108   : > { %992 = vst.msk [vmem:[#allocation6 + $0xe9] sm:$0x1] %vm864_vm9, %v14637_v0 }
 0x109   : > { %993 = vst.msk [vmem:[#allocation6 + $0x101] sm:$0x1] %vm864_vm9, %v14637_v0 }
 0x10a   : > { %994 = vst.msk [vmem:[#allocation6 + $0x119] sm:$0x1] %vm864_vm9, %v14637_v0 }
 0x10b   : > { %995 = vst.msk [vmem:[#allocation6 + $0x131] sm:$0x1] %vm864_vm9, %v14637_v0 }
 0x10c   : > { %996 = vst.msk [vmem:[#allocation6 + $0x149] sm:$0x1] %vm864_vm9, %v14637_v0 }
 0x10d   : > { %997 = vst.msk [vmem:[#allocation6 + $0x161] sm:$0x1] %vm864_vm9, %v14637_v0 }
 0x10e   : > { %998 = vst.msk [vmem:[#allocation6 + $0x179] sm:$0x1] %vm864_vm9, %v14637_v0 }
 0x10f   : > { %999 = vst.msk [vmem:[#allocation6 + $0x191] sm:$0x1] %vm864_vm9, %v14637_v0 }
 0x110   : > { %1000 = vst.msk [vmem:[#allocation6 + $0x1a9] sm:$0x1] %vm864_vm9, %v14637_v0 }
 0x111   : > { %886 = vst.msk [vmem:[#allocation4] sm:$0xff] %vm885_vm10, %v14637_v0 }
 0x112   : > { %v1062_v32 = vpop.f32.mrf.mxu0  ;;  %887 = vst.msk [vmem:[#allocation4 + $0x8] sm:$0xff] %vm885_vm10, %v14637_v0 }
 0x113   : > { %891 = vst.msk [vmem:[#allocation4 + $0x198] sm:$0xff] %vm885_vm10, %v14637_v0 }
 0x114   : > { %892 = vst.msk [vmem:[#allocation4 + $0x1a0] sm:$0xff] %vm885_vm10, %v14637_v0 }
 0x11b   : > { %v1102_v33 = vpop.f32.mrf.mxu1 }
 0x11c   : > { %v1103_v36 = vadd.f32 %v1102_v33, %v1062_v32 }
 0x11e   : > { %v1110_v39 = vrot.slane %v1103_v36, 4 }
 0x12f   : > { %v1157_v35 = vpop.f32.mrf.mxu2 }
 0x130   : > { %v1165_v40 = vrot.slane %v1157_v35, 4  ;;  %v1169_v41 = vadd.f32 %v1157_v35, %v1103_v36 }
 0x132   : > { %v1170_v44 = vadd.f32 %v1165_v40, %v1110_v39 }
 0x133   : > { %v1065_v34 = vpop.f32.mrf.mxu0 }
 0x13a   : > { %v1216_v38 = vpop.f32.mrf.mxu3 }
 0x13b   : > { %v1224_v45 = vrot.slane %v1216_v38, 4  ;;  %v1228_v46 = vadd.f32 %v1216_v38, %v1169_v41 }
 0x13c   : > { %v1105_v37 = vpop.f32.mrf.mxu1 }
 0x13d   : > { %v1229_v47 = vadd.f32 %v1224_v45, %v1170_v44  ;;  %v1106_v8 = vadd.f32 %v1105_v37, %v1065_v34 }
 0x13e   : > { %v1275_v42 = vpop.f32.mrf.mxu0 }
 0x13f   : > { %v1283_v48 = vrot.slane %v1275_v42, 4  ;;  %v1287_v51 = vadd.f32 %v1275_v42, %v1228_v46  ;;  %v1111_v13 = vrot.slane %v1106_v8, 4 }
 0x141   : > { %v1288_v53 = vadd.f32 %v1283_v48, %v1229_v47 }
 0x147   : > { %v1334_v49 = vpop.f32.mrf.mxu1 }
 0x148   : > { %v1342_v54 = vrot.slane %v1334_v49, 4  ;;  %v1346_v56 = vadd.f32 %v1334_v49, %v1287_v51  ;;  %v1609_v49 = vld [vmem:[#allocation13 + $0x8] sm:$0xff]  ;;  %v1608_v51 = vld [vmem:[#allocation13] sm:$0xff] }
 0x149   : > { %1655 = vmatpush.msra.mxu2 %v1609_v49  ;;  %v9085_v49 = vld [vmem:[%s14609_s11 + $0xb8] sm:$0xff] }
 0x14a   : > { %v1347_v59 = vadd.f32 %v1342_v54, %v1288_v53 }
 0x14b   : > { %v1160_v43 = vpop.f32.mrf.mxu2  ;;  %1656 = vmatpush.msra.mxu2 %v1608_v51  ;;  %v9072_v51 = vld [vmem:[%s14609_s11 + $0x90] sm:$0xff] }
 0x14c   : > { %v1166_v14 = vrot.slane %v1160_v43, 4  ;;  %v1171_v17 = vadd.f32 %v1160_v43, %v1106_v8 }
 0x14e   : > { %v1172_v19 = vadd.f32 %v1166_v14, %v1111_v13  ;;  %v1796_v13 = vld [vmem:[%s14609_s11 + $0x18] sm:$0xff]  ;;  %v9026_v14 = vld [vmem:[%s14609_s11 + $0x20] sm:$0xff] }
 0x154   : > { %v1219_v50 = vpop.f32.mrf.mxu3 }
 0x155   : > { %v1225_v20 = vrot.slane %v1219_v50, 4  ;;  %v1230_v21 = vadd.f32 %v1219_v50, %v1171_v17  ;;  %v1793_v17 = vld [vmem:[%s14609_s11] sm:$0xff] }
 0x156   : > { %v1394_v52 = vpop.f32.mrf.mxu2 }
 0x157   : > { %v1278_v55 = vpop.f32.mrf.mxu0  ;;  %v1402_v57 = vrot.slane %v1394_v52, 4  ;;  %v1406_v60 = vadd.f32 %v1394_v52, %v1346_v56  ;;  %v1231_v22 = vadd.f32 %v1225_v20, %v1172_v19  ;;  %v1785_v19 = vld [vmem:[#allocation5] sm:$0xff] }
 0x158   : > { %v1284_v23 = vrot.slane %v1278_v55, 4  ;;  %v1289_v26 = vadd.f32 %v1278_v55, %v1230_v21 }
 0x159   : > { %v1407_v63 = vadd.f32 %v1402_v57, %v1347_v59  ;;  %v9954_v57 = vld [vmem:[%s14608_s10] ss:$0 sm:$0xff] }
 0x15a   : > { %v1290_v29 = vadd.f32 %v1284_v23, %v1231_v22 }
 0x15f   : > { %v1453_v62 = vpop.f32.mrf.mxu3 }
 0x160   : > { %v1461_v1 = vrot.slane %v1453_v62, 4  ;;  %v1465_v2 = vadd.f32 %v1453_v62, %v1406_v60  ;;  %v1337_v25 = vpop.f32.mrf.mxu1 }
 0x161   : > { %v1343_v30 = vrot.slane %v1337_v25, 4  ;;  %v1348_v31 = vadd.f32 %v1337_v25, %v1289_v26  ;;  %v9049_v25 = vld [vmem:[%s14609_s11 + $0x58] sm:$0xff] }
 0x162   : > { %v1466_v5 = vadd.f32 %v1461_v1, %v1407_v63  ;;  %v1512_v6 = vpop.f32.mrf.mxu0 }
 0x163   : > { %v1520_v9 = vrot.slane %v1512_v6, 4  ;;  %v1524_v10 = vadd.f32 %v1512_v6, %v1465_v2  ;;  %v1349_v33 = vadd.f32 %v1343_v30, %v1290_v29  ;;  %v9029_v6 = vld [vmem:[%s14609_s11 + $0x38] sm:$0xff]  ;;  %v9046_v29 = vld [vmem:[%s14609_s11 + $0x40] sm:$0xff]  ;;  %v1940_v30 = vld [vmem:[#allocation5 + $0x2] sm:$0xff] }
 0x164   : > { %1846 = vmatpush.msrb.mxu2 %v9029_v6  ;;  %v9106_v6 = vld [vmem:[%s14609_s11 + $0xe0] sm:$0xff] }
 0x165   : > { %v1525_v11 = vadd.f32 %v1520_v9, %v1466_v5  ;;  %v1532_v12 = vadd.f32 %v9952_v4, %v1524_v10  ;;  %v1678_v10 = vld [vmem:[%s14743_s5] sm:$0xff]  ;;  %s11553_s5 = scalar_lea.vmem [#allocation19], %s8951_s29  ;;  %s9828_s29 = sshll.u32 %s12802_s17, 8 }
 0x166   : > { %1847 = vmatpush.msrb.mxu2 %v9028_v7  ;;  %s12836_s23 = scalar_lea.vmem %s14828_s2, %s9828_s29  ;;  %s14371_s9 = scalar_lea.vmem %s14993_s4, %s9828_s29 }
 0x167   : > { %v1533_v15 = vadd.f32 %v9952_v4, %v1525_v11  ;;  %v1536_v16 = vmax.f32 %v1532_v12, 0.0  ;;  %v9027_v11 = vld [vmem:[%s14609_s11 + $0x28] sm:$0xff]  ;;  %s9830_s29 = sshll.u32 %s10434_s0, 6  ;;  %s8703_s18 = sshll.u32 %s11553_s5, 4  ;;  %s8704_s18 = int_to_ptr.vmem [resolvable:$true] %s8703_s18 }
 0x168   : > { %1848 = vmatpush.msrb.mxu2 %v9027_v11  ;;  %s8702_s13 = scalar_lea.hbm %s14995_s3, %s9830_s29 }
 0x169   : > { %v1537_v18 = vmax.f32 %v1533_v15, 0.0  ;;  %1551 = vst [vmem:[#allocation1] ss:$2 sm:$0xff] %v1536_v16  ;;  %v1795_v15 = vld [vmem:[%s14609_s11 + $0x10] sm:$0xff]  ;;  %v1794_v16 = vld [vmem:[%s14609_s11 + $0x8] sm:$0xff]  ;;  %s8705_s26 = sshll.u32 %s8702_s13, 4  ;;  %s8706_s26 = int_to_ptr.hbm [resolvable:$true] %s8705_s26 }
 0x16a   : > { %1849 = vmatpush.msrb.mxu2 %v9026_v14  ;;  %v9121_v14 = vld [vmem:[%s14609_s11 + $0x118] sm:$0xff]  ;;  %s10184_s28 = sshra.s32 %s8706_s26, 4  ;;  %s10185_s28 = int_to_ptr.hbm [resolvable:$true] %s10184_s28 }
 0x16b   : > { %1553 = vst [vmem:[#allocation1 + $0x1] ss:$2 sm:$0xff] %v1537_v18  ;;  %v1797_v18 = vld [vmem:[#allocation5 + $0x1] sm:$0xff]  ;;  %s10186_s4 = scalar_lea.hbm %s10185_s28, 64  ;;  %p10191_p9 = scmp.lt.s32.totalorder %s10185_s28, %s14995_s3 }
 0x16c   : > { %p10187_p3 = scmp.ne.s32.totalorder %s10185_s28, %s10186_s4 }
 0x16e   : > { %p10188_p13 = pnand %p10187_p3, %p10509_p0 }
 0x16f   : > { %v1397_v27 = vpop.f32.mrf.mxu2 }
 0x170   : > { %v1403_v32 = vrot.slane %v1397_v27, 4  ;;  %v1408_v34 = vadd.f32 %v1397_v27, %v1348_v31  ;;  %v9048_v27 = vld [vmem:[%s14609_s11 + $0x50] sm:$0xff]  ;;  %v9061_v31 = vld [vmem:[%s14609_s11 + $0x78] sm:$0xff]  ;;  %p10189_p7 = pneg %p10188_p13 }
 0x172   : > { %v1558_v28 = vld.sshfl [vmem:[#allocation1] sm:$0xff pattern:$0x75316420]  ;;  %v1409_v36 = vadd.f32 %v1403_v32, %v1349_v33  ;;  %v9060_v32 = vld [vmem:[%s14609_s11 + $0x70] sm:$0xff]  ;;  %v9059_v33 = vld [vmem:[%s14609_s11 + $0x68] sm:$0xff] }
 0x173   : > { %9014 = vmatmul.msk.f32.vlgmr.msra.gmra.mxu1 %vm931_vm1, %v1558_v28  ;;  %1560 = vst [vmem:[#allocation1] ss:$2 sm:$0xff] %v9953_v24  ;;  %v9047_v28 = vld [vmem:[%s14609_s11 + $0x48] sm:$0xff] }
 0x174   : > { %1562 = vst [vmem:[#allocation1 + $0x1] ss:$2 sm:$0xff] %v9953_v24 }
 0x178   : > { %v1456_v35 = vpop.f32.mrf.mxu3 }
 0x179   : > { %v1462_v37 = vrot.slane %v1456_v35, 4  ;;  %v1467_v38 = vadd.f32 %v1456_v35, %v1408_v34  ;;  %v9058_v34 = vld [vmem:[%s14609_s11 + $0x60] sm:$0xff] }
 0x17b   : > { %v1468_v39 = vadd.f32 %v1462_v37, %v1409_v36  ;;  %v1515_v40 = vpop.f32.mrf.mxu0  ;;  %v1567_v50 = vld.sshfl [vmem:[#allocation1] sm:$0xff pattern:$0x75316420] }
 0x17c   : > { %v1521_v41 = vrot.slane %v1515_v40, 4  ;;  %v1526_v42 = vadd.f32 %v1515_v40, %v1467_v38 }
 0x17e   : > { %v1527_v43 = vadd.f32 %v1521_v41, %v1468_v39  ;;  %v1534_v44 = vadd.f32 %v9952_v4, %v1526_v42 }
 0x180   : > { %v1535_v45 = vadd.f32 %v9952_v4, %v1527_v43  ;;  %v1538_v46 = vmax.f32 %v1534_v44, 0.0 }
 0x182   : > { %v1539_v47 = vmax.f32 %v1535_v45, 0.0  ;;  %1555 = vst [vmem:[#allocation1 + $0x10] ss:$2 sm:$0xff] %v1538_v46 }
 0x184   : > { %1557 = vst [vmem:[#allocation1 + $0x11] ss:$2 sm:$0xff] %v1539_v47 }
 0x18b   : > { %v1559_v48 = vld.sshfl [vmem:[#allocation1 + $0x10] sm:$0xff pattern:$0x75316420] }
 0x18c   : > { %9015 = vmatmul.msk.f32.gmra.mxu1 %vm931_vm1, %v1559_v48  ;;  %1564 = vst [vmem:[#allocation1 + $0x10] ss:$2 sm:$0xff] %v9953_v24  ;;  %v9073_v48 = vld [vmem:[%s14609_s11 + $0x98] sm:$0xff] }
 0x18d   : > { %1566 = vst [vmem:[#allocation1 + $0x11] ss:$2 sm:$0xff] %v9953_v24 }
 0x194   : > { %v1568_v59 = vld.sshfl [vmem:[#allocation1 + $0x10] sm:$0xff pattern:$0x75316420] }
 0x1f0   : > { %v1592_v52 = vpop.f32.mrf.mxu1 }
 0x1f1   : > { %v1593_v53 = vadd.f32 %v1592_v52, %v1567_v50  ;;  %v9097_v50 = vld [vmem:[%s14609_s11 + $0xd8] sm:$0xff]  ;;  %v9084_v52 = vld [vmem:[%s14609_s11 + $0xb0] sm:$0xff] }
 0x1f3   : > { %v1600_v54 = vrot.slane %v1593_v53, 4  ;;  %v1604_v55 = vmax.f32 %v1593_v53, 0.0  ;;  %v9096_v53 = vld [vmem:[%s14609_s11 + $0xd0] sm:$0xff] }
 0x1f5   : > { %v1605_v56 = vmax.f32 %v1600_v54, 0.0  ;;  %1617 = vst [vmem:[#allocation1] ss:$2 sm:$0xff] %v1604_v55 }
 0x1f7   : > { %1619 = vst [vmem:[#allocation1 + $0x1] ss:$2 sm:$0xff] %v1605_v56  ;;  %v9071_v56 = vld [vmem:[%s14609_s11 + $0x88] sm:$0xff] }
 0x1fe   : > { %v1624_v58 = vld.sshfl [vmem:[#allocation1] sm:$0xff pattern:$0x75316420] }
 0x1ff   : > { %9016 = vmatmul.msk.f32.vlgmr.msra.gmra.mxu2 %vm857_vm4, %v1624_v58  ;;  %1626 = vst [vmem:[#allocation1] ss:$2 sm:$0xff] %v9954_v57 }
 0x200   : > { %1628 = vst [vmem:[#allocation1 + $0x1] ss:$2 sm:$0xff] %v9954_v57  ;;  %2161 = vmatpush.msra.mxu2 %v9073_v48 }
 0x202   : > { %2162 = vmatpush.msra.mxu2 %v9072_v51 }
 0x204   : > { %2163 = vmatpush.msra.mxu2 %v9071_v56 }
 0x207   : > { %v1633_v3 = vld.sshfl [vmem:[#allocation1] sm:$0xff pattern:$0x75316420] }
 0x209   : > { %v1595_v60 = vpop.f32.mrf.mxu1 }
 0x20a   : > { %v1596_v61 = vadd.f32 %v1595_v60, %v1568_v59  ;;  %v9095_v59 = vld [vmem:[%s14609_s11 + $0xc8] sm:$0xff]  ;;  %v9070_v60 = vld [vmem:[%s14609_s11 + $0x80] sm:$0xff] }
 0x20b   : > { %2164 = vmatpush.msra.mxu2 %v9070_v60 }
 0x20c   : > { %v1601_v62 = vrot.slane %v1596_v61, 4  ;;  %v1606_v63 = vmax.f32 %v1596_v61, 0.0  ;;  %v9082_v61 = vld [vmem:[%s14609_s11 + $0xa0] sm:$0xff] }
 0x20e   : > { %v1607_v1 = vmax.f32 %v1601_v62, 0.0  ;;  %1621 = vst [vmem:[#allocation1 + $0x10] ss:$2 sm:$0xff] %v1606_v63  ;;  %v9109_v62 = vld [vmem:[%s14609_s11 + $0xf8] sm:$0xff]  ;;  %v9094_v63 = vld [vmem:[%s14609_s11 + $0xc0] sm:$0xff] }
 0x210   : > { %1623 = vst [vmem:[#allocation1 + $0x11] ss:$2 sm:$0xff] %v1607_v1  ;;  %v9108_v1 = vld [vmem:[%s14609_s11 + $0xf0] sm:$0xff] }
 0x217   : > { %v1625_v2 = vld.sshfl [vmem:[#allocation1 + $0x10] sm:$0xff pattern:$0x75316420] }
 0x218   : > { %9017 = vmatmul.msk.f32.gmra.mxu2 %vm857_vm4, %v1625_v2  ;;  %1630 = vst [vmem:[#allocation1 + $0x10] ss:$2 sm:$0xff] %v9954_v57  ;;  %v9107_v2 = vld [vmem:[%s14609_s11 + $0xe8] sm:$0xff] }
 0x219   : > { %1632 = vst [vmem:[#allocation1 + $0x11] ss:$2 sm:$0xff] %v9954_v57  ;;  %v9083_v57 = vld [vmem:[%s14609_s11 + $0xa8] sm:$0xff] }
 0x220   : > { %9030 = vmatmul.msk.f32.vlgmr.msrb.gmra.mxu2 %vm931_vm1, %v1797_v18  ;;  %v1634_v20 = vld.sshfl [vmem:[#allocation1 + $0x10] sm:$0xff pattern:$0x75316420]  ;;  %v2292_v18 = vld [vmem:[#allocation5 + $0x90] sm:$0xff] }
 0x221   : > { %2506 = vmatpush.msrb.mxu2 %v9121_v14 }
 0x282   : > { %v1658_v4 = vpop.f32.mrf.mxu2 }
 0x283   : > { %v1659_v5 = vadd.f32 %v1658_v4, %v1633_v3 }
 0x285   : > { %v1666_v8 = vrot.slane %v1659_v5, 4  ;;  %v1670_v9 = vmax.f32 %v1659_v5, 0.0 }
 0x287   : > { %v1671_v12 = vmax.f32 %v1666_v8, 0.0  ;;  %1674 = vst.msk [vmem:[%s10842_s24] sm:$0xf] %vm1006_vm3, %v1670_v9  ;;  %9018 = vmatpush.msk.msra.mxu3 %vm1683_vm5, %v1670_v9 }
 0x288   : > { %9019 = vmatmul.msk.f32.vlgmr.msra.gmra.mxu3 %vm1679_vm6, %v1678_v10 }
 0x289   : > { %1675 = vst.msk [vmem:[%s10842_s24 + $0x4] sm:$0xf] %vm1006_vm3, %v1671_v12  ;;  %9020 = vmatpush.msk.msrb.mxu3 %vm1683_vm5, %v1671_v12 }
 0x28b   : > { %1911 = vmatpush.msra.mxu3 %v1796_v13 }
 0x28d   : > { %1912 = vmatpush.msra.mxu3 %v1795_v15  ;;  %v9120_v15 = vld [vmem:[%s14609_s11 + $0x110] sm:$0xff] }
 0x28e   : > { %2507 = vmatpush.msrb.mxu2 %v9120_v15 }
 0x28f   : > { %1913 = vmatpush.msra.mxu3 %v1794_v16  ;;  %v9119_v16 = vld [vmem:[%s14609_s11 + $0x108] sm:$0xff] }
 0x290   : > { %9021 = vmatmul.msk.f32.vlgmr.msrb.gmra.mxu3 %vm1679_vm6, %v1678_v10  ;;  %2508 = vmatpush.msrb.mxu2 %v9119_v16 }
 0x291   : > { %1914 = vmatpush.msra.mxu3 %v1793_v17  ;;  %v9118_v17 = vld [vmem:[%s14609_s11 + $0x100] sm:$0xff] }
 0x292   : > { %2509 = vmatpush.msrb.mxu2 %v9118_v17 }
 0x293   : > { %2247 = vmatpush.msrb.mxu3 %v9085_v49 }
 0x295   : > { %2248 = vmatpush.msrb.mxu3 %v9084_v52 }
 0x297   : > { %2249 = vmatpush.msrb.mxu3 %v9083_v57 }
 0x298   : > { %9038 = vmatmul.msk.f32.vlgmr.msra.gmra.mxu3 %vm931_vm1, %v1785_v19 }
 0x299   : > { %2250 = vmatpush.msrb.mxu3 %v9082_v61 }
 0x29b   : > { %v1661_v21 = vpop.f32.mrf.mxu2 }
 0x29c   : > { %v1662_v22 = vadd.f32 %v1661_v21, %v1634_v20  ;;  %v2378_v21 = vld [vmem:[#allocation5 + $0x91] sm:$0xff] }
 0x29e   : > { %v1667_v23 = vrot.slane %v1662_v22, 4  ;;  %v1672_v24 = vmax.f32 %v1662_v22, 0.0 }
 0x2a0   : > { %v1673_v26 = vmax.f32 %v1667_v23, 0.0  ;;  %1676 = vst.msk [vmem:[%s10842_s24 + $0x8] sm:$0xf] %vm1006_vm3, %v1672_v24  ;;  %9022 = vmatpush.msk.msrb.mxu0 %vm1683_vm5, %v1672_v24 }
 0x2a1   : > { %9023 = vmatmul.msk.f32.vlgmr.msrb.gmra.mxu0 %vm1679_vm6, %v1678_v10 }
 0x2a2   : > { %1677 = vst.msk [vmem:[%s10842_s24 + $0xc] sm:$0xf] %vm1006_vm3, %v1673_v26  ;;  %9024 = vmatpush.msk.msrb.mxu1 %vm1683_vm5, %v1673_v26  ;;  %1989 = vmatpush.msra.mxu0 %v9049_v25 }
 0x2a3   : > { %9025 = vmatmul.msk.f32.vlgmr.msrb.gmra.mxu1 %vm1679_vm6, %v1678_v10  ;;  %v1851_v22 = vpop.f32.mrf.mxu2 }
 0x2a4   : > { %1990 = vmatpush.msra.mxu0 %v9048_v27  ;;  %2075 = vmatpush.msra.mxu1 %v9061_v31 }
 0x2a6   : > { %1991 = vmatpush.msra.mxu0 %v9047_v28  ;;  %2076 = vmatpush.msra.mxu1 %v9060_v32 }
 0x2a8   : > { %1992 = vmatpush.msra.mxu0 %v9046_v29  ;;  %2077 = vmatpush.msra.mxu1 %v9059_v33 }
 0x2a9   : > { %9050 = vmatmul.msk.f32.vlgmr.msra.gmra.mxu0 %vm931_vm1, %v1940_v30 }
 0x2aa   : > { %2078 = vmatpush.msra.mxu1 %v9058_v34  ;;  %2334 = vmatpush.msrb.mxu0 %v9097_v50 }
 0x2ac   : > { %2335 = vmatpush.msrb.mxu0 %v9096_v53  ;;  %2420 = vmatpush.msrb.mxu1 %v9109_v62 }
 0x2ae   : > { %2336 = vmatpush.msrb.mxu0 %v9095_v59  ;;  %2421 = vmatpush.msrb.mxu1 %v9108_v1  ;;  %v2597_v1 = vld [vmem:[#allocation15 + $0x8] sm:$0xff] }
 0x2b0   : > { %2337 = vmatpush.msrb.mxu0 %v9094_v63  ;;  %2422 = vmatpush.msrb.mxu1 %v9107_v2  ;;  %v2608_v63 = vld [vmem:[#allocation15 + $0x18] sm:$0xff]  ;;  %v2749_v2 = vld [vmem:[#allocation15 + $0x28] sm:$0xff] }
 0x2b1   : > { %2647 = vmatpush.msra.mxu3 %v2608_v63  ;;  %v2563_v63 = vld [vmem:[%s10575_s16] sm:$0xff] }
 0x2b2   : > { %2423 = vmatpush.msrb.mxu1 %v9106_v6  ;;  %2712 = vmatpush.msra.mxu0 %v2597_v1 }
 0x30b   : > { %v1704_v35 = vpop.f32.mrf.mxu3 }
 0x30c   : > { %1777 = vst.msk [vmem:[#allocation5 + $0x11] sm:$0xff] %vm931_vm1, %v1704_v35 }
 0x30d   : > { %1778 = vst.msk [vmem:[#allocation5 + $0x21] sm:$0xff] %vm931_vm1, %v1704_v35 }
 0x313   : > { %v10910_v36 = vld [vmem:[#allocation5 + $0x11] sm:$0xff]  ;;  %v1727_v39 = vpop.f32.mrf.mxu3 }
 0x314   : > { %v1786_v37 = vld [vmem:[#allocation5 + $0x10] sm:$0xff]  ;;  %9031 = vmatmul.msk.f32.gmra.mxu2 %vm931_vm1, %v10910_v36  ;;  %1779 = vst.msk [vmem:[#allocation5 + $0x31] sm:$0xff] %vm931_vm1, %v1727_v39  ;;  %v10922_v40 = vld [vmem:[#allocation5 + $0x21] sm:$0xff] }
 0x315   : > { %v10912_v38 = vld [vmem:[#allocation5 + $0x12] sm:$0xff]  ;;  %9039 = vmatmul.msk.f32.gmra.mxu3 %vm931_vm1, %v1786_v37  ;;  %9062 = vmatmul.msk.f32.vlgmr.msra.gmra.mxu1 %vm931_vm1, %v1786_v37  ;;  %1780 = vst.msk [vmem:[#allocation5 + $0x41] sm:$0xff] %vm931_vm1, %v1727_v39  ;;  %v10924_v41 = vld [vmem:[#allocation5 + $0x20] sm:$0xff] }
 0x316   : > { %9051 = vmatmul.msk.f32.gmra.mxu0 %vm931_vm1, %v10912_v38  ;;  %v10930_v42 = vld [vmem:[#allocation5 + $0x22] sm:$0xff]  ;;  %v2464_v37 = vld [vmem:[#allocation5 + $0x92] sm:$0xff]  ;;  %2788 = vmatpush.msra.mxu1 %v2749_v2 }
 0x317   : > { %v2832_v2 = vld [vmem:[#allocation15 + $0x30] sm:$0xff] }
 0x31b   : > { %v10938_v45 = vld [vmem:[#allocation5 + $0x31] sm:$0xff]  ;;  %v1916_v26 = vpop.f32.mrf.mxu3 }
 0x31c   : > { %9032 = vmatmul.msk.f32.gmra.mxu2 %vm931_vm1, %v10922_v40  ;;  %v10940_v46 = vld [vmem:[#allocation5 + $0x30] sm:$0xff]  ;;  %v10972_v54 = vld [vmem:[#allocation5 + $0x41] sm:$0xff]  ;;  %v1917_v62 = vadd.f32 %v1916_v26, %v1851_v22 }
 0x31d   : > { %9040 = vmatmul.msk.f32.gmra.mxu3 %vm931_vm1, %v10924_v41  ;;  %9063 = vmatmul.msk.f32.gmra.mxu1 %vm931_vm1, %v10924_v41  ;;  %v10943_v47 = vld [vmem:[#allocation5 + $0x32] sm:$0xff]  ;;  %v1789_v55 = vld [vmem:[#allocation5 + $0x40] sm:$0xff] }
 0x31e   : > { %9052 = vmatmul.msk.f32.gmra.mxu0 %vm931_vm1, %v10930_v42  ;;  %v1750_v43 = vpop.f32.mrf.mxu0  ;;  %v10983_v58 = vld [vmem:[#allocation5 + $0x42] sm:$0xff]  ;;  %v2588_v26 = vld [vmem:[#allocation3] sm:$0xff] }
 0x31f   : > { %1781 = vst.msk [vmem:[#allocation5 + $0x51] sm:$0xff] %vm931_vm1, %v1750_v43 }
 0x320   : > { %1782 = vst.msk [vmem:[#allocation5 + $0x61] sm:$0xff] %vm931_vm1, %v1750_v43  ;;  %v1773_v44 = vpop.f32.mrf.mxu1 }
 0x321   : > { %1783 = vst.msk [vmem:[#allocation5 + $0x71] sm:$0xff] %vm931_vm1, %v1773_v44 }
 0x322   : > { %1784 = vst.msk [vmem:[#allocation5 + $0x81] sm:$0xff] %vm931_vm1, %v1773_v44 }
 0x324   : > { %9033 = vmatmul.msk.f32.gmra.mxu2 %vm931_vm1, %v10938_v45 }
 0x325   : > { %9041 = vmatmul.msk.f32.gmra.mxu3 %vm931_vm1, %v10940_v46  ;;  %9064 = vmatmul.msk.f32.gmra.mxu1 %vm931_vm1, %v10940_v46 }
 0x326   : > { %9053 = vmatmul.msk.f32.gmra.mxu0 %vm931_vm1, %v10943_v47  ;;  %v1802_v3 = vld [vmem:[#allocation5 + $0x51] sm:$0xff]  ;;  %v1994_v27 = vpop.f32.mrf.mxu0 }
 0x327   : > { %v1790_v4 = vld [vmem:[#allocation5 + $0x50] sm:$0xff]  ;;  %v1803_v7 = vld [vmem:[#allocation5 + $0x61] sm:$0xff] }
 0x328   : > { %v11009_v5 = vld [vmem:[#allocation5 + $0x52] sm:$0xff]  ;;  %v1791_v8 = vld [vmem:[#allocation5 + $0x60] sm:$0xff] }
 0x329   : > { %v11021_v9 = vld [vmem:[#allocation5 + $0x62] sm:$0xff]  ;;  %v1804_v10 = vld [vmem:[#allocation5 + $0x71] sm:$0xff] }
 0x32a   : > { %v1792_v11 = vld [vmem:[#allocation5 + $0x70] sm:$0xff]  ;;  %v2033_v13 = vld [vmem:[#allocation5 + $0x80] sm:$0xff] }
 0x32b   : > { %v11026_v12 = vld [vmem:[#allocation5 + $0x72] sm:$0xff]  ;;  %v2119_v19 = vld [vmem:[#allocation5 + $0x81] sm:$0xff] }
 0x32c   : > { %9034 = vmatmul.msk.f32.gmra.mxu2 %vm931_vm1, %v10972_v54  ;;  %v2205_v20 = vld [vmem:[#allocation5 + $0x82] sm:$0xff] }
 0x32d   : > { %9042 = vmatmul.msk.f32.gmra.mxu3 %vm931_vm1, %v1789_v55  ;;  %9065 = vmatmul.msk.f32.gmra.mxu1 %vm931_vm1, %v1789_v55 }
 0x32e   : > { %9054 = vmatmul.msk.f32.gmra.mxu0 %vm931_vm1, %v10983_v58 }
 0x334   : > { %9035 = vmatmul.msk.f32.gmra.mxu2 %vm931_vm1, %v1802_v3 }
 0x335   : > { %9043 = vmatmul.msk.f32.gmra.mxu3 %vm931_vm1, %v1790_v4  ;;  %9066 = vmatmul.msk.f32.gmra.mxu1 %vm931_vm1, %v1790_v4 }
 0x336   : > { %9055 = vmatmul.msk.f32.gmra.mxu0 %vm931_vm1, %v11009_v5 }
 0x33c   : > { %9036 = vmatmul.msk.f32.gmra.mxu2 %vm931_vm1, %v1803_v7 }
 0x33d   : > { %9044 = vmatmul.msk.f32.gmra.mxu3 %vm931_vm1, %v1791_v8  ;;  %9067 = vmatmul.msk.f32.gmra.mxu1 %vm931_vm1, %v1791_v8 }
 0x33e   : > { %9056 = vmatmul.msk.f32.gmra.mxu0 %vm931_vm1, %v11021_v9 }
 0x344   : > { %9037 = vmatmul.msk.f32.gmra.mxu2 %vm931_vm1, %v1804_v10 }
 0x345   : > { %9045 = vmatmul.msk.f32.gmra.mxu3 %vm931_vm1, %v1792_v11  ;;  %9068 = vmatmul.msk.f32.gmra.mxu1 %vm931_vm1, %v1792_v11 }
 0x346   : > { %9057 = vmatmul.msk.f32.gmra.mxu0 %vm931_vm1, %v11026_v12 }
 0x34c   : > { %9074 = vmatmul.msk.f32.vlgmr.msra.gmra.mxu2 %vm931_vm1, %v10910_v36 }
 0x34d   : > { %9086 = vmatmul.msk.f32.vlgmr.msrb.gmra.mxu3 %vm931_vm1, %v10912_v38  ;;  %9069 = vmatmul.msk.f32.gmra.mxu1 %vm931_vm1, %v2033_v13 }
 0x34e   : > { %9098 = vmatmul.msk.f32.vlgmr.msrb.gmra.mxu0 %vm931_vm1, %v10924_v41 }
 0x354   : > { %9075 = vmatmul.msk.f32.gmra.mxu2 %vm931_vm1, %v10922_v40 }
 0x355   : > { %9087 = vmatmul.msk.f32.gmra.mxu3 %vm931_vm1, %v10930_v42  ;;  %9110 = vmatmul.msk.f32.vlgmr.msrb.gmra.mxu1 %vm931_vm1, %v10922_v40 }
 0x356   : > { %9099 = vmatmul.msk.f32.gmra.mxu0 %vm931_vm1, %v10940_v46 }
 0x35c   : > { %9076 = vmatmul.msk.f32.gmra.mxu2 %vm931_vm1, %v10938_v45 }
 0x35d   : > { %9088 = vmatmul.msk.f32.gmra.mxu3 %vm931_vm1, %v10943_v47  ;;  %9111 = vmatmul.msk.f32.gmra.mxu1 %vm931_vm1, %v10938_v45 }
 0x35e   : > { %9100 = vmatmul.msk.f32.gmra.mxu0 %vm931_vm1, %v1789_v55 }
 0x364   : > { %9077 = vmatmul.msk.f32.gmra.mxu2 %vm931_vm1, %v10972_v54 }
 0x365   : > { %9089 = vmatmul.msk.f32.gmra.mxu3 %vm931_vm1, %v10983_v58  ;;  %9112 = vmatmul.msk.f32.gmra.mxu1 %vm931_vm1, %v10972_v54 }
 0x366   : > { %9101 = vmatmul.msk.f32.gmra.mxu0 %vm931_vm1, %v1790_v4  ;;  %v2018_v4 = vadd.f32 %v1994_v27, %v1917_v62  ;;  %v2833_v27 = vld [vmem:[#allocation15 + $0x38] sm:$0xff] }
 0x367   : > { %2872 = vmatpush.msra.mxu2 %v2833_v27 }
 0x369   : > { %2873 = vmatpush.msra.mxu2 %v2832_v2 }
 0x36c   : > { %9078 = vmatmul.msk.f32.gmra.mxu2 %vm931_vm1, %v1802_v3 }
 0x36d   : > { %9090 = vmatmul.msk.f32.gmra.mxu3 %vm931_vm1, %v11009_v5  ;;  %9113 = vmatmul.msk.f32.gmra.mxu1 %vm931_vm1, %v1802_v3 }
 0x36e   : > { %9102 = vmatmul.msk.f32.gmra.mxu0 %vm931_vm1, %v1791_v8 }
 0x374   : > { %9079 = vmatmul.msk.f32.gmra.mxu2 %vm931_vm1, %v1803_v7 }
 0x375   : > { %9091 = vmatmul.msk.f32.gmra.mxu3 %vm931_vm1, %v11021_v9  ;;  %9114 = vmatmul.msk.f32.gmra.mxu1 %vm931_vm1, %v1803_v7 }
 0x376   : > { %9103 = vmatmul.msk.f32.gmra.mxu0 %vm931_vm1, %v1792_v11  ;;  %v2748_v11 = vld [vmem:[#allocation15 + $0x20] sm:$0xff] }
 0x377   : > { %2789 = vmatpush.msra.mxu1 %v2748_v11 }
 0x37c   : > { %9080 = vmatmul.msk.f32.gmra.mxu2 %vm931_vm1, %v1804_v10 }
 0x37d   : > { %9092 = vmatmul.msk.f32.gmra.mxu3 %vm931_vm1, %v11026_v12  ;;  %9115 = vmatmul.msk.f32.gmra.mxu1 %vm931_vm1, %v1804_v10  ;;  %v2596_v10 = vld [vmem:[#allocation15] sm:$0xff] }
 0x37e   : > { %9104 = vmatmul.msk.f32.gmra.mxu0 %vm931_vm1, %v2033_v13 }
 0x37f   : > { %2713 = vmatpush.msra.mxu0 %v2596_v10 }
 0x384   : > { %9081 = vmatmul.msk.f32.gmra.mxu2 %vm931_vm1, %v2119_v19 }
 0x385   : > { %9093 = vmatmul.msk.f32.gmra.mxu3 %vm931_vm1, %v2205_v20  ;;  %9116 = vmatmul.msk.f32.gmra.mxu1 %vm931_vm1, %v2119_v19 }
 0x386   : > { %9105 = vmatmul.msk.f32.gmra.mxu0 %vm931_vm1, %v2292_v18  ;;  %v2598_v18 = vld [vmem:[#allocation3 + $0x1] sm:$0xff] }
 0x38c   : > { %9122 = vmatmul.msk.f32.vlgmr.msrb.gmra.mxu2 %vm931_vm1, %v10930_v42 }
 0x38d   : > { %9117 = vmatmul.msk.f32.gmra.mxu1 %vm931_vm1, %v2378_v21 }
 0x38e   : > { %9138 = vmatmul.msk.f32.vlgmr.msra.gmra.mxu0 %vm857_vm4, %v2588_v26 }
 0x392   : > { %v2080_v28 = vpop.f32.mrf.mxu1 }
 0x393   : > { %v1997_v31 = vpop.f32.mrf.mxu0  ;;  %v2104_v7 = vadd.f32 %v2080_v28, %v2018_v4  ;;  %v2739_v4 = vld [vmem:[#allocation3 + $0x2] sm:$0xff] }
 0x394   : > { %9123 = vmatmul.msk.f32.gmra.mxu2 %vm931_vm1, %v10943_v47 }
 0x395   : > { %9146 = vmatmul.msk.f32.vlgmr.msra.gmra.mxu1 %vm857_vm4, %v2739_v4 }
 0x397   : > { %v1854_v23 = vpop.f32.mrf.mxu2 }
 0x398   : > { %v1919_v30 = vpop.f32.mrf.mxu3 }
 0x399   : > { %v1920_v8 = vadd.f32 %v1919_v30, %v1854_v23 }
 0x39a   : > { %v11114_v33 = vpop.f32.mrf.mxu1 }
 0x39b   : > { %v11119_v35 = vpop.f32.mrf.mxu0  ;;  %v2019_v14 = vadd.f32 %v1997_v31, %v1920_v8  ;;  %v11202_v31 = vld [vmem:[%s14610_s12] ss:$0 sm:$0xff] }
 0x39c   : > { %9124 = vmatmul.msk.f32.gmra.mxu2 %vm931_vm1, %v10983_v58 }
 0x39d   : > { %v2105_v19 = vadd.f32 %v11114_v33, %v2019_v14 }
 0x39f   : > { %v11100_v24 = vpop.f32.mrf.mxu2 }
 0x3a0   : > { %v11116_v34 = vpop.f32.mrf.mxu3 }
 0x3a2   : > { %v11123_v38 = vpop.f32.mrf.mxu1 }
 0x3a3   : > { %v11130_v41 = vpop.f32.mrf.mxu0 }
 0x3a4   : > { %9125 = vmatmul.msk.f32.gmra.mxu2 %vm931_vm1, %v11009_v5 }
 0x3a7   : > { %v11104_v25 = vpop.f32.mrf.mxu2 }
 0x3a8   : > { %v11126_v39 = vpop.f32.mrf.mxu3 }
 0x3aa   : > { %v11132_v42 = vpop.f32.mrf.mxu1 }
 0x3ab   : > { %v11136_v45 = vpop.f32.mrf.mxu0 }
 0x3ac   : > { %9126 = vmatmul.msk.f32.gmra.mxu2 %vm931_vm1, %v11021_v9  ;;  %v2607_v9 = vld [vmem:[#allocation15 + $0x10] sm:$0xff] }
 0x3ad   : > { %2648 = vmatpush.msra.mxu3 %v2607_v9  ;;  %v1926_v9 = vadd.f32 %v11126_v39, %v11104_v25  ;;  %v2564_v39 = vld [vmem:[%s10575_s16 + $0x8] sm:$0xff] }
 0x3ae   : > { %9130 = vmatmul.msk.f32.vlgmr.msra.gmra.mxu3 %vm857_vm4, %v2598_v18 }
 0x3af   : > { %v11108_v29 = vpop.f32.mrf.mxu2  ;;  %v2021_v25 = vadd.f32 %v11130_v41, %v1926_v9 }
 0x3b0   : > { %v11134_v43 = vpop.f32.mrf.mxu3 }
 0x3b1   : > { %v1929_v11 = vadd.f32 %v11134_v43, %v11108_v29  ;;  %v2107_v41 = vadd.f32 %v11132_v42, %v2021_v25 }
 0x3b2   : > { %v11138_v46 = vpop.f32.mrf.mxu1 }
 0x3b3   : > { %v11142_v49 = vpop.f32.mrf.mxu0  ;;  %v2022_v29 = vadd.f32 %v11136_v45, %v1929_v11 }
 0x3b4   : > { %9127 = vmatmul.msk.f32.gmra.mxu2 %vm931_vm1, %v11026_v12 }
 0x3b7   : > { %v11112_v32 = vpop.f32.mrf.mxu2 }
 0x3b8   : > { %v11140_v48 = vpop.f32.mrf.mxu3 }
 0x3ba   : > { %v11146_v51 = vpop.f32.mrf.mxu1 }
 0x3bb   : > { %v11150_v53 = vpop.f32.mrf.mxu0 }
 0x3bc   : > { %9128 = vmatmul.msk.f32.gmra.mxu2 %vm931_vm1, %v2205_v20 }
 0x3bf   : > { %v11121_v36 = vpop.f32.mrf.mxu2 }
 0x3c0   : > { %v11148_v52 = vpop.f32.mrf.mxu3 }
 0x3c2   : > { %v11154_v55 = vpop.f32.mrf.mxu1 }
 0x3c3   : > { %v11160_v58 = vpop.f32.mrf.mxu0 }
 0x3c4   : > { %9129 = vmatmul.msk.f32.gmra.mxu2 %vm931_vm1, %v2464_v37 }
 0x3c7   : > { %v11128_v40 = vpop.f32.mrf.mxu2 }
 0x3c8   : > { %v11156_v56 = vpop.f32.mrf.mxu3 }
 0x3ca   : > { %v11162_v59 = vpop.f32.mrf.mxu1 }
 0x3cb   : > { %v2339_v3 = vpop.f32.mrf.mxu0 }
 0x3cf   : > { %v2166_v44 = vpop.f32.mrf.mxu2 }
 0x3d0   : > { %v2252_v60 = vpop.f32.mrf.mxu3  ;;  %v2190_v13 = vadd.f32 %v2166_v44, %v2104_v7 }
 0x3d2   : > { %v2425_v5 = vpop.f32.mrf.mxu1  ;;  %v2276_v16 = vadd.f32 %v2252_v60, %v2190_v13 }
 0x3d3   : > { %v2342_v15 = vpop.f32.mrf.mxu0 }
 0x3d4   : > { %v2363_v21 = vadd.f32 %v2339_v3, %v2276_v16 }
 0x3d6   : > { %v2449_v28 = vadd.f32 %v2425_v5, %v2363_v21  ;;  %v1923_v5 = vadd.f32 %v11116_v34, %v11100_v24  ;;  %v2108_v21 = vadd.f32 %v11138_v46, %v2022_v29 }
 0x3d7   : > { %v2169_v47 = vpop.f32.mrf.mxu2 }
 0x3d8   : > { %v2255_v12 = vpop.f32.mrf.mxu3  ;;  %v2191_v22 = vadd.f32 %v2169_v47, %v2105_v19 }
 0x3da   : > { %v2428_v20 = vpop.f32.mrf.mxu1  ;;  %v2277_v30 = vadd.f32 %v2255_v12, %v2191_v22  ;;  %v2020_v12 = vadd.f32 %v11119_v35, %v1923_v5  ;;  %v1938_v5 = vadd.f32 %v11156_v56, %v11128_v40 }
 0x3db   : > { %v11206_v33 = vpop.f32.mrf.mxu0 }
 0x3dc   : > { %v2364_v47 = vadd.f32 %v2342_v15, %v2277_v30  ;;  %v2106_v35 = vadd.f32 %v11123_v38, %v2020_v12  ;;  %v1932_v38 = vadd.f32 %v11140_v48, %v11112_v32  ;;  %v2025_v56 = vadd.f32 %v11160_v58, %v1938_v5  ;;  %v2565_v58 = vld [vmem:[%s10575_s16 + $0x10] sm:$0xff] }
 0x3de   : > { %v2450_v7 = vadd.f32 %v2428_v20, %v2364_v47  ;;  %v2023_v48 = vadd.f32 %v11142_v49, %v1932_v38  ;;  %v2111_v29 = vadd.f32 %v11162_v59, %v2025_v56  ;;  %v2568_v38 = vld [vmem:[%s10575_s16 + $0x28] sm:$0xff] }
 0x3df   : > { %v11144_v50 = vpop.f32.mrf.mxu2 }
 0x3e0   : > { %v11190_v23 = vpop.f32.mrf.mxu3  ;;  %v2192_v22 = vadd.f32 %v11144_v50, %v2106_v35  ;;  %v2109_v30 = vadd.f32 %v11146_v51, %v2023_v48 }
 0x3e2   : > { %v11217_v62 = vpop.f32.mrf.mxu1  ;;  %v2278_v50 = vadd.f32 %v11190_v23, %v2192_v22 }
 0x3e3   : > { %v2348_v34 = vpop.f32.mrf.mxu0 }
 0x3e7   : > { %v11152_v54 = vpop.f32.mrf.mxu2 }
 0x3e8   : > { %v2261_v3 = vpop.f32.mrf.mxu3  ;;  %v2193_v42 = vadd.f32 %v11152_v54, %v2107_v41 }
 0x3ea   : > { %v2434_v14 = vpop.f32.mrf.mxu1  ;;  %v2279_v54 = vadd.f32 %v2261_v3, %v2193_v42 }
 0x3eb   : > { %v2351_v46 = vpop.f32.mrf.mxu0 }
 0x3ec   : > { %v2366_v47 = vadd.f32 %v2348_v34, %v2279_v54 }
 0x3ef   : > { %v11158_v57 = vpop.f32.mrf.mxu2 }
 0x3f0   : > { %v2264_v16 = vpop.f32.mrf.mxu3  ;;  %v2194_v32 = vadd.f32 %v11158_v57, %v2108_v21 }
 0x3f2   : > { %v2280_v26 = vadd.f32 %v2264_v16, %v2194_v32  ;;  %v2437_v57 = vpop.f32.mrf.mxu1 }
 0x3f7   : > { %v11164_v61 = vpop.f32.mrf.mxu2 }
 0x3f8   : > { %v2195_v51 = vadd.f32 %v11164_v61, %v2109_v30 }
 0x3ff   : > { %v11166_v6 = vpop.f32.mrf.mxu2 }
 0x407   : > { %v11178_v17 = vpop.f32.mrf.mxu2 }
 0x408   : > { %v2197_v16 = vadd.f32 %v11178_v17, %v2111_v29 }
 0x40f   : > { %v2511_v37 = vpop.f32.mrf.mxu2 }
 0x410   : > { %v2535_v44 = vadd.f32 %v2511_v37, %v2449_v28  ;;  %v1935_v37 = vadd.f32 %v11148_v52, %v11121_v36  ;;  %v2367_v36 = vadd.f32 %v2351_v46, %v2280_v26 }
 0x412   : > { %v2547_v60 = vadd.f32 %v11202_v31, %v2535_v44  ;;  %v2365_v44 = vadd.f32 %v11206_v33, %v2278_v50  ;;  %v2024_v52 = vadd.f32 %v11150_v53, %v1935_v37  ;;  %v2453_v2 = vadd.f32 %v2437_v57, %v2367_v36  ;;  %v2569_v37 = vld [vmem:[%s10575_s16 + $0x30] sm:$0xff] }
 0x414   : > { %v2555_v1 = vmax.f32 %v2547_v60, 0.0  ;;  %v2267_v60 = vpop.f32.mrf.mxu3  ;;  %v2451_v33 = vadd.f32 %v11217_v62, %v2365_v44  ;;  %v2110_v62 = vadd.f32 %v11154_v55, %v2024_v52 }
 0x415   : > { %v2281_v61 = vadd.f32 %v2267_v60, %v2195_v51 }
 0x416   : > { %v2571_v8 = vadd.f32 %v2563_v63, %v2555_v1  ;;  %v2452_v63 = vadd.f32 %v2434_v14, %v2366_v47  ;;  %v2354_v1 = vpop.f32.mrf.mxu0 }
 0x417   : > { %v2514_v10 = vpop.f32.mrf.mxu2  ;;  %v2368_v9 = vadd.f32 %v2354_v1, %v2281_v61  ;;  %v2917_v1 = vld [vmem:[#allocation15 + $0x48] sm:$0xff] }
 0x418   : > { %2580 = vst.msk [vmem:[#allocation3 + $0x11] sm:$0xff] %vm857_vm4, %v2571_v8  ;;  %v2536_v24 = vadd.f32 %v2514_v10, %v2450_v7  ;;  %v2440_v8 = vpop.f32.mrf.mxu1  ;;  %v2196_v10 = vadd.f32 %v11166_v6, %v2110_v62  ;;  %v3086_v61 = vld [vmem:[#allocation15 + $0x68] sm:$0xff]  ;;  %2956 = vmatpush.msrb.mxu3 %v2917_v1  ;;  %v3085_v62 = vld [vmem:[#allocation15 + $0x60] sm:$0xff] }
 0x419   : > { %3125 = vmatpush.msrb.mxu1 %v3086_v61 }
 0x41a   : > { %v2548_v13 = vadd.f32 %v11202_v31, %v2536_v24  ;;  %v2454_v24 = vadd.f32 %v2440_v8, %v2368_v9  ;;  %v2570_v8 = vld [vmem:[%s10575_s16 + $0x38] sm:$0xff] }
 0x41b   : > { %3126 = vmatpush.msrb.mxu1 %v3085_v62 }
 0x41c   : > { %v2556_v43 = vmax.f32 %v2548_v13, 0.0  ;;  %v2270_v11 = vpop.f32.mrf.mxu3 }
 0x41d   : > { %v2282_v34 = vadd.f32 %v2270_v11, %v2196_v10  ;;  %v3169_v11 = vld [vmem:[#allocation15 + $0x70] sm:$0xff] }
 0x41e   : > { %v2572_v15 = vadd.f32 %v2564_v39, %v2556_v43  ;;  %v2357_v13 = vpop.f32.mrf.mxu0  ;;  %v2566_v43 = vld [vmem:[%s10575_s16 + $0x18] sm:$0xff] }
 0x41f   : > { %v2517_v45 = vpop.f32.mrf.mxu2  ;;  %v11259_v18 = vld [vmem:[#allocation3 + $0x11] sm:$0xff]  ;;  %v2369_v41 = vadd.f32 %v2357_v13, %v2282_v34 }
 0x420   : > { %v2589_v19 = vld [vmem:[#allocation3 + $0x10] sm:$0xff]  ;;  %2581 = vst.msk [vmem:[#allocation3 + $0x21] sm:$0xff] %vm857_vm4, %v2572_v15  ;;  %9131 = vmatmul.msk.f32.gmra.mxu3 %vm857_vm4, %v11259_v18  ;;  %v2537_v3 = vadd.f32 %v2517_v45, %v2451_v33  ;;  %v2567_v15 = vld [vmem:[%s10575_s16 + $0x20] sm:$0xff]  ;;  %v2443_v59 = vpop.f32.mrf.mxu1  ;;  %s8683_s16 = scalar_lea.sflag [#allocation9], %s10569_s22 }
 0x421   : > { %v11261_v20 = vld [vmem:[#allocation3 + $0x12] sm:$0xff]  ;;  %9139 = vmatmul.msk.f32.gmra.mxu0 %vm857_vm4, %v2589_v19  ;;  %9154 = vmatmul.msk.f32.vlgmr.msra.gmra.mxu2 %vm857_vm4, %v2589_v19  ;;  %v2455_v17 = vadd.f32 %v2443_v59, %v2369_v41 }
 0x422   : > { %9147 = vmatmul.msk.f32.gmra.mxu1 %vm857_vm4, %v11261_v20  ;;  %v2549_v55 = vadd.f32 %v11202_v31, %v2537_v3 }
 0x424   : > { %v2557_v12 = vmax.f32 %v2549_v55, 0.0  ;;  %v2273_v32 = vpop.f32.mrf.mxu3  ;;  %v3170_v55 = vld [vmem:[#allocation15 + $0x78] sm:$0xff] }
 0x425   : > { %v2283_v46 = vadd.f32 %v2273_v32, %v2197_v16  ;;  %3209 = vmatpush.msrb.mxu2 %v3170_v55 }
 0x426   : > { %v2573_v45 = vadd.f32 %v2565_v58, %v2557_v12  ;;  %v2360_v50 = vpop.f32.mrf.mxu0 }
 0x427   : > { %v2520_v27 = vpop.f32.mrf.mxu2  ;;  %v11292_v28 = vld [vmem:[#allocation3 + $0x21] sm:$0xff]  ;;  %v2370_v57 = vadd.f32 %v2360_v50, %v2283_v46  ;;  %3210 = vmatpush.msrb.mxu2 %v3169_v11 }
 0x428   : > { %v11294_v49 = vld [vmem:[#allocation3 + $0x20] sm:$0xff]  ;;  %9132 = vmatmul.msk.f32.gmra.mxu3 %vm857_vm4, %v11292_v28  ;;  %v2538_v53 = vadd.f32 %v2520_v27, %v2452_v63  ;;  %2582 = vst.msk [vmem:[#allocation3 + $0x31] sm:$0xff] %vm857_vm4, %v2573_v45  ;;  %v2446_v30 = vpop.f32.mrf.mxu1 }
 0x429   : > { %v11296_v23 = vld [vmem:[#allocation3 + $0x22] sm:$0xff]  ;;  %9140 = vmatmul.msk.f32.gmra.mxu0 %vm857_vm4, %v11294_v49  ;;  %9155 = vmatmul.msk.f32.gmra.mxu2 %vm857_vm4, %v11294_v49  ;;  %v2456_v51 = vadd.f32 %v2446_v30, %v2370_v57 }
 0x42a   : > { %9148 = vmatmul.msk.f32.gmra.mxu1 %vm857_vm4, %v11296_v23  ;;  %v2550_v40 = vadd.f32 %v11202_v31, %v2538_v53  ;;  %v2916_v53 = vld [vmem:[#allocation15 + $0x40] sm:$0xff] }
 0x42b   : > { %2957 = vmatpush.msrb.mxu3 %v2916_v53 }
 0x42c   : > { %v2558_v25 = vmax.f32 %v2550_v40, 0.0 }
 0x42e   : > { %v2574_v21 = vadd.f32 %v2566_v43, %v2558_v25  ;;  %v2715_v16 = vpop.f32.mrf.mxu0 }
 0x42f   : > { %v2523_v4 = vpop.f32.mrf.mxu2  ;;  %v11378_v47 = vld [vmem:[#allocation3 + $0x31] sm:$0xff] }
 0x430   : > { %v2539_v7 = vadd.f32 %v2523_v4, %v2453_v2  ;;  %2583 = vst.msk [vmem:[#allocation3 + $0x41] sm:$0xff] %vm857_vm4, %v2574_v21  ;;  %v11380_v60 = vld [vmem:[#allocation3 + $0x30] sm:$0xff]  ;;  %9133 = vmatmul.msk.f32.gmra.mxu3 %vm857_vm4, %v11378_v47  ;;  %v3001_v2 = vld [vmem:[#allocation15 + $0x58] sm:$0xff]  ;;  %v3000_v4 = vld [vmem:[#allocation15 + $0x50] sm:$0xff]  ;;  %v2791_v45 = vpop.f32.mrf.mxu1 }
 0x431   : > { %v11382_v36 = vld [vmem:[#allocation3 + $0x32] sm:$0xff]  ;;  %9141 = vmatmul.msk.f32.gmra.mxu0 %vm857_vm4, %v11380_v60  ;;  %9156 = vmatmul.msk.f32.gmra.mxu2 %vm857_vm4, %v11380_v60  ;;  %v2650_v43 = vpop.f32.mrf.mxu3 }
 0x432   : > { %v2551_v6 = vadd.f32 %v11202_v31, %v2539_v7  ;;  %9149 = vmatmul.msk.f32.gmra.mxu1 %vm857_vm4, %v11382_v36  ;;  %3040 = vmatpush.msrb.mxu0 %v3001_v2 }
 0x434   : > { %v2559_v14 = vmax.f32 %v2551_v6, 0.0  ;;  %3041 = vmatpush.msrb.mxu0 %v3000_v4 }
 0x436   : > { %v2575_v22 = vadd.f32 %v2567_v15, %v2559_v14  ;;  %v3167_v14 = vld [vmem:[#allocation3 + $0x91] sm:$0xff] }
 0x437   : > { %v2526_v39 = vpop.f32.mrf.mxu2  ;;  %v2602_v5 = vld [vmem:[#allocation3 + $0x41] sm:$0xff] }
 0x438   : > { %v2540_v35 = vadd.f32 %v2526_v39, %v2454_v24  ;;  %2584 = vst.msk [vmem:[#allocation3 + $0x51] sm:$0xff] %vm857_vm4, %v2575_v22  ;;  %v2592_v7 = vld [vmem:[#allocation3 + $0x40] sm:$0xff]  ;;  %9134 = vmatmul.msk.f32.gmra.mxu3 %vm857_vm4, %v2602_v5 }
 0x439   : > { %v11395_v9 = vld [vmem:[#allocation3 + $0x42] sm:$0xff]  ;;  %9142 = vmatmul.msk.f32.gmra.mxu0 %vm857_vm4, %v2592_v7  ;;  %9157 = vmatmul.msk.f32.gmra.mxu2 %vm857_vm4, %v2592_v7 }
 0x43a   : > { %v2552_v19 = vadd.f32 %v11202_v31, %v2540_v35  ;;  %9150 = vmatmul.msk.f32.gmra.mxu1 %vm857_vm4, %v11395_v9 }
 0x43c   : > { %v2560_v42 = vmax.f32 %v2552_v19, 0.0 }
 0x43e   : > { %v2576_v48 = vadd.f32 %v2568_v38, %v2560_v42 }
 0x43f   : > { %v2529_v54 = vpop.f32.mrf.mxu2  ;;  %v2603_v40 = vld [vmem:[#allocation3 + $0x51] sm:$0xff] }
 0x440   : > { %v2541_v26 = vadd.f32 %v2529_v54, %v2455_v17  ;;  %2585 = vst.msk [vmem:[#allocation3 + $0x61] sm:$0xff] %vm857_vm4, %v2576_v48  ;;  %v2593_v56 = vld [vmem:[#allocation3 + $0x50] sm:$0xff]  ;;  %9135 = vmatmul.msk.f32.gmra.mxu3 %vm857_vm4, %v2603_v40 }
 0x441   : > { %v11403_v6 = vld [vmem:[#allocation3 + $0x52] sm:$0xff]  ;;  %9143 = vmatmul.msk.f32.gmra.mxu0 %vm857_vm4, %v2593_v56  ;;  %9158 = vmatmul.msk.f32.gmra.mxu2 %vm857_vm4, %v2593_v56 }
 0x442   : > { %v2553_v27 = vadd.f32 %v11202_v31, %v2541_v26  ;;  %9151 = vmatmul.msk.f32.gmra.mxu1 %vm857_vm4, %v11403_v6  ;;  %v3251_v48 = vld [vmem:[#allocation3 + $0x92] sm:$0xff] }
 0x444   : > { %v2561_v44 = vmax.f32 %v2553_v27, 0.0 }
 0x446   : > { %v2577_v52 = vadd.f32 %v2569_v37, %v2561_v44 }
 0x447   : > { %v2532_v33 = vpop.f32.mrf.mxu2  ;;  %v2604_v24 = vld [vmem:[#allocation3 + $0x61] sm:$0xff] }
 0x448   : > { %2586 = vst.msk [vmem:[#allocation3 + $0x71] sm:$0xff] %vm857_vm4, %v2577_v52  ;;  %v2542_v63 = vadd.f32 %v2532_v33, %v2456_v51  ;;  %v2594_v34 = vld [vmem:[#allocation3 + $0x60] sm:$0xff]  ;;  %9136 = vmatmul.msk.f32.gmra.mxu3 %vm857_vm4, %v2604_v24 }
 0x449   : > { %v11410_v12 = vld [vmem:[#allocation3 + $0x62] sm:$0xff]  ;;  %9144 = vmatmul.msk.f32.gmra.mxu0 %vm857_vm4, %v2594_v34  ;;  %9159 = vmatmul.msk.f32.gmra.mxu2 %vm857_vm4, %v2594_v34 }
 0x44a   : > { %v2554_v3 = vadd.f32 %v11202_v31, %v2542_v63  ;;  %9152 = vmatmul.msk.f32.gmra.mxu1 %vm857_vm4, %v11410_v12 }
 0x44c   : > { %v2562_v10 = vmax.f32 %v2554_v3, 0.0 }
 0x44e   : > { %v2578_v31 = vadd.f32 %v2570_v8, %v2562_v10 }
 0x44f   : > { %v2605_v13 = vld [vmem:[#allocation3 + $0x71] sm:$0xff] }
 0x450   : > { %2587 = vst.msk [vmem:[#allocation3 + $0x81] sm:$0xff] %vm857_vm4, %v2578_v31  ;;  %v2595_v58 = vld [vmem:[#allocation3 + $0x70] sm:$0xff]  ;;  %9137 = vmatmul.msk.f32.gmra.mxu3 %vm857_vm4, %v2605_v13 }
 0x451   : > { %v2746_v25 = vld [vmem:[#allocation3 + $0x72] sm:$0xff]  ;;  %9145 = vmatmul.msk.f32.gmra.mxu0 %vm857_vm4, %v2595_v58  ;;  %9160 = vmatmul.msk.f32.gmra.mxu2 %vm857_vm4, %v2595_v58 }
 0x452   : > { %9153 = vmatmul.msk.f32.gmra.mxu1 %vm857_vm4, %v2746_v25 }
 0x457   : > { %v2830_v39 = vld [vmem:[#allocation3 + $0x80] sm:$0xff] }
 0x458   : > { %9162 = vmatmul.msk.f32.vlgmr.msrb.gmra.mxu3 %vm857_vm4, %v11259_v18  ;;  %v3254_v18 = vld [vmem:[#allocation15 + $0x88] sm:$0xff]  ;;  %v2998_v29 = vld [vmem:[#allocation3 + $0x82] sm:$0xff] }
 0x459   : > { %9170 = vmatmul.msk.f32.vlgmr.msrb.gmra.mxu0 %vm857_vm4, %v11261_v20  ;;  %9161 = vmatmul.msk.f32.gmra.mxu2 %vm857_vm4, %v2830_v39  ;;  %v3253_v20 = vld [vmem:[#allocation15 + $0x80] sm:$0xff] }
 0x45a   : > { %9178 = vmatmul.msk.f32.vlgmr.msrb.gmra.mxu1 %vm857_vm4, %v11294_v49  ;;  %3293 = vmatpush.msra.mxu3 %v3254_v18  ;;  %v2914_v49 = vld [vmem:[#allocation3 + $0x81] sm:$0xff] }
 0x45c   : > { %3294 = vmatpush.msra.mxu3 %v3253_v20 }
 0x460   : > { %9163 = vmatmul.msk.f32.gmra.mxu3 %vm857_vm4, %v11292_v28 }
 0x461   : > { %9171 = vmatmul.msk.f32.gmra.mxu0 %vm857_vm4, %v11296_v23  ;;  %9186 = vmatmul.msk.f32.vlgmr.msrb.gmra.mxu2 %vm857_vm4, %v11292_v28  ;;  %v3083_v28 = vld [vmem:[#allocation3 + $0x90] sm:$0xff] }
 0x462   : > { %9179 = vmatmul.msk.f32.gmra.mxu1 %vm857_vm4, %v11380_v60 }
 0x468   : > { %9164 = vmatmul.msk.f32.gmra.mxu3 %vm857_vm4, %v11378_v47 }
 0x469   : > { %9172 = vmatmul.msk.f32.gmra.mxu0 %vm857_vm4, %v11382_v36  ;;  %9187 = vmatmul.msk.f32.gmra.mxu2 %vm857_vm4, %v11378_v47 }
 0x46a   : > { %9180 = vmatmul.msk.f32.gmra.mxu1 %vm857_vm4, %v2592_v7  ;;  %v2716_v7 = vadd.f32 %v2715_v16, %v2650_v43 }
 0x46c   : > { %v2815_v31 = vadd.f32 %v2791_v45, %v2716_v7 }
 0x470   : > { %9165 = vmatmul.msk.f32.gmra.mxu3 %vm857_vm4, %v2602_v5 }
 0x471   : > { %9173 = vmatmul.msk.f32.gmra.mxu0 %vm857_vm4, %v11395_v9  ;;  %9188 = vmatmul.msk.f32.gmra.mxu2 %vm857_vm4, %v2602_v5 }
 0x472   : > { %9181 = vmatmul.msk.f32.gmra.mxu1 %vm857_vm4, %v2593_v56 }
 0x478   : > { %9166 = vmatmul.msk.f32.gmra.mxu3 %vm857_vm4, %v2603_v40 }
 0x479   : > { %9174 = vmatmul.msk.f32.gmra.mxu0 %vm857_vm4, %v11403_v6  ;;  %9189 = vmatmul.msk.f32.gmra.mxu2 %vm857_vm4, %v2603_v40 }
 0x47a   : > { %9182 = vmatmul.msk.f32.gmra.mxu1 %vm857_vm4, %v2594_v34 }
 0x480   : > { %9167 = vmatmul.msk.f32.gmra.mxu3 %vm857_vm4, %v2604_v24 }
 0x481   : > { %9175 = vmatmul.msk.f32.gmra.mxu0 %vm857_vm4, %v11410_v12  ;;  %9190 = vmatmul.msk.f32.gmra.mxu2 %vm857_vm4, %v2604_v24 }
 0x482   : > { %9183 = vmatmul.msk.f32.gmra.mxu1 %vm857_vm4, %v2595_v58 }
 0x488   : > { %9168 = vmatmul.msk.f32.gmra.mxu3 %vm857_vm4, %v2605_v13 }
 0x489   : > { %9176 = vmatmul.msk.f32.gmra.mxu0 %vm857_vm4, %v2746_v25  ;;  %9191 = vmatmul.msk.f32.gmra.mxu2 %vm857_vm4, %v2605_v13 }
 0x48a   : > { %9184 = vmatmul.msk.f32.gmra.mxu1 %vm857_vm4, %v2830_v39 }
 0x490   : > { %9169 = vmatmul.msk.f32.gmra.mxu3 %vm857_vm4, %v2914_v49 }
 0x491   : > { %9177 = vmatmul.msk.f32.gmra.mxu0 %vm857_vm4, %v2998_v29  ;;  %9192 = vmatmul.msk.f32.gmra.mxu2 %vm857_vm4, %v2914_v49  ;;  %v11542_v49 = vld [vmem:[%s14612_s14] ss:$0 sm:$0xff] }
 0x492   : > { %9185 = vmatmul.msk.f32.gmra.mxu1 %vm857_vm4, %v3083_v28 }
 0x498   : > { %9194 = vmatmul.msk.f32.vlgmr.msra.gmra.mxu3 %vm857_vm4, %v11296_v23 }
 0x499   : > { %9193 = vmatmul.msk.f32.gmra.mxu2 %vm857_vm4, %v3167_v14 }
 0x49e   : > { %v2718_v59 = vpop.f32.mrf.mxu0 }
 0x49f   : > { %v2794_v21 = vpop.f32.mrf.mxu1 }
 0x4a0   : > { %9195 = vmatmul.msk.f32.gmra.mxu3 %vm857_vm4, %v11382_v36 }
 0x4a3   : > { %v2653_v35 = vpop.f32.mrf.mxu3 }
 0x4a4   : > { %v2875_v23 = vpop.f32.mrf.mxu2  ;;  %v2719_v40 = vadd.f32 %v2718_v59, %v2653_v35 }
 0x4a5   : > { %v2899_v55 = vadd.f32 %v2875_v23, %v2815_v31 }
 0x4a6   : > { %v2721_v42 = vpop.f32.mrf.mxu0 }
 0x4a7   : > { %v2797_v17 = vpop.f32.mrf.mxu1 }
 0x4a8   : > { %9196 = vmatmul.msk.f32.gmra.mxu3 %vm857_vm4, %v11395_v9 }
 0x4ab   : > { %v11473_v15 = vpop.f32.mrf.mxu3 }
 0x4ac   : > { %v2878_v38 = vpop.f32.mrf.mxu2 }
 0x4ae   : > { %v2724_v50 = vpop.f32.mrf.mxu0 }
 0x4af   : > { %v11492_v26 = vpop.f32.mrf.mxu1 }
 0x4b0   : > { %9197 = vmatmul.msk.f32.gmra.mxu3 %vm857_vm4, %v11403_v6 }
 0x4b3   : > { %v11477_v41 = vpop.f32.mrf.mxu3 }
 0x4b4   : > { %v2881_v46 = vpop.f32.mrf.mxu2 }
 0x4b6   : > { %v11496_v30 = vpop.f32.mrf.mxu0 }
 0x4b7   : > { %v11498_v37 = vpop.f32.mrf.mxu1 }
 0x4b8   : > { %9198 = vmatmul.msk.f32.gmra.mxu3 %vm857_vm4, %v11410_v12  ;;  %v2816_v12 = vadd.f32 %v2794_v21, %v2719_v40  ;;  %v11568_v40 = vld [vmem:[%s14744_s7 + $0x8] sm:$0xff] }
 0x4ba   : > { %v2900_v58 = vadd.f32 %v2878_v38, %v2816_v12 }
 0x4bb   : > { %v11481_v19 = vpop.f32.mrf.mxu3 }
 0x4bc   : > { %v11494_v57 = vpop.f32.mrf.mxu2 }
 0x4be   : > { %v11502_v60 = vpop.f32.mrf.mxu0 }
 0x4bf   : > { %v11504_v36 = vpop.f32.mrf.mxu1 }
 0x4c0   : > { %9199 = vmatmul.msk.f32.gmra.mxu3 %vm857_vm4, %v2746_v25  ;;  %v2722_v25 = vadd.f32 %v2721_v42, %v11473_v15  ;;  %v2725_v15 = vadd.f32 %v2724_v50, %v11477_v41 }
 0x4c2   : > { %v2817_v43 = vadd.f32 %v2797_v17, %v2722_v25  ;;  %v2818_v41 = vadd.f32 %v11492_v26, %v2725_v15 }
 0x4c3   : > { %v11484_v22 = vpop.f32.mrf.mxu3 }
 0x4c4   : > { %v11500_v44 = vpop.f32.mrf.mxu2  ;;  %v2901_v23 = vadd.f32 %v2881_v46, %v2817_v43  ;;  %v2731_v12 = vadd.f32 %v11502_v60, %v11484_v22 }
 0x4c6   : > { %v11508_v33 = vpop.f32.mrf.mxu0  ;;  %v2820_v22 = vadd.f32 %v11504_v36, %v2731_v12 }
 0x4c7   : > { %v11512_v1 = vpop.f32.mrf.mxu1 }
 0x4c8   : > { %9200 = vmatmul.msk.f32.gmra.mxu3 %vm857_vm4, %v2998_v29 }
 0x4cb   : > { %v11487_v32 = vpop.f32.mrf.mxu3 }
 0x4cc   : > { %v11506_v51 = vpop.f32.mrf.mxu2  ;;  %v2734_v43 = vadd.f32 %v11508_v33, %v11487_v32 }
 0x4ce   : > { %v11516_v61 = vpop.f32.mrf.mxu0  ;;  %v2821_v32 = vadd.f32 %v11512_v1, %v2734_v43  ;;  %v3614_v1 = vld [vmem:[%s14745_s20 + $0x8] sm:$0xff] }
 0x4cf   : > { %v11520_v53 = vpop.f32.mrf.mxu1  ;;  %9834 = vmatpush.msrb.mxu3 %v3614_v1 }
 0x4d0   : > { %9201 = vmatmul.msk.f32.gmra.mxu3 %vm857_vm4, %v3251_v48  ;;  %v11549_v48 = vld [vmem:[%s14744_s7] sm:$0xff] }
 0x4d3   : > { %v11490_v54 = vpop.f32.mrf.mxu3 }
 0x4d4   : > { %v11514_v2 = vpop.f32.mrf.mxu2 }
 0x4d6   : > { %v3043_v5 = vpop.f32.mrf.mxu0 }
 0x4d7   : > { %v3128_v8 = vpop.f32.mrf.mxu1 }
 0x4db   : > { %v2959_v27 = vpop.f32.mrf.mxu3 }
 0x4dc   : > { %v11522_v4 = vpop.f32.mrf.mxu2  ;;  %v2983_v56 = vadd.f32 %v2959_v27, %v2899_v55 }
 0x4de   : > { %v3046_v11 = vpop.f32.mrf.mxu0  ;;  %v3067_v13 = vadd.f32 %v3043_v5, %v2983_v56 }
 0x4df   : > { %v3131_v6 = vpop.f32.mrf.mxu1 }
 0x4e0   : > { %v3152_v18 = vadd.f32 %v3128_v8, %v3067_v13 }
 0x4e3   : > { %v2962_v47 = vpop.f32.mrf.mxu3 }
 0x4e4   : > { %v3212_v9 = vpop.f32.mrf.mxu2  ;;  %v2984_v39 = vadd.f32 %v2962_v47, %v2900_v58 }
 0x4e5   : > { %v3236_v28 = vadd.f32 %v3212_v9, %v3152_v18  ;;  %v2728_v9 = vadd.f32 %v11496_v30, %v11481_v19 }
 0x4e6   : > { %v3049_v20 = vpop.f32.mrf.mxu0  ;;  %v3068_v14 = vadd.f32 %v3046_v11, %v2984_v39 }
 0x4e7   : > { %v3134_v35 = vpop.f32.mrf.mxu1  ;;  %v2819_v19 = vadd.f32 %v11498_v37, %v2728_v9 }
 0x4e8   : > { %v3153_v38 = vadd.f32 %v3131_v6, %v3068_v14 }
 0x4e9   : > { %v2903_v6 = vadd.f32 %v11500_v44, %v2819_v19 }
 0x4eb   : > { %v2965_v52 = vpop.f32.mrf.mxu3 }
 0x4ec   : > { %v3215_v24 = vpop.f32.mrf.mxu2  ;;  %v2985_v21 = vadd.f32 %v2965_v52, %v2901_v23  ;;  %v2902_v52 = vadd.f32 %v11494_v57, %v2818_v41 }
 0x4ed   : > { %v3237_v27 = vadd.f32 %v3215_v24, %v3153_v38 }
 0x4ee   : > { %v3052_v17 = vpop.f32.mrf.mxu0  ;;  %v3069_v50 = vadd.f32 %v3049_v20, %v2985_v21  ;;  %v2737_v21 = vadd.f32 %v11516_v61, %v11490_v54  ;;  %v9219_v54 = vld [vmem:[%s14745_s20 + $0x18] sm:$0xff] }
 0x4ef   : > { %v3137_v5 = vpop.f32.mrf.mxu1  ;;  %9832 = vmatpush.msra.mxu2 %v9219_v54 }
 0x4f0   : > { %v3154_v55 = vadd.f32 %v3134_v35, %v3069_v50 }
 0x4f3   : > { %v11510_v63 = vpop.f32.mrf.mxu3 }
 0x4f4   : > { %v3218_v45 = vpop.f32.mrf.mxu2  ;;  %v2986_v31 = vadd.f32 %v11510_v63, %v2902_v52  ;;  %v9218_v52 = vld [vmem:[%s14745_s20 + $0x10] sm:$0xff] }
 0x4f5   : > { %v3238_v26 = vadd.f32 %v3218_v45, %v3154_v55  ;;  %9833 = vmatpush.msra.mxu2 %v9218_v52 }
 0x4f6   : > { %v3070_v30 = vadd.f32 %v3052_v17, %v2986_v31  ;;  %v3055_v56 = vpop.f32.mrf.mxu0 }
 0x4f7   : > { %v3140_v13 = vpop.f32.mrf.mxu1 }
 0x4f8   : > { %v3155_v25 = vadd.f32 %v3137_v5, %v3070_v30  ;;  %v3613_v5 = vld [vmem:[%s14745_s20] sm:$0xff] }
 0x4f9   : > { %9835 = vmatpush.msrb.mxu3 %v3613_v5 }
 0x4fb   : > { %v11518_v3 = vpop.f32.mrf.mxu3 }
 0x4fc   : > { %v3221_v8 = vpop.f32.mrf.mxu2  ;;  %v2987_v58 = vadd.f32 %v11518_v3, %v2903_v6  ;;  %v2904_v3 = vadd.f32 %v11506_v51, %v2820_v22 }
 0x4fd   : > { %v3239_v20 = vadd.f32 %v3221_v8, %v3155_v25  ;;  %v3615_v25 = vld [vmem:[#allocation6 + $0x1] sm:$0xff] }
 0x4fe   : > { %v3071_v44 = vadd.f32 %v3055_v56, %v2987_v58 }
 0x4ff   : > { %v3143_v45 = vpop.f32.mrf.mxu1 }
 0x500   : > { %v3156_v35 = vadd.f32 %v3140_v13, %v3071_v44 }
 0x503   : > { %v11524_v62 = vpop.f32.mrf.mxu3 }
 0x504   : > { %v3224_v18 = vpop.f32.mrf.mxu2  ;;  %v2988_v14 = vadd.f32 %v11524_v62, %v2904_v3  ;;  %v2905_v62 = vadd.f32 %v11514_v2, %v2821_v32  ;;  %v2822_v2 = vadd.f32 %v11520_v53, %v2737_v21 }
 0x505   : > { %v3240_v23 = vadd.f32 %v3224_v18, %v3156_v35  ;;  %v3582_v18 = vld [vmem:[#allocation6 + $0x8] sm:$0xff] }
 0x507   : > { %v3146_v50 = vpop.f32.mrf.mxu1 }
 0x50b   : > { %v11534_v10 = vpop.f32.mrf.mxu3 }
 0x50c   : > { %v3227_v36 = vpop.f32.mrf.mxu2  ;;  %v2989_v38 = vadd.f32 %v11534_v10, %v2905_v62 }
 0x50f   : > { %v3149_v19 = vpop.f32.mrf.mxu1 }
 0x513   : > { %v11536_v34 = vpop.f32.mrf.mxu3 }
 0x51b   : > { %v3296_v29 = vpop.f32.mrf.mxu3 }
 0x51c   : > { %v3320_v16 = vadd.f32 %v3296_v29, %v3236_v28  ;;  %v3058_v29 = vpop.f32.mrf.mxu0 }
 0x51d   : > { %v3072_v51 = vadd.f32 %v3058_v29, %v2988_v14 }
 0x51e   : > { %v3332_v59 = vadd.f32 %v11542_v49, %v3320_v16 }
 0x520   : > { %v3340_v42 = vmax.f32 %v3332_v59, 0.0 }
 0x522   : > { %3348 = vst.msk [vmem:[%s11553_s5] sm:$0xff] %vm857_vm4, %v3340_v42  ;;  %3379 = vmatpush.msra.mxu0 %v3340_v42  ;;  %v3157_v42 = vadd.f32 %v3143_v45, %v3072_v51 }
 0x523   : > { %v3299_v46 = vpop.f32.mrf.mxu3  ;;  %9202 = vmatmul.msk.f32.vlgmr.msra.gmra.mxu0 %vm885_vm10, %v11549_v48 }
 0x524   : > { %v3321_v47 = vadd.f32 %v3299_v46, %v3237_v27  ;;  %v3061_v17 = vpop.f32.mrf.mxu0  ;;  %v3241_v46 = vadd.f32 %v3227_v36, %v3157_v42 }
 0x525   : > { %v3073_v61 = vadd.f32 %v3061_v17, %v2989_v38 }
 0x526   : > { %v3333_v7 = vadd.f32 %v11542_v49, %v3321_v47  ;;  %v3230_v47 = vpop.f32.mrf.mxu2 }
 0x527   : > { %v3158_v9 = vadd.f32 %v3146_v50, %v3073_v61 }
 0x528   : > { %v3341_v11 = vmax.f32 %v3333_v7, 0.0  ;;  %v2906_v7 = vadd.f32 %v11522_v4, %v2822_v2 }
 0x529   : > { %v3242_v55 = vadd.f32 %v3230_v47, %v3158_v9 }
 0x52a   : > { %3349 = vst.msk [vmem:[%s11553_s5 + $0x8] sm:$0xff] %vm857_vm4, %v3341_v11  ;;  %3402 = vmatpush.msra.mxu1 %v3341_v11  ;;  %v2990_v53 = vadd.f32 %v11536_v34, %v2906_v7 }
 0x52b   : > { %v3302_v57 = vpop.f32.mrf.mxu3  ;;  %9203 = vmatmul.msk.f32.gmra.mxu0 %vm885_vm10, %v11568_v40  ;;  %9204 = vmatmul.msk.f32.vlgmr.msra.gmra.mxu1 %vm885_vm10, %v11549_v48 }
 0x52c   : > { %v3322_v63 = vadd.f32 %v3302_v57, %v3238_v26  ;;  %v3064_v11 = vpop.f32.mrf.mxu0 }
 0x52d   : > { %v3074_v4 = vadd.f32 %v3064_v11, %v2990_v53  ;;  %v9319_v11 = vld [vmem:[%s14745_s20 + $0x38] sm:$0xff] }
 0x52e   : > { %v3334_v24 = vadd.f32 %v11542_v49, %v3322_v63  ;;  %v3233_v30 = vpop.f32.mrf.mxu2 }
 0x52f   : > { %v3159_v63 = vadd.f32 %v3149_v19, %v3074_v4  ;;  %v9318_v4 = vld [vmem:[%s14745_s20 + $0x30] sm:$0xff] }
 0x530   : > { %v3342_v39 = vmax.f32 %v3334_v24, 0.0 }
 0x531   : > { %v3243_v6 = vadd.f32 %v3233_v30, %v3159_v63 }
 0x532   : > { %3350 = vst.msk [vmem:[%s11553_s5 + $0x10] sm:$0xff] %vm857_vm4, %v3342_v39  ;;  %3425 = vmatpush.msrb.mxu0 %v3342_v39  ;;  %v3616_v39 = vld [vmem:[#allocation6 + $0x9] sm:$0xff] }
 0x533   : > { %v3305_v37 = vpop.f32.mrf.mxu3  ;;  %9205 = vmatmul.msk.f32.gmra.mxu1 %vm885_vm10, %v11568_v40  ;;  %9206 = vmatmul.msk.f32.vlgmr.msrb.gmra.mxu0 %vm885_vm10, %v11549_v48 }
 0x534   : > { %v3323_v60 = vadd.f32 %v3305_v37, %v3239_v20 }
 0x536   : > { %v3335_v28 = vadd.f32 %v11542_v49, %v3323_v60 }
 0x538   : > { %v3343_v16 = vmax.f32 %v3335_v28, 0.0 }
 0x53a   : > { %3351 = vst.msk [vmem:[%s11553_s5 + $0x18] sm:$0xff] %vm857_vm4, %v3343_v16  ;;  %3448 = vmatpush.msrb.mxu1 %v3343_v16 }
 0x53b   : > { %v3308_v59 = vpop.f32.mrf.mxu3  ;;  %9208 = vmatmul.msk.f32.vlgmr.msrb.gmra.mxu1 %vm885_vm10, %v11549_v48  ;;  %9207 = vmatmul.msk.f32.gmra.mxu0 %vm885_vm10, %v11568_v40 }
 0x53c   : > { %v3324_v33 = vadd.f32 %v3308_v59, %v3240_v23 }
 0x53e   : > { %v3336_v15 = vadd.f32 %v11542_v49, %v3324_v33 }
 0x540   : > { %v3344_v27 = vmax.f32 %v3336_v15, 0.0 }
 0x542   : > { %3352 = vst.msk [vmem:[%s11553_s5 + $0x20] sm:$0xff] %vm857_vm4, %v3344_v27  ;;  %3471 = vmatpush.msra.mxu0 %v3344_v27 }
 0x543   : > { %v3311_v41 = vpop.f32.mrf.mxu3  ;;  %9209 = vmatmul.msk.f32.gmra.mxu1 %vm885_vm10, %v11568_v40  ;;  %9210 = vmatmul.msk.f32.vlgmr.msra.gmra.mxu0 %vm885_vm10, %v11549_v48 }
 0x544   : > { %v3325_v10 = vadd.f32 %v3311_v41, %v3241_v46 }
 0x546   : > { %v3337_v8 = vadd.f32 %v11542_v49, %v3325_v10 }
 0x548   : > { %v3345_v31 = vmax.f32 %v3337_v8, 0.0 }
 0x54a   : > { %3353 = vst.msk [vmem:[%s11553_s5 + $0x28] sm:$0xff] %vm857_vm4, %v3345_v31  ;;  %3494 = vmatpush.msra.mxu1 %v3345_v31 }
 0x54b   : > { %v3314_v26 = vpop.f32.mrf.mxu3  ;;  %9211 = vmatmul.msk.f32.gmra.mxu0 %vm885_vm10, %v11568_v40  ;;  %9212 = vmatmul.msk.f32.vlgmr.msra.gmra.mxu1 %vm885_vm10, %v11549_v48 }
 0x54c   : > { %v3326_v57 = vadd.f32 %v3314_v26, %v3242_v55  ;;  %v9285_v55 = vld [vmem:[%s14745_s20 + $0x28] sm:$0xff]  ;;  %v9284_v26 = vld [vmem:[%s14745_s20 + $0x20] sm:$0xff] }
 0x54e   : > { %v3338_v34 = vadd.f32 %v11542_v49, %v3326_v57 }
 0x550   : > { %v3346_v56 = vmax.f32 %v3338_v34, 0.0 }
 0x552   : > { %3354 = vst.msk [vmem:[%s11553_s5 + $0x30] sm:$0xff] %vm857_vm4, %v3346_v56  ;;  %3517 = vmatpush.msrb.mxu0 %v3346_v56 }
 0x553   : > { %v3317_v24 = vpop.f32.mrf.mxu3  ;;  %9213 = vmatmul.msk.f32.gmra.mxu1 %vm885_vm10, %v11568_v40  ;;  %9214 = vmatmul.msk.f32.vlgmr.msrb.gmra.mxu0 %vm885_vm10, %v11549_v48 }
 0x554   : > { %v3327_v12 = vadd.f32 %v3317_v24, %v3243_v6  ;;  %3760 = vmatpush.msra.mxu0 %v9219_v54 }
 0x556   : > { %v3339_v13 = vadd.f32 %v11542_v49, %v3327_v12  ;;  %3761 = vmatpush.msra.mxu0 %v9218_v52  ;;  %v3581_v49 = vld [vmem:[#allocation6] sm:$0xff] }
 0x558   : > { %v3347_v58 = vmax.f32 %v3339_v13, 0.0  ;;  %4213 = vmatpush.msrb.mxu0 %v9285_v55 }
 0x55a   : > { %3355 = vst.msk [vmem:[%s11553_s5 + $0x38] sm:$0xff] %vm857_vm4, %v3347_v58  ;;  %3540 = vmatpush.msrb.mxu1 %v3347_v58  ;;  %4214 = vmatpush.msrb.mxu0 %v9284_v26  ;;  %s10190_s5 = scalar_lea.hbm %s14995_s3, 128 }
 0x55b   : > { %9216 = vmatmul.msk.f32.vlgmr.msrb.gmra.mxu1 %vm885_vm10, %v11549_v48  ;;  %9215 = vmatmul.msk.f32.gmra.mxu0 %vm885_vm10, %v11568_v40  ;;  %p10192_p5 = scmp.lt.s32.totalorder %s10190_s5, %s10186_s4 }
 0x55c   : > { %3969 = vmatpush.msra.mxu1 %v3614_v1 }
 0x55d   : > { %p10193_p8 = por %p10192_p5, %p10191_p9 }
 0x55e   : > { %3970 = vmatpush.msra.mxu1 %v3613_v5  ;;  %v9353_v5 = vld [vmem:[%s14745_s20 + $0x48] sm:$0xff] }
 0x55f   : > { %4765 = vmatpush.msrb.mxu2 %v9353_v5  ;;  %p10194_p10 = pnand %p10193_p8, %p10189_p7 }
 0x560   : > { %4489 = vmatpush.msrb.mxu1 %v9319_v11 }
 0x562   : > { %4490 = vmatpush.msrb.mxu1 %v9318_v4  ;;  %v9352_v4 = vld [vmem:[%s14745_s20 + $0x40] sm:$0xff] }
 0x563   : > { %9217 = vmatmul.msk.f32.gmra.mxu1 %vm885_vm10, %v11568_v40  ;;  %9220 = vmatmul.msk.f32.vlgmr.msra.gmra.mxu0 %vm857_vm4, %v3615_v25 }
 0x564   : > { %4766 = vmatpush.msrb.mxu2 %v9352_v4  ;;  %v9386_v4 = vld [vmem:[%s14745_s20 + $0x50] sm:$0xff] }
 0x56b   : > { %9252 = vmatmul.msk.f32.vlgmr.msra.gmra.mxu1 %vm857_vm4, %v3581_v49  ;;  %9221 = vmatmul.msk.f32.gmra.mxu0 %vm857_vm4, %v3616_v39 }
 0x573   : > { %9253 = vmatmul.msk.f32.gmra.mxu1 %vm857_vm4, %v3582_v18 }
 0x5a0   : > { %v3381_v48 = vpop.f32.mrf.mxu0 }
 0x5a1   : > { %3549 = vst.msk [vmem:[#allocation6 + $0x19] sm:$0xff] %vm857_vm4, %v3381_v48 }
 0x5a2   : > { %3551 = vst.msk [vmem:[#allocation6 + $0x31] sm:$0xff] %vm857_vm4, %v3381_v48 }
 0x5a8   : > { %v3384_v20 = vpop.f32.mrf.mxu0  ;;  %v3404_v37 = vpop.f32.mrf.mxu1  ;;  %v11656_v22 = vld [vmem:[#allocation6 + $0x19] sm:$0xff] }
 0x5a9   : > { %v11658_v40 = vld [vmem:[#allocation6 + $0x18] sm:$0xff]  ;;  %3550 = vst.msk [vmem:[#allocation6 + $0x21] sm:$0xff] %vm857_vm4, %v3384_v20  ;;  %9222 = vmatmul.msk.f32.gmra.mxu0 %vm857_vm4, %v11656_v22  ;;  %v11682_v43 = vld [vmem:[#allocation6 + $0x30] sm:$0xff] }
 0x5aa   : > { %9254 = vmatmul.msk.f32.gmra.mxu1 %vm857_vm4, %v11658_v40  ;;  %3552 = vst.msk [vmem:[#allocation6 + $0x39] sm:$0xff] %vm857_vm4, %v3384_v20  ;;  %v11680_v29 = vld [vmem:[#allocation6 + $0x31] sm:$0xff] }
 0x5ab   : > { %3553 = vst.msk [vmem:[#allocation6 + $0x49] sm:$0xff] %vm857_vm4, %v3404_v37 }
 0x5ac   : > { %3555 = vst.msk [vmem:[#allocation6 + $0x61] sm:$0xff] %vm857_vm4, %v3404_v37  ;;  %v4068_v37 = vld [vmem:[#allocation6 + $0x2] sm:$0xff] }
 0x5b0   : > { %v3407_v44 = vpop.f32.mrf.mxu1  ;;  %v11668_v60 = vld [vmem:[#allocation6 + $0x21] sm:$0xff]  ;;  %v3427_v28 = vpop.f32.mrf.mxu0 }
 0x5b1   : > { %v11670_v3 = vld [vmem:[#allocation6 + $0x20] sm:$0xff]  ;;  %3554 = vst.msk [vmem:[#allocation6 + $0x51] sm:$0xff] %vm857_vm4, %v3407_v44  ;;  %9223 = vmatmul.msk.f32.gmra.mxu0 %vm857_vm4, %v11668_v60  ;;  %v11694_v45 = vld [vmem:[#allocation6 + $0x38] sm:$0xff] }
 0x5b2   : > { %9255 = vmatmul.msk.f32.gmra.mxu1 %vm857_vm4, %v11670_v3  ;;  %3556 = vst.msk [vmem:[#allocation6 + $0x69] sm:$0xff] %vm857_vm4, %v3407_v44  ;;  %v11692_v16 = vld [vmem:[#allocation6 + $0x39] sm:$0xff]  ;;  %v11704_v59 = vld [vmem:[#allocation6 + $0x49] sm:$0xff] }
 0x5b3   : > { %3557 = vst.msk [vmem:[#allocation6 + $0x79] sm:$0xff] %vm857_vm4, %v3427_v28  ;;  %v11714_v62 = vld [vmem:[#allocation6 + $0x48] sm:$0xff]  ;;  %v11748_v41 = vld [vmem:[#allocation6 + $0x60] sm:$0xff] }
 0x5b4   : > { %3559 = vst.msk [vmem:[#allocation6 + $0x91] sm:$0xff] %vm857_vm4, %v3427_v28  ;;  %v11740_v17 = vld [vmem:[#allocation6 + $0x61] sm:$0xff] }
 0x5b5   : > { %v11927_v55 = vld [vmem:[#allocation6 + $0x22] sm:$0xff] }
 0x5b8   : > { %v3450_v14 = vpop.f32.mrf.mxu1  ;;  %v3430_v35 = vpop.f32.mrf.mxu0  ;;  %v11722_v15 = vld [vmem:[#allocation6 + $0x51] sm:$0xff] }
 0x5b9   : > { %3561 = vst.msk [vmem:[#allocation6 + $0xa9] sm:$0xff] %vm857_vm4, %v3450_v14  ;;  %9224 = vmatmul.msk.f32.gmra.mxu0 %vm857_vm4, %v11680_v29  ;;  %v11730_v38 = vld [vmem:[#allocation6 + $0x50] sm:$0xff]  ;;  %v11768_v50 = vld [vmem:[#allocation6 + $0x68] sm:$0xff] }
 0x5ba   : > { %9256 = vmatmul.msk.f32.gmra.mxu1 %vm857_vm4, %v11682_v43  ;;  %3563 = vst.msk [vmem:[#allocation6 + $0xc1] sm:$0xff] %vm857_vm4, %v3450_v14  ;;  %v11762_v10 = vld [vmem:[#allocation6 + $0x69] sm:$0xff]  ;;  %v11783_v8 = vld [vmem:[#allocation6 + $0x79] sm:$0xff] }
 0x5bb   : > { %3558 = vst.msk [vmem:[#allocation6 + $0x81] sm:$0xff] %vm857_vm4, %v3430_v35  ;;  %v11789_v53 = vld [vmem:[#allocation6 + $0x78] sm:$0xff]  ;;  %v11837_v24 = vld [vmem:[#allocation6 + $0x90] sm:$0xff] }
 0x5bc   : > { %3560 = vst.msk [vmem:[#allocation6 + $0x99] sm:$0xff] %vm857_vm4, %v3430_v35  ;;  %v11829_v56 = vld [vmem:[#allocation6 + $0x91] sm:$0xff] }
 0x5c0   : > { %v3453_v23 = vpop.f32.mrf.mxu1  ;;  %v3473_v36 = vpop.f32.mrf.mxu0  ;;  %v11863_v18 = vld [vmem:[#allocation6 + $0xa9] sm:$0xff] }
 0x5c1   : > { %3562 = vst.msk [vmem:[#allocation6 + $0xb1] sm:$0xff] %vm857_vm4, %v3453_v23  ;;  %9225 = vmatmul.msk.f32.gmra.mxu0 %vm857_vm4, %v11692_v16  ;;  %v11724_v21 = vld [vmem:[#allocation6 + $0xc1] sm:$0xff] }
 0x5c2   : > { %9257 = vmatmul.msk.f32.gmra.mxu1 %vm857_vm4, %v11694_v45  ;;  %3564 = vst.msk [vmem:[#allocation6 + $0xc9] sm:$0xff] %vm857_vm4, %v3453_v23  ;;  %v11732_v42 = vld [vmem:[#allocation6 + $0xc0] sm:$0xff]  ;;  %v11869_v48 = vld [vmem:[#allocation6 + $0xa8] sm:$0xff] }
 0x5c3   : > { %3565 = vst.msk [vmem:[#allocation6 + $0xd9] sm:$0xff] %vm857_vm4, %v3473_v36  ;;  %v11813_v19 = vld [vmem:[#allocation6 + $0x81] sm:$0xff]  ;;  %v11849_v25 = vld [vmem:[#allocation6 + $0x99] sm:$0xff]  ;;  %v4069_v23 = vld [vmem:[#allocation6 + $0xa] sm:$0xff] }
 0x5c4   : > { %3567 = vst.msk [vmem:[#allocation6 + $0xf1] sm:$0xff] %vm857_vm4, %v3473_v36  ;;  %v11821_v30 = vld [vmem:[#allocation6 + $0x80] sm:$0xff]  ;;  %v11855_v49 = vld [vmem:[#allocation6 + $0x98] sm:$0xff] }
 0x5c8   : > { %v11706_v32 = vld [vmem:[#allocation6 + $0xb1] sm:$0xff]  ;;  %v3476_v33 = vpop.f32.mrf.mxu0  ;;  %v3496_v27 = vpop.f32.mrf.mxu1 }
 0x5c9   : > { %v11708_v51 = vld [vmem:[#allocation6 + $0xb0] sm:$0xff]  ;;  %9226 = vmatmul.msk.f32.gmra.mxu0 %vm857_vm4, %v11704_v59  ;;  %9235 = vmatmul.msk.f32.vlgmr.msra.gmra.mxu2 %vm857_vm4, %v11706_v32  ;;  %3566 = vst.msk [vmem:[#allocation6 + $0xe1] sm:$0xff] %vm857_vm4, %v3476_v33  ;;  %v11750_v54 = vld [vmem:[#allocation6 + $0xc8] sm:$0xff] }
 0x5ca   : > { %9258 = vmatmul.msk.f32.gmra.mxu1 %vm857_vm4, %v11714_v62  ;;  %9267 = vmatmul.msk.f32.vlgmr.msrb.gmra.mxu3 %vm857_vm4, %v11708_v51  ;;  %3568 = vst.msk [vmem:[#allocation6 + $0xf9] sm:$0xff] %vm857_vm4, %v3476_v33  ;;  %v11742_v46 = vld [vmem:[#allocation6 + $0xc9] sm:$0xff]  ;;  %v11758_v2 = vld [vmem:[#allocation6 + $0xd9] sm:$0xff] }
 0x5cb   : > { %3569 = vst.msk [vmem:[#allocation6 + $0x109] sm:$0xff] %vm857_vm4, %v3496_v27  ;;  %v11760_v61 = vld [vmem:[#allocation6 + $0xd8] sm:$0xff]  ;;  %v11823_v63 = vld [vmem:[#allocation6 + $0xf0] sm:$0xff] }
 0x5cc   : > { %3571 = vst.msk [vmem:[#allocation6 + $0x121] sm:$0xff] %vm857_vm4, %v3496_v27  ;;  %v11815_v34 = vld [vmem:[#allocation6 + $0xf1] sm:$0xff] }
 0x5d0   : > { %v3499_v1 = vpop.f32.mrf.mxu1  ;;  %v3519_v47 = vpop.f32.mrf.mxu0  ;;  %v11780_v7 = vld [vmem:[#allocation6 + $0xe1] sm:$0xff] }
 0x5d1   : > { %9227 = vmatmul.msk.f32.gmra.mxu0 %vm857_vm4, %v11722_v15  ;;  %9236 = vmatmul.msk.f32.gmra.mxu2 %vm857_vm4, %v11724_v21  ;;  %3570 = vst.msk [vmem:[#allocation6 + $0x111] sm:$0xff] %vm857_vm4, %v3499_v1  ;;  %v11791_v9 = vld [vmem:[#allocation6 + $0xe0] sm:$0xff]  ;;  %v11839_v12 = vld [vmem:[#allocation6 + $0xf8] sm:$0xff] }
 0x5d2   : > { %9259 = vmatmul.msk.f32.gmra.mxu1 %vm857_vm4, %v11730_v38  ;;  %9268 = vmatmul.msk.f32.gmra.mxu3 %vm857_vm4, %v11732_v42  ;;  %3572 = vst.msk [vmem:[#allocation6 + $0x129] sm:$0xff] %vm857_vm4, %v3499_v1  ;;  %v11831_v6 = vld [vmem:[#allocation6 + $0xf9] sm:$0xff]  ;;  %v11845_v13 = vld [vmem:[#allocation6 + $0x109] sm:$0xff] }
 0x5d3   : > { %3573 = vst.msk [vmem:[#allocation6 + $0x139] sm:$0xff] %vm857_vm4, %v3519_v47  ;;  %v11847_v58 = vld [vmem:[#allocation6 + $0x108] sm:$0xff]  ;;  %v11881_v28 = vld [vmem:[#allocation6 + $0x120] sm:$0xff] }
 0x5d4   : > { %3575 = vst.msk [vmem:[#allocation6 + $0x151] sm:$0xff] %vm857_vm4, %v3519_v47  ;;  %v11877_v44 = vld [vmem:[#allocation6 + $0x121] sm:$0xff] }
 0x5d5   : > { %14746 = vst [vmem:[#allocation35_spill] sm:$0xff] %v11845_v13 }
 0x5d6   : > { %14748 = vst [vmem:[#allocation37_spill] sm:$0xff] %v11877_v44 }
 0x5d8   : > { %v3542_v52 = vpop.f32.mrf.mxu1  ;;  %v3522_v31 = vpop.f32.mrf.mxu0  ;;  %v11861_v39 = vld [vmem:[#allocation6 + $0x111] sm:$0xff] }
 0x5d9   : > { %9228 = vmatmul.msk.f32.gmra.mxu0 %vm857_vm4, %v11740_v17  ;;  %9237 = vmatmul.msk.f32.gmra.mxu2 %vm857_vm4, %v11742_v46  ;;  %3577 = vst.msk [vmem:[#allocation6 + $0x169] sm:$0xff] %vm857_vm4, %v3542_v52  ;;  %v11871_v20 = vld [vmem:[#allocation6 + $0x110] sm:$0xff]  ;;  %v11896_v33 = vld [vmem:[#allocation6 + $0x128] sm:$0xff] }
 0x5da   : > { %9260 = vmatmul.msk.f32.gmra.mxu1 %vm857_vm4, %v11748_v41  ;;  %9269 = vmatmul.msk.f32.gmra.mxu3 %vm857_vm4, %v11750_v54  ;;  %3579 = vst.msk [vmem:[#allocation6 + $0x181] sm:$0xff] %vm857_vm4, %v3542_v52  ;;  %v11892_v36 = vld [vmem:[#allocation6 + $0x129] sm:$0xff]  ;;  %v11907_v1 = vld [vmem:[#allocation6 + $0x139] sm:$0xff] }
 0x5db   : > { %3574 = vst.msk [vmem:[#allocation6 + $0x141] sm:$0xff] %vm857_vm4, %v3522_v31  ;;  %v11909_v47 = vld [vmem:[#allocation6 + $0x138] sm:$0xff] }
 0x5dc   : > { %3576 = vst.msk [vmem:[#allocation6 + $0x159] sm:$0xff] %vm857_vm4, %v3522_v31  ;;  %v11911_v52 = vld [vmem:[#allocation6 + $0x1a] sm:$0xff] }
 0x5dd   : > { %14747 = vst [vmem:[#allocation36_spill] sm:$0xff] %v11861_v39 }
 0x5de   : > { %14749 = vst [vmem:[#allocation38_spill] sm:$0xff] %v11892_v36 }
 0x5df   : > { %14750 = vst [vmem:[#allocation39_spill] sm:$0xff] %v11907_v1 }
 0x5e0   : > { %v3545_v57 = vpop.f32.mrf.mxu1  ;;  %v11888_v14 = vpop.f32.mrf.mxu0 }
 0x5e1   : > { %9229 = vmatmul.msk.f32.gmra.mxu0 %vm857_vm4, %v11762_v10  ;;  %9238 = vmatmul.msk.f32.gmra.mxu2 %vm857_vm4, %v11758_v2  ;;  %3578 = vst.msk [vmem:[#allocation6 + $0x171] sm:$0xff] %vm857_vm4, %v3545_v57 }
 0x5e2   : > { %9261 = vmatmul.msk.f32.gmra.mxu1 %vm857_vm4, %v11768_v50  ;;  %9270 = vmatmul.msk.f32.gmra.mxu3 %vm857_vm4, %v11760_v61  ;;  %3580 = vst.msk [vmem:[#allocation6 + $0x189] sm:$0xff] %vm857_vm4, %v3545_v57  ;;  %v11925_v31 = vld [vmem:[#allocation6 + $0x141] sm:$0xff]  ;;  %v11946_v57 = vld [vmem:[#allocation6 + $0x151] sm:$0xff] }
 0x5e3   : > { %14751 = vst [vmem:[#allocation40_spill] sm:$0xff] %v11925_v31  ;;  %v11931_v11 = vld [vmem:[#allocation6 + $0x140] sm:$0xff] }
 0x5e4   : > { %14752 = vst [vmem:[#allocation41_spill] sm:$0xff] %v11946_v57 }
 0x5e8   : > { %v11890_v35 = vpop.f32.mrf.mxu1 }
 0x5e9   : > { %9230 = vmatmul.msk.f32.gmra.mxu0 %vm857_vm4, %v11783_v8  ;;  %9239 = vmatmul.msk.f32.gmra.mxu2 %vm857_vm4, %v11780_v7 }
 0x5ea   : > { %9262 = vmatmul.msk.f32.gmra.mxu1 %vm857_vm4, %v11789_v53  ;;  %9271 = vmatmul.msk.f32.gmra.mxu3 %vm857_vm4, %v11791_v9 }
 0x5f0   : > { %v11905_v27 = vpop.f32.mrf.mxu1 }
 0x5f1   : > { %9231 = vmatmul.msk.f32.gmra.mxu0 %vm857_vm4, %v11813_v19  ;;  %9240 = vmatmul.msk.f32.gmra.mxu2 %vm857_vm4, %v11815_v34 }
 0x5f2   : > { %9263 = vmatmul.msk.f32.gmra.mxu1 %vm857_vm4, %v11821_v30  ;;  %9272 = vmatmul.msk.f32.gmra.mxu3 %vm857_vm4, %v11823_v63 }
 0x5f9   : > { %9232 = vmatmul.msk.f32.gmra.mxu0 %vm857_vm4, %v11829_v56  ;;  %9241 = vmatmul.msk.f32.gmra.mxu2 %vm857_vm4, %v11831_v6 }
 0x5fa   : > { %9264 = vmatmul.msk.f32.gmra.mxu1 %vm857_vm4, %v11837_v24  ;;  %9273 = vmatmul.msk.f32.gmra.mxu3 %vm857_vm4, %v11839_v12 }
 0x601   : > { %9233 = vmatmul.msk.f32.gmra.mxu0 %vm857_vm4, %v11849_v25  ;;  %9242 = vmatmul.msk.f32.gmra.mxu2 %vm857_vm4, %v11845_v13 }
 0x602   : > { %9265 = vmatmul.msk.f32.gmra.mxu1 %vm857_vm4, %v11855_v49  ;;  %9274 = vmatmul.msk.f32.gmra.mxu3 %vm857_vm4, %v11847_v58 }
 0x609   : > { %9234 = vmatmul.msk.f32.gmra.mxu0 %vm857_vm4, %v11863_v18  ;;  %9243 = vmatmul.msk.f32.gmra.mxu2 %vm857_vm4, %v11861_v39  ;;  %v12004_v39 = vld [vmem:[#allocation6 + $0x171] sm:$0xff] }
 0x60a   : > { %9266 = vmatmul.msk.f32.gmra.mxu1 %vm857_vm4, %v11869_v48  ;;  %9275 = vmatmul.msk.f32.gmra.mxu3 %vm857_vm4, %v11871_v20  ;;  %14759 = vst [vmem:[#allocation48_spill] sm:$0xff] %v12004_v39 }
 0x611   : > { %9244 = vmatmul.msk.f32.gmra.mxu2 %vm857_vm4, %v11877_v44  ;;  %9286 = vmatmul.msk.f32.vlgmr.msrb.gmra.mxu0 %vm857_vm4, %v4068_v37  ;;  %v11948_v37 = vld [vmem:[#allocation6 + $0x32] sm:$0xff]  ;;  %v11990_v44 = vld [vmem:[#allocation6 + $0x168] sm:$0xff] }
 0x612   : > { %9276 = vmatmul.msk.f32.gmra.mxu3 %vm857_vm4, %v11881_v28  ;;  %9320 = vmatmul.msk.f32.vlgmr.msrb.gmra.mxu1 %vm857_vm4, %v11658_v40  ;;  %v11903_v40 = vpop.f32.mrf.mxu0  ;;  %14757 = vst [vmem:[#allocation46_spill] sm:$0xff] %v11990_v44 }
 0x619   : > { %9245 = vmatmul.msk.f32.gmra.mxu2 %vm857_vm4, %v11892_v36  ;;  %9287 = vmatmul.msk.f32.gmra.mxu0 %vm857_vm4, %v4069_v23  ;;  %v9387_v23 = vld [vmem:[%s14745_s20 + $0x58] sm:$0xff]  ;;  %v11976_v36 = vld [vmem:[#allocation6 + $0x158] sm:$0xff] }
 0x61a   : > { %9277 = vmatmul.msk.f32.gmra.mxu3 %vm857_vm4, %v11896_v33  ;;  %9321 = vmatmul.msk.f32.gmra.mxu1 %vm857_vm4, %v11670_v3 }
 0x61b   : > { %5041 = vmatpush.msra.mxu3 %v9387_v23 }
 0x61d   : > { %5042 = vmatpush.msra.mxu3 %v9386_v4  ;;  %v11988_v4 = vld [vmem:[#allocation6 + $0x169] sm:$0xff] }
 0x61e   : > { %14756 = vst [vmem:[#allocation45_spill] sm:$0xff] %v11988_v4 }
 0x621   : > { %9246 = vmatmul.msk.f32.gmra.mxu2 %vm857_vm4, %v11907_v1  ;;  %9288 = vmatmul.msk.f32.gmra.mxu0 %vm857_vm4, %v11911_v52  ;;  %v11972_v1 = vld [vmem:[#allocation6 + $0x3a] sm:$0xff] }
 0x622   : > { %9278 = vmatmul.msk.f32.gmra.mxu3 %vm857_vm4, %v11909_v47  ;;  %9322 = vmatmul.msk.f32.gmra.mxu1 %vm857_vm4, %v11682_v43 }
 0x626   : > { %v11921_v3 = vpop.f32.mrf.mxu0 }
 0x627   : > { %v11923_v5 = vpop.f32.mrf.mxu1 }
 0x629   : > { %9247 = vmatmul.msk.f32.gmra.mxu2 %vm857_vm4, %v11925_v31  ;;  %9289 = vmatmul.msk.f32.gmra.mxu0 %vm857_vm4, %v11927_v55  ;;  %v11970_v31 = vld [vmem:[#allocation6 + $0x159] sm:$0xff] }
 0x62a   : > { %9279 = vmatmul.msk.f32.gmra.mxu3 %vm857_vm4, %v11931_v11  ;;  %9323 = vmatmul.msk.f32.gmra.mxu1 %vm857_vm4, %v11694_v45  ;;  %v11955_v45 = vld [vmem:[#allocation6 + $0x150] sm:$0xff]  ;;  %14753 = vst [vmem:[#allocation42_spill] sm:$0xff] %v11970_v31 }
 0x62e   : > { %v11939_v43 = vpop.f32.mrf.mxu0 }
 0x62f   : > { %v11941_v26 = vpop.f32.mrf.mxu1 }
 0x631   : > { %9248 = vmatmul.msk.f32.gmra.mxu2 %vm857_vm4, %v11946_v57  ;;  %9290 = vmatmul.msk.f32.gmra.mxu0 %vm857_vm4, %v11948_v37 }
 0x632   : > { %9280 = vmatmul.msk.f32.gmra.mxu3 %vm857_vm4, %v11955_v45  ;;  %9324 = vmatmul.msk.f32.gmra.mxu1 %vm857_vm4, %v11714_v62 }
 0x636   : > { %v11966_v0 = vpop.f32.mrf.mxu0 }
 0x637   : > { %v11968_v57 = vpop.f32.mrf.mxu1 }
 0x639   : > { %9249 = vmatmul.msk.f32.gmra.mxu2 %vm857_vm4, %v11970_v31  ;;  %9291 = vmatmul.msk.f32.gmra.mxu0 %vm857_vm4, %v11972_v1  ;;  %v11992_v31 = vld [vmem:[#allocation6 + $0x4a] sm:$0xff] }
 0x63a   : > { %9281 = vmatmul.msk.f32.gmra.mxu3 %vm857_vm4, %v11976_v36  ;;  %9325 = vmatmul.msk.f32.gmra.mxu1 %vm857_vm4, %v11730_v38 }
 0x63e   : > { %v11984_v62 = vpop.f32.mrf.mxu0 }
 0x63f   : > { %14754 = vst [vmem:[#allocation43_spill] sm:$0xff] %v11984_v62  ;;  %v11986_v23 = vpop.f32.mrf.mxu1  ;;  %v12008_v62 = vld [vmem:[#allocation6 + $0x52] sm:$0xff] }
 0x640   : > { %14755 = vst [vmem:[#allocation44_spill] sm:$0xff] %v11986_v23 }
 0x641   : > { %9250 = vmatmul.msk.f32.gmra.mxu2 %vm857_vm4, %v11988_v4  ;;  %9292 = vmatmul.msk.f32.gmra.mxu0 %vm857_vm4, %v11992_v31  ;;  %v12012_v4 = vld [vmem:[#allocation6 + $0x170] sm:$0xff] }
 0x642   : > { %9282 = vmatmul.msk.f32.gmra.mxu3 %vm857_vm4, %v11990_v44  ;;  %9326 = vmatmul.msk.f32.gmra.mxu1 %vm857_vm4, %v11748_v41 }
 0x646   : > { %v12002_v38 = vpop.f32.mrf.mxu0 }
 0x647   : > { %14758 = vst [vmem:[#allocation47_spill] sm:$0xff] %v12002_v38  ;;  %v12006_v23 = vpop.f32.mrf.mxu1 }
 0x648   : > { %14760 = vst [vmem:[#allocation49_spill] sm:$0xff] %v12006_v23 }
 0x649   : > { %9251 = vmatmul.msk.f32.gmra.mxu2 %vm857_vm4, %v12004_v39  ;;  %9293 = vmatmul.msk.f32.gmra.mxu0 %vm857_vm4, %v12008_v62  ;;  %v12026_v39 = vld [vmem:[#allocation6 + $0x62] sm:$0xff] }
 0x64a   : > { %9283 = vmatmul.msk.f32.gmra.mxu3 %vm857_vm4, %v12012_v4  ;;  %9327 = vmatmul.msk.f32.gmra.mxu1 %vm857_vm4, %v11768_v50 }
 0x64c   : > { %v3808_v41 = vpop.f32.mrf.mxu2 }
 0x64d   : > { %v4017_v38 = vpop.f32.mrf.mxu3 }
 0x64e   : > { %v12020_v44 = vadd.f32 %v4017_v38, %v3808_v41  ;;  %v12022_v23 = vpop.f32.mrf.mxu0 }
 0x64f   : > { %14762 = vst [vmem:[#allocation51_spill] sm:$0xff] %v12022_v23  ;;  %v12024_v13 = vpop.f32.mrf.mxu1  ;;  %v12042_v23 = vld [vmem:[#allocation6 + $0x6a] sm:$0xff] }
 0x650   : > { %14761 = vst [vmem:[#allocation50_spill] sm:$0xff] %v12020_v44 }
 0x651   : > { %14763 = vst [vmem:[#allocation52_spill] sm:$0xff] %v12024_v13  ;;  %9294 = vmatmul.msk.f32.gmra.mxu0 %vm857_vm4, %v12026_v39  ;;  %9354 = vmatmul.msk.f32.vlgmr.msrb.gmra.mxu2 %vm857_vm4, %v11656_v22 }
 0x652   : > { %9328 = vmatmul.msk.f32.gmra.mxu1 %vm857_vm4, %v11789_v53  ;;  %9388 = vmatmul.msk.f32.vlgmr.msra.gmra.mxu3 %vm857_vm4, %v11911_v52 }
 0x654   : > { %v3811_v50 = vpop.f32.mrf.mxu2 }
 0x655   : > { %v4020_v38 = vpop.f32.mrf.mxu3 }
 0x656   : > { %v12036_v41 = vadd.f32 %v4020_v38, %v3811_v50  ;;  %v12038_v44 = vpop.f32.mrf.mxu0 }
 0x657   : > { %14764 = vst [vmem:[#allocation53_spill] sm:$0xff] %v12038_v44  ;;  %v12040_v13 = vpop.f32.mrf.mxu1  ;;  %v12275_v44 = vld [vmem:[#allocation6 + $0x112] sm:$0xff] }
 0x658   : > { %14765 = vst [vmem:[#allocation54_spill] sm:$0xff] %v12040_v13  ;;  %v12058_v13 = vld [vmem:[#allocation6 + $0x7a] sm:$0xff] }
 0x659   : > { %9295 = vmatmul.msk.f32.gmra.mxu0 %vm857_vm4, %v12042_v23  ;;  %9355 = vmatmul.msk.f32.gmra.mxu2 %vm857_vm4, %v11668_v60 }
 0x65a   : > { %9329 = vmatmul.msk.f32.gmra.mxu1 %vm857_vm4, %v11821_v30  ;;  %9389 = vmatmul.msk.f32.gmra.mxu3 %vm857_vm4, %v11927_v55 }
 0x65c   : > { %v3814_v22 = vpop.f32.mrf.mxu2 }
 0x65d   : > { %v4023_v53 = vpop.f32.mrf.mxu3 }
 0x65e   : > { %v12052_v52 = vadd.f32 %v4023_v53, %v3814_v22  ;;  %v12054_v50 = vpop.f32.mrf.mxu0 }
 0x65f   : > { %14766 = vst [vmem:[#allocation55_spill] sm:$0xff] %v12054_v50  ;;  %v12056_v38 = vpop.f32.mrf.mxu1  ;;  %v12259_v50 = vld [vmem:[#allocation6 + $0x10a] sm:$0xff] }
 0x660   : > { %14767 = vst [vmem:[#allocation56_spill] sm:$0xff] %v12056_v38  ;;  %v12074_v38 = vld [vmem:[#allocation6 + $0x82] sm:$0xff] }
 0x661   : > { %9296 = vmatmul.msk.f32.gmra.mxu0 %vm857_vm4, %v12058_v13  ;;  %9356 = vmatmul.msk.f32.gmra.mxu2 %vm857_vm4, %v11680_v29 }
 0x662   : > { %9330 = vmatmul.msk.f32.gmra.mxu1 %vm857_vm4, %v11837_v24  ;;  %9390 = vmatmul.msk.f32.gmra.mxu3 %vm857_vm4, %v11948_v37 }
 0x664   : > { %v3817_v60 = vpop.f32.mrf.mxu2 }
 0x665   : > { %v4026_v30 = vpop.f32.mrf.mxu3 }
 0x666   : > { %v12068_v55 = vadd.f32 %v4026_v30, %v3817_v60  ;;  %v12070_v22 = vpop.f32.mrf.mxu0 }
 0x667   : > { %14768 = vst [vmem:[#allocation57_spill] sm:$0xff] %v12070_v22  ;;  %v12072_v53 = vpop.f32.mrf.mxu1  ;;  %v12243_v22 = vld [vmem:[#allocation6 + $0xfa] sm:$0xff] }
 0x668   : > { %14769 = vst [vmem:[#allocation58_spill] sm:$0xff] %v12072_v53  ;;  %v12090_v53 = vld [vmem:[#allocation6 + $0x92] sm:$0xff] }
 0x669   : > { %9297 = vmatmul.msk.f32.gmra.mxu0 %vm857_vm4, %v12074_v38  ;;  %9357 = vmatmul.msk.f32.gmra.mxu2 %vm857_vm4, %v11692_v16  ;;  %v9489_v16 = vld [vmem:[%s14745_s20 + $0x88] sm:$0xff] }
 0x66a   : > { %9331 = vmatmul.msk.f32.gmra.mxu1 %vm857_vm4, %v11855_v49  ;;  %9391 = vmatmul.msk.f32.gmra.mxu3 %vm857_vm4, %v11972_v1  ;;  %v9421_v49 = vld [vmem:[%s14745_s20 + $0x68] sm:$0xff] }
 0x66b   : > { %5870 = vmatpush.msra.mxu2 %v9489_v16  ;;  %5318 = vmatpush.msra.mxu0 %v9421_v49 }
 0x66c   : > { %v3820_v29 = vpop.f32.mrf.mxu2 }
 0x66d   : > { %v4029_v24 = vpop.f32.mrf.mxu3 }
 0x66e   : > { %v12084_v37 = vadd.f32 %v4029_v24, %v3820_v29  ;;  %v12086_v60 = vpop.f32.mrf.mxu0 }
 0x66f   : > { %14770 = vst [vmem:[#allocation59_spill] sm:$0xff] %v12086_v60  ;;  %v12088_v30 = vpop.f32.mrf.mxu1  ;;  %v12227_v60 = vld [vmem:[#allocation6 + $0xf2] sm:$0xff] }
 0x670   : > { %14771 = vst [vmem:[#allocation60_spill] sm:$0xff] %v12088_v30  ;;  %v9455_v30 = vld [vmem:[%s14745_s20 + $0x78] sm:$0xff] }
 0x671   : > { %9298 = vmatmul.msk.f32.gmra.mxu0 %vm857_vm4, %v12090_v53  ;;  %9358 = vmatmul.msk.f32.gmra.mxu2 %vm857_vm4, %v11704_v59 }
 0x672   : > { %9332 = vmatmul.msk.f32.gmra.mxu1 %vm857_vm4, %v11869_v48  ;;  %9392 = vmatmul.msk.f32.gmra.mxu3 %vm857_vm4, %v11992_v31  ;;  %v12115_v31 = vld [vmem:[#allocation6 + $0x9a] sm:$0xff] }
 0x673   : > { %5594 = vmatpush.msra.mxu1 %v9455_v30 }
 0x674   : > { %v3823_v1 = vpop.f32.mrf.mxu2 }
 0x675   : > { %v4032_v29 = vpop.f32.mrf.mxu3 }
 0x676   : > { %v12106_v24 = vadd.f32 %v4032_v29, %v3823_v1  ;;  %v12108_v59 = vpop.f32.mrf.mxu0 }
 0x677   : > { %14772 = vst [vmem:[#allocation61_spill] sm:$0xff] %v12108_v59  ;;  %v12113_v48 = vpop.f32.mrf.mxu1  ;;  %v12211_v59 = vld [vmem:[#allocation6 + $0xe2] sm:$0xff] }
 0x678   : > { %14773 = vst [vmem:[#allocation62_spill] sm:$0xff] %v12113_v48  ;;  %v12131_v48 = vld [vmem:[#allocation6 + $0xaa] sm:$0xff] }
 0x679   : > { %9299 = vmatmul.msk.f32.gmra.mxu0 %vm857_vm4, %v12115_v31  ;;  %9359 = vmatmul.msk.f32.gmra.mxu2 %vm857_vm4, %v11722_v15 }
 0x67a   : > { %9333 = vmatmul.msk.f32.gmra.mxu1 %vm857_vm4, %v11708_v51  ;;  %9393 = vmatmul.msk.f32.gmra.mxu3 %vm857_vm4, %v12008_v62 }
 0x67c   : > { %v3826_v16 = vpop.f32.mrf.mxu2 }
 0x67d   : > { %v4035_v49 = vpop.f32.mrf.mxu3 }
 0x67e   : > { %v12125_v1 = vadd.f32 %v4035_v49, %v3826_v16  ;;  %v12127_v29 = vpop.f32.mrf.mxu0 }
 0x67f   : > { %14774 = vst [vmem:[#allocation63_spill] sm:$0xff] %v12127_v29  ;;  %v12129_v30 = vpop.f32.mrf.mxu1  ;;  %v12195_v29 = vld [vmem:[#allocation6 + $0xda] sm:$0xff] }
 0x680   : > { %14775 = vst [vmem:[#allocation64_spill] sm:$0xff] %v12129_v30  ;;  %v12147_v30 = vld [vmem:[#allocation6 + $0xb2] sm:$0xff] }
 0x681   : > { %9300 = vmatmul.msk.f32.gmra.mxu0 %vm857_vm4, %v12131_v48  ;;  %9360 = vmatmul.msk.f32.gmra.mxu2 %vm857_vm4, %v11740_v17 }
 0x682   : > { %9334 = vmatmul.msk.f32.gmra.mxu1 %vm857_vm4, %v11732_v42  ;;  %9394 = vmatmul.msk.f32.gmra.mxu3 %vm857_vm4, %v12026_v39 }
 0x684   : > { %v3829_v51 = vpop.f32.mrf.mxu2 }
 0x685   : > { %v4038_v15 = vpop.f32.mrf.mxu3 }
 0x686   : > { %v12141_v62 = vadd.f32 %v4038_v15, %v3829_v51  ;;  %v12143_v16 = vpop.f32.mrf.mxu0 }
 0x687   : > { %14776 = vst [vmem:[#allocation65_spill] sm:$0xff] %v12143_v16  ;;  %v12145_v49 = vpop.f32.mrf.mxu1  ;;  %v12179_v16 = vld [vmem:[#allocation6 + $0xca] sm:$0xff] }
 0x688   : > { %14777 = vst [vmem:[#allocation66_spill] sm:$0xff] %v12145_v49  ;;  %v12163_v49 = vld [vmem:[#allocation6 + $0xc2] sm:$0xff] }
 0x689   : > { %9301 = vmatmul.msk.f32.gmra.mxu0 %vm857_vm4, %v12147_v30  ;;  %9361 = vmatmul.msk.f32.gmra.mxu2 %vm857_vm4, %v11762_v10 }
 0x68a   : > { %9335 = vmatmul.msk.f32.gmra.mxu1 %vm857_vm4, %v11750_v54  ;;  %9395 = vmatmul.msk.f32.gmra.mxu3 %vm857_vm4, %v12042_v23 }
 0x68c   : > { %v3832_v42 = vpop.f32.mrf.mxu2 }
 0x68d   : > { %v4041_v17 = vpop.f32.mrf.mxu3 }
 0x68e   : > { %v12157_v39 = vadd.f32 %v4041_v17, %v3832_v42  ;;  %v12159_v51 = vpop.f32.mrf.mxu0 }
 0x68f   : > { %v12161_v15 = vpop.f32.mrf.mxu1 }
 0x691   : > { %9302 = vmatmul.msk.f32.gmra.mxu0 %vm857_vm4, %v12163_v49  ;;  %9362 = vmatmul.msk.f32.gmra.mxu2 %vm857_vm4, %v11783_v8 }
 0x692   : > { %9336 = vmatmul.msk.f32.gmra.mxu1 %vm857_vm4, %v11760_v61  ;;  %9396 = vmatmul.msk.f32.gmra.mxu3 %vm857_vm4, %v12058_v13 }
 0x694   : > { %v3835_v54 = vpop.f32.mrf.mxu2 }
 0x695   : > { %v4044_v10 = vpop.f32.mrf.mxu3 }
 0x696   : > { %v12173_v23 = vadd.f32 %v4044_v10, %v3835_v54  ;;  %v12175_v42 = vpop.f32.mrf.mxu0 }
 0x697   : > { %v12177_v17 = vpop.f32.mrf.mxu1 }
 0x699   : > { %9303 = vmatmul.msk.f32.gmra.mxu0 %vm857_vm4, %v12179_v16  ;;  %9363 = vmatmul.msk.f32.gmra.mxu2 %vm857_vm4, %v11813_v19 }
 0x69a   : > { %9337 = vmatmul.msk.f32.gmra.mxu1 %vm857_vm4, %v11791_v9  ;;  %9397 = vmatmul.msk.f32.gmra.mxu3 %vm857_vm4, %v12074_v38 }
 0x69c   : > { %v3838_v61 = vpop.f32.mrf.mxu2 }
 0x69d   : > { %v4047_v8 = vpop.f32.mrf.mxu3 }
 0x69e   : > { %v12189_v13 = vadd.f32 %v4047_v8, %v3838_v61  ;;  %v12191_v54 = vpop.f32.mrf.mxu0 }
 0x69f   : > { %v12193_v10 = vpop.f32.mrf.mxu1 }
 0x6a1   : > { %9304 = vmatmul.msk.f32.gmra.mxu0 %vm857_vm4, %v12195_v29  ;;  %9364 = vmatmul.msk.f32.gmra.mxu2 %vm857_vm4, %v11829_v56 }
 0x6a2   : > { %9338 = vmatmul.msk.f32.gmra.mxu1 %vm857_vm4, %v11823_v63  ;;  %9398 = vmatmul.msk.f32.gmra.mxu3 %vm857_vm4, %v12090_v53 }
 0x6a4   : > { %v3841_v9 = vpop.f32.mrf.mxu2 }
 0x6a5   : > { %v4050_v19 = vpop.f32.mrf.mxu3 }
 0x6a6   : > { %v12205_v38 = vadd.f32 %v4050_v19, %v3841_v9  ;;  %v12207_v61 = vpop.f32.mrf.mxu0 }
 0x6a7   : > { %v12209_v8 = vpop.f32.mrf.mxu1 }
 0x6a9   : > { %9305 = vmatmul.msk.f32.gmra.mxu0 %vm857_vm4, %v12211_v59  ;;  %9365 = vmatmul.msk.f32.gmra.mxu2 %vm857_vm4, %v11849_v25 }
 0x6aa   : > { %9339 = vmatmul.msk.f32.gmra.mxu1 %vm857_vm4, %v11839_v12  ;;  %9399 = vmatmul.msk.f32.gmra.mxu3 %vm857_vm4, %v12115_v31 }
 0x6ac   : > { %v3844_v63 = vpop.f32.mrf.mxu2 }
 0x6ad   : > { %v4053_v56 = vpop.f32.mrf.mxu3 }
 0x6ae   : > { %v12221_v53 = vadd.f32 %v4053_v56, %v3844_v63  ;;  %v12223_v9 = vpop.f32.mrf.mxu0 }
 0x6af   : > { %v12225_v19 = vpop.f32.mrf.mxu1 }
 0x6b1   : > { %9306 = vmatmul.msk.f32.gmra.mxu0 %vm857_vm4, %v12227_v60  ;;  %9366 = vmatmul.msk.f32.gmra.mxu2 %vm857_vm4, %v11863_v18 }
 0x6b2   : > { %9340 = vmatmul.msk.f32.gmra.mxu1 %vm857_vm4, %v11847_v58  ;;  %9400 = vmatmul.msk.f32.gmra.mxu3 %vm857_vm4, %v12131_v48 }
 0x6b4   : > { %v3847_v12 = vpop.f32.mrf.mxu2 }
 0x6b5   : > { %v4056_v25 = vpop.f32.mrf.mxu3 }
 0x6b6   : > { %v12237_v31 = vadd.f32 %v4056_v25, %v3847_v12  ;;  %v12239_v63 = vpop.f32.mrf.mxu0 }
 0x6b7   : > { %v12241_v56 = vpop.f32.mrf.mxu1 }
 0x6b9   : > { %9307 = vmatmul.msk.f32.gmra.mxu0 %vm857_vm4, %v12243_v22  ;;  %9367 = vmatmul.msk.f32.gmra.mxu2 %vm857_vm4, %v11706_v32 }
 0x6ba   : > { %9341 = vmatmul.msk.f32.gmra.mxu1 %vm857_vm4, %v11871_v20  ;;  %9401 = vmatmul.msk.f32.gmra.mxu3 %vm857_vm4, %v12147_v30 }
 0x6bc   : > { %v3850_v58 = vpop.f32.mrf.mxu2 }
 0x6bd   : > { %v4059_v18 = vpop.f32.mrf.mxu3 }
 0x6be   : > { %v12253_v48 = vadd.f32 %v4059_v18, %v3850_v58  ;;  %v12255_v12 = vpop.f32.mrf.mxu0 }
 0x6bf   : > { %v12257_v25 = vpop.f32.mrf.mxu1 }
 0x6c0   : > { %14778 = vst [vmem:[#allocation67_spill] sm:$0xff] %v12253_v48 }
 0x6c1   : > { %9308 = vmatmul.msk.f32.gmra.mxu0 %vm857_vm4, %v12259_v50  ;;  %9368 = vmatmul.msk.f32.gmra.mxu2 %vm857_vm4, %v11724_v21 }
 0x6c2   : > { %9342 = vmatmul.msk.f32.gmra.mxu1 %vm857_vm4, %v11881_v28  ;;  %9402 = vmatmul.msk.f32.gmra.mxu3 %vm857_vm4, %v12163_v49  ;;  %v3973_v28 = vadd.f32 %v11890_v35, %v11888_v14 }
 0x6c4   : > { %v3853_v32 = vpop.f32.mrf.mxu2 }
 0x6c5   : > { %v4062_v20 = vpop.f32.mrf.mxu3 }
 0x6c6   : > { %v12269_v30 = vadd.f32 %v4062_v20, %v3853_v32  ;;  %v12271_v58 = vpop.f32.mrf.mxu0 }
 0x6c7   : > { %v12273_v18 = vpop.f32.mrf.mxu1 }
 0x6c8   : > { %14779 = vst [vmem:[#allocation68_spill] sm:$0xff] %v12269_v30  ;;  %v4312_v30 = vadd.f32 %v12159_v51, %v3973_v28 }
 0x6c9   : > { %9309 = vmatmul.msk.f32.gmra.mxu0 %vm857_vm4, %v12275_v44  ;;  %9369 = vmatmul.msk.f32.gmra.mxu2 %vm857_vm4, %v11742_v46  ;;  %v12294_v46 = vld [vmem:[#allocation6 + $0x122] sm:$0xff] }
 0x6ca   : > { %9343 = vmatmul.msk.f32.gmra.mxu1 %vm857_vm4, %v11896_v33  ;;  %9403 = vmatmul.msk.f32.gmra.mxu3 %vm857_vm4, %v12179_v16  ;;  %v4588_v14 = vadd.f32 %v12161_v15, %v4312_v30  ;;  %v3976_v33 = vadd.f32 %v11905_v27, %v11903_v40 }
 0x6cc   : > { %v3856_v21 = vpop.f32.mrf.mxu2  ;;  %v4313_v28 = vadd.f32 %v12175_v42, %v3976_v33 }
 0x6cd   : > { %v4065_v49 = vpop.f32.mrf.mxu3 }
 0x6ce   : > { %v12287_v32 = vadd.f32 %v4065_v49, %v3856_v21  ;;  %v12289_v20 = vpop.f32.mrf.mxu0  ;;  %v4589_v40 = vadd.f32 %v12177_v17, %v4313_v28 }
 0x6cf   : > { %v12292_v48 = vpop.f32.mrf.mxu1 }
 0x6d1   : > { %9310 = vmatmul.msk.f32.gmra.mxu0 %vm857_vm4, %v12294_v46  ;;  %9370 = vmatmul.msk.f32.gmra.mxu2 %vm857_vm4, %v11758_v2 }
 0x6d2   : > { %9344 = vmatmul.msk.f32.gmra.mxu1 %vm857_vm4, %v11909_v47  ;;  %9404 = vmatmul.msk.f32.gmra.mxu3 %vm857_vm4, %v12195_v29  ;;  %v12314_v47 = vld [vmem:[#allocation6 + $0x12a] sm:$0xff]  ;;  %v3979_v29 = vadd.f32 %v11923_v5, %v11921_v3 }
 0x6d4   : > { %v4768_v35 = vpop.f32.mrf.mxu2 }
 0x6d5   : > { %v4864_v16 = vadd.f32 %v4768_v35, %v4588_v14  ;;  %v5044_v51 = vpop.f32.mrf.mxu3  ;;  %v4314_v14 = vadd.f32 %v12191_v54, %v3979_v29 }
 0x6d6   : > { %v12307_v21 = vpop.f32.mrf.mxu0 }
 0x6d7   : > { %v12310_v49 = vadd.f32 %v5044_v51, %v4864_v16  ;;  %v12312_v2 = vpop.f32.mrf.mxu1  ;;  %v4590_v3 = vadd.f32 %v12193_v10, %v4314_v14  ;;  %v14787_v14 = vld [vmem:[#allocation44_spill] sm:$0xff] }
 0x6d9   : > { %9311 = vmatmul.msk.f32.gmra.mxu0 %vm857_vm4, %v12314_v47  ;;  %9371 = vmatmul.msk.f32.gmra.mxu2 %vm857_vm4, %v11780_v7 }
 0x6da   : > { %9345 = vmatmul.msk.f32.gmra.mxu1 %vm857_vm4, %v11931_v11  ;;  %9405 = vmatmul.msk.f32.gmra.mxu3 %vm857_vm4, %v12211_v59  ;;  %v12334_v11 = vld [vmem:[#allocation6 + $0x13a] sm:$0xff]  ;;  %v3982_v59 = vadd.f32 %v11941_v26, %v11939_v43 }
 0x6dc   : > { %v4771_v27 = vpop.f32.mrf.mxu2  ;;  %v4315_v16 = vadd.f32 %v12207_v61, %v3982_v59 }
 0x6dd   : > { %v4865_v15 = vadd.f32 %v4771_v27, %v4589_v40  ;;  %v5047_v42 = vpop.f32.mrf.mxu3 }
 0x6de   : > { %v12327_v30 = vpop.f32.mrf.mxu0  ;;  %v4591_v43 = vadd.f32 %v12209_v8, %v4315_v16  ;;  %v9488_v8 = vld [vmem:[%s14745_s20 + $0x80] sm:$0xff] }
 0x6df   : > { %v12330_v35 = vadd.f32 %v5047_v42, %v4865_v15  ;;  %v12332_v7 = vpop.f32.mrf.mxu1  ;;  %5871 = vmatpush.msra.mxu2 %v9488_v8  ;;  %v14786_v42 = vld [vmem:[#allocation43_spill] sm:$0xff] }
 0x6e1   : > { %9312 = vmatmul.msk.f32.gmra.mxu0 %vm857_vm4, %v12334_v11  ;;  %9372 = vmatmul.msk.f32.gmra.mxu2 %vm857_vm4, %v11815_v34 }
 0x6e2   : > { %9346 = vmatmul.msk.f32.gmra.mxu1 %vm857_vm4, %v11955_v45  ;;  %9406 = vmatmul.msk.f32.gmra.mxu3 %vm857_vm4, %v12227_v60  ;;  %v12354_v45 = vld [vmem:[#allocation6 + $0x142] sm:$0xff]  ;;  %v3985_v60 = vadd.f32 %v11968_v57, %v11966_v0  ;;  %v9420_v0 = vld [vmem:[%s14745_s20 + $0x60] sm:$0xff] }
 0x6e3   : > { %v9454_v57 = vld [vmem:[%s14745_s20 + $0x70] sm:$0xff]  ;;  %5319 = vmatpush.msra.mxu0 %v9420_v0 }
 0x6e4   : > { %v4774_v5 = vpop.f32.mrf.mxu2  ;;  %v4316_v40 = vadd.f32 %v12223_v9, %v3985_v60  ;;  %v14785_v9 = vld [vmem:[#allocation46_spill] sm:$0xff]  ;;  %5595 = vmatpush.msra.mxu1 %v9454_v57 }
 0x6e5   : > { %v4866_v17 = vadd.f32 %v4774_v5, %v4590_v3  ;;  %v5050_v54 = vpop.f32.mrf.mxu3  ;;  %v3988_v3 = vadd.f32 %v14787_v14, %v14786_v42  ;;  %v14797_v42 = vld [vmem:[#allocation51_spill] sm:$0xff]  ;;  %v14798_v14 = vld [vmem:[#allocation52_spill] sm:$0xff] }
 0x6e6   : > { %v12347_v33 = vpop.f32.mrf.mxu0  ;;  %v4592_v29 = vadd.f32 %v12225_v19, %v4316_v40  ;;  %v12406_v19 = vld [vmem:[#allocation6 + $0x15a] sm:$0xff] }
 0x6e7   : > { %14780 = vst [vmem:[#allocation69_spill] sm:$0xff] %v12347_v33  ;;  %v12350_v51 = vadd.f32 %v5050_v54, %v4866_v17  ;;  %v12352_v34 = vpop.f32.mrf.mxu1  ;;  %v4317_v54 = vadd.f32 %v12239_v63, %v3988_v3  ;;  %v3994_v3 = vadd.f32 %v14798_v14, %v14797_v42  ;;  %v5174_v14 = vld [vmem:[#allocation6 + $0x38] sm:$0xff] }
 0x6e8   : > { %14781 = vst [vmem:[#allocation70_spill] sm:$0xff] %v12352_v34  ;;  %v5181_v34 = vld [vmem:[#allocation6 + $0x90] sm:$0xff] }
 0x6e9   : > { %9313 = vmatmul.msk.f32.gmra.mxu0 %vm857_vm4, %v12354_v45  ;;  %9373 = vmatmul.msk.f32.gmra.mxu2 %vm857_vm4, %v11831_v6  ;;  %v4593_v63 = vadd.f32 %v12241_v56, %v4317_v54  ;;  %v14796_v56 = vld [vmem:[#allocation37_spill] sm:$0xff]  ;;  %v5725_v33 = vld [vmem:[#allocation6 + $0x32] sm:$0xff] }
 0x6ea   : > { %9347 = vmatmul.msk.f32.gmra.mxu1 %vm857_vm4, %v11976_v36  ;;  %9407 = vmatmul.msk.f32.gmra.mxu3 %vm857_vm4, %v12243_v22  ;;  %v12374_v36 = vld [vmem:[#allocation6 + $0x152] sm:$0xff] }
 0x6eb   : > { %v14784_v22 = vld [vmem:[#allocation35_spill] sm:$0xff] }
 0x6ec   : > { %v4777_v26 = vpop.f32.mrf.mxu2 }
 0x6ed   : > { %v4867_v10 = vadd.f32 %v4777_v26, %v4591_v43  ;;  %v5053_v61 = vpop.f32.mrf.mxu3  ;;  %v14791_v26 = vld [vmem:[#allocation36_spill] sm:$0xff] }
 0x6ee   : > { %v12367_v28 = vpop.f32.mrf.mxu0 }
 0x6ef   : > { %14782 = vst [vmem:[#allocation71_spill] sm:$0xff] %v12367_v28  ;;  %v12370_v27 = vadd.f32 %v5053_v61, %v4867_v10  ;;  %v12372_v6 = vpop.f32.mrf.mxu1  ;;  %v14792_v10 = vld [vmem:[#allocation47_spill] sm:$0xff]  ;;  %v14793_v61 = vld [vmem:[#allocation49_spill] sm:$0xff] }
 0x6f0   : > { %14783 = vst [vmem:[#allocation72_spill] sm:$0xff] %v12372_v6  ;;  %v3991_v40 = vadd.f32 %v14793_v61, %v14792_v10  ;;  %v5180_v6 = vld [vmem:[#allocation6 + $0x80] sm:$0xff] }
 0x6f1   : > { %9314 = vmatmul.msk.f32.gmra.mxu0 %vm857_vm4, %v12374_v36  ;;  %9374 = vmatmul.msk.f32.gmra.mxu2 %vm857_vm4, %v14784_v22 }
 0x6f2   : > { %9348 = vmatmul.msk.f32.gmra.mxu1 %vm857_vm4, %v14785_v9  ;;  %9408 = vmatmul.msk.f32.gmra.mxu3 %vm857_vm4, %v12259_v50  ;;  %v9522_v50 = vld [vmem:[%s14790_s1 + $0x8] sm:$0xff]  ;;  %v4318_v8 = vadd.f32 %v12255_v12, %v3991_v40 }
 0x6f3   : > { %6344 = vmatpush.msrb.mxu3 %v9522_v50  ;;  %v4319_v50 = vadd.f32 %v12271_v58, %v3994_v3  ;;  %v14801_v3 = vld [vmem:[#allocation40_spill] sm:$0xff] }
 0x6f4   : > { %v4780_v15 = vpop.f32.mrf.mxu2  ;;  %v4594_v12 = vadd.f32 %v12257_v25, %v4318_v8  ;;  %v14799_v25 = vld [vmem:[#allocation38_spill] sm:$0xff] }
 0x6f5   : > { %v4868_v5 = vadd.f32 %v4780_v15, %v4592_v29  ;;  %v5056_v59 = vpop.f32.mrf.mxu3  ;;  %v4595_v58 = vadd.f32 %v12273_v18, %v4319_v50 }
 0x6f6   : > { %v12396_v17 = vpop.f32.mrf.mxu0 }
 0x6f7   : > { %14788 = vst [vmem:[#allocation35_spill] sm:$0xff] %v12396_v17  ;;  %v12399_v16 = vadd.f32 %v5056_v59, %v4868_v5  ;;  %v12401_v43 = vpop.f32.mrf.mxu1 }
 0x6f8   : > { %14789 = vst [vmem:[#allocation46_spill] sm:$0xff] %v12401_v43 }
 0x6f9   : > { %9315 = vmatmul.msk.f32.gmra.mxu0 %vm857_vm4, %v12406_v19  ;;  %9375 = vmatmul.msk.f32.gmra.mxu2 %vm857_vm4, %v14791_v26 }
 0x6fa   : > { %9349 = vmatmul.msk.f32.gmra.mxu1 %vm857_vm4, %v12012_v4  ;;  %9409 = vmatmul.msk.f32.gmra.mxu3 %vm857_vm4, %v12275_v44  ;;  %v12426_v4 = vld [vmem:[#allocation6 + $0x16a] sm:$0xff]  ;;  %v12430_v44 = vld [vmem:[#allocation6 + $0x180] sm:$0xff] }
 0x6fc   : > { %v4783_v60 = vpop.f32.mrf.mxu2 }
 0x6fd   : > { %v4869_v22 = vadd.f32 %v4783_v60, %v4593_v63  ;;  %v5059_v0 = vpop.f32.mrf.mxu3  ;;  %v4099_v60 = vld [vmem:[#allocation6 + $0x172] sm:$0xff] }
 0x6fe   : > { %v12419_v57 = vpop.f32.mrf.mxu0 }
 0x6ff   : > { %14794 = vst [vmem:[#allocation43_spill] sm:$0xff] %v12419_v57  ;;  %v12422_v9 = vadd.f32 %v5059_v0, %v4869_v22  ;;  %v12424_v29 = vpop.f32.mrf.mxu1  ;;  %v5179_v57 = vld [vmem:[#allocation6 + $0x78] sm:$0xff] }
 0x700   : > { %14795 = vst [vmem:[#allocation44_spill] sm:$0xff] %v12424_v29  ;;  %v12535_v29 = vld [vmem:[#allocation6 + $0x181] sm:$0xff] }
 0x701   : > { %9316 = vmatmul.msk.f32.gmra.mxu0 %vm857_vm4, %v12426_v4  ;;  %9376 = vmatmul.msk.f32.gmra.mxu2 %vm857_vm4, %v14796_v56  ;;  %v5173_v56 = vld [vmem:[#allocation6 + $0x30] sm:$0xff] }
 0x702   : > { %9350 = vmatmul.msk.f32.gmra.mxu1 %vm857_vm4, %v12430_v44  ;;  %9410 = vmatmul.msk.f32.gmra.mxu3 %vm857_vm4, %v12294_v46  ;;  %v12449_v46 = vld [vmem:[#allocation6 + $0x188] sm:$0xff] }
 0x704   : > { %v4786_v15 = vpop.f32.mrf.mxu2 }
 0x705   : > { %v4870_v5 = vadd.f32 %v4786_v15, %v4594_v12  ;;  %v5062_v59 = vpop.f32.mrf.mxu3  ;;  %v14800_v12 = vld [vmem:[#allocation39_spill] sm:$0xff] }
 0x706   : > { %v12441_v54 = vpop.f32.mrf.mxu0  ;;  %v5449_v15 = vld [vmem:[#allocation6 + $0x31] sm:$0xff] }
 0x707   : > { %v12444_v26 = vadd.f32 %v5062_v59, %v4870_v5  ;;  %v12446_v63 = vpop.f32.mrf.mxu1  ;;  %v5450_v5 = vld [vmem:[#allocation6 + $0x39] sm:$0xff] }
 0x709   : > { %9317 = vmatmul.msk.f32.gmra.mxu0 %vm857_vm4, %v4099_v60  ;;  %9377 = vmatmul.msk.f32.gmra.mxu2 %vm857_vm4, %v14799_v25  ;;  %v5175_v25 = vld [vmem:[#allocation6 + $0x48] sm:$0xff] }
 0x70a   : > { %9351 = vmatmul.msk.f32.gmra.mxu1 %vm857_vm4, %v12449_v46  ;;  %9411 = vmatmul.msk.f32.gmra.mxu3 %vm857_vm4, %v12314_v47 }
 0x70c   : > { %v4789_v10 = vpop.f32.mrf.mxu2 }
 0x70d   : > { %v4871_v61 = vadd.f32 %v4789_v10, %v4595_v58  ;;  %v5065_v40 = vpop.f32.mrf.mxu3  ;;  %v14802_v58 = vld [vmem:[#allocation41_spill] sm:$0xff] }
 0x70e   : > { %v12458_v22 = vpop.f32.mrf.mxu0  ;;  %v5451_v10 = vld [vmem:[#allocation6 + $0x49] sm:$0xff] }
 0x70f   : > { %v12460_v0 = vadd.f32 %v5065_v40, %v4871_v61  ;;  %v12462_v8 = vpop.f32.mrf.mxu1  ;;  %v4328_v28 = vadd.f32 %v12458_v22, %v12036_v41 }
 0x711   : > { %9378 = vmatmul.msk.f32.gmra.mxu2 %vm857_vm4, %v14800_v12  ;;  %9422 = vmatmul.msk.f32.vlgmr.msra.gmra.mxu0 %vm857_vm4, %v5173_v56  ;;  %v5176_v56 = vld [vmem:[#allocation6 + $0x50] sm:$0xff] }
 0x712   : > { %9412 = vmatmul.msk.f32.gmra.mxu3 %vm857_vm4, %v12334_v11  ;;  %9456 = vmatmul.msk.f32.vlgmr.msra.gmra.mxu1 %vm857_vm4, %v5449_v15  ;;  %v14803_v12 = vld [vmem:[#allocation42_spill] sm:$0xff] }
 0x713   : > { %v5452_v15 = vld [vmem:[#allocation6 + $0x51] sm:$0xff] }
 0x714   : > { %v12470_v18 = vpop.f32.mrf.mxu2 }
 0x716   : > { %v12472_v47 = vpop.f32.mrf.mxu0 }
 0x717   : > { %v12474_v42 = vpop.f32.mrf.mxu1  ;;  %v4329_v41 = vadd.f32 %v12472_v47, %v12052_v52 }
 0x719   : > { %9379 = vmatmul.msk.f32.gmra.mxu2 %vm857_vm4, %v14801_v3  ;;  %9423 = vmatmul.msk.f32.gmra.mxu0 %vm857_vm4, %v5174_v14 }
 0x71a   : > { %9413 = vmatmul.msk.f32.gmra.mxu3 %vm857_vm4, %v12354_v45  ;;  %9457 = vmatmul.msk.f32.gmra.mxu1 %vm857_vm4, %v5450_v5  ;;  %v5177_v5 = vld [vmem:[#allocation6 + $0x60] sm:$0xff] }
 0x71c   : > { %v12482_v11 = vpop.f32.mrf.mxu2 }
 0x71e   : > { %v12484_v59 = vpop.f32.mrf.mxu0 }
 0x71f   : > { %v12486_v50 = vpop.f32.mrf.mxu1  ;;  %v4330_v52 = vadd.f32 %v12484_v59, %v12068_v55 }
 0x721   : > { %9380 = vmatmul.msk.f32.gmra.mxu2 %vm857_vm4, %v14802_v58  ;;  %9424 = vmatmul.msk.f32.gmra.mxu0 %vm857_vm4, %v5175_v25  ;;  %v14805_v25 = vld [vmem:[#allocation45_spill] sm:$0xff] }
 0x722   : > { %9414 = vmatmul.msk.f32.gmra.mxu3 %vm857_vm4, %v12374_v36  ;;  %9458 = vmatmul.msk.f32.gmra.mxu1 %vm857_vm4, %v5451_v10  ;;  %v5453_v58 = vld [vmem:[#allocation6 + $0x61] sm:$0xff] }
 0x724   : > { %v12494_v45 = vpop.f32.mrf.mxu2 }
 0x726   : > { %v12496_v61 = vpop.f32.mrf.mxu0 }
 0x727   : > { %v12498_v40 = vpop.f32.mrf.mxu1  ;;  %v4331_v55 = vadd.f32 %v12496_v61, %v12084_v37 }
 0x729   : > { %9381 = vmatmul.msk.f32.gmra.mxu2 %vm857_vm4, %v14803_v12  ;;  %9425 = vmatmul.msk.f32.gmra.mxu0 %vm857_vm4, %v5176_v56  ;;  %v5178_v12 = vld [vmem:[#allocation6 + $0x68] sm:$0xff] }
 0x72a   : > { %9415 = vmatmul.msk.f32.gmra.mxu3 %vm857_vm4, %v12406_v19  ;;  %9459 = vmatmul.msk.f32.gmra.mxu1 %vm857_vm4, %v5452_v15  ;;  %v14807_v15 = vld [vmem:[#allocation48_spill] sm:$0xff] }
 0x72c   : > { %v12506_v36 = vpop.f32.mrf.mxu2 }
 0x72d   : > { %14804 = vst [vmem:[#allocation36_spill] sm:$0xff] %v12506_v36 }
 0x72e   : > { %v12508_v14 = vpop.f32.mrf.mxu0 }
 0x72f   : > { %v12510_v3 = vpop.f32.mrf.mxu1  ;;  %v4332_v37 = vadd.f32 %v12508_v14, %v12106_v24 }
 0x731   : > { %9382 = vmatmul.msk.f32.gmra.mxu2 %vm857_vm4, %v14805_v25  ;;  %9426 = vmatmul.msk.f32.gmra.mxu0 %vm857_vm4, %v5177_v5  ;;  %v5454_v25 = vld [vmem:[#allocation6 + $0x69] sm:$0xff] }
 0x732   : > { %9416 = vmatmul.msk.f32.gmra.mxu3 %vm857_vm4, %v12426_v4  ;;  %9460 = vmatmul.msk.f32.gmra.mxu1 %vm857_vm4, %v5453_v58 }
 0x734   : > { %v12518_v19 = vpop.f32.mrf.mxu2 }
 0x735   : > { %14806 = vst [vmem:[#allocation47_spill] sm:$0xff] %v12518_v19  ;;  %v12550_v19 = vld [vmem:[#allocation6 + $0x189] sm:$0xff] }
 0x736   : > { %v12520_v10 = vpop.f32.mrf.mxu0 }
 0x737   : > { %v12522_v56 = vpop.f32.mrf.mxu1  ;;  %v4333_v24 = vadd.f32 %v12520_v10, %v12125_v1 }
 0x739   : > { %9383 = vmatmul.msk.f32.gmra.mxu2 %vm857_vm4, %v14807_v15  ;;  %9427 = vmatmul.msk.f32.gmra.mxu0 %vm857_vm4, %v5178_v12  ;;  %v4926_v15 = vld [vmem:[#allocation6 + $0x182] sm:$0xff]  ;;  %v5455_v12 = vld [vmem:[#allocation6 + $0x79] sm:$0xff] }
 0x73a   : > { %9417 = vmatmul.msk.f32.gmra.mxu3 %vm857_vm4, %v4099_v60  ;;  %9461 = vmatmul.msk.f32.gmra.mxu1 %vm857_vm4, %v5454_v25 }
 0x73c   : > { %v12529_v4 = vpop.f32.mrf.mxu2 }
 0x73d   : > { %14808 = vst [vmem:[#allocation49_spill] sm:$0xff] %v12529_v4  ;;  %v14810_v4 = vld [vmem:[#allocation50_spill] sm:$0xff] }
 0x73e   : > { %v12531_v5 = vpop.f32.mrf.mxu0  ;;  %v4327_v43 = vadd.f32 %v12441_v54, %v14810_v4 }
 0x73f   : > { %v12533_v58 = vpop.f32.mrf.mxu1  ;;  %v4334_v1 = vadd.f32 %v12531_v5, %v12141_v62 }
 0x741   : > { %9384 = vmatmul.msk.f32.gmra.mxu2 %vm857_vm4, %v12535_v29  ;;  %9428 = vmatmul.msk.f32.gmra.mxu0 %vm857_vm4, %v5179_v57  ;;  %v4927_v57 = vld [vmem:[#allocation6 + $0x18a] sm:$0xff] }
 0x742   : > { %9418 = vmatmul.msk.f32.gmra.mxu3 %vm857_vm4, %v4926_v15  ;;  %9462 = vmatmul.msk.f32.gmra.mxu1 %vm857_vm4, %v5455_v12  ;;  %v5456_v15 = vld [vmem:[#allocation6 + $0x81] sm:$0xff]  ;;  %v4603_v12 = vadd.f32 %v12446_v63, %v4327_v43  ;;  %v4604_v43 = vadd.f32 %v12462_v8, %v4328_v28 }
 0x744   : > { %v12542_v60 = vpop.f32.mrf.mxu2 }
 0x745   : > { %14809 = vst [vmem:[#allocation37_spill] sm:$0xff] %v12542_v60 }
 0x746   : > { %v12544_v25 = vpop.f32.mrf.mxu0 }
 0x747   : > { %v12548_v17 = vpop.f32.mrf.mxu1  ;;  %v4335_v62 = vadd.f32 %v12544_v25, %v12157_v39 }
 0x749   : > { %9385 = vmatmul.msk.f32.gmra.mxu2 %vm857_vm4, %v12550_v19  ;;  %9429 = vmatmul.msk.f32.gmra.mxu0 %vm857_vm4, %v5180_v6  ;;  %v5457_v6 = vld [vmem:[#allocation6 + $0x91] sm:$0xff] }
 0x74a   : > { %9419 = vmatmul.msk.f32.gmra.mxu3 %vm857_vm4, %v4927_v57  ;;  %9463 = vmatmul.msk.f32.gmra.mxu1 %vm857_vm4, %v5456_v15  ;;  %v5182_v15 = vld [vmem:[#allocation6 + $0x98] sm:$0xff] }
 0x74c   : > { %v4813_v60 = vpop.f32.mrf.mxu2 }
 0x74d   : > { %v12558_v54 = vadd.f32 %v4813_v60, %v4603_v12  ;;  %v5726_v12 = vld [vmem:[#allocation6 + $0x3a] sm:$0xff] }
 0x74e   : > { %v12560_v4 = vpop.f32.mrf.mxu0 }
 0x74f   : > { %v12564_v36 = vpop.f32.mrf.mxu1  ;;  %v4336_v39 = vadd.f32 %v12560_v4, %v12173_v23 }
 0x751   : > { %9430 = vmatmul.msk.f32.gmra.mxu0 %vm857_vm4, %v5181_v34  ;;  %9490 = vmatmul.msk.f32.vlgmr.msra.gmra.mxu2 %vm857_vm4, %v5725_v33  ;;  %v5458_v34 = vld [vmem:[#allocation6 + $0x99] sm:$0xff]  ;;  %v4605_v33 = vadd.f32 %v12474_v42, %v4329_v41  ;;  %v4606_v42 = vadd.f32 %v12486_v50, %v4330_v52  ;;  %v4607_v50 = vadd.f32 %v12498_v40, %v4331_v55 }
 0x752   : > { %9464 = vmatmul.msk.f32.gmra.mxu1 %vm857_vm4, %v5457_v6  ;;  %v4608_v40 = vadd.f32 %v12510_v3, %v4332_v37  ;;  %v4609_v3 = vadd.f32 %v12522_v56, %v4333_v24  ;;  %v4610_v56 = vadd.f32 %v12533_v58, %v4334_v1  ;;  %v4611_v58 = vadd.f32 %v12548_v17, %v4335_v62 }
 0x753   : > { %v4612_v17 = vadd.f32 %v12564_v36, %v4336_v39 }
 0x754   : > { %v4816_v63 = vpop.f32.mrf.mxu2 }
 0x755   : > { %v12570_v60 = vadd.f32 %v4816_v63, %v4604_v43  ;;  %v5183_v43 = vld [vmem:[#allocation6 + $0xa8] sm:$0xff] }
 0x756   : > { %v12572_v57 = vpop.f32.mrf.mxu0  ;;  %v5727_v63 = vld [vmem:[#allocation6 + $0x4a] sm:$0xff] }
 0x757   : > { %v12576_v22 = vpop.f32.mrf.mxu1  ;;  %v4337_v23 = vadd.f32 %v12572_v57, %v12189_v13 }
 0x759   : > { %9431 = vmatmul.msk.f32.gmra.mxu0 %vm857_vm4, %v5182_v15  ;;  %9491 = vmatmul.msk.f32.gmra.mxu2 %vm857_vm4, %v5726_v12  ;;  %v5459_v15 = vld [vmem:[#allocation6 + $0xa9] sm:$0xff]  ;;  %v4613_v36 = vadd.f32 %v12576_v22, %v4337_v23 }
 0x75a   : > { %9465 = vmatmul.msk.f32.gmra.mxu1 %vm857_vm4, %v5458_v34  ;;  %v12596_v34 = vpop.f32.mrf.mxu3 }
 0x75c   : > { %v4819_v28 = vpop.f32.mrf.mxu2 }
 0x75d   : > { %v12582_v8 = vadd.f32 %v4819_v28, %v4605_v33  ;;  %v5184_v28 = vld [vmem:[#allocation6 + $0xb0] sm:$0xff] }
 0x75e   : > { %v12584_v6 = vpop.f32.mrf.mxu0 }
 0x75f   : > { %v12588_v47 = vpop.f32.mrf.mxu1  ;;  %v4338_v13 = vadd.f32 %v12584_v6, %v12205_v38 }
 0x761   : > { %9432 = vmatmul.msk.f32.gmra.mxu0 %vm857_vm4, %v5183_v43  ;;  %9492 = vmatmul.msk.f32.gmra.mxu2 %vm857_vm4, %v5727_v63  ;;  %v5728_v43 = vld [vmem:[#allocation6 + $0x52] sm:$0xff]  ;;  %v4614_v22 = vadd.f32 %v12588_v47, %v4338_v13 }
 0x762   : > { %9466 = vmatmul.msk.f32.gmra.mxu1 %vm857_vm4, %v5459_v15  ;;  %v5460_v63 = vld [vmem:[#allocation6 + $0xb1] sm:$0xff] }
 0x764   : > { %v4822_v41 = vpop.f32.mrf.mxu2 }
 0x765   : > { %v12594_v12 = vadd.f32 %v4822_v41, %v4606_v42  ;;  %v12616_v41 = vpop.f32.mrf.mxu3 }
 0x766   : > { %v12598_v33 = vpop.f32.mrf.mxu0 }
 0x767   : > { %14811 = vst [vmem:[#allocation51_spill] sm:$0xff] %v12594_v12  ;;  %v12602_v59 = vpop.f32.mrf.mxu1  ;;  %v5729_v12 = vld [vmem:[#allocation6 + $0x62] sm:$0xff]  ;;  %v4339_v38 = vadd.f32 %v12598_v33, %v12221_v53 }
 0x769   : > { %9433 = vmatmul.msk.f32.gmra.mxu0 %vm857_vm4, %v5184_v28  ;;  %9493 = vmatmul.msk.f32.gmra.mxu2 %vm857_vm4, %v5728_v43  ;;  %v5185_v28 = vld [vmem:[#allocation6 + $0xc0] sm:$0xff]  ;;  %v4615_v47 = vadd.f32 %v12602_v59, %v4339_v38 }
 0x76a   : > { %9467 = vmatmul.msk.f32.gmra.mxu1 %vm857_vm4, %v5460_v63  ;;  %v5461_v43 = vld [vmem:[#allocation6 + $0xc1] sm:$0xff] }
 0x76c   : > { %v4825_v52 = vpop.f32.mrf.mxu2 }
 0x76d   : > { %v12608_v15 = vadd.f32 %v4825_v52, %v4607_v50  ;;  %v5186_v52 = vld [vmem:[#allocation6 + $0xc8] sm:$0xff] }
 0x76e   : > { %v12610_v42 = vpop.f32.mrf.mxu0 }
 0x76f   : > { %14812 = vst [vmem:[#allocation52_spill] sm:$0xff] %v12608_v15  ;;  %v12614_v61 = vpop.f32.mrf.mxu1  ;;  %v5730_v15 = vld [vmem:[#allocation6 + $0x6a] sm:$0xff]  ;;  %v4340_v53 = vadd.f32 %v12610_v42, %v12237_v31  ;;  %v14822_v31 = vld [vmem:[#allocation67_spill] sm:$0xff] }
 0x771   : > { %9434 = vmatmul.msk.f32.gmra.mxu0 %vm857_vm4, %v5185_v28  ;;  %9494 = vmatmul.msk.f32.gmra.mxu2 %vm857_vm4, %v5729_v12  ;;  %v5462_v28 = vld [vmem:[#allocation6 + $0xc9] sm:$0xff]  ;;  %v12632_v12 = vpop.f32.mrf.mxu3  ;;  %v4616_v59 = vadd.f32 %v12614_v61, %v4340_v53  ;;  %v6199_v53 = vld [vmem:[#allocation4 + $0x1] sm:$0xff] }
 0x772   : > { %9468 = vmatmul.msk.f32.gmra.mxu1 %vm857_vm4, %v5461_v43  ;;  %9523 = vmatmul.msk.f32.vlgmr.msrb.gmra.mxu3 %vm885_vm10, %v6199_v53  ;;  %v5471_v53 = vld [vmem:[#allocation6 + $0x139] sm:$0xff] }
 0x774   : > { %v4828_v55 = vpop.f32.mrf.mxu2 }
 0x775   : > { %v12622_v63 = vadd.f32 %v4828_v55, %v4608_v40  ;;  %v5187_v55 = vld [vmem:[#allocation6 + $0xd8] sm:$0xff] }
 0x776   : > { %v12624_v50 = vpop.f32.mrf.mxu0 }
 0x777   : > { %14813 = vst [vmem:[#allocation38_spill] sm:$0xff] %v12622_v63  ;;  %v12628_v14 = vpop.f32.mrf.mxu1  ;;  %v4341_v42 = vadd.f32 %v12624_v50, %v14822_v31  ;;  %v14825_v31 = vld [vmem:[#allocation68_spill] sm:$0xff] }
 0x778   : > { %v5745_v63 = vld [vmem:[#allocation6 + $0x122] sm:$0xff] }
 0x779   : > { %9435 = vmatmul.msk.f32.gmra.mxu0 %vm857_vm4, %v5186_v52  ;;  %9495 = vmatmul.msk.f32.gmra.mxu2 %vm857_vm4, %v5730_v15  ;;  %v5731_v52 = vld [vmem:[#allocation6 + $0x7a] sm:$0xff]  ;;  %v12648_v24 = vpop.f32.mrf.mxu3  ;;  %v4617_v61 = vadd.f32 %v12628_v14, %v4341_v42 }
 0x77a   : > { %9469 = vmatmul.msk.f32.gmra.mxu1 %vm857_vm4, %v5462_v28  ;;  %v5463_v15 = vld [vmem:[#allocation6 + $0xd9] sm:$0xff] }
 0x77b   : > { %v5195_v14 = vld [vmem:[#allocation6 + $0x138] sm:$0xff] }
 0x77c   : > { %v4831_v37 = vpop.f32.mrf.mxu2  ;;  %v5739_v42 = vld [vmem:[#allocation6 + $0xda] sm:$0xff] }
 0x77d   : > { %v12636_v43 = vadd.f32 %v4831_v37, %v4609_v3 }
 0x77e   : > { %v12638_v40 = vpop.f32.mrf.mxu0 }
 0x77f   : > { %14814 = vst [vmem:[#allocation39_spill] sm:$0xff] %v12636_v43  ;;  %v12642_v10 = vpop.f32.mrf.mxu1  ;;  %v5732_v43 = vld [vmem:[#allocation6 + $0x82] sm:$0xff] }
 0x781   : > { %9436 = vmatmul.msk.f32.gmra.mxu0 %vm857_vm4, %v5187_v55  ;;  %9496 = vmatmul.msk.f32.gmra.mxu2 %vm857_vm4, %v5731_v52  ;;  %v5188_v55 = vld [vmem:[#allocation6 + $0xe0] sm:$0xff] }
 0x782   : > { %9470 = vmatmul.msk.f32.gmra.mxu1 %vm857_vm4, %v5463_v15  ;;  %v5464_v52 = vld [vmem:[#allocation6 + $0xe1] sm:$0xff] }
 0x784   : > { %v4834_v28 = vpop.f32.mrf.mxu2 }
 0x785   : > { %v12650_v3 = vadd.f32 %v4834_v28, %v4610_v56  ;;  %v12664_v56 = vpop.f32.mrf.mxu3 }
 0x786   : > { %v12652_v37 = vpop.f32.mrf.mxu0 }
 0x787   : > { %14815 = vst [vmem:[#allocation40_spill] sm:$0xff] %v12650_v3  ;;  %v12656_v5 = vpop.f32.mrf.mxu1  ;;  %v5733_v3 = vld [vmem:[#allocation6 + $0x92] sm:$0xff] }
 0x789   : > { %9437 = vmatmul.msk.f32.gmra.mxu0 %vm857_vm4, %v5188_v55  ;;  %9497 = vmatmul.msk.f32.gmra.mxu2 %vm857_vm4, %v5732_v43  ;;  %v5189_v55 = vld [vmem:[#allocation6 + $0xf0] sm:$0xff] }
 0x78a   : > { %9471 = vmatmul.msk.f32.gmra.mxu1 %vm857_vm4, %v5464_v52  ;;  %v5465_v43 = vld [vmem:[#allocation6 + $0xf1] sm:$0xff] }
 0x78c   : > { %v4837_v1 = vpop.f32.mrf.mxu2 }
 0x78d   : > { %v12662_v15 = vadd.f32 %v4837_v1, %v4611_v58  ;;  %v12684_v1 = vpop.f32.mrf.mxu3 }
 0x78e   : > { %v12666_v28 = vpop.f32.mrf.mxu0 }
 0x78f   : > { %14816 = vst [vmem:[#allocation41_spill] sm:$0xff] %v12662_v15  ;;  %v12670_v25 = vpop.f32.mrf.mxu1  ;;  %v5734_v15 = vld [vmem:[#allocation6 + $0x9a] sm:$0xff] }
 0x791   : > { %9438 = vmatmul.msk.f32.gmra.mxu0 %vm857_vm4, %v5189_v55  ;;  %9498 = vmatmul.msk.f32.gmra.mxu2 %vm857_vm4, %v5733_v3  ;;  %v5190_v55 = vld [vmem:[#allocation6 + $0xf8] sm:$0xff] }
 0x792   : > { %9472 = vmatmul.msk.f32.gmra.mxu1 %vm857_vm4, %v5465_v43  ;;  %v5466_v3 = vld [vmem:[#allocation6 + $0xf9] sm:$0xff] }
 0x794   : > { %v4840_v62 = vpop.f32.mrf.mxu2 }
 0x795   : > { %v12676_v52 = vadd.f32 %v4840_v62, %v4612_v17  ;;  %v5191_v62 = vld [vmem:[#allocation6 + $0x108] sm:$0xff] }
 0x796   : > { %v12678_v58 = vpop.f32.mrf.mxu0 }
 0x797   : > { %14817 = vst [vmem:[#allocation42_spill] sm:$0xff] %v12676_v52  ;;  %v12682_v4 = vpop.f32.mrf.mxu1  ;;  %v5735_v52 = vld [vmem:[#allocation6 + $0xaa] sm:$0xff] }
 0x799   : > { %9439 = vmatmul.msk.f32.gmra.mxu0 %vm857_vm4, %v5190_v55  ;;  %9499 = vmatmul.msk.f32.gmra.mxu2 %vm857_vm4, %v5734_v15  ;;  %v5467_v55 = vld [vmem:[#allocation6 + $0x109] sm:$0xff]  ;;  %v12700_v15 = vpop.f32.mrf.mxu3 }
 0x79a   : > { %9473 = vmatmul.msk.f32.gmra.mxu1 %vm857_vm4, %v5466_v3 }
 0x79c   : > { %v4843_v39 = vpop.f32.mrf.mxu2 }
 0x79d   : > { %v12690_v43 = vadd.f32 %v4843_v39, %v4613_v36  ;;  %v5192_v39 = vld [vmem:[#allocation6 + $0x110] sm:$0xff] }
 0x79e   : > { %v12692_v17 = vpop.f32.mrf.mxu0 }
 0x79f   : > { %14818 = vst [vmem:[#allocation45_spill] sm:$0xff] %v12690_v43  ;;  %v12696_v57 = vpop.f32.mrf.mxu1  ;;  %v5738_v43 = vld [vmem:[#allocation6 + $0xca] sm:$0xff] }
 0x7a1   : > { %9440 = vmatmul.msk.f32.gmra.mxu0 %vm857_vm4, %v5191_v62  ;;  %9500 = vmatmul.msk.f32.gmra.mxu2 %vm857_vm4, %v5735_v52  ;;  %v5736_v62 = vld [vmem:[#allocation6 + $0xb2] sm:$0xff]  ;;  %v12716_v13 = vpop.f32.mrf.mxu3 }
 0x7a2   : > { %9474 = vmatmul.msk.f32.gmra.mxu1 %vm857_vm4, %v5467_v55  ;;  %v5468_v52 = vld [vmem:[#allocation6 + $0x111] sm:$0xff] }
 0x7a4   : > { %v4846_v23 = vpop.f32.mrf.mxu2 }
 0x7a5   : > { %v12704_v3 = vadd.f32 %v4846_v23, %v4614_v22 }
 0x7a6   : > { %v12706_v36 = vpop.f32.mrf.mxu0 }
 0x7a7   : > { %14819 = vst [vmem:[#allocation48_spill] sm:$0xff] %v12704_v3  ;;  %v12710_v6 = vpop.f32.mrf.mxu1  ;;  %v5737_v3 = vld [vmem:[#allocation6 + $0xc2] sm:$0xff] }
 0x7a9   : > { %9441 = vmatmul.msk.f32.gmra.mxu0 %vm857_vm4, %v5192_v39  ;;  %9501 = vmatmul.msk.f32.gmra.mxu2 %vm857_vm4, %v5736_v62  ;;  %v5193_v39 = vld [vmem:[#allocation6 + $0x120] sm:$0xff] }
 0x7aa   : > { %9475 = vmatmul.msk.f32.gmra.mxu1 %vm857_vm4, %v5468_v52  ;;  %v5469_v62 = vld [vmem:[#allocation6 + $0x121] sm:$0xff] }
 0x7ac   : > { %v4849_v55 = vpop.f32.mrf.mxu2 }
 0x7ad   : > { %v12718_v22 = vadd.f32 %v4849_v55, %v4615_v47  ;;  %v12732_v47 = vpop.f32.mrf.mxu3 }
 0x7ae   : > { %v12720_v23 = vpop.f32.mrf.mxu0 }
 0x7af   : > { %14820 = vst [vmem:[#allocation50_spill] sm:$0xff] %v12718_v22  ;;  %v12724_v33 = vpop.f32.mrf.mxu1 }
 0x7b1   : > { %9442 = vmatmul.msk.f32.gmra.mxu0 %vm857_vm4, %v5193_v39  ;;  %9502 = vmatmul.msk.f32.gmra.mxu2 %vm857_vm4, %v5737_v3  ;;  %v5194_v39 = vld [vmem:[#allocation6 + $0x128] sm:$0xff] }
 0x7b2   : > { %9476 = vmatmul.msk.f32.gmra.mxu1 %vm857_vm4, %v5469_v62  ;;  %v5470_v3 = vld [vmem:[#allocation6 + $0x129] sm:$0xff] }
 0x7b4   : > { %v4852_v38 = vpop.f32.mrf.mxu2 }
 0x7b5   : > { %v12730_v52 = vadd.f32 %v4852_v38, %v4616_v59  ;;  %v14823_v59 = vmov 0.0  }
 0x7b6   : > { %v12734_v55 = vpop.f32.mrf.mxu0  ;;  %889 = vst.msk [vmem:[#allocation4 + $0x10] sm:$0x3] %vm888_vm11, %v14823_v59 }
 0x7b7   : > { %14821 = vst [vmem:[#allocation73_spill] sm:$0xff] %v12730_v52  ;;  %v12738_v22 = vpop.f32.mrf.mxu1  ;;  %v5474_v52 = vld [vmem:[#allocation6 + $0x159] sm:$0xff] }
 0x7b8   : > { %893 = vst.msk [vmem:[#allocation4 + $0x1a8] sm:$0x3] %vm888_vm11, %v14823_v59 }
 0x7b9   : > { %9443 = vmatmul.msk.f32.gmra.mxu0 %vm857_vm4, %v5194_v39  ;;  %9503 = vmatmul.msk.f32.gmra.mxu2 %vm857_vm4, %v5738_v43  ;;  %v4342_v43 = vadd.f32 %v12638_v40, %v14825_v31  ;;  %895 = vst.msk [vmem:[#allocation4] sm:$0x1] %vm894_vm12, %v14823_v59 }
 0x7ba   : > { %9477 = vmatmul.msk.f32.gmra.mxu1 %vm857_vm4, %v5470_v3  ;;  %v12755_v3 = vpop.f32.mrf.mxu3  ;;  %896 = vst.msk [vmem:[#allocation4 + $0x18] sm:$0x1] %vm894_vm12, %v14823_v59 }
 0x7bb   : > { %897 = vst.msk [vmem:[#allocation4 + $0x30] sm:$0x1] %vm894_vm12, %v14823_v59 }
 0x7bc   : > { %v4855_v62 = vpop.f32.mrf.mxu2  ;;  %898 = vst.msk [vmem:[#allocation4 + $0x48] sm:$0x1] %vm894_vm12, %v14823_v59 }
 0x7bd   : > { %v12746_v50 = vadd.f32 %v4855_v62, %v4617_v61  ;;  %v4618_v61 = vadd.f32 %v12642_v10, %v4342_v43  ;;  %v6200_v62 = vld [vmem:[#allocation4 + $0x9] sm:$0xff]  ;;  %v4343_v10 = vadd.f32 %v12652_v37, %v12287_v32  ;;  %899 = vst.msk [vmem:[#allocation4 + $0x60] sm:$0x1] %vm894_vm12, %v14823_v59 }
 0x7be   : > { %v12749_v38 = vpop.f32.mrf.mxu0  ;;  %9524 = vmatmul.msk.f32.gmra.mxu3 %vm885_vm10, %v6200_v62  ;;  %900 = vst.msk [vmem:[#allocation4 + $0x78] sm:$0x1] %vm894_vm12, %v14823_v59 }
 0x7bf   : > { %14824 = vst [vmem:[#allocation67_spill] sm:$0xff] %v12746_v50  ;;  %v12753_v39 = vpop.f32.mrf.mxu1  ;;  %v4619_v37 = vadd.f32 %v12656_v5, %v4343_v10  ;;  %v5417_v5 = vadd.f32 %v12666_v28, %v12310_v49  ;;  %v12823_v28 = vld [vmem:[#allocation16] ss:$0 sm:$0xff] }
 0x7c0   : > { %901 = vst.msk [vmem:[#allocation4 + $0x90] sm:$0x1] %vm894_vm12, %v14823_v59 }
 0x7c1   : > { %9444 = vmatmul.msk.f32.gmra.mxu0 %vm857_vm4, %v5195_v14  ;;  %9504 = vmatmul.msk.f32.gmra.mxu2 %vm857_vm4, %v5739_v42  ;;  %v5196_v14 = vld [vmem:[#allocation6 + $0x140] sm:$0xff]  ;;  %902 = vst.msk [vmem:[#allocation4 + $0xa8] sm:$0x1] %vm894_vm12, %v14823_v59  ;;  %v5693_v49 = vadd.f32 %v12670_v25, %v5417_v5  ;;  %v5418_v5 = vadd.f32 %v12678_v58, %v12330_v35 }
 0x7c2   : > { %9478 = vmatmul.msk.f32.gmra.mxu1 %vm857_vm4, %v5471_v53  ;;  %v5472_v42 = vld [vmem:[#allocation6 + $0x141] sm:$0xff]  ;;  %v12784_v32 = vpop.f32.mrf.mxu3  ;;  %903 = vst.msk [vmem:[#allocation4 + $0xc0] sm:$0x1] %vm894_vm12, %v14823_v59 }
 0x7c3   : > { %904 = vst.msk [vmem:[#allocation4 + $0xd8] sm:$0x1] %vm894_vm12, %v14823_v59  ;;  %v5694_v35 = vadd.f32 %v12682_v4, %v5418_v5  ;;  %v5419_v4 = vadd.f32 %v12692_v17, %v12350_v51  ;;  %v6070_v5 = vld [vmem:[%s12836_s23 + $0x8] sm:$0xff] }
 0x7c4   : > { %v4858_v50 = vpop.f32.mrf.mxu2  ;;  %905 = vst.msk [vmem:[#allocation4 + $0xf0] sm:$0x1] %vm894_vm12, %v14823_v59 }
 0x7c5   : > { %v12764_v40 = vadd.f32 %v4858_v50, %v4618_v61  ;;  %v5740_v50 = vld [vmem:[#allocation6 + $0xe2] sm:$0xff]  ;;  %906 = vst.msk [vmem:[#allocation4 + $0x108] sm:$0x1] %vm894_vm12, %v14823_v59  ;;  %v5695_v51 = vadd.f32 %v12696_v57, %v5419_v4  ;;  %v5420_v57 = vadd.f32 %v12706_v36, %v12370_v27  ;;  %v5476_v27 = vld [vmem:[#allocation6 + $0x171] sm:$0xff] }
 0x7c6   : > { %v12768_v31 = vpop.f32.mrf.mxu0  ;;  %907 = vst.msk [vmem:[#allocation4 + $0x120] sm:$0x1] %vm894_vm12, %v14823_v59 }
 0x7c7   : > { %14826 = vst [vmem:[#allocation68_spill] sm:$0xff] %v12764_v40  ;;  %v12774_v43 = vpop.f32.mrf.mxu1  ;;  %v5696_v36 = vadd.f32 %v12710_v6, %v5420_v57 }
 0x7c8   : > { %908 = vst.msk [vmem:[#allocation4 + $0x138] sm:$0x1] %vm894_vm12, %v14823_v59 }
 0x7c9   : > { %9445 = vmatmul.msk.f32.gmra.mxu0 %vm857_vm4, %v5196_v14  ;;  %9505 = vmatmul.msk.f32.gmra.mxu2 %vm857_vm4, %v5740_v50  ;;  %v5197_v14 = vld [vmem:[#allocation6 + $0x150] sm:$0xff]  ;;  %909 = vst.msk [vmem:[#allocation4 + $0x150] sm:$0x1] %vm894_vm12, %v14823_v59 }
 0x7ca   : > { %9479 = vmatmul.msk.f32.gmra.mxu1 %vm857_vm4, %v5472_v42  ;;  %v5741_v50 = vld [vmem:[#allocation6 + $0xf2] sm:$0xff]  ;;  %910 = vst.msk [vmem:[#allocation4 + $0x168] sm:$0x1] %vm894_vm12, %v14823_v59 }
 0x7cb   : > { %v5473_v42 = vld [vmem:[#allocation6 + $0x151] sm:$0xff]  ;;  %911 = vst.msk [vmem:[#allocation4 + $0x180] sm:$0x1] %vm894_vm12, %v14823_v59 }
 0x7cc   : > { %v4861_v53 = vpop.f32.mrf.mxu2  ;;  %912 = vst.msk [vmem:[#allocation4 + $0x198] sm:$0x1] %vm894_vm12, %v14823_v59 }
 0x7cd   : > { %v12795_v61 = vadd.f32 %v4861_v53, %v4619_v37  ;;  %v12827_v37 = vpop.f32.mrf.mxu3  ;;  %913 = vst.msk [vmem:[#allocation4 + $0x11] sm:$0x1] %vm894_vm12, %v14823_v59 }
 0x7ce   : > { %v12799_v62 = vpop.f32.mrf.mxu0  ;;  %914 = vst.msk [vmem:[#allocation4 + $0x29] sm:$0x1] %vm894_vm12, %v14823_v59 }
 0x7cf   : > { %14827 = vst [vmem:[#allocation74_spill] sm:$0xff] %v12795_v61  ;;  %v12808_v10 = vpop.f32.mrf.mxu1  ;;  %v6069_v61 = vld [vmem:[%s12836_s23] sm:$0xff] }
 0x7d0   : > { %915 = vst.msk [vmem:[#allocation4 + $0x41] sm:$0x1] %vm894_vm12, %v14823_v59 }
 0x7d1   : > { %9446 = vmatmul.msk.f32.gmra.mxu0 %vm857_vm4, %v5197_v14  ;;  %9506 = vmatmul.msk.f32.gmra.mxu2 %vm857_vm4, %v5741_v50  ;;  %916 = vst.msk [vmem:[#allocation4 + $0x59] sm:$0x1] %vm894_vm12, %v14823_v59 }
 0x7d2   : > { %9480 = vmatmul.msk.f32.gmra.mxu1 %vm857_vm4, %v5473_v42  ;;  %917 = vst.msk [vmem:[#allocation4 + $0x71] sm:$0x1] %vm894_vm12, %v14823_v59 }
 0x7d3   : > { %918 = vst.msk [vmem:[#allocation4 + $0x89] sm:$0x1] %vm894_vm12, %v14823_v59 }
 0x7d4   : > { %v5873_v53 = vpop.f32.mrf.mxu2  ;;  %919 = vst.msk [vmem:[#allocation4 + $0xa1] sm:$0x1] %vm894_vm12, %v14823_v59 }
 0x7d5   : > { %v5969_v14 = vadd.f32 %v5873_v53, %v5693_v49  ;;  %v5198_v49 = vld [vmem:[#allocation6 + $0x158] sm:$0xff]  ;;  %920 = vst.msk [vmem:[#allocation4 + $0xb9] sm:$0x1] %vm894_vm12, %v14823_v59 }
 0x7d6   : > { %v12840_v25 = vpop.f32.mrf.mxu0  ;;  %v5742_v53 = vld [vmem:[#allocation6 + $0xfa] sm:$0xff]  ;;  %921 = vst.msk [vmem:[#allocation4 + $0xd1] sm:$0x1] %vm894_vm12, %v14823_v59 }
 0x7d7   : > { %v6005_v50 = vadd.f32 %v12823_v28, %v5969_v14  ;;  %v12847_v42 = vpop.f32.mrf.mxu1  ;;  %922 = vst.msk [vmem:[#allocation4 + $0xe9] sm:$0x1] %vm894_vm12, %v14823_v59 }
 0x7d8   : > { %923 = vst.msk [vmem:[#allocation4 + $0x101] sm:$0x1] %vm894_vm12, %v14823_v59 }
 0x7d9   : > { %v6037_v40 = vmax.f32 %v6005_v50, 0.0  ;;  %9447 = vmatmul.msk.f32.gmra.mxu0 %vm857_vm4, %v5198_v49  ;;  %9507 = vmatmul.msk.f32.gmra.mxu2 %vm857_vm4, %v5742_v53  ;;  %v12867_v49 = vpop.f32.mrf.mxu3  ;;  %v5199_v53 = vld [vmem:[#allocation6 + $0x168] sm:$0xff]  ;;  %924 = vst.msk [vmem:[#allocation4 + $0x119] sm:$0x1] %vm894_vm12, %v14823_v59 }
 0x7da   : > { %9481 = vmatmul.msk.f32.gmra.mxu1 %vm857_vm4, %v5474_v52  ;;  %14829 = vst [vmem:[#allocation75_spill] sm:$0xff] %v12867_v49 }
 0x7db   : > { %v6101_v58 = vadd.f32 %v6069_v61, %v6037_v40  ;;  %925 = vst.msk [vmem:[#allocation4 + $0x131] sm:$0x1] %vm894_vm12, %v14823_v59 }
 0x7dc   : > { %v5876_v14 = vpop.f32.mrf.mxu2  ;;  %926 = vst.msk [vmem:[#allocation4 + $0x149] sm:$0x1] %vm894_vm12, %v14823_v59 }
 0x7dd   : > { %6134 = vst.msk [vmem:[#allocation4 + $0x19] sm:$0xff] %vm885_vm10, %v6101_v58  ;;  %v5970_v50 = vadd.f32 %v5876_v14, %v5694_v35  ;;  %v5743_v35 = vld [vmem:[#allocation6 + $0x10a] sm:$0xff] }
 0x7de   : > { %v12869_v52 = vpop.f32.mrf.mxu0  ;;  %v5475_v14 = vld [vmem:[#allocation6 + $0x169] sm:$0xff]  ;;  %927 = vst.msk [vmem:[#allocation4 + $0x161] sm:$0x1] %vm894_vm12, %v14823_v59 }
 0x7df   : > { %v6006_v40 = vadd.f32 %v12823_v28, %v5970_v50  ;;  %v12876_v61 = vpop.f32.mrf.mxu1  ;;  %928 = vst.msk [vmem:[#allocation4 + $0x179] sm:$0x1] %vm894_vm12, %v14823_v59 }
 0x7e0   : > { %929 = vst.msk [vmem:[#allocation4 + $0x191] sm:$0x1] %vm894_vm12, %v14823_v59 }
 0x7e1   : > { %v6038_v58 = vmax.f32 %v6006_v40, 0.0  ;;  %9448 = vmatmul.msk.f32.gmra.mxu0 %vm857_vm4, %v5199_v53  ;;  %9508 = vmatmul.msk.f32.gmra.mxu2 %vm857_vm4, %v5743_v35  ;;  %930 = vst.msk [vmem:[#allocation4 + $0x1a9] sm:$0x1] %vm894_vm12, %v14823_v59 }
 0x7e2   : > { %9482 = vmatmul.msk.f32.gmra.mxu1 %vm857_vm4, %v5475_v14  ;;  %v6071_v14 = vld [vmem:[%s12836_s23 + $0x10] sm:$0xff] }
 0x7e3   : > { %v6102_v17 = vadd.f32 %v6070_v5, %v6038_v58  ;;  %v12908_v58 = vpop.f32.mrf.mxu3 }
 0x7e4   : > { %v5879_v50 = vpop.f32.mrf.mxu2  ;;  %v6201_v40 = vld [vmem:[#allocation4 + $0x19] sm:$0xff]  ;;  %14830 = vst [vmem:[#allocation76_spill] sm:$0xff] %v12908_v58 }
 0x7e5   : > { %6135 = vst.msk [vmem:[#allocation4 + $0x21] sm:$0xff] %vm885_vm10, %v6102_v17  ;;  %v5971_v53 = vadd.f32 %v5879_v50, %v5695_v51  ;;  %9525 = vmatmul.msk.f32.gmra.mxu3 %vm885_vm10, %v6201_v40  ;;  %v5200_v51 = vld [vmem:[#allocation6 + $0x170] sm:$0xff] }
 0x7e6   : > { %v12897_v35 = vpop.f32.mrf.mxu0  ;;  %v5744_v17 = vld [vmem:[#allocation6 + $0x112] sm:$0xff] }
 0x7e7   : > { %v6007_v4 = vadd.f32 %v12823_v28, %v5971_v53  ;;  %v12904_v5 = vpop.f32.mrf.mxu1 }
 0x7e9   : > { %v6039_v50 = vmax.f32 %v6007_v4, 0.0  ;;  %9449 = vmatmul.msk.f32.gmra.mxu0 %vm857_vm4, %v5200_v51  ;;  %9509 = vmatmul.msk.f32.gmra.mxu2 %vm857_vm4, %v5744_v17  ;;  %v5421_v51 = vadd.f32 %v12720_v23, %v12399_v16 }
 0x7ea   : > { %9483 = vmatmul.msk.f32.gmra.mxu1 %vm857_vm4, %v5476_v27  ;;  %v6072_v27 = vld [vmem:[%s12836_s23 + $0x18] sm:$0xff] }
 0x7eb   : > { %v6103_v40 = vadd.f32 %v6071_v14, %v6039_v50  ;;  %v12932_v57 = vpop.f32.mrf.mxu3  ;;  %v5422_v50 = vadd.f32 %v12734_v55, %v12422_v9 }
 0x7ec   : > { %v5882_v53 = vpop.f32.mrf.mxu2  ;;  %v6202_v58 = vld [vmem:[#allocation4 + $0x21] sm:$0xff] }
 0x7ed   : > { %6136 = vst.msk [vmem:[#allocation4 + $0x31] sm:$0xff] %vm885_vm10, %v6103_v40  ;;  %v5972_v49 = vadd.f32 %v5882_v53, %v5696_v36  ;;  %9526 = vmatmul.msk.f32.gmra.mxu3 %vm885_vm10, %v6202_v58  ;;  %v5697_v58 = vadd.f32 %v12724_v33, %v5421_v51  ;;  %v9620_v33 = vld [vmem:[%s14790_s1 + $0x18] sm:$0xff]  ;;  %v6073_v53 = vld [vmem:[%s12836_s23 + $0x20] sm:$0xff] }
 0x7ee   : > { %v12921_v4 = vpop.f32.mrf.mxu0  ;;  %7071 = vmatpush.msrb.mxu2 %v9620_v33  ;;  %v5746_v51 = vld [vmem:[#allocation6 + $0x12a] sm:$0xff]  ;;  %v5747_v33 = vld [vmem:[#allocation6 + $0x13a] sm:$0xff] }
 0x7ef   : > { %v6008_v17 = vadd.f32 %v12823_v28, %v5972_v49  ;;  %v12926_v59 = vpop.f32.mrf.mxu1 }
 0x7f1   : > { %v6040_v6 = vmax.f32 %v6008_v17, 0.0  ;;  %9450 = vmatmul.msk.f32.gmra.mxu0 %vm857_vm4, %v12430_v44  ;;  %9510 = vmatmul.msk.f32.gmra.mxu2 %vm857_vm4, %v5745_v63  ;;  %v6198_v44 = vld [vmem:[%s14790_s1] sm:$0xff]  ;;  %v9587_v63 = vld [vmem:[%s14790_s1 + $0x10] sm:$0xff] }
 0x7f2   : > { %9484 = vmatmul.msk.f32.gmra.mxu1 %vm857_vm4, %v12535_v29  ;;  %6553 = vmatpush.msrb.mxu0 %v6198_v44  ;;  %v5479_v44 = vld [vmem:[#allocation6 + $0x199] sm:$0xff] }
 0x7f3   : > { %v6104_v16 = vadd.f32 %v6072_v27, %v6040_v6  ;;  %6796 = vmatpush.msrb.mxu1 %v9587_v63  ;;  %v5698_v27 = vadd.f32 %v12738_v22, %v5422_v50  ;;  %v12962_v55 = vpop.f32.mrf.mxu3  ;;  %v5423_v22 = vadd.f32 %v12749_v38, %v12444_v26  ;;  %v6074_v63 = vld [vmem:[%s12836_s23 + $0x28] sm:$0xff] }
 0x7f4   : > { %v5885_v23 = vpop.f32.mrf.mxu2  ;;  %v6203_v49 = vld [vmem:[#allocation4 + $0x31] sm:$0xff] }
 0x7f5   : > { %6137 = vst.msk [vmem:[#allocation4 + $0x39] sm:$0xff] %vm885_vm10, %v6104_v16  ;;  %v5973_v14 = vadd.f32 %v5885_v23, %v5697_v58  ;;  %9527 = vmatmul.msk.f32.gmra.mxu3 %vm885_vm10, %v6203_v49  ;;  %v14831_v50 = vld [vmem:[#allocation53_spill] sm:$0xff]  ;;  %v5699_v26 = vadd.f32 %v12753_v39, %v5423_v22 }
 0x7f6   : > { %v12945_v29 = vpop.f32.mrf.mxu0 }
 0x7f7   : > { %v6009_v36 = vadd.f32 %v12823_v28, %v5973_v14  ;;  %v12953_v40 = vpop.f32.mrf.mxu1 }
 0x7f9   : > { %v6041_v17 = vmax.f32 %v6009_v36, 0.0  ;;  %9451 = vmatmul.msk.f32.gmra.mxu0 %vm857_vm4, %v12449_v46  ;;  %9511 = vmatmul.msk.f32.gmra.mxu2 %vm857_vm4, %v5746_v51  ;;  %v9653_v46 = vld [vmem:[%s14790_s1 + $0x20] sm:$0xff]  ;;  %v14832_v36 = vld [vmem:[#allocation54_spill] sm:$0xff] }
 0x7fa   : > { %9485 = vmatmul.msk.f32.gmra.mxu1 %vm857_vm4, %v12550_v19  ;;  %v5203_v19 = vld [vmem:[#allocation6 + $0x198] sm:$0xff]  ;;  %7346 = vmatpush.msra.mxu3 %v9653_v46  ;;  %v5204_v46 = vld [vmem:[#allocation6 + $0x1a0] sm:$0xff] }
 0x7fb   : > { %v6105_v9 = vadd.f32 %v6073_v53, %v6041_v17  ;;  %v3997_v53 = vadd.f32 %v14832_v36, %v14831_v50  ;;  %v14834_v50 = vld [vmem:[#allocation56_spill] sm:$0xff] }
 0x7fc   : > { %v5888_v6 = vpop.f32.mrf.mxu2  ;;  %v6204_v58 = vld [vmem:[#allocation4 + $0x39] sm:$0xff] }
 0x7fd   : > { %6138 = vst.msk [vmem:[#allocation4 + $0x49] sm:$0xff] %vm885_vm10, %v6105_v9  ;;  %v5974_v16 = vadd.f32 %v5888_v6, %v5698_v27  ;;  %9528 = vmatmul.msk.f32.gmra.mxu3 %vm885_vm10, %v6204_v58  ;;  %v4320_v17 = vadd.f32 %v12289_v20, %v3997_v53  ;;  %v12986_v58 = vpop.f32.mrf.mxu3  ;;  %v5424_v20 = vadd.f32 %v12768_v31, %v12460_v0 }
 0x7fe   : > { %v12969_v23 = vpop.f32.mrf.mxu0 }
 0x7ff   : > { %v6010_v49 = vadd.f32 %v12823_v28, %v5974_v16  ;;  %v12974_v14 = vpop.f32.mrf.mxu1  ;;  %v5700_v0 = vadd.f32 %v12774_v43, %v5424_v20 }
 0x801   : > { %v6042_v51 = vmax.f32 %v6010_v49, 0.0  ;;  %9452 = vmatmul.msk.f32.gmra.mxu0 %vm857_vm4, %v5203_v19  ;;  %9512 = vmatmul.msk.f32.gmra.mxu2 %vm857_vm4, %v5747_v33  ;;  %v4596_v19 = vadd.f32 %v12292_v48, %v4320_v17  ;;  %v5480_v49 = vld [vmem:[#allocation6 + $0x1a1] sm:$0xff]  ;;  %v14833_v33 = vld [vmem:[#allocation55_spill] sm:$0xff] }
 0x802   : > { %9486 = vmatmul.msk.f32.gmra.mxu1 %vm857_vm4, %v5479_v44  ;;  %v6075_v44 = vld [vmem:[%s12836_s23 + $0x30] sm:$0xff]  ;;  %v4000_v36 = vadd.f32 %v14834_v50, %v14833_v33 }
 0x803   : > { %v6106_v38 = vadd.f32 %v6074_v63, %v6042_v51  ;;  %v5748_v63 = vld [vmem:[#allocation6 + $0x142] sm:$0xff]  ;;  %v4872_v53 = vadd.f32 %v12470_v18, %v4596_v19  ;;  %v6651_v19 = vld [vmem:[#allocation4 + $0x2] sm:$0xff] }
 0x804   : > { %v5891_v27 = vpop.f32.mrf.mxu2  ;;  %v6205_v9 = vld [vmem:[#allocation4 + $0x49] sm:$0xff]  ;;  %v4321_v48 = vadd.f32 %v12307_v21, %v4000_v36 }
 0x805   : > { %6139 = vst.msk [vmem:[#allocation4 + $0x51] sm:$0xff] %vm885_vm10, %v6106_v38  ;;  %v5975_v6 = vadd.f32 %v5891_v27, %v5699_v26  ;;  %9529 = vmatmul.msk.f32.gmra.mxu3 %vm885_vm10, %v6205_v9  ;;  %v5148_v38 = vadd.f32 %v12596_v34, %v4872_v53  ;;  %v6166_v9 = vld [vmem:[#allocation4] sm:$0xff]  ;;  %v13015_v20 = vpop.f32.mrf.mxu3 }
 0x806   : > { %v12988_v16 = vpop.f32.mrf.mxu0  ;;  %v6076_v34 = vld [vmem:[%s12836_s23 + $0x38] sm:$0xff] }
 0x807   : > { %v6011_v39 = vadd.f32 %v12823_v28, %v5975_v6  ;;  %v12994_v22 = vpop.f32.mrf.mxu1  ;;  %v4597_v6 = vadd.f32 %v12312_v2, %v4321_v48  ;;  %v5425_v21 = vadd.f32 %v12799_v62, %v5148_v38  ;;  %v6652_v38 = vld [vmem:[#allocation4 + $0xa] sm:$0xff] }
 0x809   : > { %v6043_v51 = vmax.f32 %v6011_v39, 0.0  ;;  %9453 = vmatmul.msk.f32.gmra.mxu0 %vm857_vm4, %v5204_v46  ;;  %9513 = vmatmul.msk.f32.gmra.mxu2 %vm857_vm4, %v5748_v63  ;;  %v5749_v39 = vld [vmem:[#allocation6 + $0x152] sm:$0xff]  ;;  %v4873_v33 = vadd.f32 %v12482_v11, %v4597_v6  ;;  %v5701_v62 = vadd.f32 %v12808_v10, %v5425_v21  ;;  %v14838_v6 = vld [vmem:[#allocation60_spill] sm:$0xff] }
 0x80a   : > { %9487 = vmatmul.msk.f32.gmra.mxu1 %vm857_vm4, %v5480_v49  ;;  %v14835_v49 = vld [vmem:[#allocation57_spill] sm:$0xff] }
 0x80b   : > { %v6107_v31 = vadd.f32 %v6075_v44, %v6043_v51  ;;  %v14836_v44 = vld [vmem:[#allocation58_spill] sm:$0xff]  ;;  %v5149_v48 = vadd.f32 %v12616_v41, %v4873_v33  ;;  %v14837_v41 = vld [vmem:[#allocation59_spill] sm:$0xff] }
 0x80c   : > { %v5894_v17 = vpop.f32.mrf.mxu2  ;;  %v6206_v26 = vld [vmem:[#allocation4 + $0x51] sm:$0xff]  ;;  %v4003_v63 = vadd.f32 %v14836_v44, %v14835_v49  ;;  %v4006_v21 = vadd.f32 %v14838_v6, %v14837_v41 }
 0x80d   : > { %6140 = vst.msk [vmem:[#allocation4 + $0x61] sm:$0xff] %vm885_vm10, %v6107_v31  ;;  %v5976_v18 = vadd.f32 %v5894_v17, %v5700_v0  ;;  %9530 = vmatmul.msk.f32.gmra.mxu3 %vm885_vm10, %v6206_v26  ;;  %v6167_v31 = vld [vmem:[#allocation4 + $0x8] sm:$0xff] }
 0x80e   : > { %v13008_v27 = vpop.f32.mrf.mxu0  ;;  %v4322_v2 = vadd.f32 %v12327_v30, %v4003_v63  ;;  %v5426_v30 = vadd.f32 %v12840_v25, %v5149_v48  ;;  %v14839_v25 = vld [vmem:[#allocation69_spill] sm:$0xff] }
 0x80f   : > { %v6012_v43 = vadd.f32 %v12823_v28, %v5976_v18  ;;  %v13013_v46 = vpop.f32.mrf.mxu1  ;;  %v6077_v18 = vld [vmem:[%s12836_s23 + $0x40] sm:$0xff]  ;;  %v5751_v48 = vld [vmem:[#allocation6 + $0x16a] sm:$0xff] }
 0x810   : > { %v4598_v17 = vadd.f32 %v12332_v7, %v4322_v2  ;;  %v13042_v7 = vpop.f32.mrf.mxu3  ;;  %v14840_v2 = vld [vmem:[#allocation70_spill] sm:$0xff] }
 0x811   : > { %v6044_v50 = vmax.f32 %v6012_v43, 0.0  ;;  %9514 = vmatmul.msk.f32.gmra.mxu2 %vm857_vm4, %v5749_v39  ;;  %9555 = vmatmul.msk.f32.vlgmr.msrb.gmra.mxu0 %vm885_vm10, %v6166_v9  ;;  %v5750_v9 = vld [vmem:[#allocation6 + $0x15a] sm:$0xff]  ;;  %v5702_v39 = vadd.f32 %v12847_v42, %v5426_v30 }
 0x812   : > { %9588 = vmatmul.msk.f32.vlgmr.msrb.gmra.mxu1 %vm885_vm10, %v6651_v19  ;;  %v4874_v43 = vadd.f32 %v12494_v45, %v4598_v17  ;;  %v6078_v42 = vld [vmem:[%s12836_s23 + $0x48] sm:$0xff] }
 0x813   : > { %v6108_v36 = vadd.f32 %v6076_v34, %v6044_v50  ;;  %v4323_v34 = vadd.f32 %v14839_v25, %v4006_v21  ;;  %v14843_v30 = vld [vmem:[#allocation36_spill] sm:$0xff] }
 0x814   : > { %v5897_v53 = vpop.f32.mrf.mxu2  ;;  %v6207_v51 = vld [vmem:[#allocation4 + $0x61] sm:$0xff]  ;;  %v5150_v33 = vadd.f32 %v12632_v12, %v4874_v43  ;;  %v14841_v12 = vld [vmem:[#allocation61_spill] sm:$0xff] }
 0x815   : > { %6141 = vst.msk [vmem:[#allocation4 + $0x69] sm:$0xff] %vm885_vm10, %v6108_v36  ;;  %v5977_v11 = vadd.f32 %v5897_v53, %v5701_v62  ;;  %9531 = vmatmul.msk.f32.gmra.mxu3 %vm885_vm10, %v6207_v51  ;;  %v4599_v62 = vadd.f32 %v14840_v2, %v4323_v34  ;;  %v5752_v2 = vld [vmem:[#allocation6 + $0x172] sm:$0xff] }
 0x816   : > { %v13029_v0 = vpop.f32.mrf.mxu0  ;;  %v5427_v36 = vadd.f32 %v12869_v52, %v5150_v33  ;;  %v6653_v52 = vld [vmem:[#allocation4 + $0x1a] sm:$0xff] }
 0x817   : > { %v6013_v26 = vadd.f32 %v12823_v28, %v5977_v11  ;;  %v13034_v10 = vpop.f32.mrf.mxu1  ;;  %v13058_v11 = vld [vmem:[#allocation4 + $0x18] sm:$0xff] }
 0x818   : > { %v5703_v41 = vadd.f32 %v12876_v61, %v5427_v36  ;;  %v13069_v21 = vpop.f32.mrf.mxu3  ;;  %v14847_v36 = vld [vmem:[#allocation64_spill] sm:$0xff] }
 0x819   : > { %v6045_v19 = vmax.f32 %v6013_v26, 0.0  ;;  %9515 = vmatmul.msk.f32.gmra.mxu2 %vm857_vm4, %v5750_v9  ;;  %9556 = vmatmul.msk.f32.gmra.mxu0 %vm885_vm10, %v6167_v31  ;;  %v14842_v31 = vld [vmem:[#allocation62_spill] sm:$0xff]  ;;  %v4875_v26 = vadd.f32 %v14843_v30, %v4599_v62 }
 0x81a   : > { %9589 = vmatmul.msk.f32.gmra.mxu1 %vm885_vm10, %v6652_v38  ;;  %v4009_v17 = vadd.f32 %v14842_v31, %v14841_v12  ;;  %v13082_v62 = vld [vmem:[#allocation4 + $0x20] sm:$0xff] }
 0x81b   : > { %v6109_v49 = vadd.f32 %v6077_v18, %v6045_v19  ;;  %v14844_v18 = vld [vmem:[#allocation71_spill] sm:$0xff]  ;;  %v5151_v25 = vadd.f32 %v12648_v24, %v4875_v26 }
 0x81c   : > { %v5900_v44 = vpop.f32.mrf.mxu2  ;;  %v6208_v63 = vld [vmem:[#allocation4 + $0x69] sm:$0xff]  ;;  %v4324_v9 = vadd.f32 %v14844_v18, %v4009_v17 }
 0x81d   : > { %6142 = vst.msk [vmem:[#allocation4 + $0x79] sm:$0xff] %vm885_vm10, %v6109_v49  ;;  %v5978_v45 = vadd.f32 %v5900_v44, %v5702_v39  ;;  %9532 = vmatmul.msk.f32.gmra.mxu3 %vm885_vm10, %v6208_v63  ;;  %v14845_v49 = vld [vmem:[#allocation72_spill] sm:$0xff]  ;;  %v5428_v63 = vadd.f32 %v12897_v35, %v5151_v25  ;;  %v14846_v24 = vld [vmem:[#allocation63_spill] sm:$0xff] }
 0x81e   : > { %v13050_v50 = vpop.f32.mrf.mxu0  ;;  %v4600_v44 = vadd.f32 %v14845_v49, %v4324_v9  ;;  %v6654_v35 = vld [vmem:[#allocation4 + $0x22] sm:$0xff] }
 0x81f   : > { %v6014_v53 = vadd.f32 %v12823_v28, %v5978_v45  ;;  %v13055_v51 = vpop.f32.mrf.mxu1  ;;  %v6079_v45 = vld [vmem:[%s12836_s23 + $0x50] sm:$0xff]  ;;  %v14849_v31 = vld [vmem:[#allocation35_spill] sm:$0xff]  ;;  %v5704_v30 = vadd.f32 %v12904_v5, %v5428_v63 }
 0x820   : > { %v6080_v49 = vld [vmem:[%s12836_s23 + $0x58] sm:$0xff]  ;;  %v14851_v63 = vld [vmem:[#allocation65_spill] sm:$0xff] }
 0x821   : > { %v6046_v38 = vmax.f32 %v6014_v53, 0.0  ;;  %9516 = vmatmul.msk.f32.gmra.mxu2 %vm857_vm4, %v5751_v48  ;;  %9557 = vmatmul.msk.f32.gmra.mxu0 %vm885_vm10, %v13058_v11  ;;  %v4012_v53 = vadd.f32 %v14847_v36, %v14846_v24 }
 0x822   : > { %9590 = vmatmul.msk.f32.gmra.mxu1 %vm885_vm10, %v6653_v52 }
 0x823   : > { %v6110_v6 = vadd.f32 %v6078_v42, %v6046_v38  ;;  %v14848_v42 = vld [vmem:[#allocation47_spill] sm:$0xff]  ;;  %v4325_v17 = vadd.f32 %v14849_v31, %v4012_v53 }
 0x824   : > { %v5903_v43 = vpop.f32.mrf.mxu2  ;;  %v6209_v19 = vld [vmem:[#allocation4 + $0x79] sm:$0xff]  ;;  %v4876_v48 = vadd.f32 %v14848_v42, %v4600_v44  ;;  %v14854_v53 = vld [vmem:[#allocation43_spill] sm:$0xff] }
 0x825   : > { %6143 = vst.msk [vmem:[#allocation4 + $0x81] sm:$0xff] %vm885_vm10, %v6110_v6  ;;  %v5979_v34 = vadd.f32 %v5903_v43, %v5703_v41  ;;  %9533 = vmatmul.msk.f32.gmra.mxu3 %vm885_vm10, %v6209_v19  ;;  %v13096_v41 = vpop.f32.mrf.mxu3  ;;  %v14850_v43 = vld [vmem:[#allocation46_spill] sm:$0xff]  ;;  %v5753_v44 = vld [vmem:[#allocation6 + $0x182] sm:$0xff] }
 0x826   : > { %v13074_v39 = vpop.f32.mrf.mxu0  ;;  %v5152_v18 = vadd.f32 %v12664_v56, %v4876_v48  ;;  %v4601_v19 = vadd.f32 %v14850_v43, %v4325_v17  ;;  %v13106_v56 = vld [vmem:[#allocation4 + $0x30] sm:$0xff] }
 0x827   : > { %v6015_v61 = vadd.f32 %v12823_v28, %v5979_v34  ;;  %v13079_v33 = vpop.f32.mrf.mxu1 }
 0x828   : > { %v5429_v25 = vadd.f32 %v12921_v4, %v5152_v18  ;;  %v6655_v4 = vld [vmem:[#allocation4 + $0x32] sm:$0xff] }
 0x829   : > { %v6047_v12 = vmax.f32 %v6015_v61, 0.0  ;;  %9517 = vmatmul.msk.f32.gmra.mxu2 %vm857_vm4, %v5752_v2  ;;  %9558 = vmatmul.msk.f32.gmra.mxu0 %vm885_vm10, %v13082_v62  ;;  %v14852_v61 = vld [vmem:[#allocation66_spill] sm:$0xff]  ;;  %v14853_v2 = vld [vmem:[#allocation49_spill] sm:$0xff] }
 0x82a   : > { %9591 = vmatmul.msk.f32.gmra.mxu1 %vm885_vm10, %v6654_v35  ;;  %v4877_v24 = vadd.f32 %v14853_v2, %v4601_v19  ;;  %v5705_v48 = vadd.f32 %v12926_v59, %v5429_v25  ;;  %v6081_v19 = vld [vmem:[%s12836_s23 + $0x60] sm:$0xff]  ;;  %v5754_v25 = vld [vmem:[#allocation6 + $0x18a] sm:$0xff] }
 0x82b   : > { %v6111_v26 = vadd.f32 %v6079_v45, %v6047_v12  ;;  %v4015_v45 = vadd.f32 %v14852_v61, %v14851_v63 }
 0x82c   : > { %v5906_v38 = vpop.f32.mrf.mxu2  ;;  %v6210_v52 = vld [vmem:[#allocation4 + $0x81] sm:$0xff]  ;;  %v5153_v17 = vadd.f32 %v12684_v1, %v4877_v24  ;;  %v13130_v1 = vld [vmem:[#allocation4 + $0x38] sm:$0xff] }
 0x82d   : > { %6144 = vst.msk [vmem:[#allocation4 + $0x91] sm:$0xff] %vm885_vm10, %v6111_v26  ;;  %v5980_v9 = vadd.f32 %v5906_v38, %v5704_v30  ;;  %9534 = vmatmul.msk.f32.gmra.mxu3 %vm885_vm10, %v6210_v52  ;;  %v4326_v42 = vadd.f32 %v14854_v53, %v4015_v45  ;;  %v14855_v38 = vld [vmem:[#allocation44_spill] sm:$0xff]  ;;  %v13127_v59 = vpop.f32.mrf.mxu3 }
 0x82e   : > { %v13098_v6 = vpop.f32.mrf.mxu0  ;;  %v5430_v18 = vadd.f32 %v12945_v29, %v5153_v17  ;;  %v6656_v29 = vld [vmem:[#allocation4 + $0x3a] sm:$0xff]  ;;  %v5755_v53 = vld [vmem:[#allocation6 + $0x19a] sm:$0xff] }
 0x82f   : > { %v6016_v5 = vadd.f32 %v12823_v28, %v5980_v9  ;;  %v13103_v34 = vpop.f32.mrf.mxu1  ;;  %v4602_v52 = vadd.f32 %v14855_v38, %v4326_v42 }
 0x830   : > { %v5706_v63 = vadd.f32 %v12953_v40, %v5430_v18  ;;  %v6082_v40 = vld [vmem:[%s12836_s23 + $0x68] sm:$0xff]  ;;  %v5155_v18 = vadd.f32 %v12716_v13, %v12558_v54 }
 0x831   : > { %v6048_v36 = vmax.f32 %v6016_v5, 0.0  ;;  %9518 = vmatmul.msk.f32.gmra.mxu2 %vm857_vm4, %v5753_v44  ;;  %9559 = vmatmul.msk.f32.gmra.mxu0 %vm885_vm10, %v13106_v56  ;;  %v14856_v5 = vld [vmem:[#allocation37_spill] sm:$0xff] }
 0x832   : > { %9592 = vmatmul.msk.f32.gmra.mxu1 %vm885_vm10, %v6655_v4  ;;  %v6658_v54 = vld [vmem:[#allocation4 + $0x52] sm:$0xff] }
 0x833   : > { %v6112_v12 = vadd.f32 %v6080_v49, %v6048_v36  ;;  %v4878_v49 = vadd.f32 %v14856_v5, %v4602_v52  ;;  %v5432_v5 = vadd.f32 %v12988_v16, %v5155_v18 }
 0x834   : > { %v5909_v35 = vpop.f32.mrf.mxu2  ;;  %v6211_v31 = vld [vmem:[#allocation4 + $0x91] sm:$0xff] }
 0x835   : > { %6145 = vst.msk [vmem:[#allocation4 + $0x99] sm:$0xff] %vm885_vm10, %v6112_v12  ;;  %v5981_v30 = vadd.f32 %v5909_v35, %v5705_v48  ;;  %9535 = vmatmul.msk.f32.gmra.mxu3 %vm885_vm10, %v6211_v31  ;;  %v5154_v24 = vadd.f32 %v12700_v15, %v4878_v49  ;;  %v13148_v35 = vld [vmem:[#allocation4 + $0x48] sm:$0xff]  ;;  %v13153_v17 = vpop.f32.mrf.mxu3  ;;  %v5708_v13 = vadd.f32 %v12994_v22, %v5432_v5 }
 0x836   : > { %v13120_v26 = vpop.f32.mrf.mxu0  ;;  %v6657_v15 = vld [vmem:[#allocation4 + $0x4a] sm:$0xff] }
 0x837   : > { %v6017_v9 = vadd.f32 %v12823_v28, %v5981_v30  ;;  %v13125_v43 = vpop.f32.mrf.mxu1  ;;  %v5431_v42 = vadd.f32 %v12969_v23, %v5154_v24  ;;  %v5156_v24 = vadd.f32 %v12732_v47, %v12570_v60  ;;  %v6659_v60 = vld [vmem:[#allocation4 + $0x62] sm:$0xff] }
 0x838   : > { %v6085_v5 = vld [vmem:[%s12836_s23 + $0x80] sm:$0xff] }
 0x839   : > { %v6049_v44 = vmax.f32 %v6017_v9, 0.0  ;;  %9519 = vmatmul.msk.f32.gmra.mxu2 %vm857_vm4, %v5754_v25  ;;  %9560 = vmatmul.msk.f32.gmra.mxu0 %vm885_vm10, %v13130_v1  ;;  %v5707_v23 = vadd.f32 %v12974_v14, %v5431_v42  ;;  %v5756_v25 = vld [vmem:[#allocation6 + $0x1a2] sm:$0xff]  ;;  %v5433_v42 = vadd.f32 %v13008_v27, %v5156_v24 }
 0x83a   : > { %9593 = vmatmul.msk.f32.gmra.mxu1 %vm885_vm10, %v6656_v29  ;;  %v6083_v14 = vld [vmem:[%s12836_s23 + $0x70] sm:$0xff]  ;;  %v13168_v29 = vld [vmem:[#allocation4 + $0x50] sm:$0xff] }
 0x83b   : > { %v6113_v61 = vadd.f32 %v6081_v19, %v6049_v44  ;;  %v5709_v47 = vadd.f32 %v13013_v46, %v5433_v42  ;;  %v6086_v42 = vld [vmem:[%s12836_s23 + $0x88] sm:$0xff] }
 0x83c   : > { %v5912_v45 = vpop.f32.mrf.mxu2  ;;  %v6212_v2 = vld [vmem:[#allocation4 + $0x99] sm:$0xff] }
 0x83d   : > { %6146 = vst.msk [vmem:[#allocation4 + $0xa9] sm:$0xff] %vm885_vm10, %v6113_v61  ;;  %v5982_v36 = vadd.f32 %v5912_v45, %v5706_v63  ;;  %9536 = vmatmul.msk.f32.gmra.mxu3 %vm885_vm10, %v6212_v2  ;;  %v13175_v61 = vpop.f32.mrf.mxu3 }
 0x83e   : > { %v13141_v4 = vpop.f32.mrf.mxu0 }
 0x83f   : > { %v6018_v48 = vadd.f32 %v12823_v28, %v5982_v36  ;;  %v13145_v12 = vpop.f32.mrf.mxu1 }
 0x841   : > { %v6050_v31 = vmax.f32 %v6018_v48, 0.0  ;;  %9520 = vmatmul.msk.f32.gmra.mxu2 %vm857_vm4, %v5755_v53  ;;  %9561 = vmatmul.msk.f32.gmra.mxu0 %vm885_vm10, %v13148_v35 }
 0x842   : > { %9594 = vmatmul.msk.f32.gmra.mxu1 %vm885_vm10, %v6657_v15 }
 0x843   : > { %v6114_v30 = vadd.f32 %v6082_v40, %v6050_v31  ;;  %v6084_v40 = vld [vmem:[%s12836_s23 + $0x78] sm:$0xff] }
 0x844   : > { %v5915_v38 = vpop.f32.mrf.mxu2  ;;  %v6213_v52 = vld [vmem:[#allocation4 + $0xa9] sm:$0xff]  ;;  %v13188_v31 = vld [vmem:[#allocation4 + $0x60] sm:$0xff] }
 0x845   : > { %6147 = vst.msk [vmem:[#allocation4 + $0xb1] sm:$0xff] %vm885_vm10, %v6114_v30  ;;  %v5983_v9 = vadd.f32 %v5915_v38, %v5707_v23  ;;  %9537 = vmatmul.msk.f32.gmra.mxu3 %vm885_vm10, %v6213_v52  ;;  %v13196_v38 = vpop.f32.mrf.mxu3  ;;  %v5157_v52 = vadd.f32 %v12755_v3, %v12582_v8  ;;  %v6660_v8 = vld [vmem:[#allocation4 + $0x6a] sm:$0xff] }
 0x846   : > { %v13161_v19 = vpop.f32.mrf.mxu0 }
 0x847   : > { %v6019_v49 = vadd.f32 %v12823_v28, %v5983_v9  ;;  %v13165_v44 = vpop.f32.mrf.mxu1 }
 0x849   : > { %v6051_v63 = vmax.f32 %v6019_v49, 0.0  ;;  %9521 = vmatmul.msk.f32.gmra.mxu2 %vm857_vm4, %v5756_v25  ;;  %9562 = vmatmul.msk.f32.gmra.mxu0 %vm885_vm10, %v13168_v29  ;;  %v13209_v49 = vld [vmem:[#allocation4 + $0x68] sm:$0xff] }
 0x84a   : > { %9595 = vmatmul.msk.f32.gmra.mxu1 %vm885_vm10, %v6658_v54 }
 0x84b   : > { %v6115_v16 = vadd.f32 %v6083_v14, %v6051_v63 }
 0x84c   : > { %v5918_v45 = vpop.f32.mrf.mxu2  ;;  %v6214_v2 = vld [vmem:[#allocation4 + $0xb1] sm:$0xff] }
 0x84d   : > { %6148 = vst.msk [vmem:[#allocation4 + $0xc1] sm:$0xff] %vm885_vm10, %v6115_v16  ;;  %v5984_v36 = vadd.f32 %v5918_v45, %v5708_v13  ;;  %9538 = vmatmul.msk.f32.gmra.mxu3 %vm885_vm10, %v6214_v2  ;;  %v14857_v13 = vld [vmem:[#allocation51_spill] sm:$0xff]  ;;  %v13223_v24 = vpop.f32.mrf.mxu3 }
 0x84e   : > { %v13181_v53 = vpop.f32.mrf.mxu0  ;;  %v5158_v16 = vadd.f32 %v12784_v32, %v14857_v13  ;;  %v6661_v32 = vld [vmem:[#allocation4 + $0x7a] sm:$0xff] }
 0x84f   : > { %v6020_v48 = vadd.f32 %v12823_v28, %v5984_v36  ;;  %v13185_v22 = vpop.f32.mrf.mxu1 }
 0x851   : > { %v6052_v15 = vmax.f32 %v6020_v48, 0.0  ;;  %9563 = vmatmul.msk.f32.gmra.mxu0 %vm885_vm10, %v13188_v31  ;;  %9621 = vmatmul.msk.f32.vlgmr.msrb.gmra.mxu2 %vm885_vm10, %v13058_v11  ;;  %v5434_v11 = vadd.f32 %v13029_v0, %v5157_v52  ;;  %v13230_v48 = vld [vmem:[#allocation4 + $0x78] sm:$0xff] }
 0x852   : > { %9596 = vmatmul.msk.f32.gmra.mxu1 %vm885_vm10, %v6659_v60 }
 0x853   : > { %v6116_v27 = vadd.f32 %v6084_v40, %v6052_v15  ;;  %v5710_v3 = vadd.f32 %v13034_v10, %v5434_v11 }
 0x854   : > { %v5921_v23 = vpop.f32.mrf.mxu2  ;;  %v6215_v30 = vld [vmem:[#allocation4 + $0xc1] sm:$0xff] }
 0x855   : > { %6149 = vst.msk [vmem:[#allocation4 + $0xc9] sm:$0xff] %vm885_vm10, %v6116_v27  ;;  %v5985_v18 = vadd.f32 %v5921_v23, %v5709_v47  ;;  %9539 = vmatmul.msk.f32.gmra.mxu3 %vm885_vm10, %v6215_v30  ;;  %v14858_v27 = vld [vmem:[#allocation52_spill] sm:$0xff] }
 0x856   : > { %v13202_v9 = vpop.f32.mrf.mxu0  ;;  %v5159_v23 = vadd.f32 %v12827_v37, %v14858_v27  ;;  %v6662_v37 = vld [vmem:[#allocation4 + $0x82] sm:$0xff] }
 0x857   : > { %v6021_v25 = vadd.f32 %v12823_v28, %v5985_v18  ;;  %v13206_v46 = vpop.f32.mrf.mxu1  ;;  %v14861_v27 = vld [vmem:[#allocation39_spill] sm:$0xff] }
 0x858   : > { %v5436_v18 = vadd.f32 %v13074_v39, %v5159_v23  ;;  %v14862_v23 = vld [vmem:[#allocation76_spill] sm:$0xff] }
 0x859   : > { %v6053_v14 = vmax.f32 %v6021_v25, 0.0  ;;  %9564 = vmatmul.msk.f32.gmra.mxu0 %vm885_vm10, %v13209_v49  ;;  %9622 = vmatmul.msk.f32.gmra.mxu2 %vm885_vm10, %v13082_v62  ;;  %v5435_v62 = vadd.f32 %v13050_v50, %v5158_v16 }
 0x85a   : > { %9597 = vmatmul.msk.f32.gmra.mxu1 %vm885_vm10, %v6660_v8  ;;  %v5712_v39 = vadd.f32 %v13079_v33, %v5436_v18  ;;  %v6088_v33 = vld [vmem:[%s12836_s23 + $0x98] sm:$0xff] }
 0x85b   : > { %v6117_v0 = vadd.f32 %v6085_v5, %v6053_v14  ;;  %v5711_v50 = vadd.f32 %v13055_v51, %v5435_v62  ;;  %v6087_v51 = vld [vmem:[%s12836_s23 + $0x90] sm:$0xff]  ;;  %v13251_v5 = vld [vmem:[#allocation4 + $0x80] sm:$0xff] }
 0x85c   : > { %v5924_v63 = vpop.f32.mrf.mxu2  ;;  %v6216_v54 = vld [vmem:[#allocation4 + $0xc9] sm:$0xff] }
 0x85d   : > { %6150 = vst.msk [vmem:[#allocation4 + $0xd9] sm:$0xff] %vm885_vm10, %v6117_v0  ;;  %v5986_v45 = vadd.f32 %v5924_v63, %v5710_v3  ;;  %9540 = vmatmul.msk.f32.gmra.mxu3 %vm885_vm10, %v6216_v54  ;;  %v14859_v63 = vld [vmem:[#allocation38_spill] sm:$0xff]  ;;  %v14860_v54 = vld [vmem:[#allocation75_spill] sm:$0xff] }
 0x85e   : > { %v13221_v2 = vpop.f32.mrf.mxu0  ;;  %v5160_v13 = vadd.f32 %v14860_v54, %v14859_v63 }
 0x85f   : > { %v6022_v36 = vadd.f32 %v12823_v28, %v5986_v45  ;;  %v13227_v10 = vpop.f32.mrf.mxu1 }
 0x860   : > { %v5437_v62 = vadd.f32 %v13098_v6, %v5160_v13  ;;  %v14863_v13 = vld [vmem:[#allocation40_spill] sm:$0xff] }
 0x861   : > { %v6054_v40 = vmax.f32 %v6022_v36, 0.0  ;;  %9565 = vmatmul.msk.f32.gmra.mxu0 %vm885_vm10, %v13230_v48  ;;  %9623 = vmatmul.msk.f32.gmra.mxu2 %vm885_vm10, %v13106_v56 }
 0x862   : > { %9598 = vmatmul.msk.f32.gmra.mxu1 %vm885_vm10, %v6661_v32  ;;  %v5713_v6 = vadd.f32 %v13103_v34, %v5437_v62  ;;  %v6089_v34 = vld [vmem:[%s12836_s23 + $0xa0] sm:$0xff] }
 0x863   : > { %v6118_v15 = vadd.f32 %v6086_v42, %v6054_v40  ;;  %v13272_v40 = vld [vmem:[#allocation4 + $0x90] sm:$0xff] }
 0x864   : > { %v5927_v60 = vpop.f32.mrf.mxu2  ;;  %v6217_v47 = vld [vmem:[#allocation4 + $0xd9] sm:$0xff] }
 0x865   : > { %6151 = vst.msk [vmem:[#allocation4 + $0xe1] sm:$0xff] %vm885_vm10, %v6118_v15  ;;  %v5987_v30 = vadd.f32 %v5927_v60, %v5711_v50  ;;  %9541 = vmatmul.msk.f32.gmra.mxu3 %vm885_vm10, %v6217_v47  ;;  %v6663_v50 = vld [vmem:[#allocation4 + $0x92] sm:$0xff] }
 0x866   : > { %v13242_v52 = vpop.f32.mrf.mxu0 }
 0x867   : > { %v6023_v56 = vadd.f32 %v12823_v28, %v5987_v30  ;;  %v13246_v11 = vpop.f32.mrf.mxu1  ;;  %v5161_v30 = vadd.f32 %v14862_v23, %v14861_v27  ;;  %v14866_v23 = vld [vmem:[#allocation41_spill] sm:$0xff] }
 0x868   : > { %v13249_v25 = vpop.f32.mrf.mxu3 }
 0x869   : > { %v6055_v14 = vmax.f32 %v6023_v56, 0.0  ;;  %9566 = vmatmul.msk.f32.gmra.mxu0 %vm885_vm10, %v13251_v5  ;;  %9624 = vmatmul.msk.f32.gmra.mxu2 %vm885_vm10, %v13130_v1 }
 0x86a   : > { %9599 = vmatmul.msk.f32.gmra.mxu1 %vm885_vm10, %v6662_v37 }
 0x86b   : > { %v6119_v8 = vadd.f32 %v6087_v51, %v6055_v14  ;;  %v5438_v51 = vadd.f32 %v13120_v26, %v5161_v30  ;;  %v5163_v30 = vadd.f32 %v12962_v55, %v14866_v23 }
 0x86c   : > { %v5930_v3 = vpop.f32.mrf.mxu2  ;;  %v6218_v0 = vld [vmem:[#allocation4 + $0xe1] sm:$0xff] }
 0x86d   : > { %6152 = vst.msk [vmem:[#allocation4 + $0xf1] sm:$0xff] %vm885_vm10, %v6119_v8  ;;  %v5988_v16 = vadd.f32 %v5930_v3, %v5712_v39  ;;  %9542 = vmatmul.msk.f32.gmra.mxu3 %vm885_vm10, %v6218_v0  ;;  %v13293_v39 = vld [vmem:[#allocation4 + $0x98] sm:$0xff]  ;;  %v5714_v26 = vadd.f32 %v13125_v43, %v5438_v51 }
 0x86e   : > { %v13263_v45 = vpop.f32.mrf.mxu0  ;;  %v6664_v3 = vld [vmem:[#allocation4 + $0x9a] sm:$0xff] }
 0x86f   : > { %v6024_v1 = vadd.f32 %v12823_v28, %v5988_v16  ;;  %v13267_v36 = vpop.f32.mrf.mxu1  ;;  %v5162_v16 = vadd.f32 %v12932_v57, %v14863_v13 }
 0x870   : > { %v13270_v42 = vpop.f32.mrf.mxu3 }
 0x871   : > { %v6056_v32 = vmax.f32 %v6024_v1, 0.0  ;;  %9567 = vmatmul.msk.f32.gmra.mxu0 %vm885_vm10, %v13272_v40  ;;  %9625 = vmatmul.msk.f32.gmra.mxu2 %vm885_vm10, %v13148_v35 }
 0x872   : > { %9600 = vmatmul.msk.f32.gmra.mxu1 %vm885_vm10, %v6663_v50 }
 0x873   : > { %v6120_v15 = vadd.f32 %v6088_v33, %v6056_v32  ;;  %v6090_v32 = vld [vmem:[%s12836_s23 + $0xa8] sm:$0xff] }
 0x874   : > { %v5933_v60 = vpop.f32.mrf.mxu2  ;;  %v6219_v47 = vld [vmem:[#allocation4 + $0xf1] sm:$0xff] }
 0x875   : > { %6153 = vst.msk [vmem:[#allocation4 + $0xf9] sm:$0xff] %vm885_vm10, %v6120_v15  ;;  %v5989_v18 = vadd.f32 %v5933_v60, %v5713_v6  ;;  %9543 = vmatmul.msk.f32.gmra.mxu3 %vm885_vm10, %v6219_v47  ;;  %v13317_v6 = vld [vmem:[#allocation4 + $0xa8] sm:$0xff] }
 0x876   : > { %v13284_v56 = vpop.f32.mrf.mxu0  ;;  %v13321_v15 = vld [vmem:[#allocation4 + $0xaa] sm:$0xff] }
 0x877   : > { %v6025_v35 = vadd.f32 %v12823_v28, %v5989_v18  ;;  %v13288_v14 = vpop.f32.mrf.mxu1  ;;  %14864 = vst [vmem:[#allocation53_spill] sm:$0xff] %v13321_v15 }
 0x878   : > { %v13291_v37 = vpop.f32.mrf.mxu3 }
 0x879   : > { %v6057_v8 = vmax.f32 %v6025_v35, 0.0  ;;  %9568 = vmatmul.msk.f32.gmra.mxu0 %vm885_vm10, %v13293_v39  ;;  %9626 = vmatmul.msk.f32.gmra.mxu2 %vm885_vm10, %v13168_v29  ;;  %v5439_v29 = vadd.f32 %v13141_v4, %v5162_v16  ;;  %v5440_v35 = vadd.f32 %v13161_v19, %v5163_v30  ;;  %v14869_v16 = vld [vmem:[#allocation42_spill] sm:$0xff] }
 0x87a   : > { %9601 = vmatmul.msk.f32.gmra.mxu1 %vm885_vm10, %v6664_v3  ;;  %v13377_v30 = vld [vmem:[#allocation4 + $0xc2] sm:$0xff] }
 0x87b   : > { %v6121_v0 = vadd.f32 %v6089_v34, %v6057_v8  ;;  %v5715_v4 = vadd.f32 %v13145_v12, %v5439_v29  ;;  %v6091_v8 = vld [vmem:[%s12836_s23 + $0xb0] sm:$0xff]  ;;  %14871 = vst [vmem:[#allocation58_spill] sm:$0xff] %v13377_v30 }
 0x87c   : > { %v5936_v63 = vpop.f32.mrf.mxu2  ;;  %v13301_v54 = vld [vmem:[#allocation4 + $0xf9] sm:$0xff] }
 0x87d   : > { %6154 = vst.msk [vmem:[#allocation4 + $0x109] sm:$0xff] %vm885_vm10, %v6121_v0  ;;  %v5990_v62 = vadd.f32 %v5936_v63, %v5714_v26  ;;  %9544 = vmatmul.msk.f32.gmra.mxu3 %vm885_vm10, %v13301_v54  ;;  %v13344_v26 = vld [vmem:[#allocation4 + $0xb0] sm:$0xff] }
 0x87e   : > { %v13308_v1 = vpop.f32.mrf.mxu0  ;;  %v13348_v0 = vld [vmem:[#allocation4 + $0xb2] sm:$0xff] }
 0x87f   : > { %v6026_v33 = vadd.f32 %v12823_v28, %v5990_v62  ;;  %v13312_v43 = vpop.f32.mrf.mxu1  ;;  %14867 = vst [vmem:[#allocation55_spill] sm:$0xff] %v13348_v0  ;;  %v5164_v62 = vadd.f32 %v12986_v58, %v14869_v16  ;;  %v13373_v58 = vld [vmem:[#allocation4 + $0xc0] sm:$0xff] }
 0x880   : > { %v13315_v50 = vpop.f32.mrf.mxu3  ;;  %14870 = vst [vmem:[#allocation57_spill] sm:$0xff] %v13373_v58 }
 0x881   : > { %v6058_v57 = vmax.f32 %v6026_v33, 0.0  ;;  %9569 = vmatmul.msk.f32.gmra.mxu0 %vm885_vm10, %v13317_v6  ;;  %9627 = vmatmul.msk.f32.gmra.mxu2 %vm885_vm10, %v13188_v31 }
 0x882   : > { %9602 = vmatmul.msk.f32.gmra.mxu1 %vm885_vm10, %v13321_v15 }
 0x883   : > { %v6122_v60 = vadd.f32 %v6090_v32, %v6058_v57  ;;  %v5441_v32 = vadd.f32 %v13181_v53, %v5164_v62  ;;  %v13365_v57 = vld [vmem:[#allocation16] ss:$0 sm:$0xff]  ;;  %v6093_v62 = vld [vmem:[%s12836_s23 + $0xc0] sm:$0xff] }
 0x884   : > { %v5939_v47 = vpop.f32.mrf.mxu2  ;;  %v13328_v27 = vld [vmem:[#allocation4 + $0x109] sm:$0xff] }
 0x885   : > { %14865 = vst [vmem:[#allocation54_spill] sm:$0xff] %v13328_v27  ;;  %v5991_v18 = vadd.f32 %v5939_v47, %v5715_v4  ;;  %9545 = vmatmul.msk.f32.gmra.mxu3 %vm885_vm10, %v13328_v27  ;;  %v5717_v53 = vadd.f32 %v13185_v22, %v5441_v32  ;;  %v13400_v32 = vld [vmem:[#allocation4 + $0xc8] sm:$0xff] }
 0x886   : > { %6155 = vst.msk [vmem:[#allocation4 + $0x111] sm:$0xff] %vm885_vm10, %v6122_v60  ;;  %v13335_v51 = vpop.f32.mrf.mxu0  ;;  %v6092_v60 = vld [vmem:[%s12836_s23 + $0xb8] sm:$0xff] }
 0x887   : > { %v6027_v34 = vadd.f32 %v12823_v28, %v5991_v18  ;;  %v13339_v12 = vpop.f32.mrf.mxu1  ;;  %v5716_v28 = vadd.f32 %v13165_v44, %v5440_v35  ;;  %14874 = vst [vmem:[#allocation60_spill] sm:$0xff] %v13400_v32 }
 0x888   : > { %v13342_v3 = vpop.f32.mrf.mxu3 }
 0x889   : > { %v6059_v55 = vmax.f32 %v6027_v34, 0.0  ;;  %9570 = vmatmul.msk.f32.gmra.mxu0 %vm885_vm10, %v13344_v26  ;;  %9628 = vmatmul.msk.f32.gmra.mxu2 %vm885_vm10, %v13209_v49 }
 0x88a   : > { %9603 = vmatmul.msk.f32.gmra.mxu1 %vm885_vm10, %v13348_v0 }
 0x88b   : > { %v6123_v19 = vadd.f32 %v6091_v8, %v6059_v55  ;;  %v14873_v8 = vld [vmem:[#allocation45_spill] sm:$0xff] }
 0x88c   : > { %v5942_v63 = vpop.f32.mrf.mxu2  ;;  %v5165_v55 = vadd.f32 %v13015_v20, %v14873_v8 }
 0x88d   : > { %v13355_v13 = vld [vmem:[#allocation4 + $0x111] sm:$0xff]  ;;  %6156 = vst.msk [vmem:[#allocation4 + $0x121] sm:$0xff] %vm885_vm10, %v6123_v19  ;;  %v5992_v29 = vadd.f32 %v5942_v63, %v5716_v28 }
 0x88e   : > { %14868 = vst [vmem:[#allocation56_spill] sm:$0xff] %v13355_v13  ;;  %9546 = vmatmul.msk.f32.gmra.mxu3 %vm885_vm10, %v13355_v13  ;;  %v13362_v33 = vpop.f32.mrf.mxu0  ;;  %v5442_v63 = vadd.f32 %v13202_v9, %v5165_v55 }
 0x88f   : > { %v6028_v44 = vadd.f32 %v13365_v57, %v5992_v29  ;;  %v13368_v4 = vpop.f32.mrf.mxu1 }
 0x890   : > { %v13371_v47 = vpop.f32.mrf.mxu3  ;;  %v5718_v9 = vadd.f32 %v13206_v46, %v5442_v63  ;;  %v6094_v63 = vld [vmem:[%s12836_s23 + $0xc8] sm:$0xff] }
 0x891   : > { %v6060_v23 = vmax.f32 %v6028_v44, 0.0  ;;  %9571 = vmatmul.msk.f32.gmra.mxu0 %vm885_vm10, %v13373_v58  ;;  %9629 = vmatmul.msk.f32.gmra.mxu2 %vm885_vm10, %v13230_v48  ;;  %v13404_v44 = vld [vmem:[#allocation4 + $0xca] sm:$0xff] }
 0x892   : > { %9604 = vmatmul.msk.f32.gmra.mxu1 %vm885_vm10, %v13377_v30  ;;  %14875 = vst [vmem:[#allocation69_spill] sm:$0xff] %v13404_v44 }
 0x893   : > { %v6124_v18 = vadd.f32 %v6092_v60, %v6060_v23 }
 0x894   : > { %v5945_v35 = vpop.f32.mrf.mxu2  ;;  %v13384_v34 = vld [vmem:[#allocation4 + $0x121] sm:$0xff] }
 0x895   : > { %14872 = vst [vmem:[#allocation59_spill] sm:$0xff] %v13384_v34  ;;  %v5993_v28 = vadd.f32 %v5945_v35, %v5717_v53 }
 0x896   : > { %6157 = vst.msk [vmem:[#allocation4 + $0x129] sm:$0xff] %vm885_vm10, %v6124_v18  ;;  %9547 = vmatmul.msk.f32.gmra.mxu3 %vm885_vm10, %v13384_v34  ;;  %v13391_v19 = vpop.f32.mrf.mxu0  ;;  %v14877_v18 = vld [vmem:[#allocation48_spill] sm:$0xff] }
 0x897   : > { %v6029_v16 = vadd.f32 %v13365_v57, %v5993_v28  ;;  %v13395_v22 = vpop.f32.mrf.mxu1  ;;  %v5166_v35 = vadd.f32 %v13042_v7, %v14877_v18 }
 0x898   : > { %v13398_v29 = vpop.f32.mrf.mxu3 }
 0x899   : > { %v6061_v20 = vmax.f32 %v6029_v16, 0.0  ;;  %9572 = vmatmul.msk.f32.gmra.mxu0 %vm885_vm10, %v13400_v32  ;;  %9630 = vmatmul.msk.f32.gmra.mxu2 %vm885_vm10, %v13251_v5  ;;  %v5443_v28 = vadd.f32 %v13221_v2, %v5166_v35  ;;  %v14881_v35 = vld [vmem:[#allocation50_spill] sm:$0xff] }
 0x89a   : > { %9605 = vmatmul.msk.f32.gmra.mxu1 %vm885_vm10, %v13404_v44 }
 0x89b   : > { %v6125_v60 = vadd.f32 %v6093_v62, %v6061_v20  ;;  %v13427_v20 = vld [vmem:[#allocation4 + $0xd8] sm:$0xff]  ;;  %v5719_v2 = vadd.f32 %v13227_v10, %v5443_v28 }
 0x89c   : > { %v5948_v23 = vpop.f32.mrf.mxu2  ;;  %14878 = vst [vmem:[#allocation61_spill] sm:$0xff] %v13427_v20  ;;  %v6095_v28 = vld [vmem:[%s12836_s23 + $0xd0] sm:$0xff] }
 0x89d   : > { %v13411_v53 = vld [vmem:[#allocation4 + $0x129] sm:$0xff]  ;;  %6158 = vst.msk [vmem:[#allocation4 + $0x139] sm:$0xff] %vm885_vm10, %v6125_v60  ;;  %v5994_v8 = vadd.f32 %v5948_v23, %v5718_v9  ;;  %v13431_v9 = vld [vmem:[#allocation4 + $0xda] sm:$0xff] }
 0x89e   : > { %14876 = vst [vmem:[#allocation70_spill] sm:$0xff] %v13411_v53  ;;  %9548 = vmatmul.msk.f32.gmra.mxu3 %vm885_vm10, %v13411_v53  ;;  %v13418_v55 = vpop.f32.mrf.mxu0 }
 0x89f   : > { %v6030_v16 = vadd.f32 %v13365_v57, %v5994_v8  ;;  %v13422_v46 = vpop.f32.mrf.mxu1  ;;  %14879 = vst [vmem:[#allocation62_spill] sm:$0xff] %v13431_v9  ;;  %v5167_v8 = vadd.f32 %v13069_v21, %v14881_v35 }
 0x8a0   : > { %v13425_v62 = vpop.f32.mrf.mxu3 }
 0x8a1   : > { %v6062_v7 = vmax.f32 %v6030_v16, 0.0  ;;  %9573 = vmatmul.msk.f32.gmra.mxu0 %vm885_vm10, %v13427_v20  ;;  %9631 = vmatmul.msk.f32.gmra.mxu2 %vm885_vm10, %v13272_v40  ;;  %v5444_v44 = vadd.f32 %v13242_v52, %v5167_v8  ;;  %v14885_v8 = vld [vmem:[#allocation73_spill] sm:$0xff] }
 0x8a2   : > { %9606 = vmatmul.msk.f32.gmra.mxu1 %vm885_vm10, %v13431_v9 }
 0x8a3   : > { %v6126_v60 = vadd.f32 %v6094_v63, %v6062_v7  ;;  %v13454_v7 = vld [vmem:[#allocation4 + $0xe0] sm:$0xff]  ;;  %v5720_v52 = vadd.f32 %v13246_v11, %v5444_v44 }
 0x8a4   : > { %v5951_v23 = vpop.f32.mrf.mxu2  ;;  %v13438_v18 = vld [vmem:[#allocation4 + $0x139] sm:$0xff]  ;;  %14882 = vst [vmem:[#allocation71_spill] sm:$0xff] %v13454_v7 }
 0x8a5   : > { %14880 = vst [vmem:[#allocation36_spill] sm:$0xff] %v13438_v18  ;;  %v5995_v16 = vadd.f32 %v5951_v23, %v5719_v2  ;;  %v13458_v2 = vld [vmem:[#allocation4 + $0xe2] sm:$0xff] }
 0x8a6   : > { %6159 = vst.msk [vmem:[#allocation4 + $0x141] sm:$0xff] %vm885_vm10, %v6126_v60  ;;  %9549 = vmatmul.msk.f32.gmra.mxu3 %vm885_vm10, %v13438_v18  ;;  %v13445_v53 = vpop.f32.mrf.mxu0  ;;  %v6096_v44 = vld [vmem:[%s12836_s23 + $0xd8] sm:$0xff] }
 0x8a7   : > { %v6031_v9 = vadd.f32 %v13365_v57, %v5995_v16  ;;  %v13449_v10 = vpop.f32.mrf.mxu1  ;;  %14883 = vst [vmem:[#allocation72_spill] sm:$0xff] %v13458_v2 }
 0x8a8   : > { %v13452_v63 = vpop.f32.mrf.mxu3 }
 0x8a9   : > { %v6063_v21 = vmax.f32 %v6031_v9, 0.0  ;;  %9574 = vmatmul.msk.f32.gmra.mxu0 %vm885_vm10, %v13454_v7  ;;  %9632 = vmatmul.msk.f32.gmra.mxu2 %vm885_vm10, %v13293_v39  ;;  %v5168_v9 = vadd.f32 %v13096_v41, %v14885_v8 }
 0x8aa   : > { %9607 = vmatmul.msk.f32.gmra.mxu1 %vm885_vm10, %v13458_v2 }
 0x8ab   : > { %v6127_v60 = vadd.f32 %v6095_v28, %v6063_v21  ;;  %v5445_v34 = vadd.f32 %v13263_v45, %v5168_v9  ;;  %v13481_v21 = vld [vmem:[#allocation4 + $0xf0] sm:$0xff]  ;;  %v14889_v9 = vld [vmem:[#allocation67_spill] sm:$0xff] }
 0x8ac   : > { %v5954_v23 = vpop.f32.mrf.mxu2  ;;  %14886 = vst [vmem:[#allocation64_spill] sm:$0xff] %v13481_v21 }
 0x8ad   : > { %v13465_v35 = vld [vmem:[#allocation4 + $0x141] sm:$0xff]  ;;  %6160 = vst.msk [vmem:[#allocation4 + $0x151] sm:$0xff] %vm885_vm10, %v6127_v60  ;;  %v5996_v16 = vadd.f32 %v5954_v23, %v5720_v52  ;;  %v13485_v52 = vld [vmem:[#allocation4 + $0xf2] sm:$0xff]  ;;  %v5721_v45 = vadd.f32 %v13267_v36, %v5445_v34 }
 0x8ae   : > { %14884 = vst [vmem:[#allocation63_spill] sm:$0xff] %v13465_v35  ;;  %9550 = vmatmul.msk.f32.gmra.mxu3 %vm885_vm10, %v13465_v35  ;;  %v13472_v18 = vpop.f32.mrf.mxu0  ;;  %v6097_v34 = vld [vmem:[%s12836_s23 + $0xe0] sm:$0xff] }
 0x8af   : > { %v6032_v2 = vadd.f32 %v13365_v57, %v5996_v16  ;;  %v13476_v11 = vpop.f32.mrf.mxu1  ;;  %14887 = vst [vmem:[#allocation47_spill] sm:$0xff] %v13485_v52 }
 0x8b0   : > { %v13479_v28 = vpop.f32.mrf.mxu3 }
 0x8b1   : > { %v6064_v41 = vmax.f32 %v6032_v2, 0.0  ;;  %9575 = vmatmul.msk.f32.gmra.mxu0 %vm885_vm10, %v13481_v21  ;;  %9633 = vmatmul.msk.f32.gmra.mxu2 %vm885_vm10, %v13317_v6  ;;  %v5169_v2 = vadd.f32 %v13127_v59, %v14889_v9 }
 0x8b2   : > { %9608 = vmatmul.msk.f32.gmra.mxu1 %vm885_vm10, %v13485_v52 }
 0x8b3   : > { %v6128_v60 = vadd.f32 %v6096_v44, %v6064_v41  ;;  %v5446_v30 = vadd.f32 %v13284_v56, %v5169_v2  ;;  %v13508_v41 = vld [vmem:[#allocation4 + $0xf8] sm:$0xff]  ;;  %v14893_v2 = vld [vmem:[#allocation68_spill] sm:$0xff] }
 0x8b4   : > { %v5957_v23 = vpop.f32.mrf.mxu2  ;;  %v13492_v8 = vld [vmem:[#allocation4 + $0x151] sm:$0xff]  ;;  %14890 = vst [vmem:[#allocation46_spill] sm:$0xff] %v13508_v41 }
 0x8b5   : > { %14888 = vst [vmem:[#allocation35_spill] sm:$0xff] %v13492_v8  ;;  %v5997_v16 = vadd.f32 %v5957_v23, %v5721_v45  ;;  %v13512_v45 = vld [vmem:[#allocation4 + $0xfa] sm:$0xff]  ;;  %v5722_v56 = vadd.f32 %v13288_v14, %v5446_v30  ;;  %v6098_v14 = vld [vmem:[%s12836_s23 + $0xe8] sm:$0xff] }
 0x8b6   : > { %6161 = vst.msk [vmem:[#allocation4 + $0x159] sm:$0xff] %vm885_vm10, %v6128_v60  ;;  %9551 = vmatmul.msk.f32.gmra.mxu3 %vm885_vm10, %v13492_v8  ;;  %v13499_v35 = vpop.f32.mrf.mxu0 }
 0x8b7   : > { %v6033_v52 = vadd.f32 %v13365_v57, %v5997_v16  ;;  %v13503_v36 = vpop.f32.mrf.mxu1  ;;  %14891 = vst [vmem:[#allocation65_spill] sm:$0xff] %v13512_v45 }
 0x8b8   : > { %v13506_v44 = vpop.f32.mrf.mxu3 }
 0x8b9   : > { %v6065_v59 = vmax.f32 %v6033_v52, 0.0  ;;  %9576 = vmatmul.msk.f32.gmra.mxu0 %vm885_vm10, %v13508_v41  ;;  %9634 = vmatmul.msk.f32.gmra.mxu2 %vm885_vm10, %v13344_v26  ;;  %v5170_v52 = vadd.f32 %v13153_v17, %v14893_v2 }
 0x8ba   : > { %9609 = vmatmul.msk.f32.gmra.mxu1 %vm885_vm10, %v13512_v45 }
 0x8bb   : > { %v6129_v60 = vadd.f32 %v6097_v34, %v6065_v59  ;;  %v5447_v13 = vadd.f32 %v13308_v1, %v5170_v52  ;;  %v13535_v59 = vld [vmem:[#allocation4 + $0x108] sm:$0xff]  ;;  %v14897_v52 = vld [vmem:[#allocation74_spill] sm:$0xff] }
 0x8bc   : > { %v5960_v23 = vpop.f32.mrf.mxu2  ;;  %14894 = vst [vmem:[#allocation49_spill] sm:$0xff] %v13535_v59 }
 0x8bd   : > { %v13519_v9 = vld [vmem:[#allocation4 + $0x159] sm:$0xff]  ;;  %6162 = vst.msk [vmem:[#allocation4 + $0x169] sm:$0xff] %vm885_vm10, %v6129_v60  ;;  %v5998_v16 = vadd.f32 %v5960_v23, %v5722_v56  ;;  %v13539_v56 = vld [vmem:[#allocation4 + $0x10a] sm:$0xff]  ;;  %v5723_v1 = vadd.f32 %v13312_v43, %v5447_v13 }
 0x8be   : > { %14892 = vst [vmem:[#allocation66_spill] sm:$0xff] %v13519_v9  ;;  %9552 = vmatmul.msk.f32.gmra.mxu3 %vm885_vm10, %v13519_v9  ;;  %v13526_v8 = vpop.f32.mrf.mxu0  ;;  %v6099_v43 = vld [vmem:[%s12836_s23 + $0xf0] sm:$0xff] }
 0x8bf   : > { %v6034_v45 = vadd.f32 %v13365_v57, %v5998_v16  ;;  %v13531_v30 = vpop.f32.mrf.mxu1  ;;  %14895 = vst [vmem:[#allocation43_spill] sm:$0xff] %v13539_v56 }
 0x8c0   : > { %v13533_v34 = vpop.f32.mrf.mxu3 }
 0x8c1   : > { %v6066_v17 = vmax.f32 %v6034_v45, 0.0  ;;  %9577 = vmatmul.msk.f32.gmra.mxu0 %vm885_vm10, %v13535_v59  ;;  %9635 = vmatmul.msk.f32.gmra.mxu2 %vm885_vm10, %v13373_v58  ;;  %v5171_v45 = vadd.f32 %v13175_v61, %v14897_v52  ;;  %v13564_v61 = vld [vmem:[#allocation4 + $0x112] sm:$0xff] }
 0x8c2   : > { %9610 = vmatmul.msk.f32.gmra.mxu1 %vm885_vm10, %v13539_v56  ;;  %14899 = vst [vmem:[#allocation51_spill] sm:$0xff] %v13564_v61 }
 0x8c3   : > { %v6130_v60 = vadd.f32 %v6098_v14, %v6066_v17  ;;  %v5448_v0 = vadd.f32 %v13335_v51, %v5171_v45  ;;  %v13560_v14 = vld [vmem:[#allocation4 + $0x110] sm:$0xff] }
 0x8c4   : > { %v5963_v23 = vpop.f32.mrf.mxu2  ;;  %v13546_v2 = vld [vmem:[#allocation4 + $0x169] sm:$0xff]  ;;  %14898 = vst [vmem:[#allocation37_spill] sm:$0xff] %v13560_v14 }
 0x8c5   : > { %14896 = vst [vmem:[#allocation44_spill] sm:$0xff] %v13546_v2  ;;  %v5999_v16 = vadd.f32 %v5963_v23, %v5723_v1  ;;  %v5724_v51 = vadd.f32 %v13339_v12, %v5448_v0  ;;  %v13588_v0 = vld [vmem:[#allocation4 + $0x122] sm:$0xff] }
 0x8c6   : > { %6163 = vst.msk [vmem:[#allocation4 + $0x171] sm:$0xff] %vm885_vm10, %v6130_v60  ;;  %9553 = vmatmul.msk.f32.gmra.mxu3 %vm885_vm10, %v13546_v2  ;;  %v13553_v9 = vpop.f32.mrf.mxu0  ;;  %v6100_v2 = vld [vmem:[%s12836_s23 + $0xf8] sm:$0xff] }
 0x8c7   : > { %v6035_v56 = vadd.f32 %v13365_v57, %v5999_v16  ;;  %v13568_v1 = vpop.f32.mrf.mxu1  ;;  %14902 = vst [vmem:[#allocation75_spill] sm:$0xff] %v13588_v0 }
 0x8c8   : > { %v13558_v13 = vpop.f32.mrf.mxu3 }
 0x8c9   : > { %v6067_v17 = vmax.f32 %v6035_v56, 0.0  ;;  %9578 = vmatmul.msk.f32.gmra.mxu0 %vm885_vm10, %v13560_v14  ;;  %9636 = vmatmul.msk.f32.gmra.mxu2 %vm885_vm10, %v13400_v32 }
 0x8ca   : > { %9611 = vmatmul.msk.f32.gmra.mxu1 %vm885_vm10, %v13564_v61  ;;  %v13584_v61 = vld [vmem:[#allocation4 + $0x120] sm:$0xff] }
 0x8cb   : > { %v6131_v60 = vadd.f32 %v6099_v43, %v6067_v17  ;;  %14901 = vst [vmem:[#allocation38_spill] sm:$0xff] %v13584_v61 }
 0x8cc   : > { %v5966_v23 = vpop.f32.mrf.mxu2 }
 0x8cd   : > { %v13573_v52 = vld [vmem:[#allocation4 + $0x171] sm:$0xff]  ;;  %6164 = vst.msk [vmem:[#allocation4 + $0x181] sm:$0xff] %vm885_vm10, %v6131_v60  ;;  %v6000_v56 = vadd.f32 %v5966_v23, %v5724_v51  ;;  %v7201_v51 = vld [vmem:[#allocation4 + $0x19] sm:$0xff]  ;;  %v6559_v60 = vadd.f32 %v13391_v19, %v13223_v24  ;;  %v7202_v19 = vld [vmem:[#allocation4 + $0x21] sm:$0xff] }
 0x8ce   : > { %14900 = vst [vmem:[#allocation52_spill] sm:$0xff] %v13573_v52  ;;  %9554 = vmatmul.msk.f32.gmra.mxu3 %vm885_vm10, %v13573_v52  ;;  %v13578_v45 = vpop.f32.mrf.mxu0 }
 0x8cf   : > { %v6036_v16 = vadd.f32 %v13365_v57, %v6000_v56  ;;  %v13594_v17 = vpop.f32.mrf.mxu1 }
 0x8d0   : > { %v13582_v32 = vpop.f32.mrf.mxu3 }
 0x8d1   : > { %v6068_v12 = vmax.f32 %v6036_v16, 0.0  ;;  %9579 = vmatmul.msk.f32.gmra.mxu0 %vm885_vm10, %v13584_v61  ;;  %9637 = vmatmul.msk.f32.gmra.mxu2 %vm885_vm10, %v13427_v20  ;;  %v13606_v16 = vld [vmem:[#allocation4 + $0x128] sm:$0xff]  ;;  %v13626_v20 = vld [vmem:[#allocation4 + $0x138] sm:$0xff] }
 0x8d2   : > { %9612 = vmatmul.msk.f32.gmra.mxu1 %vm885_vm10, %v13588_v0  ;;  %14903 = vst [vmem:[#allocation39_spill] sm:$0xff] %v13606_v16  ;;  %v6562_v0 = vadd.f32 %v13418_v55, %v13249_v25  ;;  %v13639_v55 = vld [vmem:[#allocation4 + $0x31] sm:$0xff] }
 0x8d3   : > { %v6132_v43 = vadd.f32 %v6100_v2, %v6068_v12  ;;  %v13610_v2 = vld [vmem:[#allocation4 + $0x12a] sm:$0xff]  ;;  %v6895_v12 = vadd.f32 %v13395_v22, %v6559_v60  ;;  %14905 = vst [vmem:[#allocation40_spill] sm:$0xff] %v13626_v20 }
 0x8d4   : > { %v13596_v57 = vpop.f32.mrf.mxu2  ;;  %14904 = vst [vmem:[#allocation76_spill] sm:$0xff] %v13610_v2  ;;  %v6896_v60 = vadd.f32 %v13422_v46, %v6562_v0  ;;  %v13655_v46 = vld [vmem:[#allocation4 + $0x142] sm:$0xff] }
 0x8d5   : > { %6165 = vst.msk [vmem:[#allocation4 + $0x189] sm:$0xff] %vm885_vm10, %v6132_v43 }
 0x8d6   : > { %9654 = vmatmul.msk.f32.vlgmr.msra.gmra.mxu3 %vm885_vm10, %v7201_v51  ;;  %v13602_v23 = vpop.f32.mrf.mxu0  ;;  %14908 = vst [vmem:[#allocation45_spill] sm:$0xff] %v13655_v46 }
 0x8d7   : > { %v13620_v51 = vpop.f32.mrf.mxu1 }
 0x8d8   : > { %v13604_v56 = vpop.f32.mrf.mxu3 }
 0x8d9   : > { %9580 = vmatmul.msk.f32.gmra.mxu0 %vm885_vm10, %v13606_v16  ;;  %9638 = vmatmul.msk.f32.gmra.mxu2 %vm885_vm10, %v13454_v7  ;;  %v13651_v7 = vld [vmem:[#allocation4 + $0x140] sm:$0xff] }
 0x8da   : > { %9613 = vmatmul.msk.f32.gmra.mxu1 %vm885_vm10, %v13610_v2  ;;  %v13630_v2 = vld [vmem:[#allocation4 + $0x13a] sm:$0xff]  ;;  %14907 = vst [vmem:[#allocation42_spill] sm:$0xff] %v13651_v7 }
 0x8db   : > { %14906 = vst [vmem:[#allocation41_spill] sm:$0xff] %v13630_v2 }
 0x8dc   : > { %v7076_v24 = vpop.f32.mrf.mxu2 }
 0x8dd   : > { %v13617_v43 = vadd.f32 %v7076_v24, %v6895_v12  ;;  %v6565_v24 = vadd.f32 %v13445_v53, %v13270_v42 }
 0x8de   : > { %9655 = vmatmul.msk.f32.gmra.mxu3 %vm885_vm10, %v7202_v19  ;;  %v13634_v22 = vpop.f32.mrf.mxu0 }
 0x8df   : > { %v13647_v19 = vpop.f32.mrf.mxu1  ;;  %v6897_v0 = vadd.f32 %v13449_v10, %v6565_v24  ;;  %v13678_v10 = vld [vmem:[#allocation4 + $0x152] sm:$0xff] }
 0x8e0   : > { %v13624_v52 = vpop.f32.mrf.mxu3  ;;  %14910 = vst [vmem:[#allocation50_spill] sm:$0xff] %v13678_v10  ;;  %v9686_v24 = vld [vmem:[%s14790_s1 + $0x28] sm:$0xff] }
 0x8e1   : > { %9581 = vmatmul.msk.f32.gmra.mxu0 %vm885_vm10, %v13626_v20  ;;  %9639 = vmatmul.msk.f32.gmra.mxu2 %vm885_vm10, %v13481_v21 }
 0x8e2   : > { %9614 = vmatmul.msk.f32.gmra.mxu1 %vm885_vm10, %v13630_v2  ;;  %v6568_v2 = vadd.f32 %v13472_v18, %v13291_v37  ;;  %v9719_v37 = vld [vmem:[%s14790_s1 + $0x30] sm:$0xff]  ;;  %7621 = vmatpush.msra.mxu0 %v9686_v24  ;;  %v9785_v24 = vld [vmem:[%s14790_s1 + $0x40] sm:$0xff] }
 0x8e3   : > { %7897 = vmatpush.msra.mxu1 %v9719_v37  ;;  %8447 = vmatpush.msrb.mxu3 %v9785_v24  ;;  %v13711_v37 = vld [vmem:[#allocation4 + $0x158] sm:$0xff] }
 0x8e4   : > { %v7079_v25 = vpop.f32.mrf.mxu2  ;;  %14912 = vst [vmem:[#allocation67_spill] sm:$0xff] %v13711_v37 }
 0x8e5   : > { %v13641_v12 = vadd.f32 %v7079_v25, %v6896_v60  ;;  %v13664_v60 = vld [vmem:[#allocation4 + $0x39] sm:$0xff] }
 0x8e6   : > { %9656 = vmatmul.msk.f32.gmra.mxu3 %vm885_vm10, %v13639_v55  ;;  %v13662_v42 = vpop.f32.mrf.mxu0 }
 0x8e7   : > { %v13688_v18 = vpop.f32.mrf.mxu1 }
 0x8e8   : > { %v13649_v21 = vpop.f32.mrf.mxu3 }
 0x8e9   : > { %9582 = vmatmul.msk.f32.gmra.mxu0 %vm885_vm10, %v13651_v7  ;;  %9640 = vmatmul.msk.f32.gmra.mxu2 %vm885_vm10, %v13508_v41  ;;  %v13674_v41 = vld [vmem:[#allocation4 + $0x150] sm:$0xff] }
 0x8ea   : > { %9615 = vmatmul.msk.f32.gmra.mxu1 %vm885_vm10, %v13655_v46  ;;  %14909 = vst [vmem:[#allocation48_spill] sm:$0xff] %v13674_v41 }
 0x8ec   : > { %v7082_v53 = vpop.f32.mrf.mxu2 }
 0x8ed   : > { %v13666_v25 = vadd.f32 %v7082_v53, %v6897_v0  ;;  %v9752_v0 = vld [vmem:[%s14790_s1 + $0x38] sm:$0xff]  ;;  %v6898_v53 = vadd.f32 %v13476_v11, %v6568_v2  ;;  %v6571_v11 = vadd.f32 %v13499_v35, %v13315_v50  ;;  %v13724_v35 = vld [vmem:[#allocation4 + $0x51] sm:$0xff] }
 0x8ee   : > { %9657 = vmatmul.msk.f32.gmra.mxu3 %vm885_vm10, %v13664_v60  ;;  %8172 = vmatpush.msra.mxu2 %v9752_v0 }
 0x8ef   : > { %v6899_v0 = vadd.f32 %v13503_v36, %v6571_v11  ;;  %v13740_v36 = vld [vmem:[#allocation4 + $0x16a] sm:$0xff] }
 0x8f0   : > { %v13672_v27 = vpop.f32.mrf.mxu3  ;;  %14917 = vst [vmem:[#allocation79_spill] sm:$0xff] %v13740_v36 }
 0x8f1   : > { %9583 = vmatmul.msk.f32.gmra.mxu0 %vm885_vm10, %v13674_v41  ;;  %9641 = vmatmul.msk.f32.gmra.mxu2 %vm885_vm10, %v13535_v59  ;;  %v13696_v59 = vld [vmem:[#allocation4 + $0x49] sm:$0xff] }
 0x8f2   : > { %9616 = vmatmul.msk.f32.gmra.mxu1 %vm885_vm10, %v13678_v10  ;;  %v13705_v10 = vpop.f32.mrf.mxu0 }
 0x8f4   : > { %v7085_v46 = vpop.f32.mrf.mxu2 }
 0x8f5   : > { %v13698_v58 = vadd.f32 %v7085_v46, %v6898_v53  ;;  %v13715_v46 = vld [vmem:[#allocation4 + $0x15a] sm:$0xff]  ;;  %v13722_v53 = vpop.f32.mrf.mxu1 }
 0x8f6   : > { %9658 = vmatmul.msk.f32.gmra.mxu3 %vm885_vm10, %v13696_v59  ;;  %14913 = vst [vmem:[#allocation68_spill] sm:$0xff] %v13715_v46 }
 0x8f7   : > { %14911 = vst [vmem:[#allocation73_spill] sm:$0xff] %v13698_v58  ;;  %v6574_v58 = vadd.f32 %v13526_v8, %v13342_v3  ;;  %v13747_v8 = vld [vmem:[#allocation4 + $0x61] sm:$0xff] }
 0x8f8   : > { %v13709_v2 = vpop.f32.mrf.mxu3 }
 0x8f9   : > { %9584 = vmatmul.msk.f32.gmra.mxu0 %vm885_vm10, %v13711_v37  ;;  %9642 = vmatmul.msk.f32.gmra.mxu2 %vm885_vm10, %v13560_v14  ;;  %v6900_v11 = vadd.f32 %v13531_v30, %v6574_v58  ;;  %v13763_v58 = vld [vmem:[#allocation4 + $0x172] sm:$0xff] }
 0x8fa   : > { %9617 = vmatmul.msk.f32.gmra.mxu1 %vm885_vm10, %v13715_v46  ;;  %v13732_v15 = vpop.f32.mrf.mxu0  ;;  %v13736_v46 = vld [vmem:[#allocation4 + $0x168] sm:$0xff]  ;;  %14921 = vst [vmem:[#allocation83_spill] sm:$0xff] %v13763_v58 }
 0x8fb   : > { %14916 = vst [vmem:[#allocation78_spill] sm:$0xff] %v13736_v46 }
 0x8fc   : > { %v7088_v50 = vpop.f32.mrf.mxu2 }
 0x8fd   : > { %v13726_v24 = vadd.f32 %v7088_v50, %v6899_v0  ;;  %v13753_v50 = vpop.f32.mrf.mxu1 }
 0x8fe   : > { %9659 = vmatmul.msk.f32.gmra.mxu3 %vm885_vm10, %v13724_v35 }
 0x8ff   : > { %14914 = vst [vmem:[#allocation74_spill] sm:$0xff] %v13726_v24  ;;  %v6577_v24 = vadd.f32 %v13553_v9, %v13371_v47  ;;  %v13772_v9 = vld [vmem:[#allocation4 + $0x69] sm:$0xff] }
 0x900   : > { %v13734_v14 = vpop.f32.mrf.mxu3 }
 0x901   : > { %14915 = vst [vmem:[#allocation77_spill] sm:$0xff] %v13734_v14  ;;  %9585 = vmatmul.msk.f32.gmra.mxu0 %vm885_vm10, %v13736_v46  ;;  %9643 = vmatmul.msk.f32.gmra.mxu2 %vm885_vm10, %v13584_v61  ;;  %v13759_v61 = vld [vmem:[#allocation4 + $0x170] sm:$0xff] }
 0x902   : > { %9618 = vmatmul.msk.f32.gmra.mxu1 %vm885_vm10, %v13740_v36  ;;  %14920 = vst [vmem:[#allocation82_spill] sm:$0xff] %v13759_v61  ;;  %v13767_v30 = vpop.f32.mrf.mxu0  ;;  %v6580_v36 = vadd.f32 %v13578_v45, %v13398_v29  ;;  %v6583_v45 = vadd.f32 %v13602_v23, %v13425_v62  ;;  %v6586_v23 = vadd.f32 %v13634_v22, %v13452_v63 }
 0x903   : > { %v6589_v22 = vadd.f32 %v13662_v42, %v13479_v28 }
 0x904   : > { %v7091_v3 = vpop.f32.mrf.mxu2 }
 0x905   : > { %v13749_v0 = vadd.f32 %v7091_v3, %v6900_v11  ;;  %v6901_v11 = vadd.f32 %v13568_v1, %v6577_v24  ;;  %v7752_v1 = vld [vmem:[#allocation4 + $0x30] sm:$0xff]  ;;  %v6902_v24 = vadd.f32 %v13594_v17, %v6580_v36  ;;  %v7753_v17 = vld [vmem:[#allocation4 + $0x38] sm:$0xff] }
 0x906   : > { %9660 = vmatmul.msk.f32.gmra.mxu3 %vm885_vm10, %v13747_v8 }
 0x907   : > { %14918 = vst [vmem:[#allocation80_spill] sm:$0xff] %v13749_v0  ;;  %v13780_v0 = vpop.f32.mrf.mxu1 }
 0x908   : > { %v13757_v14 = vpop.f32.mrf.mxu3 }
 0x909   : > { %14919 = vst [vmem:[#allocation81_spill] sm:$0xff] %v13757_v14  ;;  %9586 = vmatmul.msk.f32.gmra.mxu0 %vm885_vm10, %v13759_v61  ;;  %9644 = vmatmul.msk.f32.gmra.mxu2 %vm885_vm10, %v13606_v16  ;;  %v7476_v14 = vld [vmem:[#allocation4 + $0x1a] sm:$0xff] }
 0x90a   : > { %9619 = vmatmul.msk.f32.gmra.mxu1 %vm885_vm10, %v13763_v58  ;;  %v13791_v58 = vld [vmem:[#allocation4 + $0x79] sm:$0xff] }
 0x90c   : > { %v7094_v47 = vpop.f32.mrf.mxu2 }
 0x90d   : > { %v13774_v3 = vadd.f32 %v7094_v47, %v6901_v11  ;;  %v13789_v11 = vpop.f32.mrf.mxu0 }
 0x90e   : > { %9661 = vmatmul.msk.f32.gmra.mxu3 %vm885_vm10, %v13772_v9 }
 0x90f   : > { %v13804_v36 = vpop.f32.mrf.mxu1 }
 0x911   : > { %v13782_v16 = vpop.f32.mrf.mxu3  ;;  %9645 = vmatmul.msk.f32.gmra.mxu2 %vm885_vm10, %v13626_v20  ;;  %9687 = vmatmul.msk.f32.vlgmr.msra.gmra.mxu0 %vm885_vm10, %v7476_v14  ;;  %v7477_v14 = vld [vmem:[#allocation4 + $0x22] sm:$0xff] }
 0x912   : > { %9720 = vmatmul.msk.f32.vlgmr.msra.gmra.mxu1 %vm885_vm10, %v7752_v1  ;;  %v6903_v1 = vadd.f32 %v13620_v51, %v6583_v45  ;;  %v7754_v51 = vld [vmem:[#allocation4 + $0x48] sm:$0xff]  ;;  %v6904_v45 = vadd.f32 %v13647_v19, %v6586_v23  ;;  %v7755_v19 = vld [vmem:[#allocation4 + $0x50] sm:$0xff]  ;;  %v6905_v23 = vadd.f32 %v13688_v18, %v6589_v22 }
 0x914   : > { %v7097_v47 = vpop.f32.mrf.mxu2 }
 0x915   : > { %v13793_v29 = vadd.f32 %v7097_v47, %v6902_v24  ;;  %v13808_v47 = vld [vmem:[#allocation4 + $0x81] sm:$0xff]  ;;  %v13814_v62 = vpop.f32.mrf.mxu0 }
 0x916   : > { %9662 = vmatmul.msk.f32.gmra.mxu3 %vm885_vm10, %v13791_v58 }
 0x917   : > { %14922 = vst [vmem:[#allocation84_spill] sm:$0xff] %v13793_v29 }
 0x919   : > { %v13799_v20 = vpop.f32.mrf.mxu3  ;;  %9646 = vmatmul.msk.f32.gmra.mxu2 %vm885_vm10, %v13651_v7  ;;  %9688 = vmatmul.msk.f32.gmra.mxu0 %vm885_vm10, %v7477_v14  ;;  %v13820_v7 = vld [vmem:[#allocation4 + $0x32] sm:$0xff] }
 0x91a   : > { %9721 = vmatmul.msk.f32.gmra.mxu1 %vm885_vm10, %v7753_v17  ;;  %14923 = vst [vmem:[#allocation85_spill] sm:$0xff] %v13820_v7  ;;  %v13828_v17 = vpop.f32.mrf.mxu1 }
 0x91c   : > { %v7100_v24 = vpop.f32.mrf.mxu2 }
 0x91d   : > { %v13810_v29 = vadd.f32 %v7100_v24, %v6903_v1  ;;  %v13830_v24 = vld [vmem:[#allocation4 + $0x91] sm:$0xff] }
 0x91e   : > { %9663 = vmatmul.msk.f32.gmra.mxu3 %vm885_vm10, %v13808_v47 }
 0x921   : > { %v13818_v14 = vpop.f32.mrf.mxu3  ;;  %9647 = vmatmul.msk.f32.gmra.mxu2 %vm885_vm10, %v13674_v41  ;;  %9689 = vmatmul.msk.f32.gmra.mxu0 %vm885_vm10, %v13820_v7  ;;  %v13838_v41 = vpop.f32.mrf.mxu0 }
 0x922   : > { %9722 = vmatmul.msk.f32.gmra.mxu1 %vm885_vm10, %v7754_v51  ;;  %v13842_v51 = vld [vmem:[#allocation4 + $0x3a] sm:$0xff]  ;;  %v13856_v42 = vpop.f32.mrf.mxu1 }
 0x923   : > { %14925 = vst [vmem:[#allocation87_spill] sm:$0xff] %v13842_v51 }
 0x924   : > { %v7103_v1 = vpop.f32.mrf.mxu2 }
 0x925   : > { %v13832_v63 = vadd.f32 %v7103_v1, %v6904_v45  ;;  %v13850_v1 = vld [vmem:[#allocation4 + $0x99] sm:$0xff] }
 0x926   : > { %9664 = vmatmul.msk.f32.gmra.mxu3 %vm885_vm10, %v13830_v24 }
 0x927   : > { %14924 = vst [vmem:[#allocation86_spill] sm:$0xff] %v13832_v63 }
 0x929   : > { %v13840_v7 = vpop.f32.mrf.mxu3  ;;  %9648 = vmatmul.msk.f32.gmra.mxu2 %vm885_vm10, %v13711_v37  ;;  %9690 = vmatmul.msk.f32.gmra.mxu0 %vm885_vm10, %v13842_v51  ;;  %v6592_v37 = vadd.f32 %v13705_v10, %v13506_v44  ;;  %v13862_v51 = vld [vmem:[#allocation4 + $0x4a] sm:$0xff]  ;;  %v13868_v18 = vpop.f32.mrf.mxu0  ;;  %v6595_v10 = vadd.f32 %v13732_v15, %v13533_v34 }
 0x92a   : > { %9723 = vmatmul.msk.f32.gmra.mxu1 %vm885_vm10, %v7755_v19  ;;  %14926 = vst [vmem:[#allocation88_spill] sm:$0xff] %v13862_v51  ;;  %v13896_v34 = vld [vmem:[#allocation4 + $0xb1] sm:$0xff] }
 0x92b   : > { %v6906_v22 = vadd.f32 %v13722_v53, %v6592_v37 }
 0x92c   : > { %v7106_v45 = vpop.f32.mrf.mxu2 }
 0x92d   : > { %v13852_v28 = vadd.f32 %v7106_v45, %v6905_v23  ;;  %v13873_v23 = vld [vmem:[#allocation4 + $0xa9] sm:$0xff]  ;;  %v13881_v45 = vpop.f32.mrf.mxu1 }
 0x92e   : > { %9665 = vmatmul.msk.f32.gmra.mxu3 %vm885_vm10, %v13850_v1 }
 0x931   : > { %v13860_v63 = vpop.f32.mrf.mxu3  ;;  %9649 = vmatmul.msk.f32.gmra.mxu2 %vm885_vm10, %v13736_v46  ;;  %9691 = vmatmul.msk.f32.gmra.mxu0 %vm885_vm10, %v13862_v51  ;;  %v13885_v46 = vld [vmem:[#allocation4 + $0x52] sm:$0xff]  ;;  %v13894_v37 = vpop.f32.mrf.mxu0 }
 0x932   : > { %9724 = vmatmul.msk.f32.gmra.mxu1 %vm885_vm10, %v13188_v31  ;;  %14927 = vst [vmem:[#allocation89_spill] sm:$0xff] %v13885_v46  ;;  %v6907_v31 = vadd.f32 %v13753_v50, %v6595_v10 }
 0x934   : > { %v7109_v19 = vpop.f32.mrf.mxu2 }
 0x935   : > { %v13875_v44 = vadd.f32 %v7109_v19, %v6906_v22  ;;  %v6598_v22 = vadd.f32 %v13767_v30, %v13558_v13  ;;  %v13914_v50 = vpop.f32.mrf.mxu1  ;;  %v13919_v30 = vld [vmem:[#allocation4 + $0xc1] sm:$0xff] }
 0x936   : > { %9666 = vmatmul.msk.f32.gmra.mxu3 %vm885_vm10, %v13873_v23 }
 0x937   : > { %v6908_v10 = vadd.f32 %v13780_v0, %v6598_v22 }
 0x939   : > { %v13883_v51 = vpop.f32.mrf.mxu3  ;;  %9650 = vmatmul.msk.f32.gmra.mxu2 %vm885_vm10, %v13759_v61  ;;  %9692 = vmatmul.msk.f32.gmra.mxu0 %vm885_vm10, %v13885_v46  ;;  %v13906_v46 = vld [vmem:[#allocation4 + $0x180] sm:$0xff]  ;;  %v13931_v61 = vld [vmem:[#allocation4 + $0x188] sm:$0xff] }
 0x93a   : > { %9725 = vmatmul.msk.f32.gmra.mxu1 %vm885_vm10, %v13209_v49  ;;  %14928 = vst [vmem:[#allocation90_spill] sm:$0xff] %v13906_v46  ;;  %v13908_v49 = vld [vmem:[#allocation4 + $0x62] sm:$0xff] }
 0x93b   : > { %14929 = vst [vmem:[#allocation91_spill] sm:$0xff] %v13908_v49 }
 0x93c   : > { %v7112_v15 = vpop.f32.mrf.mxu2  ;;  %14930 = vst [vmem:[#allocation92_spill] sm:$0xff] %v13931_v61 }
 0x93d   : > { %v13898_v53 = vadd.f32 %v7112_v15, %v6907_v31  ;;  %v13925_v15 = vpop.f32.mrf.mxu0  ;;  %v13942_v22 = vpop.f32.mrf.mxu1 }
 0x93e   : > { %9667 = vmatmul.msk.f32.gmra.mxu3 %vm885_vm10, %v13896_v34 }
 0x941   : > { %v13904_v19 = vpop.f32.mrf.mxu3  ;;  %9651 = vmatmul.msk.f32.gmra.mxu2 %vm885_vm10, %v13906_v46  ;;  %9693 = vmatmul.msk.f32.gmra.mxu0 %vm885_vm10, %v13908_v49  ;;  %v6601_v49 = vadd.f32 %v13789_v11, %v13582_v32  ;;  %v13944_v11 = vld [vmem:[#allocation4 + $0xc9] sm:$0xff] }
 0x942   : > { %9726 = vmatmul.msk.f32.gmra.mxu1 %vm885_vm10, %v13230_v48  ;;  %v13933_v48 = vld [vmem:[#allocation4 + $0x6a] sm:$0xff] }
 0x943   : > { %14931 = vst [vmem:[#allocation93_spill] sm:$0xff] %v13933_v48  ;;  %v6909_v0 = vadd.f32 %v13804_v36, %v6601_v49  ;;  %v6556_v36 = vadd.f32 %v13362_v33, %v13196_v38  ;;  %v13967_v49 = vld [vmem:[#allocation4 + $0xd9] sm:$0xff] }
 0x944   : > { %v7115_v13 = vpop.f32.mrf.mxu2 }
 0x945   : > { %v13921_v31 = vadd.f32 %v7115_v13, %v6908_v10  ;;  %v6604_v13 = vadd.f32 %v13814_v62, %v13604_v56  ;;  %v6861_v38 = vpop.f32.mrf.mxu1 }
 0x946   : > { %9668 = vmatmul.msk.f32.gmra.mxu3 %vm885_vm10, %v13919_v30 }
 0x947   : > { %v6910_v56 = vadd.f32 %v13828_v17, %v6604_v13 }
 0x949   : > { %v13929_v46 = vpop.f32.mrf.mxu3  ;;  %9652 = vmatmul.msk.f32.gmra.mxu2 %vm885_vm10, %v13931_v61  ;;  %9694 = vmatmul.msk.f32.gmra.mxu0 %vm885_vm10, %v13933_v48  ;;  %v13952_v61 = vpop.f32.mrf.mxu0 }
 0x94a   : > { %9727 = vmatmul.msk.f32.gmra.mxu1 %vm885_vm10, %v13251_v5  ;;  %v13956_v5 = vld [vmem:[#allocation4 + $0x7a] sm:$0xff] }
 0x94b   : > { %14932 = vst [vmem:[#allocation94_spill] sm:$0xff] %v13956_v5 }
 0x94c   : > { %v7118_v32 = vpop.f32.mrf.mxu2 }
 0x94d   : > { %v13946_v10 = vadd.f32 %v7118_v32, %v6909_v0  ;;  %v6894_v0 = vadd.f32 %v13368_v4, %v6556_v36  ;;  %v13988_v36 = vld [vmem:[#allocation4 + $0xe1] sm:$0xff] }
 0x94e   : > { %9669 = vmatmul.msk.f32.gmra.mxu3 %vm885_vm10, %v13944_v11 }
 0x94f   : > { %v7169_v33 = vadd.f32 %v13596_v57, %v6894_v0 }
 0x951   : > { %v13954_v48 = vpop.f32.mrf.mxu3  ;;  %9695 = vmatmul.msk.f32.gmra.mxu0 %vm885_vm10, %v13956_v5  ;;  %9753 = vmatmul.msk.f32.vlgmr.msra.gmra.mxu2 %vm885_vm10, %v13639_v55  ;;  %v6607_v55 = vadd.f32 %v13838_v41, %v13624_v52  ;;  %v6621_v4 = vpop.f32.mrf.mxu0  ;;  %v6610_v52 = vadd.f32 %v13868_v18, %v13649_v21  ;;  %v14008_v18 = vld [vmem:[#allocation4 + $0xf1] sm:$0xff] }
 0x952   : > { %9728 = vmatmul.msk.f32.gmra.mxu1 %vm885_vm10, %v13272_v40  ;;  %v13977_v40 = vld [vmem:[#allocation4 + $0x82] sm:$0xff] }
 0x953   : > { %v6911_v57 = vadd.f32 %v13856_v42, %v6607_v55  ;;  %v14016_v55 = vld [vmem:[#allocation4 + $0x9a] sm:$0xff] }
 0x954   : > { %v7121_v62 = vpop.f32.mrf.mxu2 }
 0x955   : > { %v13970_v32 = vadd.f32 %v7121_v62, %v6910_v56 }
 0x956   : > { %9670 = vmatmul.msk.f32.gmra.mxu3 %vm885_vm10, %v13967_v49 }
 0x959   : > { %v7348_v5 = vpop.f32.mrf.mxu3  ;;  %9696 = vmatmul.msk.f32.gmra.mxu0 %vm885_vm10, %v13977_v40  ;;  %9754 = vmatmul.msk.f32.gmra.mxu2 %vm885_vm10, %v13664_v60  ;;  %v13996_v60 = vld [vmem:[#allocation4 + $0x92] sm:$0xff]  ;;  %v6624_v42 = vpop.f32.mrf.mxu0 }
 0x95a   : > { %v13979_v17 = vadd.f32 %v7348_v5, %v7169_v33  ;;  %9729 = vmatmul.msk.f32.gmra.mxu1 %vm885_vm10, %v13293_v39  ;;  %v6864_v5 = vpop.f32.mrf.mxu1  ;;  %v6912_v39 = vadd.f32 %v13881_v45, %v6610_v52 }
 0x95c   : > { %v7124_v13 = vpop.f32.mrf.mxu2 }
 0x95d   : > { %v13990_v41 = vadd.f32 %v7124_v13, %v6911_v57 }
 0x95e   : > { %9671 = vmatmul.msk.f32.gmra.mxu3 %vm885_vm10, %v13988_v36 }
 0x961   : > { %v7351_v56 = vpop.f32.mrf.mxu3  ;;  %9697 = vmatmul.msk.f32.gmra.mxu0 %vm885_vm10, %v13996_v60  ;;  %9755 = vmatmul.msk.f32.gmra.mxu2 %vm885_vm10, %v13696_v59 }
 0x962   : > { %v13999_v62 = vadd.f32 %v7351_v56, %v13617_v43  ;;  %9730 = vmatmul.msk.f32.gmra.mxu1 %vm885_vm10, %v13317_v6  ;;  %v6613_v43 = vadd.f32 %v13894_v37, %v13672_v27  ;;  %v6867_v6 = vpop.f32.mrf.mxu1  ;;  %v6616_v37 = vadd.f32 %v13925_v15, %v13709_v2  ;;  %v14935_v2 = vld [vmem:[#allocation54_spill] sm:$0xff] }
 0x964   : > { %v7127_v21 = vpop.f32.mrf.mxu2  ;;  %v6913_v45 = vadd.f32 %v13914_v50, %v6613_v43  ;;  %v6914_v50 = vadd.f32 %v13942_v22, %v6616_v37  ;;  %v14939_v22 = vld [vmem:[#allocation60_spill] sm:$0xff] }
 0x965   : > { %v14010_v0 = vadd.f32 %v7127_v21, %v6912_v39 }
 0x966   : > { %9672 = vmatmul.msk.f32.gmra.mxu3 %vm885_vm10, %v14008_v18 }
 0x969   : > { %v7354_v33 = vpop.f32.mrf.mxu3  ;;  %9698 = vmatmul.msk.f32.gmra.mxu0 %vm885_vm10, %v14016_v55  ;;  %9756 = vmatmul.msk.f32.gmra.mxu2 %vm885_vm10, %v13724_v35  ;;  %v14933_v35 = vld [vmem:[#allocation53_spill] sm:$0xff] }
 0x96a   : > { %v14019_v59 = vadd.f32 %v7354_v33, %v13641_v12  ;;  %9731 = vmatmul.msk.f32.gmra.mxu1 %vm885_vm10, %v13344_v26  ;;  %v6627_v12 = vpop.f32.mrf.mxu0  ;;  %v14934_v26 = vld [vmem:[#allocation57_spill] sm:$0xff] }
 0x96b   : > { %v14937_v33 = vld [vmem:[#allocation73_spill] sm:$0xff] }
 0x96c   : > { %v7130_v57 = vpop.f32.mrf.mxu2 }
 0x96d   : > { %v14028_v27 = vadd.f32 %v7130_v57, %v6913_v45 }
 0x96e   : > { %9673 = vmatmul.msk.f32.gmra.mxu3 %vm885_vm10, %v13301_v54  ;;  %v6870_v54 = vpop.f32.mrf.mxu1 }
 0x971   : > { %v7357_v13 = vpop.f32.mrf.mxu3  ;;  %9699 = vmatmul.msk.f32.gmra.mxu0 %vm885_vm10, %v14933_v35  ;;  %9757 = vmatmul.msk.f32.gmra.mxu2 %vm885_vm10, %v13747_v8  ;;  %v14938_v8 = vld [vmem:[#allocation55_spill] sm:$0xff]  ;;  %v14940_v35 = vld [vmem:[#allocation56_spill] sm:$0xff] }
 0x972   : > { %v14035_v52 = vadd.f32 %v7357_v13, %v13666_v25  ;;  %9732 = vmatmul.msk.f32.gmra.mxu1 %vm885_vm10, %v14934_v26  ;;  %v14936_v25 = vld [vmem:[#allocation77_spill] sm:$0xff]  ;;  %v6630_v21 = vpop.f32.mrf.mxu0 }
 0x973   : > { %v6619_v15 = vadd.f32 %v13952_v61, %v14936_v25  ;;  %v14941_v26 = vld [vmem:[#allocation81_spill] sm:$0xff] }
 0x974   : > { %v7133_v56 = vpop.f32.mrf.mxu2 }
 0x975   : > { %v14044_v39 = vadd.f32 %v7133_v56, %v6914_v50  ;;  %v6915_v57 = vadd.f32 %v6861_v38, %v6619_v15  ;;  %v6622_v50 = vadd.f32 %v6621_v4, %v14941_v26  ;;  %v14944_v38 = vld [vmem:[#allocation61_spill] sm:$0xff]  ;;  %v6625_v4 = vadd.f32 %v6624_v42, %v13782_v16  ;;  %v14949_v16 = vld [vmem:[#allocation70_spill] sm:$0xff] }
 0x976   : > { %9674 = vmatmul.msk.f32.gmra.mxu3 %vm885_vm10, %v14935_v2  ;;  %v6873_v61 = vpop.f32.mrf.mxu1  ;;  %v14942_v2 = vld [vmem:[#allocation74_spill] sm:$0xff]  ;;  %v6628_v42 = vadd.f32 %v6627_v12, %v13799_v20 }
 0x977   : > { %v6916_v15 = vadd.f32 %v6864_v5, %v6622_v50  ;;  %v6917_v5 = vadd.f32 %v6867_v6, %v6625_v4  ;;  %v14951_v6 = vld [vmem:[#allocation64_spill] sm:$0xff] }
 0x979   : > { %v7360_v43 = vpop.f32.mrf.mxu3  ;;  %9700 = vmatmul.msk.f32.gmra.mxu0 %vm885_vm10, %v14938_v8  ;;  %9758 = vmatmul.msk.f32.gmra.mxu2 %vm885_vm10, %v13772_v9 }
 0x97a   : > { %v14051_v45 = vadd.f32 %v7360_v43, %v14937_v33  ;;  %9733 = vmatmul.msk.f32.gmra.mxu1 %vm885_vm10, %v14939_v22  ;;  %v14943_v43 = vld [vmem:[#allocation58_spill] sm:$0xff]  ;;  %v6633_v9 = vpop.f32.mrf.mxu0  ;;  %v14945_v22 = vld [vmem:[#allocation59_spill] sm:$0xff] }
 0x97c   : > { %v7136_v37 = vpop.f32.mrf.mxu2 }
 0x97d   : > { %v14059_v13 = vadd.f32 %v7136_v37, %v6915_v57 }
 0x97e   : > { %9675 = vmatmul.msk.f32.gmra.mxu3 %vm885_vm10, %v14940_v35  ;;  %v6876_v57 = vpop.f32.mrf.mxu1  ;;  %v14946_v35 = vld [vmem:[#allocation80_spill] sm:$0xff] }
 0x981   : > { %v7363_v56 = vpop.f32.mrf.mxu3  ;;  %9701 = vmatmul.msk.f32.gmra.mxu0 %vm885_vm10, %v14943_v43  ;;  %9759 = vmatmul.msk.f32.gmra.mxu2 %vm885_vm10, %v13791_v58  ;;  %v14948_v58 = vld [vmem:[#allocation71_spill] sm:$0xff] }
 0x982   : > { %v14065_v25 = vadd.f32 %v7363_v56, %v14942_v2  ;;  %9734 = vmatmul.msk.f32.gmra.mxu1 %vm885_vm10, %v14944_v38  ;;  %v14947_v56 = vld [vmem:[#allocation69_spill] sm:$0xff]  ;;  %v6636_v50 = vpop.f32.mrf.mxu0 }
 0x984   : > { %v7139_v33 = vpop.f32.mrf.mxu2 }
 0x985   : > { %v14073_v8 = vadd.f32 %v7139_v33, %v6916_v15  ;;  %v14950_v33 = vld [vmem:[#allocation62_spill] sm:$0xff] }
 0x986   : > { %9676 = vmatmul.msk.f32.gmra.mxu3 %vm885_vm10, %v14945_v22  ;;  %v6918_v22 = vadd.f32 %v6870_v54, %v6628_v42 }
 0x989   : > { %v7366_v37 = vpop.f32.mrf.mxu3  ;;  %9702 = vmatmul.msk.f32.gmra.mxu0 %vm885_vm10, %v14947_v56  ;;  %9760 = vmatmul.msk.f32.gmra.mxu2 %vm885_vm10, %v13808_v47  ;;  %v6879_v47 = vpop.f32.mrf.mxu1  ;;  %v14953_v56 = vld [vmem:[#allocation84_spill] sm:$0xff] }
 0x98a   : > { %v14079_v26 = vadd.f32 %v7366_v37, %v14946_v35  ;;  %9735 = vmatmul.msk.f32.gmra.mxu1 %vm885_vm10, %v14948_v58  ;;  %v14952_v35 = vld [vmem:[#allocation36_spill] sm:$0xff]  ;;  %v6639_v20 = vpop.f32.mrf.mxu0 }
 0x98c   : > { %v7142_v2 = vpop.f32.mrf.mxu2 }
 0x98d   : > { %v14087_v43 = vadd.f32 %v7142_v2, %v6917_v5  ;;  %v14954_v5 = vld [vmem:[#allocation72_spill] sm:$0xff] }
 0x98e   : > { %9677 = vmatmul.msk.f32.gmra.mxu3 %vm885_vm10, %v14949_v16 }
 0x991   : > { %v7369_v38 = vpop.f32.mrf.mxu3  ;;  %9703 = vmatmul.msk.f32.gmra.mxu0 %vm885_vm10, %v14950_v33  ;;  %9761 = vmatmul.msk.f32.gmra.mxu2 %vm885_vm10, %v13830_v24  ;;  %v14955_v24 = vld [vmem:[#allocation46_spill] sm:$0xff]  ;;  %v6882_v2 = vpop.f32.mrf.mxu1 }
 0x992   : > { %v14093_v15 = vadd.f32 %v7369_v38, %v13774_v3  ;;  %9736 = vmatmul.msk.f32.gmra.mxu1 %vm885_vm10, %v14951_v6  ;;  %v6631_v3 = vadd.f32 %v6630_v21, %v13818_v14  ;;  %v14956_v38 = vld [vmem:[#allocation63_spill] sm:$0xff]  ;;  %v6634_v14 = vadd.f32 %v6633_v9, %v13840_v7  ;;  %v6642_v21 = vpop.f32.mrf.mxu0 }
 0x994   : > { %v7145_v4 = vpop.f32.mrf.mxu2  ;;  %v6919_v54 = vadd.f32 %v6873_v61, %v6631_v3  ;;  %v6920_v61 = vadd.f32 %v6876_v57, %v6634_v14  ;;  %v14959_v3 = vld [vmem:[#allocation35_spill] sm:$0xff]  ;;  %v14962_v57 = vld [vmem:[#allocation37_spill] sm:$0xff] }
 0x995   : > { %v14101_v37 = vadd.f32 %v7145_v4, %v6918_v22  ;;  %v14957_v22 = vld [vmem:[#allocation47_spill] sm:$0xff] }
 0x996   : > { %9678 = vmatmul.msk.f32.gmra.mxu3 %vm885_vm10, %v14952_v35 }
 0x999   : > { %v7372_v12 = vpop.f32.mrf.mxu3  ;;  %9704 = vmatmul.msk.f32.gmra.mxu0 %vm885_vm10, %v14954_v5  ;;  %9762 = vmatmul.msk.f32.gmra.mxu2 %vm885_vm10, %v13850_v1  ;;  %v14958_v1 = vld [vmem:[#allocation49_spill] sm:$0xff]  ;;  %v6885_v7 = vpop.f32.mrf.mxu1 }
 0x99a   : > { %v14107_v58 = vadd.f32 %v7372_v12, %v14953_v56  ;;  %9737 = vmatmul.msk.f32.gmra.mxu1 %vm885_vm10, %v14955_v24  ;;  %v14960_v12 = vld [vmem:[#allocation86_spill] sm:$0xff]  ;;  %v14961_v5 = vld [vmem:[#allocation65_spill] sm:$0xff] }
 0x99c   : > { %v7148_v16 = vpop.f32.mrf.mxu2 }
 0x99d   : > { %v14115_v42 = vadd.f32 %v7148_v16, %v6919_v54 }
 0x99e   : > { %9679 = vmatmul.msk.f32.gmra.mxu3 %vm885_vm10, %v14956_v38  ;;  %v14963_v38 = vld [vmem:[#allocation66_spill] sm:$0xff] }
 0x9a1   : > { %v7375_v33 = vpop.f32.mrf.mxu3  ;;  %9705 = vmatmul.msk.f32.gmra.mxu0 %vm885_vm10, %v14957_v22  ;;  %9763 = vmatmul.msk.f32.gmra.mxu2 %vm885_vm10, %v13873_v23  ;;  %v6645_v23 = vpop.f32.mrf.mxu0  ;;  %v14964_v22 = vld [vmem:[#allocation43_spill] sm:$0xff] }
 0x9a2   : > { %v14121_v6 = vadd.f32 %v7375_v33, %v13810_v29  ;;  %9738 = vmatmul.msk.f32.gmra.mxu1 %vm885_vm10, %v14958_v1  ;;  %v6637_v29 = vadd.f32 %v6636_v50, %v13860_v63  ;;  %v6640_v63 = vadd.f32 %v6639_v20, %v13883_v51  ;;  %v6888_v50 = vpop.f32.mrf.mxu1  ;;  %v14966_v51 = vld [vmem:[#allocation44_spill] sm:$0xff] }
 0x9a4   : > { %v7151_v4 = vpop.f32.mrf.mxu2  ;;  %v6921_v24 = vadd.f32 %v6879_v47, %v6637_v29  ;;  %v6922_v47 = vadd.f32 %v6882_v2, %v6640_v63  ;;  %v14967_v29 = vld [vmem:[#allocation51_spill] sm:$0xff] }
 0x9a5   : > { %v14129_v35 = vadd.f32 %v7151_v4, %v6920_v61  ;;  %v14968_v2 = vld [vmem:[#allocation39_spill] sm:$0xff] }
 0x9a6   : > { %9680 = vmatmul.msk.f32.gmra.mxu3 %vm885_vm10, %v14959_v3 }
 0x9a9   : > { %v7378_v9 = vpop.f32.mrf.mxu3  ;;  %9706 = vmatmul.msk.f32.gmra.mxu0 %vm885_vm10, %v14961_v5  ;;  %9764 = vmatmul.msk.f32.gmra.mxu2 %vm885_vm10, %v13896_v34  ;;  %v14965_v34 = vld [vmem:[#allocation38_spill] sm:$0xff]  ;;  %v6648_v1 = vpop.f32.mrf.mxu0 }
 0x9aa   : > { %v14135_v56 = vadd.f32 %v7378_v9, %v14960_v12  ;;  %9739 = vmatmul.msk.f32.gmra.mxu1 %vm885_vm10, %v14962_v57  ;;  %v14969_v57 = vld [vmem:[#allocation52_spill] sm:$0xff] }
 0x9ac   : > { %v7154_v54 = vpop.f32.mrf.mxu2 }
 0x9ad   : > { %v14143_v16 = vadd.f32 %v7154_v54, %v6921_v24  ;;  %v14970_v54 = vld [vmem:[#allocation75_spill] sm:$0xff] }
 0x9ae   : > { %9681 = vmatmul.msk.f32.gmra.mxu3 %vm885_vm10, %v14963_v38 }
 0x9b1   : > { %v7381_v14 = vpop.f32.mrf.mxu3  ;;  %9707 = vmatmul.msk.f32.gmra.mxu0 %vm885_vm10, %v14964_v22  ;;  %9765 = vmatmul.msk.f32.gmra.mxu2 %vm885_vm10, %v13919_v30  ;;  %v6891_v30 = vpop.f32.mrf.mxu1 }
 0x9b2   : > { %v14149_v33 = vadd.f32 %v7381_v14, %v13852_v28  ;;  %9740 = vmatmul.msk.f32.gmra.mxu1 %vm885_vm10, %v14965_v34  ;;  %v6643_v28 = vadd.f32 %v6642_v21, %v13904_v19  ;;  %v7623_v19 = vpop.f32.mrf.mxu0  ;;  %v14185_v14 = vld [vmem:[#allocation4 + $0x181] sm:$0xff] }
 0x9b4   : > { %v7157_v61 = vpop.f32.mrf.mxu2  ;;  %v6923_v9 = vadd.f32 %v6885_v7, %v6643_v28 }
 0x9b5   : > { %v14157_v4 = vadd.f32 %v7157_v61, %v6922_v47 }
 0x9b6   : > { %9682 = vmatmul.msk.f32.gmra.mxu3 %vm885_vm10, %v14966_v51  ;;  %v14201_v51 = vld [vmem:[#allocation4 + $0x189] sm:$0xff] }
 0x9b9   : > { %v7384_v20 = vpop.f32.mrf.mxu3  ;;  %9708 = vmatmul.msk.f32.gmra.mxu0 %vm885_vm10, %v14967_v29  ;;  %9766 = vmatmul.msk.f32.gmra.mxu2 %vm885_vm10, %v13944_v11  ;;  %v14971_v11 = vld [vmem:[#allocation40_spill] sm:$0xff]  ;;  %v7899_v38 = vpop.f32.mrf.mxu1 }
 0x9ba   : > { %v14163_v3 = vadd.f32 %v7384_v20, %v13875_v44  ;;  %9741 = vmatmul.msk.f32.gmra.mxu1 %vm885_vm10, %v14968_v2  ;;  %v6646_v44 = vadd.f32 %v6645_v23, %v13929_v46  ;;  %v6649_v46 = vadd.f32 %v6648_v1, %v13954_v48  ;;  %v7719_v48 = vadd.f32 %v7623_v19, %v13979_v17 }
 0x9bc   : > { %v7160_v12 = vpop.f32.mrf.mxu2  ;;  %v6924_v7 = vadd.f32 %v6888_v50, %v6646_v44  ;;  %v14973_v50 = vld [vmem:[#allocation42_spill] sm:$0xff]  ;;  %v6925_v47 = vadd.f32 %v6891_v30, %v6649_v46  ;;  %v14975_v30 = vld [vmem:[#allocation48_spill] sm:$0xff]  ;;  %v7995_v2 = vadd.f32 %v7899_v38, %v7719_v48 }
 0x9bd   : > { %v14171_v5 = vadd.f32 %v7160_v12, %v6923_v9  ;;  %v8044_v44 = vld [vmem:[#allocation4 + $0xf9] sm:$0xff] }
 0x9be   : > { %9683 = vmatmul.msk.f32.gmra.mxu3 %vm885_vm10, %v14969_v57  ;;  %v14976_v57 = vld [vmem:[#allocation85_spill] sm:$0xff] }
 0x9c1   : > { %v7387_v21 = vpop.f32.mrf.mxu3  ;;  %9709 = vmatmul.msk.f32.gmra.mxu0 %vm885_vm10, %v14970_v54  ;;  %9767 = vmatmul.msk.f32.gmra.mxu2 %vm885_vm10, %v13967_v49  ;;  %v14972_v49 = vld [vmem:[#allocation76_spill] sm:$0xff]  ;;  %v14978_v54 = vld [vmem:[#allocation67_spill] sm:$0xff] }
 0x9c2   : > { %v14177_v24 = vadd.f32 %v7387_v21, %v13898_v53  ;;  %9742 = vmatmul.msk.f32.gmra.mxu1 %vm885_vm10, %v14971_v11  ;;  %v7626_v53 = vpop.f32.mrf.mxu0 }
 0x9c4   : > { %v7163_v63 = vpop.f32.mrf.mxu2 }
 0x9c5   : > { %v14187_v22 = vadd.f32 %v7163_v63, %v6924_v7 }
 0x9c6   : > { %9684 = vmatmul.msk.f32.gmra.mxu3 %vm885_vm10, %v14185_v14 }
 0x9c9   : > { %v7390_v23 = vpop.f32.mrf.mxu3  ;;  %9710 = vmatmul.msk.f32.gmra.mxu0 %vm885_vm10, %v14972_v49  ;;  %9768 = vmatmul.msk.f32.gmra.mxu2 %vm885_vm10, %v13988_v36  ;;  %v14974_v36 = vld [vmem:[#allocation41_spill] sm:$0xff]  ;;  %v14980_v49 = vld [vmem:[#allocation50_spill] sm:$0xff] }
 0x9ca   : > { %v14193_v34 = vadd.f32 %v7390_v23, %v13921_v31  ;;  %9743 = vmatmul.msk.f32.gmra.mxu1 %vm885_vm10, %v14973_v50  ;;  %v7902_v31 = vpop.f32.mrf.mxu1  ;;  %v7629_v29 = vpop.f32.mrf.mxu0 }
 0x9cb   : > { %v7721_v46 = vadd.f32 %v7629_v29, %v14019_v59  ;;  %v8046_v29 = vld [vmem:[#allocation4 + $0x111] sm:$0xff] }
 0x9cc   : > { %v7166_v61 = vpop.f32.mrf.mxu2 }
 0x9cd   : > { %v14203_v28 = vadd.f32 %v7166_v61, %v6925_v47  ;;  %v14981_v47 = vld [vmem:[#allocation78_spill] sm:$0xff] }
 0x9ce   : > { %9685 = vmatmul.msk.f32.gmra.mxu3 %vm885_vm10, %v14201_v51 }
 0x9d1   : > { %v7393_v1 = vpop.f32.mrf.mxu3  ;;  %9711 = vmatmul.msk.f32.gmra.mxu0 %vm885_vm10, %v14974_v36  ;;  %9769 = vmatmul.msk.f32.gmra.mxu2 %vm885_vm10, %v14008_v18  ;;  %v14977_v18 = vld [vmem:[#allocation45_spill] sm:$0xff] }
 0x9d2   : > { %v14209_v20 = vadd.f32 %v7393_v1, %v13946_v10  ;;  %9744 = vmatmul.msk.f32.gmra.mxu1 %vm885_vm10, %v14975_v30  ;;  %v7720_v10 = vadd.f32 %v7626_v53, %v13999_v62  ;;  %v7905_v17 = vpop.f32.mrf.mxu1  ;;  %v7632_v7 = vpop.f32.mrf.mxu0  ;;  %v14979_v62 = vld [vmem:[#allocation87_spill] sm:$0xff]  ;;  %v14982_v1 = vld [vmem:[#allocation88_spill] sm:$0xff] }
 0x9d3   : > { %v8045_v53 = vld [vmem:[#allocation4 + $0x109] sm:$0xff]  ;;  %v7997_v61 = vadd.f32 %v7905_v17, %v7721_v46 }
 0x9d4   : > { %v8174_v9 = vpop.f32.mrf.mxu2  ;;  %v7996_v11 = vadd.f32 %v7902_v31, %v7720_v10 }
 0x9d5   : > { %v14217_v12 = vadd.f32 %v8174_v9, %v7995_v2  ;;  %v14983_v2 = vld [vmem:[#allocation68_spill] sm:$0xff]  ;;  %v14984_v9 = vld [vmem:[#allocation82_spill] sm:$0xff] }
 0x9d6   : > { %9786 = vmatmul.msk.f32.vlgmr.msrb.gmra.mxu3 %vm885_vm10, %v14976_v57 }
 0x9d9   : > { %v7396_v19 = vpop.f32.mrf.mxu3  ;;  %9712 = vmatmul.msk.f32.gmra.mxu0 %vm885_vm10, %v14977_v18  ;;  %9770 = vmatmul.msk.f32.gmra.mxu2 %vm885_vm10, %v8044_v44  ;;  %v14985_v44 = vld [vmem:[#allocation89_spill] sm:$0xff] }
 0x9da   : > { %v14223_v21 = vadd.f32 %v7396_v19, %v13970_v32  ;;  %9745 = vmatmul.msk.f32.gmra.mxu1 %vm885_vm10, %v14978_v54  ;;  %v7908_v50 = vpop.f32.mrf.mxu1  ;;  %v7635_v59 = vpop.f32.mrf.mxu0  ;;  %v8047_v54 = vld [vmem:[#allocation4 + $0x121] sm:$0xff] }
 0x9dc   : > { %v8177_v38 = vpop.f32.mrf.mxu2 }
 0x9dd   : > { %v14230_v63 = vadd.f32 %v8177_v38, %v7996_v11  ;;  %v14987_v38 = vld [vmem:[#allocation90_spill] sm:$0xff] }
 0x9de   : > { %9787 = vmatmul.msk.f32.gmra.mxu3 %vm885_vm10, %v14979_v62 }
 0x9e1   : > { %v7399_v32 = vpop.f32.mrf.mxu3  ;;  %9713 = vmatmul.msk.f32.gmra.mxu0 %vm885_vm10, %v14980_v49  ;;  %9771 = vmatmul.msk.f32.gmra.mxu2 %vm885_vm10, %v8045_v53  ;;  %v14988_v53 = vld [vmem:[#allocation91_spill] sm:$0xff] }
 0x9e2   : > { %v14236_v23 = vadd.f32 %v7399_v32, %v13990_v41  ;;  %9746 = vmatmul.msk.f32.gmra.mxu1 %vm885_vm10, %v14981_v47  ;;  %v7722_v41 = vadd.f32 %v7632_v7, %v14035_v52  ;;  %v7911_v10 = vpop.f32.mrf.mxu1  ;;  %v7723_v52 = vadd.f32 %v7635_v59, %v14051_v45  ;;  %v14986_v7 = vld [vmem:[#allocation79_spill] sm:$0xff] }
 0x9e4   : > { %v8180_v31 = vpop.f32.mrf.mxu2  ;;  %v7998_v57 = vadd.f32 %v7908_v50, %v7722_v41  ;;  %v7999_v62 = vadd.f32 %v7911_v10, %v7723_v52  ;;  %v8048_v50 = vld [vmem:[#allocation4 + $0x129] sm:$0xff]  ;;  %v8049_v10 = vld [vmem:[#allocation4 + $0x139] sm:$0xff] }
 0x9e5   : > { %v14243_v48 = vadd.f32 %v8180_v31, %v7997_v61  ;;  %v14989_v61 = vld [vmem:[#allocation83_spill] sm:$0xff] }
 0x9e6   : > { %9788 = vmatmul.msk.f32.gmra.mxu3 %vm885_vm10, %v14982_v1  ;;  %v14990_v1 = vld [vmem:[#allocation92_spill] sm:$0xff] }
 0x9e9   : > { %v7402_v36 = vpop.f32.mrf.mxu3  ;;  %9714 = vmatmul.msk.f32.gmra.mxu0 %vm885_vm10, %v14983_v2  ;;  %9772 = vmatmul.msk.f32.gmra.mxu2 %vm885_vm10, %v8046_v29  ;;  %v14991_v29 = vld [vmem:[#allocation93_spill] sm:$0xff] }
 0x9ea   : > { %v14249_v30 = vadd.f32 %v7402_v36, %v14010_v0  ;;  %9747 = vmatmul.msk.f32.gmra.mxu1 %vm885_vm10, %v14984_v9  ;;  %v7638_v0 = vpop.f32.mrf.mxu0  ;;  %v7914_v45 = vpop.f32.mrf.mxu1 }
 0x9eb   : > { %v7724_v49 = vadd.f32 %v7638_v0, %v14065_v25 }
 0x9ec   : > { %v8183_v17 = vpop.f32.mrf.mxu2 }
 0x9ed   : > { %v14256_v19 = vadd.f32 %v8183_v17, %v7998_v57  ;;  %v8000_v59 = vadd.f32 %v7914_v45, %v7724_v49  ;;  %v14287_v57 = vld [vmem:[#allocation4 + $0x182] sm:$0xff] }
 0x9ee   : > { %9789 = vmatmul.msk.f32.gmra.mxu3 %vm885_vm10, %v14985_v44 }
 0x9f1   : > { %v7405_v18 = vpop.f32.mrf.mxu3  ;;  %9715 = vmatmul.msk.f32.gmra.mxu0 %vm885_vm10, %v14986_v7  ;;  %9773 = vmatmul.msk.f32.gmra.mxu2 %vm885_vm10, %v8047_v54  ;;  %v7783_v7 = vld [vmem:[#allocation4 + $0x1a0] sm:$0xff] }
 0x9f2   : > { %v14262_v11 = vadd.f32 %v7405_v18, %v14028_v27  ;;  %9748 = vmatmul.msk.f32.gmra.mxu1 %vm885_vm10, %v14987_v38  ;;  %v7641_v31 = vpop.f32.mrf.mxu0  ;;  %v7917_v2 = vpop.f32.mrf.mxu1  ;;  %v14992_v18 = vld [vmem:[#allocation94_spill] sm:$0xff]  ;;  %v14301_v38 = vld [vmem:[#allocation4 + $0x18a] sm:$0xff] }
 0x9f3   : > { %v7725_v25 = vadd.f32 %v7641_v31, %v14079_v26  ;;  %v8052_v31 = vld [vmem:[#allocation4 + $0x159] sm:$0xff] }
 0x9f4   : > { %v8186_v46 = vpop.f32.mrf.mxu2 }
 0x9f5   : > { %v14269_v32 = vadd.f32 %v8186_v46, %v7999_v62  ;;  %v8001_v44 = vadd.f32 %v7917_v2, %v7725_v25  ;;  %v8050_v62 = vld [vmem:[#allocation4 + $0x141] sm:$0xff]  ;;  %v8313_v25 = vld [vmem:[#allocation4 + $0xb2] sm:$0xff] }
 0x9f6   : > { %9790 = vmatmul.msk.f32.gmra.mxu3 %vm885_vm10, %v14988_v53 }
 0x9f9   : > { %v7408_v27 = vpop.f32.mrf.mxu3  ;;  %9716 = vmatmul.msk.f32.gmra.mxu0 %vm885_vm10, %v14989_v61  ;;  %9774 = vmatmul.msk.f32.gmra.mxu2 %vm885_vm10, %v8048_v50  ;;  %v8051_v50 = vld [vmem:[#allocation4 + $0x151] sm:$0xff] }
 0x9fa   : > { %v14275_v47 = vadd.f32 %v7408_v27, %v14044_v39  ;;  %9749 = vmatmul.msk.f32.gmra.mxu1 %vm885_vm10, %v14990_v1  ;;  %v7782_v39 = vld [vmem:[#allocation4 + $0x198] sm:$0xff]  ;;  %v7644_v52 = vpop.f32.mrf.mxu0  ;;  %v7920_v53 = vpop.f32.mrf.mxu1 }
 0x9fb   : > { %v7726_v54 = vadd.f32 %v7644_v52, %v14093_v15  ;;  %v8058_v52 = vld [vmem:[#allocation4 + $0x1a1] sm:$0xff] }
 0x9fc   : > { %v8189_v41 = vpop.f32.mrf.mxu2 }
 0x9fd   : > { %v14282_v36 = vadd.f32 %v8189_v41, %v8000_v59  ;;  %v8002_v45 = vadd.f32 %v7920_v53, %v7726_v54  ;;  %v8053_v59 = vld [vmem:[#allocation4 + $0x169] sm:$0xff]  ;;  %v8318_v54 = vld [vmem:[#allocation4 + $0xf2] sm:$0xff] }
 0x9fe   : > { %9791 = vmatmul.msk.f32.gmra.mxu3 %vm885_vm10, %v14991_v29  ;;  %v8312_v41 = vld [vmem:[#allocation4 + $0xaa] sm:$0xff] }
 0x9ff   : > { %v8054_v29 = vld [vmem:[#allocation4 + $0x171] sm:$0xff] }
 0xa01   : > { %v7411_v9 = vpop.f32.mrf.mxu3  ;;  %9717 = vmatmul.msk.f32.gmra.mxu0 %vm885_vm10, %v14287_v57  ;;  %9775 = vmatmul.msk.f32.gmra.mxu2 %vm885_vm10, %v8049_v10  ;;  %v8057_v10 = vld [vmem:[#allocation4 + $0x199] sm:$0xff] }
 0xa02   : > { %v14290_v17 = vadd.f32 %v7411_v9, %v14059_v13  ;;  %9750 = vmatmul.msk.f32.gmra.mxu1 %vm885_vm10, %v7782_v39 }
 0xa04   : > { %v8192_v0 = vpop.f32.mrf.mxu2 }
 0xa05   : > { %v14296_v26 = vadd.f32 %v8192_v0, %v8001_v44 }
 0xa06   : > { %9792 = vmatmul.msk.f32.gmra.mxu3 %vm885_vm10, %v14992_v18 }
 0xa09   : > { %v7414_v13 = vpop.f32.mrf.mxu3  ;;  %9718 = vmatmul.msk.f32.gmra.mxu0 %vm885_vm10, %v14301_v38  ;;  %9776 = vmatmul.msk.f32.gmra.mxu2 %vm885_vm10, %v8050_v62 }
 0xa0a   : > { %v14304_v46 = vadd.f32 %v7414_v13, %v14073_v8  ;;  %9751 = vmatmul.msk.f32.gmra.mxu1 %vm885_vm10, %v7783_v7  ;;  %v14362_v7 = vld [vmem:[#allocation18] ss:$0 sm:$0xff] }
 0xa0c   : > { %v8195_v49 = vpop.f32.mrf.mxu2 }
 0xa0d   : > { %v14310_v27 = vadd.f32 %v8195_v49, %v8002_v45  ;;  %v7647_v45 = vpop.f32.mrf.mxu0 }
 0xa0e   : > { %9793 = vmatmul.msk.f32.gmra.mxu3 %vm885_vm10, %v13977_v40 }
 0xa11   : > { %v7417_v15 = vpop.f32.mrf.mxu3  ;;  %9777 = vmatmul.msk.f32.gmra.mxu2 %vm885_vm10, %v8051_v50  ;;  %v8320_v50 = vld [vmem:[#allocation4 + $0x10a] sm:$0xff] }
 0xa12   : > { %v14315_v8 = vadd.f32 %v7417_v15, %v14087_v43 }
 0xa16   : > { %9794 = vmatmul.msk.f32.gmra.mxu3 %vm885_vm10, %v13996_v60 }
 0xa19   : > { %v7420_v61 = vpop.f32.mrf.mxu3  ;;  %9778 = vmatmul.msk.f32.gmra.mxu2 %vm885_vm10, %v8052_v31 }
 0xa1a   : > { %v14321_v1 = vadd.f32 %v7420_v61, %v14101_v37  ;;  %v7923_v61 = vpop.f32.mrf.mxu1 }
 0xa1e   : > { %9795 = vmatmul.msk.f32.gmra.mxu3 %vm885_vm10, %v14016_v55 }
 0xa21   : > { %v7423_v40 = vpop.f32.mrf.mxu3  ;;  %9779 = vmatmul.msk.f32.gmra.mxu2 %vm885_vm10, %v8053_v59 }
 0xa22   : > { %v14327_v43 = vadd.f32 %v7423_v40, %v14115_v42  ;;  %v8314_v42 = vld [vmem:[#allocation4 + $0xc2] sm:$0xff]  ;;  %v8198_v40 = vpop.f32.mrf.mxu2 }
 0xa26   : > { %9796 = vmatmul.msk.f32.gmra.mxu3 %vm885_vm10, %v8312_v41 }
 0xa29   : > { %v7426_v60 = vpop.f32.mrf.mxu3  ;;  %9780 = vmatmul.msk.f32.gmra.mxu2 %vm885_vm10, %v8054_v29 }
 0xa2a   : > { %v14332_v37 = vadd.f32 %v7426_v60, %v14129_v35  ;;  %v8315_v35 = vld [vmem:[#allocation4 + $0xca] sm:$0xff]  ;;  %v7650_v60 = vpop.f32.mrf.mxu0 }
 0xa2e   : > { %9797 = vmatmul.msk.f32.gmra.mxu3 %vm885_vm10, %v8313_v25  ;;  %v8321_v25 = vld [vmem:[#allocation4 + $0x112] sm:$0xff] }
 0xa31   : > { %v7429_v55 = vpop.f32.mrf.mxu3  ;;  %9781 = vmatmul.msk.f32.gmra.mxu2 %vm885_vm10, %v14185_v14  ;;  %v8316_v14 = vld [vmem:[#allocation4 + $0xda] sm:$0xff] }
 0xa32   : > { %v14337_v39 = vadd.f32 %v7429_v55, %v14143_v16  ;;  %v7926_v55 = vpop.f32.mrf.mxu1 }
 0xa36   : > { %9798 = vmatmul.msk.f32.gmra.mxu3 %vm885_vm10, %v8314_v42  ;;  %v8201_v42 = vpop.f32.mrf.mxu2 }
 0xa39   : > { %v7432_v2 = vpop.f32.mrf.mxu3  ;;  %9782 = vmatmul.msk.f32.gmra.mxu2 %vm885_vm10, %v14201_v51  ;;  %v8317_v51 = vld [vmem:[#allocation4 + $0xe2] sm:$0xff] }
 0xa3a   : > { %v14343_v9 = vadd.f32 %v7432_v2, %v14157_v4 }
 0xa3e   : > { %9799 = vmatmul.msk.f32.gmra.mxu3 %vm885_vm10, %v8315_v35 }
 0xa41   : > { %v7435_v44 = vpop.f32.mrf.mxu3  ;;  %9783 = vmatmul.msk.f32.gmra.mxu2 %vm885_vm10, %v8057_v10 }
 0xa42   : > { %v14349_v16 = vadd.f32 %v7435_v44, %v14171_v5  ;;  %v7653_v44 = vpop.f32.mrf.mxu0 }
 0xa46   : > { %9800 = vmatmul.msk.f32.gmra.mxu3 %vm885_vm10, %v8316_v14 }
 0xa49   : > { %v7438_v4 = vpop.f32.mrf.mxu3  ;;  %9784 = vmatmul.msk.f32.gmra.mxu2 %vm885_vm10, %v8058_v52 }
 0xa4a   : > { %v14354_v0 = vadd.f32 %v7438_v4, %v14187_v22  ;;  %v7929_v4 = vpop.f32.mrf.mxu1 }
 0xa4e   : > { %9801 = vmatmul.msk.f32.gmra.mxu3 %vm885_vm10, %v8317_v51 }
 0xa51   : > { %v7441_v18 = vpop.f32.mrf.mxu3 }
 0xa52   : > { %v14359_v5 = vadd.f32 %v7441_v18, %v14203_v28  ;;  %v8319_v28 = vld [vmem:[#allocation4 + $0xfa] sm:$0xff]  ;;  %v8204_v18 = vpop.f32.mrf.mxu2 }
 0xa56   : > { %9802 = vmatmul.msk.f32.gmra.mxu3 %vm885_vm10, %v8318_v54 }
 0xa59   : > { %v8449_v13 = vpop.f32.mrf.mxu3 }
 0xa5a   : > { %v8545_v62 = vadd.f32 %v8449_v13, %v14217_v12  ;;  %v8323_v13 = vld [vmem:[#allocation4 + $0x12a] sm:$0xff] }
 0xa5c   : > { %v8581_v22 = vadd.f32 %v14362_v7, %v8545_v62  ;;  %v7656_v62 = vpop.f32.mrf.mxu0 }
 0xa5e   : > { %v8613_v53 = vmax.f32 %v8581_v22, 0.0  ;;  %9803 = vmatmul.msk.f32.gmra.mxu3 %vm885_vm10, %v8319_v28 }
 0xa60   : > { %8645 = vst.msk [vmem:[%s14371_s9] sm:$0xff] %vm885_vm10, %v8613_v53  ;;  %v7932_v53 = vpop.f32.mrf.mxu1 }
 0xa61   : > { %v8452_v49 = vpop.f32.mrf.mxu3 }
 0xa62   : > { %v8546_v12 = vadd.f32 %v8452_v49, %v14230_v63 }
 0xa64   : > { %v8582_v15 = vadd.f32 %v14362_v7, %v8546_v12  ;;  %v8207_v12 = vpop.f32.mrf.mxu2 }
 0xa66   : > { %v8614_v31 = vmax.f32 %v8582_v15, 0.0  ;;  %9804 = vmatmul.msk.f32.gmra.mxu3 %vm885_vm10, %v8320_v50  ;;  %v7659_v50 = vpop.f32.mrf.mxu0 }
 0xa68   : > { %8646 = vst.msk [vmem:[%s14371_s9 + $0x8] sm:$0xff] %vm885_vm10, %v8614_v31 }
 0xa69   : > { %v8455_v59 = vpop.f32.mrf.mxu3 }
 0xa6a   : > { %v8547_v41 = vadd.f32 %v8455_v59, %v14243_v48  ;;  %v8322_v48 = vld [vmem:[#allocation4 + $0x122] sm:$0xff] }
 0xa6c   : > { %v8583_v29 = vadd.f32 %v14362_v7, %v8547_v41 }
 0xa6e   : > { %v8615_v63 = vmax.f32 %v8583_v29, 0.0  ;;  %9805 = vmatmul.msk.f32.gmra.mxu3 %vm885_vm10, %v8321_v25  ;;  %v8325_v29 = vld [vmem:[#allocation4 + $0x142] sm:$0xff]  ;;  %v7935_v25 = vpop.f32.mrf.mxu1 }
 0xa70   : > { %8647 = vst.msk [vmem:[%s14371_s9 + $0x10] sm:$0xff] %vm885_vm10, %v8615_v63  ;;  %v8210_v63 = vpop.f32.mrf.mxu2 }
 0xa71   : > { %v8458_v2 = vpop.f32.mrf.mxu3 }
 0xa72   : > { %v8548_v35 = vadd.f32 %v8458_v2, %v14256_v19 }
 0xa74   : > { %v8584_v10 = vadd.f32 %v14362_v7, %v8548_v35  ;;  %v7727_v35 = vadd.f32 %v7647_v45, %v14107_v58 }
 0xa76   : > { %v8616_v14 = vmax.f32 %v8584_v10, 0.0  ;;  %9806 = vmatmul.msk.f32.gmra.mxu3 %vm885_vm10, %v8322_v48  ;;  %v7662_v48 = vpop.f32.mrf.mxu0 }
 0xa78   : > { %8648 = vst.msk [vmem:[%s14371_s9 + $0x18] sm:$0xff] %vm885_vm10, %v8616_v14 }
 0xa79   : > { %v8461_v52 = vpop.f32.mrf.mxu3 }
 0xa7a   : > { %v8549_v51 = vadd.f32 %v8461_v52, %v14269_v32  ;;  %v8324_v32 = vld [vmem:[#allocation4 + $0x13a] sm:$0xff]  ;;  %v8003_v52 = vadd.f32 %v7923_v61, %v7727_v35 }
 0xa7c   : > { %v8585_v54 = vadd.f32 %v14362_v7, %v8549_v51 }
 0xa7e   : > { %v8617_v19 = vmax.f32 %v8585_v54, 0.0  ;;  %9807 = vmatmul.msk.f32.gmra.mxu3 %vm885_vm10, %v8323_v13  ;;  %v7938_v54 = vpop.f32.mrf.mxu1  ;;  %v8278_v13 = vadd.f32 %v8198_v40, %v8003_v52  ;;  %v7665_v45 = vpop.f32.mrf.mxu0  ;;  %v8329_v52 = vld [vmem:[#allocation4 + $0x172] sm:$0xff] }
 0xa80   : > { %8649 = vst.msk [vmem:[%s14371_s9 + $0x20] sm:$0xff] %vm885_vm10, %v8617_v19  ;;  %v8213_v19 = vpop.f32.mrf.mxu2 }
 0xa81   : > { %v8464_v22 = vpop.f32.mrf.mxu3 }
 0xa82   : > { %v8550_v28 = vadd.f32 %v8464_v22, %v14282_v36 }
 0xa84   : > { %v8586_v49 = vadd.f32 %v14362_v7, %v8550_v28  ;;  %v7728_v28 = vadd.f32 %v7650_v60, %v14121_v6  ;;  %v8328_v60 = vld [vmem:[#allocation4 + $0x16a] sm:$0xff] }
 0xa86   : > { %v8618_v15 = vmax.f32 %v8586_v49, 0.0  ;;  %9808 = vmatmul.msk.f32.gmra.mxu3 %vm885_vm10, %v8324_v32  ;;  %v8327_v49 = vld [vmem:[#allocation4 + $0x15a] sm:$0xff]  ;;  %v8004_v32 = vadd.f32 %v7926_v55, %v7728_v28  ;;  %v7668_v55 = vpop.f32.mrf.mxu0  ;;  %v7731_v28 = vadd.f32 %v7659_v50, %v14163_v3 }
 0xa88   : > { %8650 = vst.msk [vmem:[%s14371_s9 + $0x28] sm:$0xff] %vm885_vm10, %v8618_v15  ;;  %v8279_v61 = vadd.f32 %v8201_v42, %v8004_v32 }
 0xa89   : > { %v8467_v31 = vpop.f32.mrf.mxu3 }
 0xa8a   : > { %v8551_v59 = vadd.f32 %v8467_v31, %v14296_v26  ;;  %v8326_v26 = vld [vmem:[#allocation4 + $0x152] sm:$0xff]  ;;  %v7729_v31 = vadd.f32 %v7653_v44, %v14135_v56 }
 0xa8c   : > { %v8587_v41 = vadd.f32 %v14362_v7, %v8551_v59  ;;  %v7941_v59 = vpop.f32.mrf.mxu1 }
 0xa8e   : > { %v8619_v36 = vmax.f32 %v8587_v41, 0.0  ;;  %9809 = vmatmul.msk.f32.gmra.mxu3 %vm885_vm10, %v8325_v29  ;;  %v8216_v29 = vpop.f32.mrf.mxu2 }
 0xa90   : > { %8651 = vst.msk [vmem:[%s14371_s9 + $0x30] sm:$0xff] %vm885_vm10, %v8619_v36  ;;  %v8005_v36 = vadd.f32 %v7929_v4, %v7729_v31 }
 0xa91   : > { %v8470_v2 = vpop.f32.mrf.mxu3 }
 0xa92   : > { %v8552_v10 = vadd.f32 %v8470_v2, %v14310_v27  ;;  %v8280_v35 = vadd.f32 %v8204_v18, %v8005_v36  ;;  %v7671_v18 = vpop.f32.mrf.mxu0 }
 0xa94   : > { %v8588_v14 = vadd.f32 %v14362_v7, %v8552_v10  ;;  %v7730_v10 = vadd.f32 %v7656_v62, %v14149_v33  ;;  %v7944_v56 = vpop.f32.mrf.mxu1  ;;  %v8007_v62 = vadd.f32 %v7935_v25, %v7731_v28 }
 0xa96   : > { %v8620_v51 = vmax.f32 %v8588_v14, 0.0  ;;  %9810 = vmatmul.msk.f32.gmra.mxu3 %vm885_vm10, %v8326_v26  ;;  %v8219_v26 = vpop.f32.mrf.mxu2  ;;  %v8282_v32 = vadd.f32 %v8210_v63, %v8007_v62 }
 0xa98   : > { %8652 = vst.msk [vmem:[%s14371_s9 + $0x38] sm:$0xff] %vm885_vm10, %v8620_v51  ;;  %v8006_v51 = vadd.f32 %v7932_v53, %v7730_v10  ;;  %v8333_v10 = vld [vmem:[#allocation4 + $0x1a2] sm:$0xff] }
 0xa99   : > { %v8473_v22 = vpop.f32.mrf.mxu3 }
 0xa9a   : > { %v8553_v58 = vadd.f32 %v8473_v22, %v8278_v13  ;;  %v8281_v13 = vadd.f32 %v8207_v12, %v8006_v51 }
 0xa9c   : > { %v8589_v27 = vadd.f32 %v14362_v7, %v8553_v58 }
 0xa9e   : > { %v8621_v15 = vmax.f32 %v8589_v27, 0.0  ;;  %9811 = vmatmul.msk.f32.gmra.mxu3 %vm885_vm10, %v8327_v49  ;;  %v7947_v27 = vpop.f32.mrf.mxu1  ;;  %v8222_v53 = vpop.f32.mrf.mxu2 }
 0xaa0   : > { %8653 = vst.msk [vmem:[%s14371_s9 + $0x40] sm:$0xff] %vm885_vm10, %v8621_v15  ;;  %v7732_v15 = vadd.f32 %v7662_v48, %v14177_v24  ;;  %v7733_v24 = vadd.f32 %v7665_v45, %v14193_v34 }
 0xaa1   : > { %v8476_v40 = vpop.f32.mrf.mxu3 }
 0xaa2   : > { %v8554_v41 = vadd.f32 %v8476_v40, %v8279_v61  ;;  %v7674_v40 = vpop.f32.mrf.mxu0  ;;  %v8008_v50 = vadd.f32 %v7938_v54, %v7732_v15  ;;  %v8009_v36 = vadd.f32 %v7941_v59, %v7733_v24 }
 0xaa4   : > { %v8590_v6 = vadd.f32 %v14362_v7, %v8554_v41 }
 0xaa6   : > { %v8622_v2 = vmax.f32 %v8590_v6, 0.0  ;;  %9812 = vmatmul.msk.f32.gmra.mxu3 %vm885_vm10, %v8328_v60  ;;  %v14437_v25 = vpop.f32.mrf.mxu1  ;;  %v14441_v63 = vpop.f32.mrf.mxu2  ;;  %v8332_v6 = vld [vmem:[#allocation4 + $0x19a] sm:$0xff] }
 0xaa8   : > { %8654 = vst.msk [vmem:[%s14371_s9 + $0x48] sm:$0xff] %vm885_vm10, %v8622_v2 }
 0xaa9   : > { %v8479_v42 = vpop.f32.mrf.mxu3 }
 0xaaa   : > { %v8555_v14 = vadd.f32 %v8479_v42, %v8280_v35  ;;  %v14445_v54 = vpop.f32.mrf.mxu0  ;;  %v7734_v35 = vadd.f32 %v7668_v55, %v14209_v20  ;;  %v7735_v55 = vadd.f32 %v7671_v18, %v14223_v21  ;;  %v7736_v21 = vadd.f32 %v7674_v40, %v14236_v23 }
 0xaac   : > { %v8591_v44 = vadd.f32 %v14362_v7, %v8555_v14  ;;  %v8010_v59 = vadd.f32 %v7944_v56, %v7734_v35 }
 0xaae   : > { %v8623_v4 = vmax.f32 %v8591_v44, 0.0  ;;  %9813 = vmatmul.msk.f32.gmra.mxu3 %vm885_vm10, %v8329_v52  ;;  %v14451_v42 = vpop.f32.mrf.mxu1  ;;  %v14453_v45 = vpop.f32.mrf.mxu2  ;;  %v8285_v52 = vadd.f32 %v8219_v26, %v8010_v59 }
 0xab0   : > { %8655 = vst.msk [vmem:[%s14371_s9 + $0x50] sm:$0xff] %vm885_vm10, %v8623_v4 }
 0xab1   : > { %v8482_v22 = vpop.f32.mrf.mxu3 }
 0xab2   : > { %v8556_v58 = vadd.f32 %v8482_v22, %v8281_v13  ;;  %v8011_v22 = vadd.f32 %v7947_v27, %v7735_v55 }
 0xab4   : > { %v8592_v33 = vadd.f32 %v14362_v7, %v8556_v58  ;;  %v8286_v58 = vadd.f32 %v8222_v53, %v8011_v22 }
 0xab6   : > { %v8624_v49 = vmax.f32 %v8592_v33, 0.0  ;;  %9814 = vmatmul.msk.f32.gmra.mxu3 %vm885_vm10, %v14287_v57  ;;  %v8283_v57 = vadd.f32 %v8213_v19, %v8008_v50  ;;  %v14462_v4 = vpop.f32.mrf.mxu1  ;;  %v14465_v56 = vpop.f32.mrf.mxu2 }
 0xab8   : > { %8656 = vst.msk [vmem:[%s14371_s9 + $0x58] sm:$0xff] %vm885_vm10, %v8624_v49 }
 0xab9   : > { %v8485_v12 = vpop.f32.mrf.mxu3 }
 0xaba   : > { %v8557_v61 = vadd.f32 %v8485_v12, %v8282_v32 }
 0xabc   : > { %v8593_v3 = vadd.f32 %v14362_v7, %v8557_v61 }
 0xabe   : > { %v8625_v31 = vmax.f32 %v8593_v3, 0.0  ;;  %9815 = vmatmul.msk.f32.gmra.mxu3 %vm885_vm10, %v14301_v38  ;;  %v8284_v38 = vadd.f32 %v8216_v29, %v8009_v36  ;;  %v14457_v29 = vpop.f32.mrf.mxu0 }
 0xac0   : > { %8657 = vst.msk [vmem:[%s14371_s9 + $0x60] sm:$0xff] %vm885_vm10, %v8625_v31 }
 0xac1   : > { %v8488_v41 = vpop.f32.mrf.mxu3 }
 0xac2   : > { %v8558_v48 = vadd.f32 %v8488_v41, %v8283_v57 }
 0xac4   : > { %v8594_v60 = vadd.f32 %v14362_v7, %v8558_v48 }
 0xac6   : > { %v8626_v2 = vmax.f32 %v8594_v60, 0.0  ;;  %9816 = vmatmul.msk.f32.gmra.mxu3 %vm885_vm10, %v8332_v6  ;;  %v14471_v26 = vpop.f32.mrf.mxu0 }
 0xac8   : > { %8658 = vst.msk [vmem:[%s14371_s9 + $0x68] sm:$0xff] %vm885_vm10, %v8626_v2 }
 0xac9   : > { %v8491_v19 = vpop.f32.mrf.mxu3 }
 0xaca   : > { %v8559_v34 = vadd.f32 %v8491_v19, %v8284_v38 }
 0xacc   : > { %v8595_v14 = vadd.f32 %v14362_v7, %v8559_v34 }
 0xace   : > { %v8627_v44 = vmax.f32 %v8595_v14, 0.0  ;;  %9817 = vmatmul.msk.f32.gmra.mxu3 %vm885_vm10, %v8333_v10 }
 0xad0   : > { %8659 = vst.msk [vmem:[%s14371_s9 + $0x70] sm:$0xff] %vm885_vm10, %v8627_v44 }
 0xad1   : > { %v8494_v20 = vpop.f32.mrf.mxu3 }
 0xad2   : > { %v8560_v51 = vadd.f32 %v8494_v20, %v8285_v52 }
 0xad4   : > { %v8596_v13 = vadd.f32 %v14362_v7, %v8560_v51 }
 0xad6   : > { %v8628_v28 = vmax.f32 %v8596_v13, 0.0 }
 0xad8   : > { %8660 = vst.msk [vmem:[%s14371_s9 + $0x78] sm:$0xff] %vm885_vm10, %v8628_v28 }
 0xad9   : > { %v8497_v33 = vpop.f32.mrf.mxu3 }
 0xada   : > { %v8561_v18 = vadd.f32 %v8497_v33, %v8286_v58 }
 0xadc   : > { %v8597_v62 = vadd.f32 %v14362_v7, %v8561_v18 }
 0xadd   : > { %10197 = shalt.err (!%p10194_p10)
}
 0xade   : > { %s10296_s13 = smov 128   ;;  %s10297_s1 = smov 8   ;;  %v8012_v23 = vadd.f32 %v14437_v25, %v7736_v21  ;;  %v7959_v27 = vpop.f32.mrf.mxu1  ;;  %v8629_v49 = vmax.f32 %v8597_v62, 0.0  ;;  %v8234_v53 = vpop.f32.mrf.mxu2  ;;  %v7737_v15 = vadd.f32 %v14445_v54, %v14249_v30 }
 0xadf   : > { %9860 = dma.vmem_to_hbm [thread:$0]  (%p10509_p0), %s8704_s18, 1024, %s8706_s26, %s8683_s16, %s10296_s13, %s10296_s13, %s10297_s1  }
 0xae0   : > { %s9831_s17 = sshll.u32 %s10434_s0, 4  ;;  %s14996_s23 = sshll.u32 %s10842_s24, 4  ;;  %v8287_v32 = vadd.f32 %v14441_v63, %v8012_v23  ;;  %8661 = vst.msk [vmem:[%s14371_s9 + $0x80] sm:$0xff] %vm885_vm10, %v8629_v49  ;;  %s14494_s23 = int_to_ptr.vmem [resolvable:$true] %s14996_s23 }
 0xae1   : > { %s14997_s5 = sld [smem:[#allocation110_spill]]  ;;  %v8500_v12 = vpop.f32.mrf.mxu3  ;;  %s8688_s0 = scalar_lea.sflag [#allocation21], %s10569_s22 }
 0xae2   : > { %v8562_v61 = vadd.f32 %v8500_v12, %v8287_v32 }
 0xae7   : > { %s8719_s29 = scalar_lea.hbm %s14997_s5, %s9831_s17  ;;  %s10218_s16 = scalar_lea.hbm %s14997_s5, 32 }
 0xae8   : > { %s8722_s21 = sshll.u32 %s8719_s29, 4  ;;  %s8723_s21 = int_to_ptr.hbm [resolvable:$true] %s8722_s21 }
 0xae9   : > { %s10212_s24 = sshra.s32 %s8723_s21, 4  ;;  %s10213_s24 = int_to_ptr.hbm [resolvable:$true] %s10212_s24 }
 0xaea   : > { %s10214_s1 = scalar_lea.hbm %s10213_s24, 16  ;;  %p10219_p4 = scmp.lt.s32.totalorder %s10213_s24, %s14997_s5 }
 0xaeb   : > { %p10215_p11 = scmp.ne.s32.totalorder %s10213_s24, %s10214_s1  ;;  %p10220_p1 = scmp.lt.s32.totalorder %s10218_s16, %s10214_s1 }
 0xaed   : > { %p10216_p12 = pnand %p10215_p11, %p10509_p0  ;;  %p10221_p3 = por %p10220_p1, %p10219_p4 }
 0xaef   : > { %p10217_p2 = pneg %p10216_p12 }
 0xaf1   : > { %p10222_p13 = pnand %p10221_p3, %p10217_p2 }
 0xaf3   : > { %10225 = shalt.err (!%p10222_p13)
}
 0xaf4   : > { %s10298_s22 = smov 64   ;;  %s10299_s28 = smov 4   ;;  %v7686_v30 = vpop.f32.mrf.mxu0  ;;  %v8598_v40 = vadd.f32 %v14362_v7, %v8562_v61  ;;  %v8013_v3 = vadd.f32 %v14451_v42, %v7737_v15  ;;  %v7962_v31 = vpop.f32.mrf.mxu1  ;;  %v7738_v41 = vadd.f32 %v14457_v29, %v14262_v11  ;;  %v7739_v38 = vadd.f32 %v14471_v26, %v14275_v47 }
 0xaf5   : > { %9861 = dma.vmem_to_hbm [thread:$0]  (%p10509_p0), %s14494_s23, 256, %s8723_s21, %s8688_s0, %s10298_s22, %s10298_s22, %s10299_s28   ;;  %v8237_v57 = vpop.f32.mrf.mxu2  ;;  %v8503_v63 = vpop.f32.mrf.mxu3  ;;  %v7740_v44 = vadd.f32 %v7686_v30, %v14290_v17 }
 0xaf6   : > { %v8630_v50 = vmax.f32 %v8598_v40, 0.0  ;;  %v8288_v25 = vadd.f32 %v14453_v45, %v8013_v3  ;;  %v8014_v60 = vadd.f32 %v14462_v4, %v7738_v41  ;;  %v8015_v34 = vadd.f32 %v7959_v27, %v7739_v38 }
 0xaf7   : > { %v8016_v55 = vadd.f32 %v7962_v31, %v7740_v44 }
 0xaf8   : > { %8662 = vst.msk [vmem:[%s14371_s9 + $0x88] sm:$0xff] %vm885_vm10, %v8630_v50  ;;  %v8563_v24 = vadd.f32 %v8503_v63, %v8288_v25  ;;  %v8289_v36 = vadd.f32 %v14465_v56, %v8014_v60  ;;  %v8290_v14 = vadd.f32 %v8234_v53, %v8015_v34 }
 0xaf9   : > { %v8291_v4 = vadd.f32 %v8237_v57, %v8016_v55 }
 0xafa   : > { %v8599_v48 = vadd.f32 %v14362_v7, %v8563_v24 }
 0xafc   : > { %v7689_v6 = vpop.f32.mrf.mxu0  ;;  %v8631_v54 = vmax.f32 %v8599_v48, 0.0  ;;  %v7965_v19 = vpop.f32.mrf.mxu1 }
 0xafd   : > { %v8506_v2 = vpop.f32.mrf.mxu3  ;;  %v8240_v42 = vpop.f32.mrf.mxu2  ;;  %v7741_v22 = vadd.f32 %v7689_v6, %v14304_v46 }
 0xafe   : > { %8663 = vst.msk [vmem:[%s14371_s9 + $0x90] sm:$0xff] %vm885_vm10, %v8631_v54  ;;  %v8564_v35 = vadd.f32 %v8506_v2, %v8289_v36 }
 0xaff   : > { %v8017_v17 = vadd.f32 %v7965_v19, %v7741_v22 }
 0xb00   : > { %v8600_v11 = vadd.f32 %v14362_v7, %v8564_v35 }
 0xb01   : > { %v8292_v18 = vadd.f32 %v8240_v42, %v8017_v17 }
 0xb02   : > { %v8632_v45 = vmax.f32 %v8600_v11, 0.0 }
 0xb04   : > { %v7692_v10 = vpop.f32.mrf.mxu0  ;;  %8664 = vst.msk [vmem:[%s14371_s9 + $0x98] sm:$0xff] %vm885_vm10, %v8632_v45  ;;  %v7968_v52 = vpop.f32.mrf.mxu1 }
 0xb05   : > { %v8509_v59 = vpop.f32.mrf.mxu3  ;;  %v8243_v47 = vpop.f32.mrf.mxu2  ;;  %v7742_v23 = vadd.f32 %v7692_v10, %v14315_v8 }
 0xb06   : > { %v8565_v29 = vadd.f32 %v8509_v59, %v8290_v14 }
 0xb07   : > { %v8018_v46 = vadd.f32 %v7968_v52, %v7742_v23 }
 0xb08   : > { %v8601_v20 = vadd.f32 %v14362_v7, %v8565_v29 }
 0xb09   : > { %v8293_v15 = vadd.f32 %v8243_v47, %v8018_v46 }
 0xb0a   : > { %v8633_v51 = vmax.f32 %v8601_v20, 0.0 }
 0xb0c   : > { %8665 = vst.msk [vmem:[%s14371_s9 + $0xa0] sm:$0xff] %vm885_vm10, %v8633_v51  ;;  %v7695_v13 = vpop.f32.mrf.mxu0  ;;  %v7971_v26 = vpop.f32.mrf.mxu1 }
 0xb0d   : > { %v8512_v56 = vpop.f32.mrf.mxu3  ;;  %v8246_v21 = vpop.f32.mrf.mxu2  ;;  %v7743_v40 = vadd.f32 %v7695_v13, %v14321_v1 }
 0xb0e   : > { %v8566_v28 = vadd.f32 %v8512_v56, %v8291_v4 }
 0xb0f   : > { %v8019_v31 = vadd.f32 %v7971_v26, %v7743_v40 }
 0xb10   : > { %v8602_v58 = vadd.f32 %v14362_v7, %v8566_v28 }
 0xb11   : > { %v8294_v57 = vadd.f32 %v8246_v21, %v8019_v31 }
 0xb12   : > { %v8634_v33 = vmax.f32 %v8602_v58, 0.0 }
 0xb14   : > { %8666 = vst.msk [vmem:[%s14371_s9 + $0xa8] sm:$0xff] %vm885_vm10, %v8634_v33  ;;  %v7698_v49 = vpop.f32.mrf.mxu0  ;;  %v7974_v12 = vpop.f32.mrf.mxu1 }
 0xb15   : > { %v8515_v62 = vpop.f32.mrf.mxu3  ;;  %v8249_v61 = vpop.f32.mrf.mxu2  ;;  %v7744_v41 = vadd.f32 %v7698_v49, %v14327_v43 }
 0xb16   : > { %v8567_v27 = vadd.f32 %v8515_v62, %v8292_v18 }
 0xb17   : > { %v8020_v1 = vadd.f32 %v7974_v12, %v7744_v41 }
 0xb18   : > { %v8603_v53 = vadd.f32 %v14362_v7, %v8567_v27 }
 0xb19   : > { %v8295_v2 = vadd.f32 %v8249_v61, %v8020_v1 }
 0xb1a   : > { %v8635_v32 = vmax.f32 %v8603_v53, 0.0 }
 0xb1c   : > { %8667 = vst.msk [vmem:[%s14371_s9 + $0xb0] sm:$0xff] %vm885_vm10, %v8635_v32  ;;  %v7701_v8 = vpop.f32.mrf.mxu0  ;;  %v7977_v24 = vpop.f32.mrf.mxu1 }
 0xb1d   : > { %v8518_v30 = vpop.f32.mrf.mxu3  ;;  %v8252_v6 = vpop.f32.mrf.mxu2  ;;  %v7745_v19 = vadd.f32 %v7701_v8, %v14332_v37 }
 0xb1e   : > { %v8568_v3 = vadd.f32 %v8518_v30, %v8293_v15 }
 0xb1f   : > { %v8021_v34 = vadd.f32 %v7977_v24, %v7745_v19 }
 0xb20   : > { %v8604_v50 = vadd.f32 %v14362_v7, %v8568_v3 }
 0xb21   : > { %v8296_v10 = vadd.f32 %v8252_v6, %v8021_v34 }
 0xb22   : > { %v8636_v25 = vmax.f32 %v8604_v50, 0.0 }
 0xb24   : > { %8668 = vst.msk [vmem:[%s14371_s9 + $0xb8] sm:$0xff] %vm885_vm10, %v8636_v25  ;;  %v7704_v36 = vpop.f32.mrf.mxu0  ;;  %v7980_v42 = vpop.f32.mrf.mxu1 }
 0xb25   : > { %v8521_v63 = vpop.f32.mrf.mxu3  ;;  %v8255_v43 = vpop.f32.mrf.mxu2  ;;  %v7746_v44 = vadd.f32 %v7704_v36, %v14337_v39 }
 0xb26   : > { %v8569_v48 = vadd.f32 %v8521_v63, %v8294_v57 }
 0xb27   : > { %v8022_v37 = vadd.f32 %v7980_v42, %v7746_v44 }
 0xb28   : > { %v8605_v60 = vadd.f32 %v14362_v7, %v8569_v48 }
 0xb29   : > { %v8297_v51 = vadd.f32 %v8255_v43, %v8022_v37 }
 0xb2a   : > { %v8637_v54 = vmax.f32 %v8605_v60, 0.0 }
 0xb2c   : > { %8669 = vst.msk [vmem:[%s14371_s9 + $0xc0] sm:$0xff] %vm885_vm10, %v8637_v54  ;;  %v7707_v14 = vpop.f32.mrf.mxu0  ;;  %v7983_v20 = vpop.f32.mrf.mxu1 }
 0xb2d   : > { %v8524_v38 = vpop.f32.mrf.mxu3  ;;  %v8258_v55 = vpop.f32.mrf.mxu2  ;;  %v7747_v13 = vadd.f32 %v7707_v14, %v14343_v9 }
 0xb2e   : > { %v8570_v35 = vadd.f32 %v8524_v38, %v8295_v2 }
 0xb2f   : > { %v8023_v39 = vadd.f32 %v7983_v20, %v7747_v13 }
 0xb30   : > { %v8606_v11 = vadd.f32 %v14362_v7, %v8570_v35 }
 0xb31   : > { %v8298_v26 = vadd.f32 %v8258_v55, %v8023_v39 }
 0xb32   : > { %v8638_v45 = vmax.f32 %v8606_v11, 0.0 }
 0xb34   : > { %8670 = vst.msk [vmem:[%s14371_s9 + $0xc8] sm:$0xff] %vm885_vm10, %v8638_v45  ;;  %v7710_v22 = vpop.f32.mrf.mxu0  ;;  %v7986_v17 = vpop.f32.mrf.mxu1 }
 0xb35   : > { %v8527_v59 = vpop.f32.mrf.mxu3  ;;  %v8261_v33 = vpop.f32.mrf.mxu2  ;;  %v7748_v18 = vadd.f32 %v7710_v22, %v14349_v16 }
 0xb36   : > { %v8571_v29 = vadd.f32 %v8527_v59, %v8296_v10 }
 0xb37   : > { %v8024_v27 = vadd.f32 %v7986_v17, %v7748_v18 }
 0xb38   : > { %v8607_v52 = vadd.f32 %v14362_v7, %v8571_v29 }
 0xb39   : > { %v8299_v53 = vadd.f32 %v8261_v33, %v8024_v27 }
 0xb3a   : > { %v8639_v47 = vmax.f32 %v8607_v52, 0.0 }
 0xb3c   : > { %8671 = vst.msk [vmem:[%s14371_s9 + $0xd0] sm:$0xff] %vm885_vm10, %v8639_v47  ;;  %v7713_v9 = vpop.f32.mrf.mxu0  ;;  %v7989_v46 = vpop.f32.mrf.mxu1 }
 0xb3d   : > { %v8530_v4 = vpop.f32.mrf.mxu3  ;;  %v7749_v12 = vadd.f32 %v7713_v9, %v14354_v0  ;;  %v8264_v61 = vpop.f32.mrf.mxu2 }
 0xb3e   : > { %v8572_v56 = vadd.f32 %v8530_v4, %v8297_v51 }
 0xb3f   : > { %v8025_v16 = vadd.f32 %v7989_v46, %v7749_v12 }
 0xb40   : > { %v8608_v28 = vadd.f32 %v14362_v7, %v8572_v56 }
 0xb41   : > { %v8300_v50 = vadd.f32 %v8264_v61, %v8025_v16 }
 0xb42   : > { %v8640_v58 = vmax.f32 %v8608_v28, 0.0 }
 0xb44   : > { %8672 = vst.msk [vmem:[%s14371_s9 + $0xd8] sm:$0xff] %vm885_vm10, %v8640_v58  ;;  %v7716_v3 = vpop.f32.mrf.mxu0  ;;  %v7992_v57 = vpop.f32.mrf.mxu1 }
 0xb45   : > { %v8533_v21 = vpop.f32.mrf.mxu3  ;;  %v7750_v31 = vadd.f32 %v7716_v3, %v14359_v5  ;;  %v8267_v0 = vpop.f32.mrf.mxu2 }
 0xb46   : > { %v8573_v62 = vadd.f32 %v8533_v21, %v8298_v26 }
 0xb47   : > { %v8026_v41 = vadd.f32 %v7992_v57, %v7750_v31 }
 0xb48   : > { %v8609_v23 = vadd.f32 %v14362_v7, %v8573_v62 }
 0xb49   : > { %v8301_v48 = vadd.f32 %v8267_v0, %v8026_v41 }
 0xb4a   : > { %v8641_v49 = vmax.f32 %v8609_v23, 0.0 }
 0xb4c   : > { %8673 = vst.msk [vmem:[%s14371_s9 + $0xe0] sm:$0xff] %vm885_vm10, %v8641_v49 }
 0xb4d   : > { %v8536_v32 = vpop.f32.mrf.mxu3 }
 0xb4e   : > { %v8574_v15 = vadd.f32 %v8536_v32, %v8299_v53 }
 0xb50   : > { %v8610_v30 = vadd.f32 %v14362_v7, %v8574_v15 }
 0xb52   : > { %v8642_v40 = vmax.f32 %v8610_v30, 0.0 }
 0xb54   : > { %8674 = vst.msk [vmem:[%s14371_s9 + $0xe8] sm:$0xff] %vm885_vm10, %v8642_v40 }
 0xb55   : > { %v8539_v8 = vpop.f32.mrf.mxu3 }
 0xb56   : > { %v8575_v25 = vadd.f32 %v8539_v8, %v8300_v50 }
 0xb58   : > { %v8611_v63 = vadd.f32 %v14362_v7, %v8575_v25 }
 0xb5a   : > { %v8643_v24 = vmax.f32 %v8611_v63, 0.0 }
 0xb5c   : > { %8675 = vst.msk [vmem:[%s14371_s9 + $0xf0] sm:$0xff] %vm885_vm10, %v8643_v24 }
 0xb5d   : > { %v8542_v6 = vpop.f32.mrf.mxu3 }
 0xb5e   : > { %v8576_v60 = vadd.f32 %v8542_v6, %v8301_v48 }
 0xb60   : > { %v8612_v1 = vadd.f32 %v14362_v7, %v8576_v60 }
 0xb62   : > { %v8644_v54 = vmax.f32 %v8612_v1, 0.0 }
 0xb64   : > { %8676 = vst.msk [vmem:[%s14371_s9 + $0xf8] sm:$0xff] %vm885_vm10, %v8644_v54 }
 0xb65 PF: > { %s14998_s2 = sld [smem:[#allocation29_spill]]  ;;  %p15000_p0 = scmp.ge.s32.totalorder %s10284_s27, 2 }
 0xb67   : > { %p9888_p7 = pnand %p15000_p0, %p10517_p6 }
 0xb69   : > { %p9889_p9 = pneg %p9888_p7 }
 0xb6b   : > { %s8745_s4 = sand.u32 1, %s14998_s2  }
 0xb6c   : > { %s8746_s29 = scalar_lea.sflag [#allocation9], %s8745_s4 }
 0xb6d   : > { %10263 = dma.done.wait (%p9889_p9), %s8746_s29, 1024  }
 0xb6e   : > { %10265 = vsyncadd (%p9889_p9), %s8746_s29, 4294966272  ;;  %s8756_s21 = scalar_lea.sflag [#allocation21], %s8745_s4 }
 0xb6f   : > { %10267 = dma.done.wait (%p9889_p9), %s8756_s21, 256  }
 0xb70   : > { %10269 = vsyncadd (%p9889_p9), %s8756_s21, 4294967040  ;;  %s15001_s27 = sld [smem:[#allocation31_spill]]  ;;  %s15004_s2 = smov %s10276_s25 }
 0xb71   : > { %s15002_s0 = sld [smem:[#allocation30_spill]] }
 0xb72   : > { %s15003_s26 = sld [smem:[#allocation32_spill]] }
 0xb76   : > { %p43_p5 = scmp.ge.s32.totalorder %s15001_s27, 4  }
 0xb77   : > { %s15005_s25 = smov %s15002_s0 }
 0xb78   :  { %45 = sbr.rel (!%p43_p5) target bundleno = 28 (0x1c), region = 300 }
 0xb7d   :  { %8762 = vsyncpa [#allocation8], 1 }
 0xb7e   :  { %8764 = vsyncpa [#allocation8 + $0x1], 1 }
 0xb7f   :  { %8765 = vsyncpa [#allocation11], 1 }
 0xb80   :  { %8767 = vsyncpa [#allocation11 + $0x1], 1 }
 0xb81   :  { %8768 = vsyncpa [#allocation14], 1 }
 0xb82   :  { %8769 = vsyncpa [#allocation17], 1 }
 0xb83   :  { %8770 = vsyncpa [#allocation9], 1 }
 0xb84   :  { %8772 = vsyncpa [#allocation9 + $0x1], 1 }
 0xb85   :  { %8773 = vsyncpa [#allocation21], 1 }
 0xb86   :  { %8775 = vsyncpa [#allocation21 + $0x1], 1 }

</bundles_post_ra>
